<compile_context>
chip_gen: v5e
topology: v5e:2x2
jax: 0.10.0
libtpu: 0.0.40
codegen_flags: <defaults>
</compile_context>

<pallas_src>
import functools
import numpy as np

import jax
import jax.numpy as jnp
from jax.experimental import pallas as pl
from jax.experimental.pallas import tpu as pltpu

# ---------------- configuration (small synthetic sizes) ----------------
B = 2
IN_CHANNELS = 2
EMBED = 32
HEADS = 4
NODE_L = 8            # stands in for 277 in the original dataset
NODE_T = 8            # stands in for 269
NODE_NUM = NODE_L + NODE_T   # stands in for 546
T_DIM = 8
OUTPUT_T_DIM = 4
NUM_LAYERS = 1
FWD_EXP = 2

ROW_TILE = 1024       # row-tile cap for the pointwise / GEMM kernels (512-2048 band)
NODE_TILE = 128       # node tile for the fused temporal-attention kernel


def _pick_row_tile(M, cap=ROW_TILE):
    """Row tile: multiple of 8, capped at `cap`, and small enough that the grid has
    >= 2 steps whenever M allows it (keeps both TensorCores busy on v7x)."""
    if M <= 16:
        return int(M)                       # full block (full dims always legal)
    half = ((M + 1) // 2 + 7) // 8 * 8      # cdiv(M,2) rounded up to a multiple of 8
    return int(min(cap, half))


# =======================================================================
# generic row-tiled kernels (linear / residual+LN / FFN+residual+LN)
# =======================================================================
def _linear_kernel(x_ref, w_ref, b_ref, o_ref, *, activation):
    y = jnp.dot(x_ref[...], w_ref[...], preferred_element_type=jnp.float32) + b_ref[...]
    if activation == "relu":
        y = jnp.maximum(y, 0.0)
    elif activation == "sigmoid":
        y = jax.nn.sigmoid(y)
    o_ref[...] = y


def pallas_linear(x, w, b=None, activation=None):
    """x: [..., K]; w: [K, Nout] (already transposed vs. torch); b: [Nout]."""
    lead = x.shape[:-1]
    K = x.shape[-1]
    Nout = w.shape[1]
    M = int(np.prod(lead)) if lead else 1
    x2 = x.reshape(M, K)
    if b is None:
        b = jnp.zeros((Nout,), jnp.float32)
    TM = _pick_row_tile(M)
    out = pl.pallas_call(
        functools.partial(_linear_kernel, activation=activation),
        out_shape=jax.ShapeDtypeStruct((M, Nout), jnp.float32),
        grid=(pl.cdiv(M, TM),),
        in_specs=[
            pl.BlockSpec((TM, K), lambda i: (i, 0)),
            pl.BlockSpec((K, Nout), lambda i: (0, 0)),     # weight resident
            pl.BlockSpec((1, Nout), lambda i: (0, 0)),     # bias resident
        ],
        out_specs=pl.BlockSpec((TM, Nout), lambda i: (i, 0)),
        compiler_params=pltpu.CompilerParams(dimension_semantics=("parallel",)),
    )(x2, w, b.reshape(1, Nout))
    return out.reshape(lead + (Nout,))


def _add_ln_kernel(x_ref, r_ref, g_ref, b_ref, o_ref, *, eps, mode):
    x = x_ref[...]
    r = r_ref[...]
    if mode == "add_before":          # LN(x + r)
        x = x + r
    mu = jnp.mean(x, axis=-1, keepdims=True)
    var = jnp.mean(jnp.square(x - mu), axis=-1, keepdims=True)
    y = (x - mu) * jax.lax.rsqrt(var + eps) * g_ref[...] + b_ref[...]
    if mode == "add_after":           # LN(x) + r
        y = y + r
    o_ref[...] = y


def pallas_add_layernorm(x, r, gamma, beta, mode, eps=1e-5):
    """Fused residual + LayerNorm (mode: 'add_before' | 'add_after')."""
    shape = x.shape
    C = shape[-1]
    M = int(np.prod(shape[:-1]))
    TM = _pick_row_tile(M)
    out = pl.pallas_call(
        functools.partial(_add_ln_kernel, eps=eps, mode=mode),
        out_shape=jax.ShapeDtypeStruct((M, C), jnp.float32),
        grid=(pl.cdiv(M, TM),),
        in_specs=[
            pl.BlockSpec((TM, C), lambda i: (i, 0)),
            pl.BlockSpec((TM, C), lambda i: (i, 0)),
            pl.BlockSpec((1, C), lambda i: (0, 0)),
            pl.BlockSpec((1, C), lambda i: (0, 0)),
        ],
        out_specs=pl.BlockSpec((TM, C), lambda i: (i, 0)),
        compiler_params=pltpu.CompilerParams(dimension_semantics=("parallel",)),
    )(x.reshape(M, C), r.reshape(M, C), gamma.reshape(1, C), beta.reshape(1, C))
    return out.reshape(shape)


def _ffn_res_ln_kernel(x_ref, w1_ref, b1_ref, w2_ref, b2_ref, g_ref, be_ref, o_ref, *, eps):
    x = x_ref[...]
    h = jnp.dot(x, w1_ref[...], preferred_element_type=jnp.float32) + b1_ref[...]
    h = jnp.maximum(h, 0.0)                                # hidden never touches HBM
    y = jnp.dot(h, w2_ref[...], preferred_element_type=jnp.float32) + b2_ref[...]
    z = y + x                                              # residual
    mu = jnp.mean(z, axis=-1, keepdims=True)
    var = jnp.mean(jnp.square(z - mu), axis=-1, keepdims=True)
    o_ref[...] = (z - mu) * jax.lax.rsqrt(var + eps) * g_ref[...] + be_ref[...]


def pallas_ffn_res_ln(x, w1, b1, w2, b2, gamma, beta, eps=1e-5):
    """Fused LN( W2(relu(W1 x)) + x ) tiled over rows; all weights resident."""
    shape = x.shape
    C = shape[-1]
    H = w1.shape[1]
    M = int(np.prod(shape[:-1]))
    TM = _pick_row_tile(M)
    out = pl.pallas_call(
        functools.partial(_ffn_res_ln_kernel, eps=eps),
        out_shape=jax.ShapeDtypeStruct((M, C), jnp.float32),
        grid=(pl.cdiv(M, TM),),
        in_specs=[
            pl.BlockSpec((TM, C), lambda i: (i, 0)),
            pl.BlockSpec((C, H), lambda i: (0, 0)),
            pl.BlockSpec((1, H), lambda i: (0, 0)),
            pl.BlockSpec((H, C), lambda i: (0, 0)),
            pl.BlockSpec((1, C), lambda i: (0, 0)),
            pl.BlockSpec((1, C), lambda i: (0, 0)),
            pl.BlockSpec((1, C), lambda i: (0, 0)),
        ],
        out_specs=pl.BlockSpec((TM, C), lambda i: (i, 0)),
        compiler_params=pltpu.CompilerParams(dimension_semantics=("parallel",)),
    )(x.reshape(M, C), w1, b1.reshape(1, H), w2, b2.reshape(1, C),
      gamma.reshape(1, C), beta.reshape(1, C))
    return out.reshape(shape)


# =======================================================================
# fused spatial attention block:
#   X_tilde = x + (ID + in_deg + out_deg);  attn = softmax(QK^T/sqrt(d) + bias) V
#   out = LN1( fc_out(attn) + X_tilde )           one grid step per (b, t)
# =======================================================================
def _spatial_fused_kernel(x_ref, emb_ref, bias_ref, wqkv_ref, wout_ref, bout_ref,
                          g_ref, be_ref, o_ref, *, heads, eps):
    x = x_ref[0] + emb_ref[...]                      # [N, C] = X_tilde_S of one (b, t)
    N, C = x.shape
    d = C // heads
    scale = 1.0 / float(np.sqrt(d))

    qkv = jnp.dot(x, wqkv_ref[...], preferred_element_type=jnp.float32)   # [N, 3C]

    # per-head attention; head-merge is folded into the fc_out GEMM (no lane concat)
    y = jnp.zeros((N, C), jnp.float32)
    for h in range(heads):
        q = qkv[:, h * d:(h + 1) * d]
        k = qkv[:, C + h * d:C + (h + 1) * d]
        v = qkv[:, 2 * C + h * d:2 * C + (h + 1) * d]
        s = jnp.einsum("nd,md->nm", q, k, preferred_element_type=jnp.float32) * scale
        s = s + bias_ref[h]                          # resident [N, N] rel-pos bias
        m = jnp.max(s, axis=-1, keepdims=True)
        p = jnp.exp(s - m)
        l = jnp.sum(p, axis=-1, keepdims=True)
        ctx = jnp.einsum("nm,md->nd", p, v, preferred_element_type=jnp.float32) / l
        y = y + jnp.dot(ctx, wout_ref[h * d:(h + 1) * d, :],
                        preferred_element_type=jnp.float32)
    y = y + bout_ref[...]

    z = y + x                                        # residual with X_tilde_S
    mu = jnp.mean(z, axis=-1, keepdims=True)
    var = jnp.mean(jnp.square(z - mu), axis=-1, keepdims=True)
    o_ref[0] = (z - mu) * jax.lax.rsqrt(var + eps) * g_ref[...] + be_ref[...]


def pallas_spatial_block(x, spa, heads=HEADS, eps=1e-5):
    """x: [G=B*T, N, C] -> LN1(attn + X_tilde): [G, N, C]."""
    G, N, C = x.shape
    # NOTE(v7x): at production N=546 the resident bias is ~4.8 MB and per-head score
    # intermediates ~1.2 MB, comfortably under the 32 MiB scoped-VMEM default; tile the
    # key axis flash-style only if VMEM pressure appears.
    return pl.pallas_call(
        functools.partial(_spatial_fused_kernel, heads=heads, eps=eps),
        out_shape=jax.ShapeDtypeStruct((G, N, C), jnp.float32),
        grid=(G,),
        in_specs=[
            pl.BlockSpec((1, N, C), lambda g: (g, 0, 0)),
            pl.BlockSpec((N, C), lambda g: (0, 0)),           # embedding sum, resident
            pl.BlockSpec((heads, N, N), lambda g: (0, 0, 0)), # rel-pos bias, resident
            pl.BlockSpec((C, 3 * C), lambda g: (0, 0)),
            pl.BlockSpec((C, C), lambda g: (0, 0)),
            pl.BlockSpec((1, C), lambda g: (0, 0)),
            pl.BlockSpec((1, C), lambda g: (0, 0)),
            pl.BlockSpec((1, C), lambda g: (0, 0)),
        ],
        out_specs=pl.BlockSpec((1, N, C), lambda g: (g, 0, 0)),
        compiler_params=pltpu.CompilerParams(dimension_semantics=("parallel",)),
    )(x, spa["emb_sum"], spa["rel_bias"], spa["attention_s"]["W_QKV"],
      spa["attention_s"]["fc_out_w"], spa["attention_s"]["fc_out_b"].reshape(1, C),
      spa["norm1_g"].reshape(1, C), spa["norm1_b"].reshape(1, C))


# =======================================================================
# fused temporal attention block:
#   X_tilde = s_x + sinusoid(T) + W_T(w_t);  x_soft = soft-threshold(origin, thr)
#   attn over T (no bias);  out = LN3( fc_out(attn) + x_soft )
#   grid step = (batch, node-tile) with lane-dense [Nb, T, C] blocks
# =======================================================================
def _temporal_fused_kernel(sx_ref, orig_ref, thr_ref, dt_ref, wt_ref,
                           wqkv_ref, wout_ref, bout_ref, g_ref, be_ref, o_ref,
                           *, heads, eps):
    sx = sx_ref[0]                                   # [Nb, T, C]
    Nb, T, C = sx.shape
    d = C // heads
    scale = 1.0 / float(np.sqrt(d))

    x = sx + dt_ref[...] + wt_ref[...]               # [T,C] and [1,1,C] broadcasts

    # soft-threshold residual (origin_input of the temporal branch), fused in-kernel
    orig = orig_ref[0]                               # [Nb, T, C]
    thr = thr_ref[0][:, :, None]                     # [Nb, 1, 1]
    xa = jnp.abs(orig)
    sgn = jnp.where(orig > 0.0, 1.0, jnp.where(orig < 0.0, -1.0, 0.0))
    xsoft = sgn * jnp.maximum(xa - thr, 0.0)

    # fused QKV projection (lane-dense GEMM)
    x2 = x.reshape(Nb * T, C)
    qkv = jnp.dot(x2, wqkv_ref[...], preferred_element_type=jnp.float32)
    qkv = qkv.reshape(Nb, T, 3 * C)

    # per-head attention over T; head-merge folded into fc_out accumulation
    y = jnp.zeros((Nb * T, C), jnp.float32)
    for h in range(heads):
        q = qkv[:, :, h * d:(h + 1) * d]
        k = qkv[:, :, C + h * d:C + (h + 1) * d]
        v = qkv[:, :, 2 * C + h * d:2 * C + (h + 1) * d]
        s = jnp.einsum("ntd,nsd->nts", q, k, preferred_element_type=jnp.float32) * scale
        m = jnp.max(s, axis=-1, keepdims=True)
        p = jnp.exp(s - m)
        l = jnp.sum(p, axis=-1, keepdims=True)
        ctx = jnp.einsum("nts,nsd->ntd", p, v, preferred_element_type=jnp.float32) / l
        y = y + jnp.dot(ctx.reshape(Nb * T, d), wout_ref[h * d:(h + 1) * d, :],
                        preferred_element_type=jnp.float32)
    y = y + bout_ref[...]

    z = y.reshape(Nb, T, C) + xsoft                  # residual with x_soft (norm3)
    mu = jnp.mean(z, axis=-1, keepdims=True)
    var = jnp.mean(jnp.square(z - mu), axis=-1, keepdims=True)
    o_ref[0] = (z - mu) * jax.lax.rsqrt(var + eps) * g_ref[...] + be_ref[...]


def pallas_temporal_block(s_x, origin, thr, d_t, wt_emb, tp,
                          heads=HEADS, eps=1e-5, node_tile=NODE_TILE):
    """s_x, origin: [B, N, T, C]; thr: [B, N, 1]; wt_emb: [B, 1, C]; d_t: [T, C]."""
    B_, N, T, C = s_x.shape
    Nb = N if N <= node_tile else node_tile
    return pl.pallas_call(
        functools.partial(_temporal_fused_kernel, heads=heads, eps=eps),
        out_shape=jax.ShapeDtypeStruct((B_, N, T, C), jnp.float32),
        grid=(B_, pl.cdiv(N, Nb)),
        in_specs=[
            pl.BlockSpec((1, Nb, T, C), lambda b, n: (b, n, 0, 0)),
            pl.BlockSpec((1, Nb, T, C), lambda b, n: (b, n, 0, 0)),
            pl.BlockSpec((1, Nb, 1), lambda b, n: (b, n, 0)),
            pl.BlockSpec((T, C), lambda b, n: (0, 0)),        # sinusoid table, resident
            pl.BlockSpec((1, 1, C), lambda b, n: (b, 0, 0)),  # W_T(w_t), per-batch
            pl.BlockSpec((C, 3 * C), lambda b, n: (0, 0)),
            pl.BlockSpec((C, C), lambda b, n: (0, 0)),
            pl.BlockSpec((1, C), lambda b, n: (0, 0)),
            pl.BlockSpec((1, C), lambda b, n: (0, 0)),
            pl.BlockSpec((1, C), lambda b, n: (0, 0)),
        ],
        out_specs=pl.BlockSpec((1, Nb, T, C), lambda b, n: (b, n, 0, 0)),
        compiler_params=pltpu.CompilerParams(dimension_semantics=("parallel", "parallel")),
    )(s_x, origin, thr, d_t, wt_emb,
      tp["attention_t"]["W_QKV"], tp["attention_t"]["fc_out_w"],
      tp["attention_t"]["fc_out_b"].reshape(1, C),
      tp["norm3_g"].reshape(1, C), tp["norm3_b"].reshape(1, C))


# =======================================================================
# fused gating kernel: threshold = gap * sigmoid(fc2(relu(BN_eval(fc1(gap)))))
# =======================================================================
def _gate_kernel(gap_ref, w1_ref, b1_ref, bn_g_ref, bn_b_ref, bn_m_ref, bn_v_ref,
                 w2_ref, b2_ref, thr_ref, *, eps):
    g = gap_ref[...]
    h = jnp.dot(g, w1_ref[...], preferred_element_type=jnp.float32) + b1_ref[...]
    # TODO(synk): training-mode BatchNorm1d (batch statistics) is not reproduced;
    #             eval-mode running-statistics semantics are used instead.
    h = (h - bn_m_ref[...]) * jax.lax.rsqrt(bn_v_ref[...] + eps) * bn_g_ref[...] + bn_b_ref[...]
    h = jnp.maximum(h, 0.0)
    a = jax.nn.sigmoid(jnp.dot(h, w2_ref[...], preferred_element_type=jnp.float32) + b2_ref[...])
    thr_ref[...] = g * a


def pallas_gate_threshold(gap, p, eps=1e-5):
    """gap: [B, N] -> threshold [B, N] (single small kernel, whole arrays in VMEM)."""
    B_, N = gap.shape
    return pl.pallas_call(
        functools.partial(_gate_kernel, eps=eps),
        out_shape=jax.ShapeDtypeStruct((B_, N), jnp.float32),
    )(gap, p["fc1_w"], p["fc1_b"].reshape(1, N),
      p["bn_g"].reshape(1, N), p["bn_b"].reshape(1, N),
      p["bn_mean"].reshape(1, N), p["bn_var"].reshape(1, N),
      p["fc2_w"], p["fc2_b"].reshape(1, N))


# =======================================================================
# fused output tail: relu(x . w_head + b_head) over C, then relu(. @ W1 + b1) over T
# =======================================================================
def _tail_kernel(x_ref, wh_ref, bh_ref, w1_ref, b1_ref, o_ref):
    x = x_ref[...]                                          # [Nb, T, C]
    y = jnp.sum(x * wh_ref[...], axis=-1) + bh_ref[...]     # weighted lane reduction -> [Nb, T]
    y = jnp.maximum(y, 0.0)
    z = jnp.dot(y, w1_ref[...], preferred_element_type=jnp.float32) + b1_ref[...]
    o_ref[...] = jnp.maximum(z, 0.0)


def pallas_output_tail(x, w_head, b_head, w1, b1):
    """x: [M, T, C] -> [M, OUT_T] (fused C->1 reduction + T->OUT_T GEMM, both relu'd)."""
    M, T, C = x.shape
    OT = w1.shape[1]
    TM = _pick_row_tile(M)
    return pl.pallas_call(
        _tail_kernel,
        out_shape=jax.ShapeDtypeStruct((M, OT), jnp.float32),
        grid=(pl.cdiv(M, TM),),
        in_specs=[
            pl.BlockSpec((TM, T, C), lambda i: (i, 0, 0)),
            pl.BlockSpec((1, C), lambda i: (0, 0)),
            pl.BlockSpec((1, 1), lambda i: (0, 0)),
            pl.BlockSpec((T, OT), lambda i: (0, 0)),
            pl.BlockSpec((1, OT), lambda i: (0, 0)),
        ],
        out_specs=pl.BlockSpec((TM, OT), lambda i: (i, 0)),
        compiler_params=pltpu.CompilerParams(dimension_semantics=("parallel",)),
    )(x, w_head.reshape(1, C), b_head.reshape(1, 1), w1, b1.reshape(1, OT))


# =======================================================================
# model glue (plain-JAX around the fused kernels)
# =======================================================================
def get_sinusoid_encoding_table(n_position, d_model):
    def cal_angle(position, hid_idx):
        return position / np.power(10000, 2 * (hid_idx // 2) / d_model)
    table = np.array([[cal_angle(p, j) for j in range(d_model)]
                      for p in range(n_position)], dtype=np.float64)
    table[:, 0::2] = np.sin(table[:, 0::2])
    table[:, 1::2] = np.cos(table[:, 1::2])
    return jnp.asarray(table, dtype=jnp.float32)


def st_block(origin, w_t_r, p, d_t, heads=HEADS):
    B_, N, T, C = origin.shape
    spa = p["spa"]
    tp = p["temp"]

    # ---- spatial branch (grid over (b, t); [B*T, N, C] lane-dense layout) ----
    q_s = jnp.transpose(origin, (0, 2, 1, 3)).reshape(B_ * T, N, C)
    x_s = pallas_spatial_block(q_s, spa, heads=heads)                      # LN1(attn + X_tilde)
    x_s = pallas_ffn_res_ln(x_s, spa["ff_w1"], spa["ff_b1"], spa["ff_w2"], spa["ff_b2"],
                            spa["norm2_g"], spa["norm2_b"])                # LN2(FFN + X_S)
    spa_out = jnp.transpose(x_s.reshape(B_, T, N, C), (0, 2, 1, 3))        # back to [B,N,T,C]
    s_x = pallas_add_layernorm(spa_out, origin, p["norm1_g"], p["norm1_b"],
                               mode="add_before")                          # block norm1

    # ---- gating threshold (tiny; abs/mean stays in XLA, FC chain fused in 1 kernel) ----
    gap = jnp.mean(jnp.abs(origin), axis=(2, 3))                           # [B, N]
    thr = pallas_gate_threshold(gap, p).reshape(B_, N, 1)                  # gap * alpha

    # ---- temporal branch (no transposes; [B*N, T, C]-style node tiles) ----
    wt_emb = (jnp.dot(w_t_r, tp["W_T_w"]) + tp["W_T_b"]).reshape(B_, 1, C)
    x_t = pallas_temporal_block(s_x, origin, thr, d_t, wt_emb, tp, heads=heads)  # LN3(attn + x_soft)
    x_t = pallas_ffn_res_ln(x_t, tp["ff_w1"], tp["ff_b1"], tp["ff_w2"], tp["ff_b2"],
                            tp["norm4_g"], tp["norm4_b"])                  # LN4(FFN + X_T)
    t_x = pallas_add_layernorm(x_t, s_x, p["norm2_g"], p["norm2_b"],
                               mode="add_after")                           # LN(temp_out) + s_x
    return t_x


def sthg_former(x, w_t, params, d_t):
    # x: [B, in_channels, N, T] (NCHW)
    input_w_t_r = w_t[:, 0, :]                                             # [B, 2]
    x_cl = jnp.transpose(x, (0, 2, 3, 1))                                  # [B, N, T, Cin]
    out = pallas_linear(x_cl, params["conv_w"], params["conv_b"])          # conv1x1 == matmul

    for layer in params["layers"]:
        out = st_block(out, input_w_t_r, layer, d_t)

    # ---- fused output tail (no 4-D transposes, no C->1 masked-store kernels) ----
    B_, N, T, C = out.shape
    L = out[:, :NODE_L].reshape(B_ * NODE_L, T, C)
    Tt = out[:, NODE_L:].reshape(B_ * (N - NODE_L), T, C)
    L_out = pallas_output_tail(L, params["Llinear_w"], params["Llinear_b"],
                               params["Llinear1_w"], params["Llinear1_b"])
    T_out = pallas_output_tail(Tt, params["Tlinear_w"], params["Tlinear_b"],
                               params["Tlinear1_w"], params["Tlinear1_b"])
    L_out = L_out.reshape(B_, NODE_L, -1)
    T_out = T_out.reshape(B_, N - NODE_L, -1)
    return jnp.concatenate([L_out, T_out], axis=1)                         # [B, N, OUT_T]


# ---------------- parameter init + one-time precompute ----------------
def init_params(key):
    keys = iter(jax.random.split(key, 512))

    def w(shape, scale=0.05):
        return (scale * jax.random.normal(next(keys), shape)).astype(jnp.float32)

    def zeros(shape):
        return jnp.zeros(shape, jnp.float32)

    def ones(shape):
        return jnp.ones(shape, jnp.float32)

    def mha():
        # Q|K|V fused into one [C, 3C] projection (bias-free, as in the reference).
        return dict(W_QKV=w((EMBED, 3 * EMBED)),
                    fc_out_w=w((EMBED, EMBED)), fc_out_b=zeros((EMBED,)))

    def spa():
        return dict(ID_embedding=w((NODE_NUM, EMBED)),
                    in_degree_encoder=w((NODE_NUM, EMBED)),
                    out_degree_encoder=w((NODE_NUM, EMBED)),
                    rel_pos_encoder=w((4, HEADS)),
                    attention_s=mha(),
                    norm1_g=ones((EMBED,)), norm1_b=zeros((EMBED,)),
                    norm2_g=ones((EMBED,)), norm2_b=zeros((EMBED,)),
                    ff_w1=w((EMBED, FWD_EXP * EMBED)), ff_b1=zeros((FWD_EXP * EMBED,)),
                    ff_w2=w((FWD_EXP * EMBED, EMBED)), ff_b2=zeros((EMBED,)))

    def temp():
        return dict(W_T_w=w((2, EMBED)), W_T_b=zeros((EMBED,)),
                    attention_t=mha(),
                    norm3_g=ones((EMBED,)), norm3_b=zeros((EMBED,)),
                    norm4_g=ones((EMBED,)), norm4_b=zeros((EMBED,)),
                    ff_w1=w((EMBED, FWD_EXP * EMBED)), ff_b1=zeros((FWD_EXP * EMBED,)),
                    ff_w2=w((FWD_EXP * EMBED, EMBED)), ff_b2=zeros((EMBED,)))

    def block():
        return dict(spa=spa(), temp=temp(),
                    norm1_g=ones((EMBED,)), norm1_b=zeros((EMBED,)),
                    norm2_g=ones((EMBED,)), norm2_b=zeros((EMBED,)),
                    fc1_w=w((NODE_NUM, NODE_NUM)), fc1_b=zeros((NODE_NUM,)),
                    bn_g=ones((NODE_NUM,)), bn_b=zeros((NODE_NUM,)),
                    bn_mean=zeros((NODE_NUM,)), bn_var=ones((NODE_NUM,)),
                    fc2_w=w((NODE_NUM, NODE_NUM)), fc2_b=zeros((NODE_NUM,)))

    return dict(conv_w=w((IN_CHANNELS, EMBED)), conv_b=zeros((EMBED,)),
                layers=[block() for _ in range(NUM_LAYERS)],
                Llinear_w=w((1, EMBED)), Llinear_b=zeros((1,)),
                Llinear1_w=w((T_DIM, OUTPUT_T_DIM)), Llinear1_b=zeros((OUTPUT_T_DIM,)),
                Tlinear_w=w((1, EMBED)), Tlinear_b=zeros((1,)),
                Tlinear1_w=w((T_DIM, OUTPUT_T_DIM)), Tlinear1_b=zeros((OUTPUT_T_DIM,)))


def prepare_params(params, adj, g_id, g_od):
    """One-time (eager) precompute: rel-pos bias [H,N,N] and embedding sum [N,C]
    per layer, so no gather/transpose happens inside the jit'd forward."""
    new_layers = []
    for layer in params["layers"]:
        l = dict(layer)
        spa = dict(l["spa"])
        spa["rel_bias"] = jnp.transpose(spa["rel_pos_encoder"][adj], (2, 0, 1))
        spa["emb_sum"] = (spa["ID_embedding"]
                          + spa["in_degree_encoder"][g_id]
                          + spa["out_degree_encoder"][g_od])
        l["spa"] = spa
        new_layers.append(l)
    out = dict(params)
    out["layers"] = new_layers
    return out


# ---------------- main ----------------
if __name__ == "__main__":
    key = jax.random.PRNGKey(0)
    kx, kw, kp, ka, ki, ko = jax.random.split(key, 6)

    x = jax.random.normal(kx, (B, IN_CHANNELS, NODE_NUM, T_DIM), jnp.float32)
    w_t = jax.random.normal(kw, (B, 3, 2), jnp.float32)
    adj = jax.random.randint(ka, (NODE_NUM, NODE_NUM), 0, 4)       # Embedding(4, heads) indices
    g_id = jax.random.randint(ki, (NODE_NUM,), 0, NODE_NUM)        # in-degree indices
    g_od = jax.random.randint(ko, (NODE_NUM,), 0, NODE_NUM)        # out-degree indices

    params = init_params(kp)
    params = prepare_params(params, adj, g_id, g_od)               # one-time bias/embedding precompute
    d_t = get_sinusoid_encoding_table(T_DIM, EMBED)                # hoisted, computed once

    forward = jax.jit(sthg_former)
    out = forward(x, w_t, params, d_t)
    out = jax.block_until_ready(out)

    assert out.shape == (B, NODE_NUM, OUTPUT_T_DIM), out.shape
    assert bool(jnp.all(jnp.isfinite(out)))
    print("KERNEL_OK")
</pallas_src>

<mosaic_0001>
module attributes {stable_mosaic.version = 11 : i64} {
  func.func @_linear_kernel(%arg0: i32, %arg1: memref<128x2xf32, #tpu.memory_space<vmem>>, %arg2: memref<2x32xf32, #tpu.memory_space<vmem>>, %arg3: memref<1x32xf32, #tpu.memory_space<vmem>>, %arg4: memref<128x32xf32, #tpu.memory_space<vmem>>) attributes {dimension_semantics = [#tpu.dimension_semantics<parallel>], iteration_bounds = array<i64: 2>, scalar_prefetch = 0 : i64, scratch_operands = 0 : i64, tpu.core_type = #tpu.core_type<tc>, window_params = [{transform_indices = @transform_0, window_bounds = array<i64: 128, 2>}, {pipeline_mode = #tpu.pipeline_mode<synchronous>, transform_indices = @transform_1, window_bounds = array<i64: 2, 32>}, {pipeline_mode = #tpu.pipeline_mode<synchronous>, transform_indices = @transform_2, window_bounds = array<i64: 1, 32>}, {transform_indices = @transform_3, window_bounds = array<i64: 128, 32>}]} {
    %c0 = arith.constant 0 : index
    %c0_0 = arith.constant 0 : index
    %0 = vector.load %arg1[%c0, %c0_0] : memref<128x2xf32, #tpu.memory_space<vmem>>, vector<128x2xf32>
    %c0_1 = arith.constant 0 : index
    %c0_2 = arith.constant 0 : index
    %1 = vector.load %arg2[%c0_1, %c0_2] : memref<2x32xf32, #tpu.memory_space<vmem>>, vector<2x32xf32>
    %cst = arith.constant dense<0.000000e+00> : vector<128x32xf32>
    %2 = tpu.matmul %0, %1, %cst {dimension_numbers = #tpu.dot_dimension_numbers<[1], [0], [0], [1], [0, 0, 1, 1], [], []>} : vector<128x2xf32>, vector<2x32xf32>, vector<128x32xf32> -> vector<128x32xf32>
    %c0_3 = arith.constant 0 : index
    %c0_4 = arith.constant 0 : index
    %3 = vector.load %arg3[%c0_3, %c0_4] : memref<1x32xf32, #tpu.memory_space<vmem>>, vector<1x32xf32>
    %4 = vector.broadcast %3 : vector<1x32xf32> to vector<128x32xf32>
    %5 = arith.addf %2, %4 : vector<128x32xf32>
    %c0_5 = arith.constant 0 : index
    %c0_6 = arith.constant 0 : index
    %6 = vector.load %arg4[%c0_5, %c0_6] : memref<128x32xf32, #tpu.memory_space<vmem>>, vector<128x32xf32>
    tpu.vector_store %arg4[%c0_5, %c0_6], %5 {strides = array<i32>} : memref<128x32xf32, #tpu.memory_space<vmem>>, vector<128x32xf32>,
    return
  }
  func.func @transform_0(%arg0: i32) -> (i32, i32) {
    %c0_i32 = arith.constant 0 : i32
    %c0_i32_0 = arith.constant 0 : i32
    return %arg0, %c0_i32 : i32, i32
  }
  func.func @transform_1(%arg0: i32) -> (i32, i32) {
    %c0_i32 = arith.constant 0 : i32
    %c0_i32_0 = arith.constant 0 : i32
    %c0_i32_1 = arith.constant 0 : i32
    return %c0_i32, %c0_i32_0 : i32, i32
  }
  func.func @transform_2(%arg0: i32) -> (i32, i32) {
    %c0_i32 = arith.constant 0 : i32
    %c0_i32_0 = arith.constant 0 : i32
    %c0_i32_1 = arith.constant 0 : i32
    return %c0_i32, %c0_i32_0 : i32, i32
  }
  func.func @transform_3(%arg0: i32) -> (i32, i32) {
    %c0_i32 = arith.constant 0 : i32
    %c0_i32_0 = arith.constant 0 : i32
    return %arg0, %c0_i32 : i32, i32
  }
}

module attributes {stable_mosaic.version = 11 : i64} {
  func.func @_spatial_fused_kernel(%arg0: i32, %arg1: memref<1x16x32xf32, #tpu.memory_space<vmem>>, %arg2: memref<16x32xf32, #tpu.memory_space<vmem>>, %arg3: memref<4x16x16xf32, #tpu.memory_space<vmem>>, %arg4: memref<32x96xf32, #tpu.memory_space<vmem>>, %arg5: memref<32x32xf32, #tpu.memory_space<vmem>>, %arg6: memref<1x32xf32, #tpu.memory_space<vmem>>, %arg7: memref<1x32xf32, #tpu.memory_space<vmem>>, %arg8: memref<1x32xf32, #tpu.memory_space<vmem>>, %arg9: memref<1x16x32xf32, #tpu.memory_space<vmem>>) attributes {dimension_semantics = [#tpu.dimension_semantics<parallel>], iteration_bounds = array<i64: 16>, scalar_prefetch = 0 : i64, scratch_operands = 0 : i64, tpu.core_type = #tpu.core_type<tc>, window_params = [{transform_indices = @transform_0, window_bounds = array<i64: 1, 16, 32>}, {pipeline_mode = #tpu.pipeline_mode<synchronous>, transform_indices = @transform_1, window_bounds = array<i64: 16, 32>}, {pipeline_mode = #tpu.pipeline_mode<synchronous>, transform_indices = @transform_2, window_bounds = array<i64: 4, 16, 16>}, {pipeline_mode = #tpu.pipeline_mode<synchronous>, transform_indices = @transform_3, window_bounds = array<i64: 32, 96>}, {pipeline_mode = #tpu.pipeline_mode<synchronous>, transform_indices = @transform_4, window_bounds = array<i64: 32, 32>}, {pipeline_mode = #tpu.pipeline_mode<synchronous>, transform_indices = @transform_5, window_bounds = array<i64: 1, 32>}, {pipeline_mode = #tpu.pipeline_mode<synchronous>, transform_indices = @transform_6, window_bounds = array<i64: 1, 32>}, {pipeline_mode = #tpu.pipeline_mode<synchronous>, transform_indices = @transform_7, window_bounds = array<i64: 1, 32>}, {transform_indices = @transform_8, window_bounds = array<i64: 1, 16, 32>}]} {
    %c0 = arith.constant 0 : index
    %c0_0 = arith.constant 0 : index
    %c0_1 = arith.constant 0 : index
    %0 = vector.load %arg1[%c0, %c0_0, %c0_1] : memref<1x16x32xf32, #tpu.memory_space<vmem>>, vector<1x16x32xf32>
    %1 = vector.shape_cast %0 : vector<1x16x32xf32> to vector<16x32xf32>
    %c0_2 = arith.constant 0 : index
    %c0_3 = arith.constant 0 : index
    %2 = vector.load %arg2[%c0_2, %c0_3] : memref<16x32xf32, #tpu.memory_space<vmem>>, vector<16x32xf32>
    %3 = arith.addf %1, %2 : vector<16x32xf32>
    %c0_4 = arith.constant 0 : index
    %c0_5 = arith.constant 0 : index
    %4 = vector.load %arg4[%c0_4, %c0_5] : memref<32x96xf32, #tpu.memory_space<vmem>>, vector<32x96xf32>
    %cst = arith.constant dense<0.000000e+00> : vector<16x96xf32>
    %5 = tpu.matmul %3, %4, %cst {dimension_numbers = #tpu.dot_dimension_numbers<[1], [0], [0], [1], [0, 0, 1, 1], [], []>} : vector<16x32xf32>, vector<32x96xf32>, vector<16x96xf32> -> vector<16x96xf32>
    %cst_6 = arith.constant 0.000000e+00 : f32
    %6 = vector.broadcast %cst_6 : f32 to vector<16x32xf32>
    %7 = vector.extract_strided_slice %5 {offsets = [0, 0], sizes = [16, 8], strides = [1, 1]} : vector<16x96xf32> to vector<16x8xf32>
    %8 = vector.extract_strided_slice %5 {offsets = [0, 32], sizes = [16, 8], strides = [1, 1]} : vector<16x96xf32> to vector<16x8xf32>
    %9 = vector.extract_strided_slice %5 {offsets = [0, 64], sizes = [16, 8], strides = [1, 1]} : vector<16x96xf32> to vector<16x8xf32>
    "tpu.trace_start"() <{level = 10 : i32, message = "nd,md->nm"}> : () -> ()
    %cst_7 = arith.constant dense<0.000000e+00> : vector<16x16xf32>
    %10 = tpu.matmul %7, %8, %cst_7 {dimension_numbers = #tpu.dot_dimension_numbers<[1], [1], [0], [0], [0, 0, 1, 0], [], []>} : vector<16x8xf32>, vector<16x8xf32>, vector<16x16xf32> -> vector<16x16xf32>
    "tpu.trace_stop"() : () -> ()
    %cst_8 = arith.constant 0.353553385 : f32
    %11 = vector.broadcast %cst_8 : f32 to vector<16x16xf32>
    %12 = arith.mulf %10, %11 : vector<16x16xf32>
    %c0_9 = arith.constant 0 : index
    %c0_10 = arith.constant 0 : index
    %c0_11 = arith.constant 0 : index
    %13 = vector.load %arg3[%c0_9, %c0_10, %c0_11] : memref<4x16x16xf32, #tpu.memory_space<vmem>>, vector<1x16x16xf32>
    %14 = vector.shape_cast %13 : vector<1x16x16xf32> to vector<16x16xf32>
    %15 = arith.addf %12, %14 : vector<16x16xf32>
    %cst_12 = arith.constant dense<0xFF800000> : vector<16xf32>
    %16 = vector.multi_reduction <maximumf>, %15, %cst_12 [1] : vector<16x16xf32> to vector<16xf32>
    %17 = vector.shape_cast %16 : vector<16xf32> to vector<16x1xf32>
    %18 = vector.broadcast %17 : vector<16x1xf32> to vector<16x16xf32>
    %19 = arith.subf %15, %18 : vector<16x16xf32>
    %20 = math.exp %19 : vector<16x16xf32>
    %cst_13 = arith.constant dense<0.000000e+00> : vector<16xf32>
    %21 = vector.multi_reduction <add>, %20, %cst_13 [1] : vector<16x16xf32> to vector<16xf32>
    %22 = vector.shape_cast %21 : vector<16xf32> to vector<16x1xf32>
    "tpu.trace_start"() <{level = 10 : i32, message = "nm,md->nd"}> : () -> ()
    %cst_14 = arith.constant dense<0.000000e+00> : vector<16x8xf32>
    %23 = tpu.matmul %20, %9, %cst_14 {dimension_numbers = #tpu.dot_dimension_numbers<[1], [0], [0], [1], [0, 0, 1, 1], [], []>} : vector<16x16xf32>, vector<16x8xf32>, vector<16x8xf32> -> vector<16x8xf32>
    "tpu.trace_stop"() : () -> ()
    %24 = vector.broadcast %22 : vector<16x1xf32> to vector<16x8xf32>
    %25 = arith.divf %23, %24 : vector<16x8xf32>
    %c0_15 = arith.constant 0 : index
    %c0_16 = arith.constant 0 : index
    %26 = vector.load %arg5[%c0_15, %c0_16] : memref<32x32xf32, #tpu.memory_space<vmem>>, vector<8x32xf32>
    %cst_17 = arith.constant dense<0.000000e+00> : vector<16x32xf32>
    %27 = tpu.matmul %25, %26, %cst_17 {dimension_numbers = #tpu.dot_dimension_numbers<[1], [0], [0], [1], [0, 0, 1, 1], [], []>} : vector<16x8xf32>, vector<8x32xf32>, vector<16x32xf32> -> vector<16x32xf32>
    %28 = arith.addf %6, %27 : vector<16x32xf32>
    %29 = vector.extract_strided_slice %5 {offsets = [0, 8], sizes = [16, 8], strides = [1, 1]} : vector<16x96xf32> to vector<16x8xf32>
    %30 = vector.extract_strided_slice %5 {offsets = [0, 40], sizes = [16, 8], strides = [1, 1]} : vector<16x96xf32> to vector<16x8xf32>
    %31 = vector.extract_strided_slice %5 {offsets = [0, 72], sizes = [16, 8], strides = [1, 1]} : vector<16x96xf32> to vector<16x8xf32>
    "tpu.trace_start"() <{level = 10 : i32, message = "nd,md->nm"}> : () -> ()
    %cst_18 = arith.constant dense<0.000000e+00> : vector<16x16xf32>
    %32 = tpu.matmul %29, %30, %cst_18 {dimension_numbers = #tpu.dot_dimension_numbers<[1], [1], [0], [0], [0, 0, 1, 0], [], []>} : vector<16x8xf32>, vector<16x8xf32>, vector<16x16xf32> -> vector<16x16xf32>
    "tpu.trace_stop"() : () -> ()
    %cst_19 = arith.constant 0.353553385 : f32
    %33 = vector.broadcast %cst_19 : f32 to vector<16x16xf32>
    %34 = arith.mulf %32, %33 : vector<16x16xf32>
    %c1 = arith.constant 1 : index
    %c0_20 = arith.constant 0 : index
    %c0_21 = arith.constant 0 : index
    %35 = vector.load %arg3[%c1, %c0_20, %c0_21] : memref<4x16x16xf32, #tpu.memory_space<vmem>>, vector<1x16x16xf32>
    %36 = vector.shape_cast %35 : vector<1x16x16xf32> to vector<16x16xf32>
    %37 = arith.addf %34, %36 : vector<16x16xf32>
    %cst_22 = arith.constant dense<0xFF800000> : vector<16xf32>
    %38 = vector.multi_reduction <maximumf>, %37, %cst_22 [1] : vector<16x16xf32> to vector<16xf32>
    %39 = vector.shape_cast %38 : vector<16xf32> to vector<16x1xf32>
    %40 = vector.broadcast %39 : vector<16x1xf32> to vector<16x16xf32>
    %41 = arith.subf %37, %40 : vector<16x16xf32>
    %42 = math.exp %41 : vector<16x16xf32>
    %cst_23 = arith.constant dense<0.000000e+00> : vector<16xf32>
    %43 = vector.multi_reduction <add>, %42, %cst_23 [1] : vector<16x16xf32> to vector<16xf32>
    %44 = vector.shape_cast %43 : vector<16xf32> to vector<16x1xf32>
    "tpu.trace_start"() <{level = 10 : i32, message = "nm,md->nd"}> : () -> ()
    %cst_24 = arith.constant dense<0.000000e+00> : vector<16x8xf32>
    %45 = tpu.matmul %42, %31, %cst_24 {dimension_numbers = #tpu.dot_dimension_numbers<[1], [0], [0], [1], [0, 0, 1, 1], [], []>} : vector<16x16xf32>, vector<16x8xf32>, vector<16x8xf32> -> vector<16x8xf32>
    "tpu.trace_stop"() : () -> ()
    %46 = vector.broadcast %44 : vector<16x1xf32> to vector<16x8xf32>
    %47 = arith.divf %45, %46 : vector<16x8xf32>
    %c8 = arith.constant 8 : index
    %c0_25 = arith.constant 0 : index
    %48 = vector.load %arg5[%c8, %c0_25] : memref<32x32xf32, #tpu.memory_space<vmem>>, vector<8x32xf32>
    %cst_26 = arith.constant dense<0.000000e+00> : vector<16x32xf32>
    %49 = tpu.matmul %47, %48, %cst_26 {dimension_numbers = #tpu.dot_dimension_numbers<[1], [0], [0], [1], [0, 0, 1, 1], [], []>} : vector<16x8xf32>, vector<8x32xf32>, vector<16x32xf32> -> vector<16x32xf32>
    %50 = arith.addf %28, %49 : vector<16x32xf32>
    %51 = vector.extract_strided_slice %5 {offsets = [0, 16], sizes = [16, 8], strides = [1, 1]} : vector<16x96xf32> to vector<16x8xf32>
    %52 = vector.extract_strided_slice %5 {offsets = [0, 48], sizes = [16, 8], strides = [1, 1]} : vector<16x96xf32> to vector<16x8xf32>
    %53 = vector.extract_strided_slice %5 {offsets = [0, 80], sizes = [16, 8], strides = [1, 1]} : vector<16x96xf32> to vector<16x8xf32>
    "tpu.trace_start"() <{level = 10 : i32, message = "nd,md->nm"}> : () -> ()
    %cst_27 = arith.constant dense<0.000000e+00> : vector<16x16xf32>
    %54 = tpu.matmul %51, %52, %cst_27 {dimension_numbers = #tpu.dot_dimension_numbers<[1], [1], [0], [0], [0, 0, 1, 0], [], []>} : vector<16x8xf32>, vector<16x8xf32>, vector<16x16xf32> -> vector<16x16xf32>
    "tpu.trace_stop"() : () -> ()
    %cst_28 = arith.constant 0.353553385 : f32
    %55 = vector.broadcast %cst_28 : f32 to vector<16x16xf32>
    %56 = arith.mulf %54, %55 : vector<16x16xf32>
    %c2 = arith.constant 2 : index
    %c0_29 = arith.constant 0 : index
    %c0_30 = arith.constant 0 : index
    %57 = vector.load %arg3[%c2, %c0_29, %c0_30] : memref<4x16x16xf32, #tpu.memory_space<vmem>>, vector<1x16x16xf32>
    %58 = vector.shape_cast %57 : vector<1x16x16xf32> to vector<16x16xf32>
    %59 = arith.addf %56, %58 : vector<16x16xf32>
    %cst_31 = arith.constant dense<0xFF800000> : vector<16xf32>
    %60 = vector.multi_reduction <maximumf>, %59, %cst_31 [1] : vector<16x16xf32> to vector<16xf32>
    %61 = vector.shape_cast %60 : vector<16xf32> to vector<16x1xf32>
    %62 = vector.broadcast %61 : vector<16x1xf32> to vector<16x16xf32>
    %63 = arith.subf %59, %62 : vector<16x16xf32>
    %64 = math.exp %63 : vector<16x16xf32>
    %cst_32 = arith.constant dense<0.000000e+00> : vector<16xf32>
    %65 = vector.multi_reduction <add>, %64, %cst_32 [1] : vector<16x16xf32> to vector<16xf32>
    %66 = vector.shape_cast %65 : vector<16xf32> to vector<16x1xf32>
    "tpu.trace_start"() <{level = 10 : i32, message = "nm,md->nd"}> : () -> ()
    %cst_33 = arith.constant dense<0.000000e+00> : vector<16x8xf32>
    %67 = tpu.matmul %64, %53, %cst_33 {dimension_numbers = #tpu.dot_dimension_numbers<[1], [0], [0], [1], [0, 0, 1, 1], [], []>} : vector<16x16xf32>, vector<16x8xf32>, vector<16x8xf32> -> vector<16x8xf32>
    "tpu.trace_stop"() : () -> ()
    %68 = vector.broadcast %66 : vector<16x1xf32> to vector<16x8xf32>
    %69 = arith.divf %67, %68 : vector<16x8xf32>
    %c16 = arith.constant 16 : index
    %c0_34 = arith.constant 0 : index
    %70 = vector.load %arg5[%c16, %c0_34] : memref<32x32xf32, #tpu.memory_space<vmem>>, vector<8x32xf32>
    %cst_35 = arith.constant dense<0.000000e+00> : vector<16x32xf32>
    %71 = tpu.matmul %69, %70, %cst_35 {dimension_numbers = #tpu.dot_dimension_numbers<[1], [0], [0], [1], [0, 0, 1, 1], [], []>} : vector<16x8xf32>, vector<8x32xf32>, vector<16x32xf32> -> vector<16x32xf32>
    %72 = arith.addf %50, %71 : vector<16x32xf32>
    %73 = vector.extract_strided_slice %5 {offsets = [0, 24], sizes = [16, 8], strides = [1, 1]} : vector<16x96xf32> to vector<16x8xf32>
    %74 = vector.extract_strided_slice %5 {offsets = [0, 56], sizes = [16, 8], strides = [1, 1]} : vector<16x96xf32> to vector<16x8xf32>
    %75 = vector.extract_strided_slice %5 {offsets = [0, 88], sizes = [16, 8], strides = [1, 1]} : vector<16x96xf32> to vector<16x8xf32>
    "tpu.trace_start"() <{level = 10 : i32, message = "nd,md->nm"}> : () -> ()
    %cst_36 = arith.constant dense<0.000000e+00> : vector<16x16xf32>
    %76 = tpu.matmul %73, %74, %cst_36 {dimension_numbers = #tpu.dot_dimension_numbers<[1], [1], [0], [0], [0, 0, 1, 0], [], []>} : vector<16x8xf32>, vector<16x8xf32>, vector<16x16xf32> -> vector<16x16xf32>
    "tpu.trace_stop"() : () -> ()
    %cst_37 = arith.constant 0.353553385 : f32
    %77 = vector.broadcast %cst_37 : f32 to vector<16x16xf32>
    %78 = arith.mulf %76, %77 : vector<16x16xf32>
    %c3 = arith.constant 3 : index
    %c0_38 = arith.constant 0 : index
    %c0_39 = arith.constant 0 : index
    %79 = vector.load %arg3[%c3, %c0_38, %c0_39] : memref<4x16x16xf32, #tpu.memory_space<vmem>>, vector<1x16x16xf32>
    %80 = vector.shape_cast %79 : vector<1x16x16xf32> to vector<16x16xf32>
    %81 = arith.addf %78, %80 : vector<16x16xf32>
    %cst_40 = arith.constant dense<0xFF800000> : vector<16xf32>
    %82 = vector.multi_reduction <maximumf>, %81, %cst_40 [1] : vector<16x16xf32> to vector<16xf32>
    %83 = vector.shape_cast %82 : vector<16xf32> to vector<16x1xf32>
    %84 = vector.broadcast %83 : vector<16x1xf32> to vector<16x16xf32>
    %85 = arith.subf %81, %84 : vector<16x16xf32>
    %86 = math.exp %85 : vector<16x16xf32>
    %cst_41 = arith.constant dense<0.000000e+00> : vector<16xf32>
    %87 = vector.multi_reduction <add>, %86, %cst_41 [1] : vector<16x16xf32> to vector<16xf32>
    %88 = vector.shape_cast %87 : vector<16xf32> to vector<16x1xf32>
    "tpu.trace_start"() <{level = 10 : i32, message = "nm,md->nd"}> : () -> ()
    %cst_42 = arith.constant dense<0.000000e+00> : vector<16x8xf32>
    %89 = tpu.matmul %86, %75, %cst_42 {dimension_numbers = #tpu.dot_dimension_numbers<[1], [0], [0], [1], [0, 0, 1, 1], [], []>} : vector<16x16xf32>, vector<16x8xf32>, vector<16x8xf32> -> vector<16x8xf32>
    "tpu.trace_stop"() : () -> ()
    %90 = vector.broadcast %88 : vector<16x1xf32> to vector<16x8xf32>
    %91 = arith.divf %89, %90 : vector<16x8xf32>
    %c24 = arith.constant 24 : index
    %c0_43 = arith.constant 0 : index
    %92 = vector.load %arg5[%c24, %c0_43] : memref<32x32xf32, #tpu.memory_space<vmem>>, vector<8x32xf32>
    %cst_44 = arith.constant dense<0.000000e+00> : vector<16x32xf32>
    %93 = tpu.matmul %91, %92, %cst_44 {dimension_numbers = #tpu.dot_dimension_numbers<[1], [0], [0], [1], [0, 0, 1, 1], [], []>} : vector<16x8xf32>, vector<8x32xf32>, vector<16x32xf32> -> vector<16x32xf32>
    %94 = arith.addf %72, %93 : vector<16x32xf32>
    %c0_45 = arith.constant 0 : index
    %c0_46 = arith.constant 0 : index
    %95 = vector.load %arg6[%c0_45, %c0_46] : memref<1x32xf32, #tpu.memory_space<vmem>>, vector<1x32xf32>
    %96 = vector.broadcast %95 : vector<1x32xf32> to vector<16x32xf32>
    %97 = arith.addf %94, %96 : vector<16x32xf32>
    %98 = arith.addf %97, %3 : vector<16x32xf32>
    %cst_47 = arith.constant dense<0.000000e+00> : vector<16xf32>
    %99 = vector.multi_reduction <add>, %98, %cst_47 [1] : vector<16x32xf32> to vector<16xf32>
    %100 = vector.shape_cast %99 : vector<16xf32> to vector<16x1xf32>
    %cst_48 = arith.constant 3.200000e+01 : f32
    %101 = vector.broadcast %cst_48 : f32 to vector<16x1xf32>
    %102 = arith.divf %100, %101 : vector<16x1xf32>
    %103 = vector.broadcast %102 : vector<16x1xf32> to vector<16x32xf32>
    %104 = arith.subf %98, %103 : vector<16x32xf32>
    %105 = arith.mulf %104, %104 : vector<16x32xf32>
    %cst_49 = arith.constant dense<0.000000e+00> : vector<16xf32>
    %106 = vector.multi_reduction <add>, %105, %cst_49 [1] : vector<16x32xf32> to vector<16xf32>
    %107 = vector.shape_cast %106 : vector<16xf32> to vector<16x1xf32>
    %cst_50 = arith.constant 3.200000e+01 : f32
    %108 = vector.broadcast %cst_50 : f32 to vector<16x1xf32>
    %109 = arith.divf %107, %108 : vector<16x1xf32>
    %110 = vector.broadcast %102 : vector<16x1xf32> to vector<16x32xf32>
    %111 = arith.subf %98, %110 : vector<16x32xf32>
    %cst_51 = arith.constant 9.99999974E-6 : f32
    %112 = vector.broadcast %cst_51 : f32 to vector<16x1xf32>
    %113 = arith.addf %109, %112 : vector<16x1xf32>
    %114 = math.rsqrt %113 : vector<16x1xf32>
    %115 = vector.broadcast %114 : vector<16x1xf32> to vector<16x32xf32>
    %116 = arith.mulf %111, %115 : vector<16x32xf32>
    %c0_52 = arith.constant 0 : index
    %c0_53 = arith.constant 0 : index
    %117 = vector.load %arg7[%c0_52, %c0_53] : memref<1x32xf32, #tpu.memory_space<vmem>>, vector<1x32xf32>
    %118 = vector.broadcast %117 : vector<1x32xf32> to vector<16x32xf32>
    %119 = arith.mulf %116, %118 : vector<16x32xf32>
    %c0_54 = arith.constant 0 : index
    %c0_55 = arith.constant 0 : index
    %120 = vector.load %arg8[%c0_54, %c0_55] : memref<1x32xf32, #tpu.memory_space<vmem>>, vector<1x32xf32>
    %121 = vector.broadcast %120 : vector<1x32xf32> to vector<16x32xf32>
    %122 = arith.addf %119, %121 : vector<16x32xf32>
    %c0_56 = arith.constant 0 : index
    %c0_57 = arith.constant 0 : index
    %c0_58 = arith.constant 0 : index
    %123 = vector.load %arg9[%c0_56, %c0_57, %c0_58] : memref<1x16x32xf32, #tpu.memory_space<vmem>>, vector<1x16x32xf32>
    %124 = vector.shape_cast %123 : vector<1x16x32xf32> to vector<16x32xf32>
    %125 = vector.shape_cast %122 : vector<16x32xf32> to vector<1x16x32xf32>
    tpu.vector_store %arg9[%c0_56, %c0_57, %c0_58], %125 {strides = array<i32>} : memref<1x16x32xf32, #tpu.memory_space<vmem>>, vector<1x16x32xf32>,
    return
  }
  func.func @transform_0(%arg0: i32) -> (i32, i32, i32) {
    %c0_i32 = arith.constant 0 : i32
    %c0_i32_0 = arith.constant 0 : i32
    %c0_i32_1 = arith.constant 0 : i32
    return %arg0, %c0_i32, %c0_i32_0 : i32, i32, i32
  }
  func.func @transform_1(%arg0: i32) -> (i32, i32) {
    %c0_i32 = arith.constant 0 : i32
    %c0_i32_0 = arith.constant 0 : i32
    %c0_i32_1 = arith.constant 0 : i32
    return %c0_i32, %c0_i32_0 : i32, i32
  }
  func.func @transform_2(%arg0: i32) -> (i32, i32, i32) {
    %c0_i32 = arith.constant 0 : i32
    %c0_i32_0 = arith.constant 0 : i32
    %c0_i32_1 = arith.constant 0 : i32
    %c0_i32_2 = arith.constant 0 : i32
    return %c0_i32, %c0_i32_0, %c0_i32_1 : i32, i32, i32
  }
  func.func @transform_3(%arg0: i32) -> (i32, i32) {
    %c0_i32 = arith.constant 0 : i32
    %c0_i32_0 = arith.constant 0 : i32
    %c0_i32_1 = arith.constant 0 : i32
    return %c0_i32, %c0_i32_0 : i32, i32
  }
  func.func @transform_4(%arg0: i32) -> (i32, i32) {
    %c0_i32 = arith.constant 0 : i32
    %c0_i32_0 = arith.constant 0 : i32
    %c0_i32_1 = arith.constant 0 : i32
    return %c0_i32, %c0_i32_0 : i32, i32
  }
  func.func @transform_5(%arg0: i32) -> (i32, i32) {
    %c0_i32 = arith.constant 0 : i32
    %c0_i32_0 = arith.constant 0 : i32
    %c0_i32_1 = arith.constant 0 : i32
    return %c0_i32, %c0_i32_0 : i32, i32
  }
  func.func @transform_6(%arg0: i32) -> (i32, i32) {
    %c0_i32 = arith.constant 0 : i32
    %c0_i32_0 = arith.constant 0 : i32
    %c0_i32_1 = arith.constant 0 : i32
    return %c0_i32, %c0_i32_0 : i32, i32
  }
  func.func @transform_7(%arg0: i32) -> (i32, i32) {
    %c0_i32 = arith.constant 0 : i32
    %c0_i32_0 = arith.constant 0 : i32
    %c0_i32_1 = arith.constant 0 : i32
    return %c0_i32, %c0_i32_0 : i32, i32
  }
  func.func @transform_8(%arg0: i32) -> (i32, i32, i32) {
    %c0_i32 = arith.constant 0 : i32
    %c0_i32_0 = arith.constant 0 : i32
    %c0_i32_1 = arith.constant 0 : i32
    return %arg0, %c0_i32, %c0_i32_0 : i32, i32, i32
  }
}

module attributes {stable_mosaic.version = 11 : i64} {
  func.func @_ffn_res_ln_kernel(%arg0: i32, %arg1: memref<128x32xf32, #tpu.memory_space<vmem>>, %arg2: memref<32x64xf32, #tpu.memory_space<vmem>>, %arg3: memref<1x64xf32, #tpu.memory_space<vmem>>, %arg4: memref<64x32xf32, #tpu.memory_space<vmem>>, %arg5: memref<1x32xf32, #tpu.memory_space<vmem>>, %arg6: memref<1x32xf32, #tpu.memory_space<vmem>>, %arg7: memref<1x32xf32, #tpu.memory_space<vmem>>, %arg8: memref<128x32xf32, #tpu.memory_space<vmem>>) attributes {dimension_semantics = [#tpu.dimension_semantics<parallel>], iteration_bounds = array<i64: 2>, scalar_prefetch = 0 : i64, scratch_operands = 0 : i64, tpu.core_type = #tpu.core_type<tc>, window_params = [{transform_indices = @transform_0, window_bounds = array<i64: 128, 32>}, {pipeline_mode = #tpu.pipeline_mode<synchronous>, transform_indices = @transform_1, window_bounds = array<i64: 32, 64>}, {pipeline_mode = #tpu.pipeline_mode<synchronous>, transform_indices = @transform_2, window_bounds = array<i64: 1, 64>}, {pipeline_mode = #tpu.pipeline_mode<synchronous>, transform_indices = @transform_3, window_bounds = array<i64: 64, 32>}, {pipeline_mode = #tpu.pipeline_mode<synchronous>, transform_indices = @transform_4, window_bounds = array<i64: 1, 32>}, {pipeline_mode = #tpu.pipeline_mode<synchronous>, transform_indices = @transform_5, window_bounds = array<i64: 1, 32>}, {pipeline_mode = #tpu.pipeline_mode<synchronous>, transform_indices = @transform_6, window_bounds = array<i64: 1, 32>}, {transform_indices = @transform_7, window_bounds = array<i64: 128, 32>}]} {
    %c0 = arith.constant 0 : index
    %c0_0 = arith.constant 0 : index
    %0 = vector.load %arg1[%c0, %c0_0] : memref<128x32xf32, #tpu.memory_space<vmem>>, vector<128x32xf32>
    %c0_1 = arith.constant 0 : index
    %c0_2 = arith.constant 0 : index
    %1 = vector.load %arg2[%c0_1, %c0_2] : memref<32x64xf32, #tpu.memory_space<vmem>>, vector<32x64xf32>
    %cst = arith.constant dense<0.000000e+00> : vector<128x64xf32>
    %2 = tpu.matmul %0, %1, %cst {dimension_numbers = #tpu.dot_dimension_numbers<[1], [0], [0], [1], [0, 0, 1, 1], [], []>} : vector<128x32xf32>, vector<32x64xf32>, vector<128x64xf32> -> vector<128x64xf32>
    %c0_3 = arith.constant 0 : index
    %c0_4 = arith.constant 0 : index
    %3 = vector.load %arg3[%c0_3, %c0_4] : memref<1x64xf32, #tpu.memory_space<vmem>>, vector<1x64xf32>
    %4 = vector.broadcast %3 : vector<1x64xf32> to vector<128x64xf32>
    %5 = arith.addf %2, %4 : vector<128x64xf32>
    %cst_5 = arith.constant 0.000000e+00 : f32
    %6 = vector.broadcast %cst_5 : f32 to vector<128x64xf32>
    %7 = arith.maximumf %5, %6 : vector<128x64xf32>
    %c0_6 = arith.constant 0 : index
    %c0_7 = arith.constant 0 : index
    %8 = vector.load %arg4[%c0_6, %c0_7] : memref<64x32xf32, #tpu.memory_space<vmem>>, vector<64x32xf32>
    %cst_8 = arith.constant dense<0.000000e+00> : vector<128x32xf32>
    %9 = tpu.matmul %7, %8, %cst_8 {dimension_numbers = #tpu.dot_dimension_numbers<[1], [0], [0], [1], [0, 0, 1, 1], [], []>} : vector<128x64xf32>, vector<64x32xf32>, vector<128x32xf32> -> vector<128x32xf32>
    %c0_9 = arith.constant 0 : index
    %c0_10 = arith.constant 0 : index
    %10 = vector.load %arg5[%c0_9, %c0_10] : memref<1x32xf32, #tpu.memory_space<vmem>>, vector<1x32xf32>
    %11 = vector.broadcast %10 : vector<1x32xf32> to vector<128x32xf32>
    %12 = arith.addf %9, %11 : vector<128x32xf32>
    %13 = arith.addf %12, %0 : vector<128x32xf32>
    %cst_11 = arith.constant dense<0.000000e+00> : vector<128xf32>
    %14 = vector.multi_reduction <add>, %13, %cst_11 [1] : vector<128x32xf32> to vector<128xf32>
    %15 = vector.shape_cast %14 : vector<128xf32> to vector<128x1xf32>
    %cst_12 = arith.constant 3.200000e+01 : f32
    %16 = vector.broadcast %cst_12 : f32 to vector<128x1xf32>
    %17 = arith.divf %15, %16 : vector<128x1xf32>
    %18 = vector.broadcast %17 : vector<128x1xf32> to vector<128x32xf32>
    %19 = arith.subf %13, %18 : vector<128x32xf32>
    %20 = arith.mulf %19, %19 : vector<128x32xf32>
    %cst_13 = arith.constant dense<0.000000e+00> : vector<128xf32>
    %21 = vector.multi_reduction <add>, %20, %cst_13 [1] : vector<128x32xf32> to vector<128xf32>
    %22 = vector.shape_cast %21 : vector<128xf32> to vector<128x1xf32>
    %cst_14 = arith.constant 3.200000e+01 : f32
    %23 = vector.broadcast %cst_14 : f32 to vector<128x1xf32>
    %24 = arith.divf %22, %23 : vector<128x1xf32>
    %25 = vector.broadcast %17 : vector<128x1xf32> to vector<128x32xf32>
    %26 = arith.subf %13, %25 : vector<128x32xf32>
    %cst_15 = arith.constant 9.99999974E-6 : f32
    %27 = vector.broadcast %cst_15 : f32 to vector<128x1xf32>
    %28 = arith.addf %24, %27 : vector<128x1xf32>
    %29 = math.rsqrt %28 : vector<128x1xf32>
    %30 = vector.broadcast %29 : vector<128x1xf32> to vector<128x32xf32>
    %31 = arith.mulf %26, %30 : vector<128x32xf32>
    %c0_16 = arith.constant 0 : index
    %c0_17 = arith.constant 0 : index
    %32 = vector.load %arg6[%c0_16, %c0_17] : memref<1x32xf32, #tpu.memory_space<vmem>>, vector<1x32xf32>
    %33 = vector.broadcast %32 : vector<1x32xf32> to vector<128x32xf32>
    %34 = arith.mulf %31, %33 : vector<128x32xf32>
    %c0_18 = arith.constant 0 : index
    %c0_19 = arith.constant 0 : index
    %35 = vector.load %arg7[%c0_18, %c0_19] : memref<1x32xf32, #tpu.memory_space<vmem>>, vector<1x32xf32>
    %36 = vector.broadcast %35 : vector<1x32xf32> to vector<128x32xf32>
    %37 = arith.addf %34, %36 : vector<128x32xf32>
    %c0_20 = arith.constant 0 : index
    %c0_21 = arith.constant 0 : index
    %38 = vector.load %arg8[%c0_20, %c0_21] : memref<128x32xf32, #tpu.memory_space<vmem>>, vector<128x32xf32>
    tpu.vector_store %arg8[%c0_20, %c0_21], %37 {strides = array<i32>} : memref<128x32xf32, #tpu.memory_space<vmem>>, vector<128x32xf32>,
    return
  }
  func.func @transform_0(%arg0: i32) -> (i32, i32) {
    %c0_i32 = arith.constant 0 : i32
    %c0_i32_0 = arith.constant 0 : i32
    return %arg0, %c0_i32 : i32, i32
  }
  func.func @transform_1(%arg0: i32) -> (i32, i32) {
    %c0_i32 = arith.constant 0 : i32
    %c0_i32_0 = arith.constant 0 : i32
    %c0_i32_1 = arith.constant 0 : i32
    return %c0_i32, %c0_i32_0 : i32, i32
  }
  func.func @transform_2(%arg0: i32) -> (i32, i32) {
    %c0_i32 = arith.constant 0 : i32
    %c0_i32_0 = arith.constant 0 : i32
    %c0_i32_1 = arith.constant 0 : i32
    return %c0_i32, %c0_i32_0 : i32, i32
  }
  func.func @transform_3(%arg0: i32) -> (i32, i32) {
    %c0_i32 = arith.constant 0 : i32
    %c0_i32_0 = arith.constant 0 : i32
    %c0_i32_1 = arith.constant 0 : i32
    return %c0_i32, %c0_i32_0 : i32, i32
  }
  func.func @transform_4(%arg0: i32) -> (i32, i32) {
    %c0_i32 = arith.constant 0 : i32
    %c0_i32_0 = arith.constant 0 : i32
    %c0_i32_1 = arith.constant 0 : i32
    return %c0_i32, %c0_i32_0 : i32, i32
  }
  func.func @transform_5(%arg0: i32) -> (i32, i32) {
    %c0_i32 = arith.constant 0 : i32
    %c0_i32_0 = arith.constant 0 : i32
    %c0_i32_1 = arith.constant 0 : i32
    return %c0_i32, %c0_i32_0 : i32, i32
  }
  func.func @transform_6(%arg0: i32) -> (i32, i32) {
    %c0_i32 = arith.constant 0 : i32
    %c0_i32_0 = arith.constant 0 : i32
    %c0_i32_1 = arith.constant 0 : i32
    return %c0_i32, %c0_i32_0 : i32, i32
  }
  func.func @transform_7(%arg0: i32) -> (i32, i32) {
    %c0_i32 = arith.constant 0 : i32
    %c0_i32_0 = arith.constant 0 : i32
    return %arg0, %c0_i32 : i32, i32
  }
}

module attributes {stable_mosaic.version = 11 : i64} {
  func.func @_add_ln_kernel(%arg0: i32, %arg1: memref<128x32xf32, #tpu.memory_space<vmem>>, %arg2: memref<128x32xf32, #tpu.memory_space<vmem>>, %arg3: memref<1x32xf32, #tpu.memory_space<vmem>>, %arg4: memref<1x32xf32, #tpu.memory_space<vmem>>, %arg5: memref<128x32xf32, #tpu.memory_space<vmem>>) attributes {dimension_semantics = [#tpu.dimension_semantics<parallel>], iteration_bounds = array<i64: 2>, scalar_prefetch = 0 : i64, scratch_operands = 0 : i64, tpu.core_type = #tpu.core_type<tc>, window_params = [{transform_indices = @transform_0, window_bounds = array<i64: 128, 32>}, {transform_indices = @transform_1, window_bounds = array<i64: 128, 32>}, {pipeline_mode = #tpu.pipeline_mode<synchronous>, transform_indices = @transform_2, window_bounds = array<i64: 1, 32>}, {pipeline_mode = #tpu.pipeline_mode<synchronous>, transform_indices = @transform_3, window_bounds = array<i64: 1, 32>}, {transform_indices = @transform_4, window_bounds = array<i64: 128, 32>}]} {
    %c0 = arith.constant 0 : index
    %c0_0 = arith.constant 0 : index
    %0 = vector.load %arg1[%c0, %c0_0] : memref<128x32xf32, #tpu.memory_space<vmem>>, vector<128x32xf32>
    %c0_1 = arith.constant 0 : index
    %c0_2 = arith.constant 0 : index
    %1 = vector.load %arg2[%c0_1, %c0_2] : memref<128x32xf32, #tpu.memory_space<vmem>>, vector<128x32xf32>
    %2 = arith.addf %0, %1 : vector<128x32xf32>
    %cst = arith.constant dense<0.000000e+00> : vector<128xf32>
    %3 = vector.multi_reduction <add>, %2, %cst [1] : vector<128x32xf32> to vector<128xf32>
    %4 = vector.shape_cast %3 : vector<128xf32> to vector<128x1xf32>
    %cst_3 = arith.constant 3.200000e+01 : f32
    %5 = vector.broadcast %cst_3 : f32 to vector<128x1xf32>
    %6 = arith.divf %4, %5 : vector<128x1xf32>
    %7 = vector.broadcast %6 : vector<128x1xf32> to vector<128x32xf32>
    %8 = arith.subf %2, %7 : vector<128x32xf32>
    %9 = arith.mulf %8, %8 : vector<128x32xf32>
    %cst_4 = arith.constant dense<0.000000e+00> : vector<128xf32>
    %10 = vector.multi_reduction <add>, %9, %cst_4 [1] : vector<128x32xf32> to vector<128xf32>
    %11 = vector.shape_cast %10 : vector<128xf32> to vector<128x1xf32>
    %cst_5 = arith.constant 3.200000e+01 : f32
    %12 = vector.broadcast %cst_5 : f32 to vector<128x1xf32>
    %13 = arith.divf %11, %12 : vector<128x1xf32>
    %14 = vector.broadcast %6 : vector<128x1xf32> to vector<128x32xf32>
    %15 = arith.subf %2, %14 : vector<128x32xf32>
    %cst_6 = arith.constant 9.99999974E-6 : f32
    %16 = vector.broadcast %cst_6 : f32 to vector<128x1xf32>
    %17 = arith.addf %13, %16 : vector<128x1xf32>
    %18 = math.rsqrt %17 : vector<128x1xf32>
    %19 = vector.broadcast %18 : vector<128x1xf32> to vector<128x32xf32>
    %20 = arith.mulf %15, %19 : vector<128x32xf32>
    %c0_7 = arith.constant 0 : index
    %c0_8 = arith.constant 0 : index
    %21 = vector.load %arg3[%c0_7, %c0_8] : memref<1x32xf32, #tpu.memory_space<vmem>>, vector<1x32xf32>
    %22 = vector.broadcast %21 : vector<1x32xf32> to vector<128x32xf32>
    %23 = arith.mulf %20, %22 : vector<128x32xf32>
    %c0_9 = arith.constant 0 : index
    %c0_10 = arith.constant 0 : index
    %24 = vector.load %arg4[%c0_9, %c0_10] : memref<1x32xf32, #tpu.memory_space<vmem>>, vector<1x32xf32>
    %25 = vector.broadcast %24 : vector<1x32xf32> to vector<128x32xf32>
    %26 = arith.addf %23, %25 : vector<128x32xf32>
    %c0_11 = arith.constant 0 : index
    %c0_12 = arith.constant 0 : index
    %27 = vector.load %arg5[%c0_11, %c0_12] : memref<128x32xf32, #tpu.memory_space<vmem>>, vector<128x32xf32>
    tpu.vector_store %arg5[%c0_11, %c0_12], %26 {strides = array<i32>} : memref<128x32xf32, #tpu.memory_space<vmem>>, vector<128x32xf32>,
    return
  }
  func.func @transform_0(%arg0: i32) -> (i32, i32) {
    %c0_i32 = arith.constant 0 : i32
    %c0_i32_0 = arith.constant 0 : i32
    return %arg0, %c0_i32 : i32, i32
  }
  func.func @transform_1(%arg0: i32) -> (i32, i32) {
    %c0_i32 = arith.constant 0 : i32
    %c0_i32_0 = arith.constant 0 : i32
    return %arg0, %c0_i32 : i32, i32
  }
  func.func @transform_2(%arg0: i32) -> (i32, i32) {
    %c0_i32 = arith.constant 0 : i32
    %c0_i32_0 = arith.constant 0 : i32
    %c0_i32_1 = arith.constant 0 : i32
    return %c0_i32, %c0_i32_0 : i32, i32
  }
  func.func @transform_3(%arg0: i32) -> (i32, i32) {
    %c0_i32 = arith.constant 0 : i32
    %c0_i32_0 = arith.constant 0 : i32
    %c0_i32_1 = arith.constant 0 : i32
    return %c0_i32, %c0_i32_0 : i32, i32
  }
  func.func @transform_4(%arg0: i32) -> (i32, i32) {
    %c0_i32 = arith.constant 0 : i32
    %c0_i32_0 = arith.constant 0 : i32
    return %arg0, %c0_i32 : i32, i32
  }
}

module attributes {stable_mosaic.version = 11 : i64} {
  func.func @_add_ln_kernel(%arg0: i32, %arg1: memref<128x32xf32, #tpu.memory_space<vmem>>, %arg2: memref<128x32xf32, #tpu.memory_space<vmem>>, %arg3: memref<1x32xf32, #tpu.memory_space<vmem>>, %arg4: memref<1x32xf32, #tpu.memory_space<vmem>>, %arg5: memref<128x32xf32, #tpu.memory_space<vmem>>) attributes {dimension_semantics = [#tpu.dimension_semantics<parallel>], iteration_bounds = array<i64: 2>, scalar_prefetch = 0 : i64, scratch_operands = 0 : i64, tpu.core_type = #tpu.core_type<tc>, window_params = [{transform_indices = @transform_0, window_bounds = array<i64: 128, 32>}, {transform_indices = @transform_1, window_bounds = array<i64: 128, 32>}, {pipeline_mode = #tpu.pipeline_mode<synchronous>, transform_indices = @transform_2, window_bounds = array<i64: 1, 32>}, {pipeline_mode = #tpu.pipeline_mode<synchronous>, transform_indices = @transform_3, window_bounds = array<i64: 1, 32>}, {transform_indices = @transform_4, window_bounds = array<i64: 128, 32>}]} {
    %c0 = arith.constant 0 : index
    %c0_0 = arith.constant 0 : index
    %0 = vector.load %arg1[%c0, %c0_0] : memref<128x32xf32, #tpu.memory_space<vmem>>, vector<128x32xf32>
    %c0_1 = arith.constant 0 : index
    %c0_2 = arith.constant 0 : index
    %1 = vector.load %arg2[%c0_1, %c0_2] : memref<128x32xf32, #tpu.memory_space<vmem>>, vector<128x32xf32>
    %cst = arith.constant dense<0.000000e+00> : vector<128xf32>
    %2 = vector.multi_reduction <add>, %0, %cst [1] : vector<128x32xf32> to vector<128xf32>
    %3 = vector.shape_cast %2 : vector<128xf32> to vector<128x1xf32>
    %cst_3 = arith.constant 3.200000e+01 : f32
    %4 = vector.broadcast %cst_3 : f32 to vector<128x1xf32>
    %5 = arith.divf %3, %4 : vector<128x1xf32>
    %6 = vector.broadcast %5 : vector<128x1xf32> to vector<128x32xf32>
    %7 = arith.subf %0, %6 : vector<128x32xf32>
    %8 = arith.mulf %7, %7 : vector<128x32xf32>
    %cst_4 = arith.constant dense<0.000000e+00> : vector<128xf32>
    %9 = vector.multi_reduction <add>, %8, %cst_4 [1] : vector<128x32xf32> to vector<128xf32>
    %10 = vector.shape_cast %9 : vector<128xf32> to vector<128x1xf32>
    %cst_5 = arith.constant 3.200000e+01 : f32
    %11 = vector.broadcast %cst_5 : f32 to vector<128x1xf32>
    %12 = arith.divf %10, %11 : vector<128x1xf32>
    %13 = vector.broadcast %5 : vector<128x1xf32> to vector<128x32xf32>
    %14 = arith.subf %0, %13 : vector<128x32xf32>
    %cst_6 = arith.constant 9.99999974E-6 : f32
    %15 = vector.broadcast %cst_6 : f32 to vector<128x1xf32>
    %16 = arith.addf %12, %15 : vector<128x1xf32>
    %17 = math.rsqrt %16 : vector<128x1xf32>
    %18 = vector.broadcast %17 : vector<128x1xf32> to vector<128x32xf32>
    %19 = arith.mulf %14, %18 : vector<128x32xf32>
    %c0_7 = arith.constant 0 : index
    %c0_8 = arith.constant 0 : index
    %20 = vector.load %arg3[%c0_7, %c0_8] : memref<1x32xf32, #tpu.memory_space<vmem>>, vector<1x32xf32>
    %21 = vector.broadcast %20 : vector<1x32xf32> to vector<128x32xf32>
    %22 = arith.mulf %19, %21 : vector<128x32xf32>
    %c0_9 = arith.constant 0 : index
    %c0_10 = arith.constant 0 : index
    %23 = vector.load %arg4[%c0_9, %c0_10] : memref<1x32xf32, #tpu.memory_space<vmem>>, vector<1x32xf32>
    %24 = vector.broadcast %23 : vector<1x32xf32> to vector<128x32xf32>
    %25 = arith.addf %22, %24 : vector<128x32xf32>
    %26 = arith.addf %25, %1 : vector<128x32xf32>
    %c0_11 = arith.constant 0 : index
    %c0_12 = arith.constant 0 : index
    %27 = vector.load %arg5[%c0_11, %c0_12] : memref<128x32xf32, #tpu.memory_space<vmem>>, vector<128x32xf32>
    tpu.vector_store %arg5[%c0_11, %c0_12], %26 {strides = array<i32>} : memref<128x32xf32, #tpu.memory_space<vmem>>, vector<128x32xf32>,
    return
  }
  func.func @transform_0(%arg0: i32) -> (i32, i32) {
    %c0_i32 = arith.constant 0 : i32
    %c0_i32_0 = arith.constant 0 : i32
    return %arg0, %c0_i32 : i32, i32
  }
  func.func @transform_1(%arg0: i32) -> (i32, i32) {
    %c0_i32 = arith.constant 0 : i32
    %c0_i32_0 = arith.constant 0 : i32
    return %arg0, %c0_i32 : i32, i32
  }
  func.func @transform_2(%arg0: i32) -> (i32, i32) {
    %c0_i32 = arith.constant 0 : i32
    %c0_i32_0 = arith.constant 0 : i32
    %c0_i32_1 = arith.constant 0 : i32
    return %c0_i32, %c0_i32_0 : i32, i32
  }
  func.func @transform_3(%arg0: i32) -> (i32, i32) {
    %c0_i32 = arith.constant 0 : i32
    %c0_i32_0 = arith.constant 0 : i32
    %c0_i32_1 = arith.constant 0 : i32
    return %c0_i32, %c0_i32_0 : i32, i32
  }
  func.func @transform_4(%arg0: i32) -> (i32, i32) {
    %c0_i32 = arith.constant 0 : i32
    %c0_i32_0 = arith.constant 0 : i32
    return %arg0, %c0_i32 : i32, i32
  }
}

module attributes {stable_mosaic.version = 11 : i64} {
  func.func @_gate_kernel(%arg0: memref<2x16xf32, #tpu.memory_space<vmem>>, %arg1: memref<16x16xf32, #tpu.memory_space<vmem>>, %arg2: memref<1x16xf32, #tpu.memory_space<vmem>>, %arg3: memref<1x16xf32, #tpu.memory_space<vmem>>, %arg4: memref<1x16xf32, #tpu.memory_space<vmem>>, %arg5: memref<1x16xf32, #tpu.memory_space<vmem>>, %arg6: memref<1x16xf32, #tpu.memory_space<vmem>>, %arg7: memref<16x16xf32, #tpu.memory_space<vmem>>, %arg8: memref<1x16xf32, #tpu.memory_space<vmem>>, %arg9: memref<2x16xf32, #tpu.memory_space<vmem>>) attributes {dimension_semantics = [], scalar_prefetch = 0 : i64, scratch_operands = 0 : i64, tpu.core_type = #tpu.core_type<tc>} {
    %c0 = arith.constant 0 : index
    %c0_0 = arith.constant 0 : index
    %0 = vector.load %arg0[%c0, %c0_0] : memref<2x16xf32, #tpu.memory_space<vmem>>, vector<2x16xf32>
    %c0_1 = arith.constant 0 : index
    %c0_2 = arith.constant 0 : index
    %1 = vector.load %arg1[%c0_1, %c0_2] : memref<16x16xf32, #tpu.memory_space<vmem>>, vector<16x16xf32>
    %cst = arith.constant dense<0.000000e+00> : vector<2x16xf32>
    %2 = tpu.matmul %0, %1, %cst {dimension_numbers = #tpu.dot_dimension_numbers<[1], [0], [0], [1], [0, 0, 1, 1], [], []>} : vector<2x16xf32>, vector<16x16xf32>, vector<2x16xf32> -> vector<2x16xf32>
    %c0_3 = arith.constant 0 : index
    %c0_4 = arith.constant 0 : index
    %3 = vector.load %arg2[%c0_3, %c0_4] : memref<1x16xf32, #tpu.memory_space<vmem>>, vector<1x16xf32>
    %4 = vector.broadcast %3 : vector<1x16xf32> to vector<2x16xf32>
    %5 = arith.addf %2, %4 : vector<2x16xf32>
    %c0_5 = arith.constant 0 : index
    %c0_6 = arith.constant 0 : index
    %6 = vector.load %arg5[%c0_5, %c0_6] : memref<1x16xf32, #tpu.memory_space<vmem>>, vector<1x16xf32>
    %7 = vector.broadcast %6 : vector<1x16xf32> to vector<2x16xf32>
    %8 = arith.subf %5, %7 : vector<2x16xf32>
    %c0_7 = arith.constant 0 : index
    %c0_8 = arith.constant 0 : index
    %9 = vector.load %arg6[%c0_7, %c0_8] : memref<1x16xf32, #tpu.memory_space<vmem>>, vector<1x16xf32>
    %cst_9 = arith.constant 9.99999974E-6 : f32
    %10 = vector.broadcast %cst_9 : f32 to vector<1x16xf32>
    %11 = arith.addf %9, %10 : vector<1x16xf32>
    %12 = math.rsqrt %11 : vector<1x16xf32>
    %13 = vector.broadcast %12 : vector<1x16xf32> to vector<2x16xf32>
    %14 = arith.mulf %8, %13 : vector<2x16xf32>
    %c0_10 = arith.constant 0 : index
    %c0_11 = arith.constant 0 : index
    %15 = vector.load %arg3[%c0_10, %c0_11] : memref<1x16xf32, #tpu.memory_space<vmem>>, vector<1x16xf32>
    %16 = vector.broadcast %15 : vector<1x16xf32> to vector<2x16xf32>
    %17 = arith.mulf %14, %16 : vector<2x16xf32>
    %c0_12 = arith.constant 0 : index
    %c0_13 = arith.constant 0 : index
    %18 = vector.load %arg4[%c0_12, %c0_13] : memref<1x16xf32, #tpu.memory_space<vmem>>, vector<1x16xf32>
    %19 = vector.broadcast %18 : vector<1x16xf32> to vector<2x16xf32>
    %20 = arith.addf %17, %19 : vector<2x16xf32>
    %cst_14 = arith.constant 0.000000e+00 : f32
    %21 = vector.broadcast %cst_14 : f32 to vector<2x16xf32>
    %22 = arith.maximumf %20, %21 : vector<2x16xf32>
    %c0_15 = arith.constant 0 : index
    %c0_16 = arith.constant 0 : index
    %23 = vector.load %arg7[%c0_15, %c0_16] : memref<16x16xf32, #tpu.memory_space<vmem>>, vector<16x16xf32>
    %cst_17 = arith.constant dense<0.000000e+00> : vector<2x16xf32>
    %24 = tpu.matmul %22, %23, %cst_17 {dimension_numbers = #tpu.dot_dimension_numbers<[1], [0], [0], [1], [0, 0, 1, 1], [], []>} : vector<2x16xf32>, vector<16x16xf32>, vector<2x16xf32> -> vector<2x16xf32>
    %c0_18 = arith.constant 0 : index
    %c0_19 = arith.constant 0 : index
    %25 = vector.load %arg8[%c0_18, %c0_19] : memref<1x16xf32, #tpu.memory_space<vmem>>, vector<1x16xf32>
    %26 = vector.broadcast %25 : vector<1x16xf32> to vector<2x16xf32>
    %27 = arith.addf %24, %26 : vector<2x16xf32>
    %28 = arith.negf %27 : vector<2x16xf32>
    %29 = math.exp %28 : vector<2x16xf32>
    %cst_20 = arith.constant 1.000000e+00 : f32
    %30 = vector.broadcast %cst_20 : f32 to vector<2x16xf32>
    %31 = arith.addf %30, %29 : vector<2x16xf32>
    %32 = arith.divf %30, %31 : vector<2x16xf32>
    %33 = arith.mulf %0, %32 : vector<2x16xf32>
    %c0_21 = arith.constant 0 : index
    %c0_22 = arith.constant 0 : index
    %34 = vector.load %arg9[%c0_21, %c0_22] : memref<2x16xf32, #tpu.memory_space<vmem>>, vector<2x16xf32>
    tpu.vector_store %arg9[%c0_21, %c0_22], %33 {strides = array<i32>} : memref<2x16xf32, #tpu.memory_space<vmem>>, vector<2x16xf32>,
    return
  }
}

module attributes {stable_mosaic.version = 11 : i64} {
  func.func @_temporal_fused_kernel(%arg0: i32, %arg1: i32, %arg2: memref<1x16x8x32xf32, #tpu.memory_space<vmem>>, %arg3: memref<1x16x8x32xf32, #tpu.memory_space<vmem>>, %arg4: memref<1x16x1xf32, #tpu.memory_space<vmem>>, %arg5: memref<8x32xf32, #tpu.memory_space<vmem>>, %arg6: memref<1x1x32xf32, #tpu.memory_space<vmem>>, %arg7: memref<32x96xf32, #tpu.memory_space<vmem>>, %arg8: memref<32x32xf32, #tpu.memory_space<vmem>>, %arg9: memref<1x32xf32, #tpu.memory_space<vmem>>, %arg10: memref<1x32xf32, #tpu.memory_space<vmem>>, %arg11: memref<1x32xf32, #tpu.memory_space<vmem>>, %arg12: memref<1x16x8x32xf32, #tpu.memory_space<vmem>>) attributes {dimension_semantics = [#tpu.dimension_semantics<parallel>, #tpu.dimension_semantics<parallel>], iteration_bounds = array<i64: 2, 1>, scalar_prefetch = 0 : i64, scratch_operands = 0 : i64, tpu.core_type = #tpu.core_type<tc>, window_params = [{transform_indices = @transform_0, window_bounds = array<i64: 1, 16, 8, 32>}, {transform_indices = @transform_1, window_bounds = array<i64: 1, 16, 8, 32>}, {transform_indices = @transform_2, window_bounds = array<i64: 1, 16, 1>}, {pipeline_mode = #tpu.pipeline_mode<synchronous>, transform_indices = @transform_3, window_bounds = array<i64: 8, 32>}, {transform_indices = @transform_4, window_bounds = array<i64: 1, 1, 32>}, {pipeline_mode = #tpu.pipeline_mode<synchronous>, transform_indices = @transform_5, window_bounds = array<i64: 32, 96>}, {pipeline_mode = #tpu.pipeline_mode<synchronous>, transform_indices = @transform_6, window_bounds = array<i64: 32, 32>}, {pipeline_mode = #tpu.pipeline_mode<synchronous>, transform_indices = @transform_7, window_bounds = array<i64: 1, 32>}, {pipeline_mode = #tpu.pipeline_mode<synchronous>, transform_indices = @transform_8, window_bounds = array<i64: 1, 32>}, {pipeline_mode = #tpu.pipeline_mode<synchronous>, transform_indices = @transform_9, window_bounds = array<i64: 1, 32>}, {transform_indices = @transform_10, window_bounds = array<i64: 1, 16, 8, 32>}]} {
    %c0 = arith.constant 0 : index
    %c0_0 = arith.constant 0 : index
    %c0_1 = arith.constant 0 : index
    %c0_2 = arith.constant 0 : index
    %0 = vector.load %arg2[%c0, %c0_0, %c0_1, %c0_2] : memref<1x16x8x32xf32, #tpu.memory_space<vmem>>, vector<1x16x8x32xf32>
    %1 = vector.shape_cast %0 : vector<1x16x8x32xf32> to vector<16x8x32xf32>
    %c0_3 = arith.constant 0 : index
    %c0_4 = arith.constant 0 : index
    %2 = vector.load %arg5[%c0_3, %c0_4] : memref<8x32xf32, #tpu.memory_space<vmem>>, vector<8x32xf32>
    %3 = vector.shape_cast %2 : vector<8x32xf32> to vector<1x8x32xf32>
    %4 = vector.broadcast %3 : vector<1x8x32xf32> to vector<16x8x32xf32>
    %5 = arith.addf %1, %4 : vector<16x8x32xf32>
    %c0_5 = arith.constant 0 : index
    %c0_6 = arith.constant 0 : index
    %c0_7 = arith.constant 0 : index
    %6 = vector.load %arg6[%c0_5, %c0_6, %c0_7] : memref<1x1x32xf32, #tpu.memory_space<vmem>>, vector<1x1x32xf32>
    %7 = vector.broadcast %6 : vector<1x1x32xf32> to vector<16x8x32xf32>
    %8 = arith.addf %5, %7 : vector<16x8x32xf32>
    %c0_8 = arith.constant 0 : index
    %c0_9 = arith.constant 0 : index
    %c0_10 = arith.constant 0 : index
    %c0_11 = arith.constant 0 : index
    %9 = vector.load %arg3[%c0_8, %c0_9, %c0_10, %c0_11] : memref<1x16x8x32xf32, #tpu.memory_space<vmem>>, vector<1x16x8x32xf32>
    %10 = vector.shape_cast %9 : vector<1x16x8x32xf32> to vector<16x8x32xf32>
    %c0_12 = arith.constant 0 : index
    %c0_13 = arith.constant 0 : index
    %c0_14 = arith.constant 0 : index
    %11 = vector.load %arg4[%c0_12, %c0_13, %c0_14] : memref<1x16x1xf32, #tpu.memory_space<vmem>>, vector<1x16x1xf32>
    %12 = vector.shape_cast %11 : vector<1x16x1xf32> to vector<16x1xf32>
    %13 = vector.shape_cast %12 : vector<16x1xf32> to vector<16x1x1xf32>
    %14 = math.absf %10 : vector<16x8x32xf32>
    %cst = arith.constant 0.000000e+00 : f32
    %15 = vector.broadcast %cst : f32 to vector<16x8x32xf32>
    %16 = arith.cmpf ogt, %10, %15 : vector<16x8x32xf32>
    %cst_15 = arith.constant 0.000000e+00 : f32
    %17 = vector.broadcast %cst_15 : f32 to vector<16x8x32xf32>
    %18 = arith.cmpf olt, %10, %17 : vector<16x8x32xf32>
    %cst_16 = arith.constant -1.000000e+00 : f32
    %cst_17 = arith.constant 0.000000e+00 : f32
    %19 = vector.broadcast %cst_16 : f32 to vector<16x8x32xf32>
    %20 = vector.broadcast %cst_17 : f32 to vector<16x8x32xf32>
    %21 = arith.select %18, %19, %20 : vector<16x8x32xi1>, vector<16x8x32xf32>
    %cst_18 = arith.constant 1.000000e+00 : f32
    %22 = vector.broadcast %cst_18 : f32 to vector<16x8x32xf32>
    %23 = arith.select %16, %22, %21 : vector<16x8x32xi1>, vector<16x8x32xf32>
    %24 = vector.broadcast %13 : vector<16x1x1xf32> to vector<16x8x32xf32>
    %25 = arith.subf %14, %24 : vector<16x8x32xf32>
    %cst_19 = arith.constant 0.000000e+00 : f32
    %26 = vector.broadcast %cst_19 : f32 to vector<16x8x32xf32>
    %27 = arith.maximumf %25, %26 : vector<16x8x32xf32>
    %28 = arith.mulf %23, %27 : vector<16x8x32xf32>
    %29 = vector.shape_cast %8 : vector<16x8x32xf32> to vector<128x32xf32>
    %c0_20 = arith.constant 0 : index
    %c0_21 = arith.constant 0 : index
    %30 = vector.load %arg7[%c0_20, %c0_21] : memref<32x96xf32, #tpu.memory_space<vmem>>, vector<32x96xf32>
    %cst_22 = arith.constant dense<0.000000e+00> : vector<128x96xf32>
    %31 = tpu.matmul %29, %30, %cst_22 {dimension_numbers = #tpu.dot_dimension_numbers<[1], [0], [0], [1], [0, 0, 1, 1], [], []>} : vector<128x32xf32>, vector<32x96xf32>, vector<128x96xf32> -> vector<128x96xf32>
    %32 = vector.shape_cast %31 : vector<128x96xf32> to vector<16x8x96xf32>
    %cst_23 = arith.constant 0.000000e+00 : f32
    %33 = vector.broadcast %cst_23 : f32 to vector<128x32xf32>
    %34 = vector.extract_strided_slice %32 {offsets = [0, 0, 0], sizes = [16, 8, 8], strides = [1, 1, 1]} : vector<16x8x96xf32> to vector<16x8x8xf32>
    %35 = vector.extract_strided_slice %32 {offsets = [0, 0, 32], sizes = [16, 8, 8], strides = [1, 1, 1]} : vector<16x8x96xf32> to vector<16x8x8xf32>
    %36 = vector.extract_strided_slice %32 {offsets = [0, 0, 64], sizes = [16, 8, 8], strides = [1, 1, 1]} : vector<16x8x96xf32> to vector<16x8x8xf32>
    "tpu.trace_start"() <{level = 10 : i32, message = "ntd,nsd->nts"}> : () -> ()
    %cst_24 = arith.constant dense<0.000000e+00> : vector<16x8x8xf32>
    %37 = tpu.matmul %34, %35, %cst_24 {dimension_numbers = #tpu.dot_dimension_numbers<[2], [2], [1], [1], [0, 0, 0, 1, 1, 1], [0], [0]>} : vector<16x8x8xf32>, vector<16x8x8xf32>, vector<16x8x8xf32> -> vector<16x8x8xf32>
    "tpu.trace_stop"() : () -> ()
    %cst_25 = arith.constant 0.353553385 : f32
    %38 = vector.broadcast %cst_25 : f32 to vector<16x8x8xf32>
    %39 = arith.mulf %37, %38 : vector<16x8x8xf32>
    %cst_26 = arith.constant dense<0xFF800000> : vector<16x8xf32>
    %40 = vector.multi_reduction <maximumf>, %39, %cst_26 [2] : vector<16x8x8xf32> to vector<16x8xf32>
    %41 = vector.shape_cast %40 : vector<16x8xf32> to vector<16x8x1xf32>
    %42 = vector.broadcast %41 : vector<16x8x1xf32> to vector<16x8x8xf32>
    %43 = arith.subf %39, %42 : vector<16x8x8xf32>
    %44 = math.exp %43 : vector<16x8x8xf32>
    %cst_27 = arith.constant dense<0.000000e+00> : vector<16x8xf32>
    %45 = vector.multi_reduction <add>, %44, %cst_27 [2] : vector<16x8x8xf32> to vector<16x8xf32>
    %46 = vector.shape_cast %45 : vector<16x8xf32> to vector<16x8x1xf32>
    "tpu.trace_start"() <{level = 10 : i32, message = "nts,nsd->ntd"}> : () -> ()
    %cst_28 = arith.constant dense<0.000000e+00> : vector<16x8x8xf32>
    %47 = tpu.matmul %44, %36, %cst_28 {dimension_numbers = #tpu.dot_dimension_numbers<[2], [1], [1], [2], [0, 0, 0, 1, 1, 2], [0], [0]>} : vector<16x8x8xf32>, vector<16x8x8xf32>, vector<16x8x8xf32> -> vector<16x8x8xf32>
    "tpu.trace_stop"() : () -> ()
    %48 = vector.broadcast %46 : vector<16x8x1xf32> to vector<16x8x8xf32>
    %49 = arith.divf %47, %48 : vector<16x8x8xf32>
    %50 = vector.shape_cast %49 : vector<16x8x8xf32> to vector<128x8xf32>
    %c0_29 = arith.constant 0 : index
    %c0_30 = arith.constant 0 : index
    %51 = vector.load %arg8[%c0_29, %c0_30] : memref<32x32xf32, #tpu.memory_space<vmem>>, vector<8x32xf32>
    %cst_31 = arith.constant dense<0.000000e+00> : vector<128x32xf32>
    %52 = tpu.matmul %50, %51, %cst_31 {dimension_numbers = #tpu.dot_dimension_numbers<[1], [0], [0], [1], [0, 0, 1, 1], [], []>} : vector<128x8xf32>, vector<8x32xf32>, vector<128x32xf32> -> vector<128x32xf32>
    %53 = arith.addf %33, %52 : vector<128x32xf32>
    %54 = vector.extract_strided_slice %32 {offsets = [0, 0, 8], sizes = [16, 8, 8], strides = [1, 1, 1]} : vector<16x8x96xf32> to vector<16x8x8xf32>
    %55 = vector.extract_strided_slice %32 {offsets = [0, 0, 40], sizes = [16, 8, 8], strides = [1, 1, 1]} : vector<16x8x96xf32> to vector<16x8x8xf32>
    %56 = vector.extract_strided_slice %32 {offsets = [0, 0, 72], sizes = [16, 8, 8], strides = [1, 1, 1]} : vector<16x8x96xf32> to vector<16x8x8xf32>
    "tpu.trace_start"() <{level = 10 : i32, message = "ntd,nsd->nts"}> : () -> ()
    %cst_32 = arith.constant dense<0.000000e+00> : vector<16x8x8xf32>
    %57 = tpu.matmul %54, %55, %cst_32 {dimension_numbers = #tpu.dot_dimension_numbers<[2], [2], [1], [1], [0, 0, 0, 1, 1, 1], [0], [0]>} : vector<16x8x8xf32>, vector<16x8x8xf32>, vector<16x8x8xf32> -> vector<16x8x8xf32>
    "tpu.trace_stop"() : () -> ()
    %cst_33 = arith.constant 0.353553385 : f32
    %58 = vector.broadcast %cst_33 : f32 to vector<16x8x8xf32>
    %59 = arith.mulf %57, %58 : vector<16x8x8xf32>
    %cst_34 = arith.constant dense<0xFF800000> : vector<16x8xf32>
    %60 = vector.multi_reduction <maximumf>, %59, %cst_34 [2] : vector<16x8x8xf32> to vector<16x8xf32>
    %61 = vector.shape_cast %60 : vector<16x8xf32> to vector<16x8x1xf32>
    %62 = vector.broadcast %61 : vector<16x8x1xf32> to vector<16x8x8xf32>
    %63 = arith.subf %59, %62 : vector<16x8x8xf32>
    %64 = math.exp %63 : vector<16x8x8xf32>
    %cst_35 = arith.constant dense<0.000000e+00> : vector<16x8xf32>
    %65 = vector.multi_reduction <add>, %64, %cst_35 [2] : vector<16x8x8xf32> to vector<16x8xf32>
    %66 = vector.shape_cast %65 : vector<16x8xf32> to vector<16x8x1xf32>
    "tpu.trace_start"() <{level = 10 : i32, message = "nts,nsd->ntd"}> : () -> ()
    %cst_36 = arith.constant dense<0.000000e+00> : vector<16x8x8xf32>
    %67 = tpu.matmul %64, %56, %cst_36 {dimension_numbers = #tpu.dot_dimension_numbers<[2], [1], [1], [2], [0, 0, 0, 1, 1, 2], [0], [0]>} : vector<16x8x8xf32>, vector<16x8x8xf32>, vector<16x8x8xf32> -> vector<16x8x8xf32>
    "tpu.trace_stop"() : () -> ()
    %68 = vector.broadcast %66 : vector<16x8x1xf32> to vector<16x8x8xf32>
    %69 = arith.divf %67, %68 : vector<16x8x8xf32>
    %70 = vector.shape_cast %69 : vector<16x8x8xf32> to vector<128x8xf32>
    %c8 = arith.constant 8 : index
    %c0_37 = arith.constant 0 : index
    %71 = vector.load %arg8[%c8, %c0_37] : memref<32x32xf32, #tpu.memory_space<vmem>>, vector<8x32xf32>
    %cst_38 = arith.constant dense<0.000000e+00> : vector<128x32xf32>
    %72 = tpu.matmul %70, %71, %cst_38 {dimension_numbers = #tpu.dot_dimension_numbers<[1], [0], [0], [1], [0, 0, 1, 1], [], []>} : vector<128x8xf32>, vector<8x32xf32>, vector<128x32xf32> -> vector<128x32xf32>
    %73 = arith.addf %53, %72 : vector<128x32xf32>
    %74 = vector.extract_strided_slice %32 {offsets = [0, 0, 16], sizes = [16, 8, 8], strides = [1, 1, 1]} : vector<16x8x96xf32> to vector<16x8x8xf32>
    %75 = vector.extract_strided_slice %32 {offsets = [0, 0, 48], sizes = [16, 8, 8], strides = [1, 1, 1]} : vector<16x8x96xf32> to vector<16x8x8xf32>
    %76 = vector.extract_strided_slice %32 {offsets = [0, 0, 80], sizes = [16, 8, 8], strides = [1, 1, 1]} : vector<16x8x96xf32> to vector<16x8x8xf32>
    "tpu.trace_start"() <{level = 10 : i32, message = "ntd,nsd->nts"}> : () -> ()
    %cst_39 = arith.constant dense<0.000000e+00> : vector<16x8x8xf32>
    %77 = tpu.matmul %74, %75, %cst_39 {dimension_numbers = #tpu.dot_dimension_numbers<[2], [2], [1], [1], [0, 0, 0, 1, 1, 1], [0], [0]>} : vector<16x8x8xf32>, vector<16x8x8xf32>, vector<16x8x8xf32> -> vector<16x8x8xf32>
    "tpu.trace_stop"() : () -> ()
    %cst_40 = arith.constant 0.353553385 : f32
    %78 = vector.broadcast %cst_40 : f32 to vector<16x8x8xf32>
    %79 = arith.mulf %77, %78 : vector<16x8x8xf32>
    %cst_41 = arith.constant dense<0xFF800000> : vector<16x8xf32>
    %80 = vector.multi_reduction <maximumf>, %79, %cst_41 [2] : vector<16x8x8xf32> to vector<16x8xf32>
    %81 = vector.shape_cast %80 : vector<16x8xf32> to vector<16x8x1xf32>
    %82 = vector.broadcast %81 : vector<16x8x1xf32> to vector<16x8x8xf32>
    %83 = arith.subf %79, %82 : vector<16x8x8xf32>
    %84 = math.exp %83 : vector<16x8x8xf32>
    %cst_42 = arith.constant dense<0.000000e+00> : vector<16x8xf32>
    %85 = vector.multi_reduction <add>, %84, %cst_42 [2] : vector<16x8x8xf32> to vector<16x8xf32>
    %86 = vector.shape_cast %85 : vector<16x8xf32> to vector<16x8x1xf32>
    "tpu.trace_start"() <{level = 10 : i32, message = "nts,nsd->ntd"}> : () -> ()
    %cst_43 = arith.constant dense<0.000000e+00> : vector<16x8x8xf32>
    %87 = tpu.matmul %84, %76, %cst_43 {dimension_numbers = #tpu.dot_dimension_numbers<[2], [1], [1], [2], [0, 0, 0, 1, 1, 2], [0], [0]>} : vector<16x8x8xf32>, vector<16x8x8xf32>, vector<16x8x8xf32> -> vector<16x8x8xf32>
    "tpu.trace_stop"() : () -> ()
    %88 = vector.broadcast %86 : vector<16x8x1xf32> to vector<16x8x8xf32>
    %89 = arith.divf %87, %88 : vector<16x8x8xf32>
    %90 = vector.shape_cast %89 : vector<16x8x8xf32> to vector<128x8xf32>
    %c16 = arith.constant 16 : index
    %c0_44 = arith.constant 0 : index
    %91 = vector.load %arg8[%c16, %c0_44] : memref<32x32xf32, #tpu.memory_space<vmem>>, vector<8x32xf32>
    %cst_45 = arith.constant dense<0.000000e+00> : vector<128x32xf32>
    %92 = tpu.matmul %90, %91, %cst_45 {dimension_numbers = #tpu.dot_dimension_numbers<[1], [0], [0], [1], [0, 0, 1, 1], [], []>} : vector<128x8xf32>, vector<8x32xf32>, vector<128x32xf32> -> vector<128x32xf32>
    %93 = arith.addf %73, %92 : vector<128x32xf32>
    %94 = vector.extract_strided_slice %32 {offsets = [0, 0, 24], sizes = [16, 8, 8], strides = [1, 1, 1]} : vector<16x8x96xf32> to vector<16x8x8xf32>
    %95 = vector.extract_strided_slice %32 {offsets = [0, 0, 56], sizes = [16, 8, 8], strides = [1, 1, 1]} : vector<16x8x96xf32> to vector<16x8x8xf32>
    %96 = vector.extract_strided_slice %32 {offsets = [0, 0, 88], sizes = [16, 8, 8], strides = [1, 1, 1]} : vector<16x8x96xf32> to vector<16x8x8xf32>
    "tpu.trace_start"() <{level = 10 : i32, message = "ntd,nsd->nts"}> : () -> ()
    %cst_46 = arith.constant dense<0.000000e+00> : vector<16x8x8xf32>
    %97 = tpu.matmul %94, %95, %cst_46 {dimension_numbers = #tpu.dot_dimension_numbers<[2], [2], [1], [1], [0, 0, 0, 1, 1, 1], [0], [0]>} : vector<16x8x8xf32>, vector<16x8x8xf32>, vector<16x8x8xf32> -> vector<16x8x8xf32>
    "tpu.trace_stop"() : () -> ()
    %cst_47 = arith.constant 0.353553385 : f32
    %98 = vector.broadcast %cst_47 : f32 to vector<16x8x8xf32>
    %99 = arith.mulf %97, %98 : vector<16x8x8xf32>
    %cst_48 = arith.constant dense<0xFF800000> : vector<16x8xf32>
    %100 = vector.multi_reduction <maximumf>, %99, %cst_48 [2] : vector<16x8x8xf32> to vector<16x8xf32>
    %101 = vector.shape_cast %100 : vector<16x8xf32> to vector<16x8x1xf32>
    %102 = vector.broadcast %101 : vector<16x8x1xf32> to vector<16x8x8xf32>
    %103 = arith.subf %99, %102 : vector<16x8x8xf32>
    %104 = math.exp %103 : vector<16x8x8xf32>
    %cst_49 = arith.constant dense<0.000000e+00> : vector<16x8xf32>
    %105 = vector.multi_reduction <add>, %104, %cst_49 [2] : vector<16x8x8xf32> to vector<16x8xf32>
    %106 = vector.shape_cast %105 : vector<16x8xf32> to vector<16x8x1xf32>
    "tpu.trace_start"() <{level = 10 : i32, message = "nts,nsd->ntd"}> : () -> ()
    %cst_50 = arith.constant dense<0.000000e+00> : vector<16x8x8xf32>
    %107 = tpu.matmul %104, %96, %cst_50 {dimension_numbers = #tpu.dot_dimension_numbers<[2], [1], [1], [2], [0, 0, 0, 1, 1, 2], [0], [0]>} : vector<16x8x8xf32>, vector<16x8x8xf32>, vector<16x8x8xf32> -> vector<16x8x8xf32>
    "tpu.trace_stop"() : () -> ()
    %108 = vector.broadcast %106 : vector<16x8x1xf32> to vector<16x8x8xf32>
    %109 = arith.divf %107, %108 : vector<16x8x8xf32>
    %110 = vector.shape_cast %109 : vector<16x8x8xf32> to vector<128x8xf32>
    %c24 = arith.constant 24 : index
    %c0_51 = arith.constant 0 : index
    %111 = vector.load %arg8[%c24, %c0_51] : memref<32x32xf32, #tpu.memory_space<vmem>>, vector<8x32xf32>
    %cst_52 = arith.constant dense<0.000000e+00> : vector<128x32xf32>
    %112 = tpu.matmul %110, %111, %cst_52 {dimension_numbers = #tpu.dot_dimension_numbers<[1], [0], [0], [1], [0, 0, 1, 1], [], []>} : vector<128x8xf32>, vector<8x32xf32>, vector<128x32xf32> -> vector<128x32xf32>
    %113 = arith.addf %93, %112 : vector<128x32xf32>
    %c0_53 = arith.constant 0 : index
    %c0_54 = arith.constant 0 : index
    %114 = vector.load %arg9[%c0_53, %c0_54] : memref<1x32xf32, #tpu.memory_space<vmem>>, vector<1x32xf32>
    %115 = vector.broadcast %114 : vector<1x32xf32> to vector<128x32xf32>
    %116 = arith.addf %113, %115 : vector<128x32xf32>
    %117 = vector.shape_cast %116 : vector<128x32xf32> to vector<16x8x32xf32>
    %118 = arith.addf %117, %28 : vector<16x8x32xf32>
    %cst_55 = arith.constant dense<0.000000e+00> : vector<16x8xf32>
    %119 = vector.multi_reduction <add>, %118, %cst_55 [2] : vector<16x8x32xf32> to vector<16x8xf32>
    %120 = vector.shape_cast %119 : vector<16x8xf32> to vector<16x8x1xf32>
    %cst_56 = arith.constant 3.200000e+01 : f32
    %121 = vector.broadcast %cst_56 : f32 to vector<16x8x1xf32>
    %122 = arith.divf %120, %121 : vector<16x8x1xf32>
    %123 = vector.broadcast %122 : vector<16x8x1xf32> to vector<16x8x32xf32>
    %124 = arith.subf %118, %123 : vector<16x8x32xf32>
    %125 = arith.mulf %124, %124 : vector<16x8x32xf32>
    %cst_57 = arith.constant dense<0.000000e+00> : vector<16x8xf32>
    %126 = vector.multi_reduction <add>, %125, %cst_57 [2] : vector<16x8x32xf32> to vector<16x8xf32>
    %127 = vector.shape_cast %126 : vector<16x8xf32> to vector<16x8x1xf32>
    %cst_58 = arith.constant 3.200000e+01 : f32
    %128 = vector.broadcast %cst_58 : f32 to vector<16x8x1xf32>
    %129 = arith.divf %127, %128 : vector<16x8x1xf32>
    %130 = vector.broadcast %122 : vector<16x8x1xf32> to vector<16x8x32xf32>
    %131 = arith.subf %118, %130 : vector<16x8x32xf32>
    %cst_59 = arith.constant 9.99999974E-6 : f32
    %132 = vector.broadcast %cst_59 : f32 to vector<16x8x1xf32>
    %133 = arith.addf %129, %132 : vector<16x8x1xf32>
    %134 = math.rsqrt %133 : vector<16x8x1xf32>
    %135 = vector.broadcast %134 : vector<16x8x1xf32> to vector<16x8x32xf32>
    %136 = arith.mulf %131, %135 : vector<16x8x32xf32>
    %c0_60 = arith.constant 0 : index
    %c0_61 = arith.constant 0 : index
    %137 = vector.load %arg10[%c0_60, %c0_61] : memref<1x32xf32, #tpu.memory_space<vmem>>, vector<1x32xf32>
    %138 = vector.shape_cast %137 : vector<1x32xf32> to vector<1x1x32xf32>
    %139 = vector.broadcast %138 : vector<1x1x32xf32> to vector<16x8x32xf32>
    %140 = arith.mulf %136, %139 : vector<16x8x32xf32>
    %c0_62 = arith.constant 0 : index
    %c0_63 = arith.constant 0 : index
    %141 = vector.load %arg11[%c0_62, %c0_63] : memref<1x32xf32, #tpu.memory_space<vmem>>, vector<1x32xf32>
    %142 = vector.shape_cast %141 : vector<1x32xf32> to vector<1x1x32xf32>
    %143 = vector.broadcast %142 : vector<1x1x32xf32> to vector<16x8x32xf32>
    %144 = arith.addf %140, %143 : vector<16x8x32xf32>
    %c0_64 = arith.constant 0 : index
    %c0_65 = arith.constant 0 : index
    %c0_66 = arith.constant 0 : index
    %c0_67 = arith.constant 0 : index
    %145 = vector.load %arg12[%c0_64, %c0_65, %c0_66, %c0_67] : memref<1x16x8x32xf32, #tpu.memory_space<vmem>>, vector<1x16x8x32xf32>
    %146 = vector.shape_cast %145 : vector<1x16x8x32xf32> to vector<16x8x32xf32>
    %147 = vector.shape_cast %144 : vector<16x8x32xf32> to vector<1x16x8x32xf32>
    tpu.vector_store %arg12[%c0_64, %c0_65, %c0_66, %c0_67], %147 {strides = array<i32>} : memref<1x16x8x32xf32, #tpu.memory_space<vmem>>, vector<1x16x8x32xf32>,
    return
  }
  func.func @transform_0(%arg0: i32, %arg1: i32) -> (i32, i32, i32, i32) {
    %c0_i32 = arith.constant 0 : i32
    %c0_i32_0 = arith.constant 0 : i32
    %c0_i32_1 = arith.constant 0 : i32
    return %arg0, %arg1, %c0_i32, %c0_i32_0 : i32, i32, i32, i32
  }
  func.func @transform_1(%arg0: i32, %arg1: i32) -> (i32, i32, i32, i32) {
    %c0_i32 = arith.constant 0 : i32
    %c0_i32_0 = arith.constant 0 : i32
    %c0_i32_1 = arith.constant 0 : i32
    return %arg0, %arg1, %c0_i32, %c0_i32_0 : i32, i32, i32, i32
  }
  func.func @transform_2(%arg0: i32, %arg1: i32) -> (i32, i32, i32) {
    %c0_i32 = arith.constant 0 : i32
    %c0_i32_0 = arith.constant 0 : i32
    return %arg0, %arg1, %c0_i32 : i32, i32, i32
  }
  func.func @transform_3(%arg0: i32, %arg1: i32) -> (i32, i32) {
    %c0_i32 = arith.constant 0 : i32
    %c0_i32_0 = arith.constant 0 : i32
    %c0_i32_1 = arith.constant 0 : i32
    return %c0_i32, %c0_i32_0 : i32, i32
  }
  func.func @transform_4(%arg0: i32, %arg1: i32) -> (i32, i32, i32) {
    %c0_i32 = arith.constant 0 : i32
    %c0_i32_0 = arith.constant 0 : i32
    %c0_i32_1 = arith.constant 0 : i32
    return %arg0, %c0_i32, %c0_i32_0 : i32, i32, i32
  }
  func.func @transform_5(%arg0: i32, %arg1: i32) -> (i32, i32) {
    %c0_i32 = arith.constant 0 : i32
    %c0_i32_0 = arith.constant 0 : i32
    %c0_i32_1 = arith.constant 0 : i32
    return %c0_i32, %c0_i32_0 : i32, i32
  }
  func.func @transform_6(%arg0: i32, %arg1: i32) -> (i32, i32) {
    %c0_i32 = arith.constant 0 : i32
    %c0_i32_0 = arith.constant 0 : i32
    %c0_i32_1 = arith.constant 0 : i32
    return %c0_i32, %c0_i32_0 : i32, i32
  }
  func.func @transform_7(%arg0: i32, %arg1: i32) -> (i32, i32) {
    %c0_i32 = arith.constant 0 : i32
    %c0_i32_0 = arith.constant 0 : i32
    %c0_i32_1 = arith.constant 0 : i32
    return %c0_i32, %c0_i32_0 : i32, i32
  }
  func.func @transform_8(%arg0: i32, %arg1: i32) -> (i32, i32) {
    %c0_i32 = arith.constant 0 : i32
    %c0_i32_0 = arith.constant 0 : i32
    %c0_i32_1 = arith.constant 0 : i32
    return %c0_i32, %c0_i32_0 : i32, i32
  }
  func.func @transform_9(%arg0: i32, %arg1: i32) -> (i32, i32) {
    %c0_i32 = arith.constant 0 : i32
    %c0_i32_0 = arith.constant 0 : i32
    %c0_i32_1 = arith.constant 0 : i32
    return %c0_i32, %c0_i32_0 : i32, i32
  }
  func.func @transform_10(%arg0: i32, %arg1: i32) -> (i32, i32, i32, i32) {
    %c0_i32 = arith.constant 0 : i32
    %c0_i32_0 = arith.constant 0 : i32
    %c0_i32_1 = arith.constant 0 : i32
    return %arg0, %arg1, %c0_i32, %c0_i32_0 : i32, i32, i32, i32
  }
}

module attributes {stable_mosaic.version = 11 : i64} {
  func.func @_tail_kernel(%arg0: i32, %arg1: memref<16x8x32xf32, #tpu.memory_space<vmem>>, %arg2: memref<1x32xf32, #tpu.memory_space<vmem>>, %arg3: memref<1x1xf32, #tpu.memory_space<vmem>>, %arg4: memref<8x4xf32, #tpu.memory_space<vmem>>, %arg5: memref<1x4xf32, #tpu.memory_space<vmem>>, %arg6: memref<16x4xf32, #tpu.memory_space<vmem>>) attributes {dimension_semantics = [#tpu.dimension_semantics<parallel>], iteration_bounds = array<i64: 1>, scalar_prefetch = 0 : i64, scratch_operands = 0 : i64, tpu.core_type = #tpu.core_type<tc>, window_params = [{transform_indices = @transform_0, window_bounds = array<i64: 16, 8, 32>}, {pipeline_mode = #tpu.pipeline_mode<synchronous>, transform_indices = @transform_1, window_bounds = array<i64: 1, 32>}, {pipeline_mode = #tpu.pipeline_mode<synchronous>, transform_indices = @transform_2, window_bounds = array<i64: 1, 1>}, {pipeline_mode = #tpu.pipeline_mode<synchronous>, transform_indices = @transform_3, window_bounds = array<i64: 8, 4>}, {pipeline_mode = #tpu.pipeline_mode<synchronous>, transform_indices = @transform_4, window_bounds = array<i64: 1, 4>}, {transform_indices = @transform_5, window_bounds = array<i64: 16, 4>}]} {
    %c0 = arith.constant 0 : index
    %c0_0 = arith.constant 0 : index
    %c0_1 = arith.constant 0 : index
    %0 = vector.load %arg1[%c0, %c0_0, %c0_1] : memref<16x8x32xf32, #tpu.memory_space<vmem>>, vector<16x8x32xf32>
    %c0_2 = arith.constant 0 : index
    %c0_3 = arith.constant 0 : index
    %1 = vector.load %arg2[%c0_2, %c0_3] : memref<1x32xf32, #tpu.memory_space<vmem>>, vector<1x32xf32>
    %2 = vector.shape_cast %1 : vector<1x32xf32> to vector<1x1x32xf32>
    %3 = vector.broadcast %2 : vector<1x1x32xf32> to vector<16x8x32xf32>
    %4 = arith.mulf %0, %3 : vector<16x8x32xf32>
    %cst = arith.constant dense<0.000000e+00> : vector<16x8xf32>
    %5 = vector.multi_reduction <add>, %4, %cst [2] : vector<16x8x32xf32> to vector<16x8xf32>
    %c0_4 = arith.constant 0 : index
    %c0_5 = arith.constant 0 : index
    %6 = vector.load %arg3[%c0_4, %c0_5] : memref<1x1xf32, #tpu.memory_space<vmem>>, vector<1x1xf32>
    %7 = vector.broadcast %6 : vector<1x1xf32> to vector<16x8xf32>
    %8 = arith.addf %5, %7 : vector<16x8xf32>
    %cst_6 = arith.constant 0.000000e+00 : f32
    %9 = vector.broadcast %cst_6 : f32 to vector<16x8xf32>
    %10 = arith.maximumf %8, %9 : vector<16x8xf32>
    %c0_7 = arith.constant 0 : index
    %c0_8 = arith.constant 0 : index
    %11 = vector.load %arg4[%c0_7, %c0_8] : memref<8x4xf32, #tpu.memory_space<vmem>>, vector<8x4xf32>
    %cst_9 = arith.constant dense<0.000000e+00> : vector<16x4xf32>
    %12 = tpu.matmul %10, %11, %cst_9 {dimension_numbers = #tpu.dot_dimension_numbers<[1], [0], [0], [1], [0, 0, 1, 1], [], []>} : vector<16x8xf32>, vector<8x4xf32>, vector<16x4xf32> -> vector<16x4xf32>
    %c0_10 = arith.constant 0 : index
    %c0_11 = arith.constant 0 : index
    %13 = vector.load %arg5[%c0_10, %c0_11] : memref<1x4xf32, #tpu.memory_space<vmem>>, vector<1x4xf32>
    %14 = vector.broadcast %13 : vector<1x4xf32> to vector<16x4xf32>
    %15 = arith.addf %12, %14 : vector<16x4xf32>
    %cst_12 = arith.constant 0.000000e+00 : f32
    %16 = vector.broadcast %cst_12 : f32 to vector<16x4xf32>
    %17 = arith.maximumf %15, %16 : vector<16x4xf32>
    %c0_13 = arith.constant 0 : index
    %c0_14 = arith.constant 0 : index
    %18 = vector.load %arg6[%c0_13, %c0_14] : memref<16x4xf32, #tpu.memory_space<vmem>>, vector<16x4xf32>
    tpu.vector_store %arg6[%c0_13, %c0_14], %17 {strides = array<i32>} : memref<16x4xf32, #tpu.memory_space<vmem>>, vector<16x4xf32>,
    return
  }
  func.func @transform_0(%arg0: i32) -> (i32, i32, i32) {
    %c0_i32 = arith.constant 0 : i32
    %c0_i32_0 = arith.constant 0 : i32
    %c0_i32_1 = arith.constant 0 : i32
    return %arg0, %c0_i32, %c0_i32_0 : i32, i32, i32
  }
  func.func @transform_1(%arg0: i32) -> (i32, i32) {
    %c0_i32 = arith.constant 0 : i32
    %c0_i32_0 = arith.constant 0 : i32
    %c0_i32_1 = arith.constant 0 : i32
    return %c0_i32, %c0_i32_0 : i32, i32
  }
  func.func @transform_2(%arg0: i32) -> (i32, i32) {
    %c0_i32 = arith.constant 0 : i32
    %c0_i32_0 = arith.constant 0 : i32
    %c0_i32_1 = arith.constant 0 : i32
    return %c0_i32, %c0_i32_0 : i32, i32
  }
  func.func @transform_3(%arg0: i32) -> (i32, i32) {
    %c0_i32 = arith.constant 0 : i32
    %c0_i32_0 = arith.constant 0 : i32
    %c0_i32_1 = arith.constant 0 : i32
    return %c0_i32, %c0_i32_0 : i32, i32
  }
  func.func @transform_4(%arg0: i32) -> (i32, i32) {
    %c0_i32 = arith.constant 0 : i32
    %c0_i32_0 = arith.constant 0 : i32
    %c0_i32_1 = arith.constant 0 : i32
    return %c0_i32, %c0_i32_0 : i32, i32
  }
  func.func @transform_5(%arg0: i32) -> (i32, i32) {
    %c0_i32 = arith.constant 0 : i32
    %c0_i32_0 = arith.constant 0 : i32
    return %arg0, %c0_i32 : i32, i32
  }
}

</mosaic_0001>

<bundles_post_ra>
// kernel: sthg_former.10
= control target key start
LH: loop header
LB: loop body
LE: loop exit
PB: predicated region body
PF: predicated region fallthrough
CT: control target
= control target key end

     0   :  { %s454_s12 = smov 0   ;;  %s534_s0 = inlined_call_operand.vmem [shape: f32[256,2], index: 0, kind: input, shape index: {}]   ;;  %s535_s1 = inlined_call_operand.vmem [shape: f32[2,32], index: 1, kind: input, shape index: {}]   ;;  %s536_s2 = inlined_call_operand.vmem [shape: f32[1,32], index: 2, kind: input, shape index: {}]   ;;  %s537_s3 = inlined_call_operand.vmem [shape: f32[256,32], index: 3, kind: output, shape index: {}]  }
   0x1 LB: > { %s386_s13 = sadd.s32 4294967295, %s432_s12   ;;  %p390_p0 = scmp.ge.s32.totalorder %s432_s12, 1  ;;  %s432_s12 = sphi %s454_s12, %s13_s12  }
   0x2   : > { %p138_p1 = scmp.lt.s32.totalorder %s432_s12, 3 }
   0x4   : > { %p139_p2 = pnand %p390_p0, %p138_p1 }
   0x5   : > { %s391_s16 = sshll.u32 (!%p139_p2), %s386_s13, 4 }
   0x6   : > { %142 = sbr.rel (%p139_p2) target bundleno = 175 (0xaf), region = 32  ;;  %p163_p3 = scmp.lt.s32.totalorder (!%p139_p2), %s391_s16, 31 }
   0xb   : > { %v190_v0 = vld [vmem:[%s535_s1] sm:$0x3]  ;;  %vm244_vm0 = vcmask 1041408   ;;  %s539_s16 = smov (!%p163_p3, %s391_s16), 31  ;;  %vm195_vm1 = vcmask 15360   ;;  %vm313_vm2 = vcmask 261120  }
   0xc   : > { %415 = vmatpush.msk.msra.mxu2 %vm244_vm0, %v190_v0  ;;  %416 = vmatpush.msk.msra.mxu3 %vm244_vm0, %v190_v0  ;;  %s392_s17 = sshll.u32 %s539_s16, 3  ;;  %v425_v17 = vld [vmem:[%s536_s2] ss:$0 sm:$0xff] }
   0xd   : > { %395 = vmatpush.msk.msra.mxu0 %vm244_vm0, %v190_v0  ;;  %414 = vmatpush.msk.msra.mxu1 %vm244_vm0, %v190_v0  ;;  %s166_s20 = scalar_lea.vmem %s534_s0, %s392_s17  ;;  %s497_s25 = scalar_lea.vmem %s537_s3, %s392_s17 }
   0xe   : > { %v182_v1 = vld [vmem:[%s166_s20 + $0x40] sm:$0xff]  ;;  %v183_v5 = vld [vmem:[%s166_s20 + $0x48] sm:$0xff]  ;;  %v184_v9 = vld [vmem:[%s166_s20 + $0x50] sm:$0xff] }
   0xf   : > { %v186_v2 = vld [vmem:[%s166_s20 + $0x60] sm:$0xff]  ;;  %404 = vmatmul.msk.f32.vlgmr.msra.gmra.mxu2 %vm195_vm1, %v182_v1  ;;  %v187_v6 = vld [vmem:[%s166_s20 + $0x68] sm:$0xff]  ;;  %v188_v10 = vld [vmem:[%s166_s20 + $0x70] sm:$0xff] }
  0x10   : > { %v174_v3 = vld [vmem:[%s166_s20] sm:$0xff]  ;;  %408 = vmatmul.msk.f32.vlgmr.msra.gmra.mxu3 %vm195_vm1, %v186_v2  ;;  %v175_v7 = vld [vmem:[%s166_s20 + $0x8] sm:$0xff]  ;;  %v176_v11 = vld [vmem:[%s166_s20 + $0x10] sm:$0xff] }
  0x11   : > { %v178_v4 = vld [vmem:[%s166_s20 + $0x20] sm:$0xff]  ;;  %396 = vmatmul.msk.f32.vlgmr.msra.gmra.mxu0 %vm195_vm1, %v174_v3  ;;  %v179_v8 = vld [vmem:[%s166_s20 + $0x28] sm:$0xff]  ;;  %v180_v12 = vld [vmem:[%s166_s20 + $0x30] sm:$0xff] }
  0x12   : > { %400 = vmatmul.msk.f32.vlgmr.msra.gmra.mxu1 %vm195_vm1, %v178_v4  ;;  %v185_v13 = vld [vmem:[%s166_s20 + $0x58] sm:$0xff] }
  0x13   : > { %v189_v14 = vld [vmem:[%s166_s20 + $0x78] sm:$0xff] }
  0x14   : > { %v177_v15 = vld [vmem:[%s166_s20 + $0x18] sm:$0xff] }
  0x15   : > { %v181_v16 = vld [vmem:[%s166_s20 + $0x38] sm:$0xff] }
  0x17   : > { %405 = vmatmul.msk.f32.gmra.mxu2 %vm195_vm1, %v183_v5 }
  0x18   : > { %409 = vmatmul.msk.f32.gmra.mxu3 %vm195_vm1, %v187_v6 }
  0x19   : > { %397 = vmatmul.msk.f32.gmra.mxu0 %vm195_vm1, %v175_v7 }
  0x1a   : > { %401 = vmatmul.msk.f32.gmra.mxu1 %vm195_vm1, %v179_v8 }
  0x1f   : > { %406 = vmatmul.msk.f32.gmra.mxu2 %vm195_vm1, %v184_v9 }
  0x20   : > { %410 = vmatmul.msk.f32.gmra.mxu3 %vm195_vm1, %v188_v10 }
  0x21   : > { %398 = vmatmul.msk.f32.gmra.mxu0 %vm195_vm1, %v176_v11 }
  0x22   : > { %402 = vmatmul.msk.f32.gmra.mxu1 %vm195_vm1, %v180_v12 }
  0x27   : > { %407 = vmatmul.msk.f32.gmra.mxu2 %vm195_vm1, %v185_v13 }
  0x28   : > { %411 = vmatmul.msk.f32.gmra.mxu3 %vm195_vm1, %v189_v14 }
  0x29   : > { %399 = vmatmul.msk.f32.gmra.mxu0 %vm195_vm1, %v177_v15 }
  0x2a   : > { %403 = vmatmul.msk.f32.gmra.mxu1 %vm195_vm1, %v181_v16 }
  0x8e   : > { %v265_v18 = vpop.f32.mrf.mxu0 }
  0x8f   : > { %v277_v19 = vpop.f32.mrf.mxu1  ;;  %v266_v20 = vadd.f32 %v425_v17, %v265_v18 }
  0x90   : > { %v278_v21 = vadd.f32 %v425_v17, %v277_v19 }
  0x91   : > { %314 = vst.msk [vmem:[%s497_s25] sm:$0xff] %vm313_vm2, %v266_v20 }
  0x92   : > { %318 = vst.msk [vmem:[%s497_s25 + $0x20] sm:$0xff] %vm313_vm2, %v278_v21  ;;  %v289_v22 = vpop.f32.mrf.mxu2 }
  0x93   : > { %v301_v23 = vpop.f32.mrf.mxu3  ;;  %v290_v24 = vadd.f32 %v425_v17, %v289_v22 }
  0x94   : > { %v302_v25 = vadd.f32 %v425_v17, %v301_v23 }
  0x95   : > { %322 = vst.msk [vmem:[%s497_s25 + $0x40] sm:$0xff] %vm313_vm2, %v290_v24 }
  0x96   : > { %v268_v26 = vpop.f32.mrf.mxu0  ;;  %326 = vst.msk [vmem:[%s497_s25 + $0x60] sm:$0xff] %vm313_vm2, %v302_v25 }
  0x97   : > { %v280_v27 = vpop.f32.mrf.mxu1  ;;  %v269_v28 = vadd.f32 %v425_v17, %v268_v26 }
  0x98   : > { %v281_v29 = vadd.f32 %v425_v17, %v280_v27 }
  0x99   : > { %315 = vst.msk [vmem:[%s497_s25 + $0x8] sm:$0xff] %vm313_vm2, %v269_v28 }
  0x9a   : > { %319 = vst.msk [vmem:[%s497_s25 + $0x28] sm:$0xff] %vm313_vm2, %v281_v29  ;;  %v292_v30 = vpop.f32.mrf.mxu2 }
  0x9b   : > { %v304_v31 = vpop.f32.mrf.mxu3  ;;  %v293_v32 = vadd.f32 %v425_v17, %v292_v30 }
  0x9c   : > { %v305_v33 = vadd.f32 %v425_v17, %v304_v31 }
  0x9d   : > { %323 = vst.msk [vmem:[%s497_s25 + $0x48] sm:$0xff] %vm313_vm2, %v293_v32 }
  0x9e   : > { %v271_v34 = vpop.f32.mrf.mxu0  ;;  %327 = vst.msk [vmem:[%s497_s25 + $0x68] sm:$0xff] %vm313_vm2, %v305_v33 }
  0x9f   : > { %v283_v35 = vpop.f32.mrf.mxu1  ;;  %v272_v36 = vadd.f32 %v425_v17, %v271_v34 }
  0xa0   : > { %v284_v37 = vadd.f32 %v425_v17, %v283_v35 }
  0xa1   : > { %316 = vst.msk [vmem:[%s497_s25 + $0x10] sm:$0xff] %vm313_vm2, %v272_v36 }
  0xa2   : > { %320 = vst.msk [vmem:[%s497_s25 + $0x30] sm:$0xff] %vm313_vm2, %v284_v37  ;;  %v295_v38 = vpop.f32.mrf.mxu2 }
  0xa3   : > { %v307_v39 = vpop.f32.mrf.mxu3  ;;  %v296_v40 = vadd.f32 %v425_v17, %v295_v38 }
  0xa4   : > { %v308_v41 = vadd.f32 %v425_v17, %v307_v39 }
  0xa5   : > { %324 = vst.msk [vmem:[%s497_s25 + $0x50] sm:$0xff] %vm313_vm2, %v296_v40 }
  0xa6   : > { %v274_v42 = vpop.f32.mrf.mxu0  ;;  %328 = vst.msk [vmem:[%s497_s25 + $0x70] sm:$0xff] %vm313_vm2, %v308_v41 }
  0xa7   : > { %v286_v43 = vpop.f32.mrf.mxu1  ;;  %v275_v44 = vadd.f32 %v425_v17, %v274_v42 }
  0xa8   : > { %v287_v45 = vadd.f32 %v425_v17, %v286_v43 }
  0xa9   : > { %317 = vst.msk [vmem:[%s497_s25 + $0x18] sm:$0xff] %vm313_vm2, %v275_v44 }
  0xaa   : > { %321 = vst.msk [vmem:[%s497_s25 + $0x38] sm:$0xff] %vm313_vm2, %v287_v45  ;;  %v298_v46 = vpop.f32.mrf.mxu2 }
  0xab   : > { %v310_v47 = vpop.f32.mrf.mxu3  ;;  %v299_v48 = vadd.f32 %v425_v17, %v298_v46 }
  0xac   : > { %v311_v49 = vadd.f32 %v425_v17, %v310_v47 }
  0xad   : > { %325 = vst.msk [vmem:[%s497_s25 + $0x58] sm:$0xff] %vm313_vm2, %v299_v48 }
  0xae   : > { %329 = vst.msk [vmem:[%s497_s25 + $0x78] sm:$0xff] %vm313_vm2, %v311_v49 }
  0xaf PF: > { %s13_s12 = sadd.s32 1, %s432_s12  }
  0xb0   : > { %p10_p4 = scmp.ge.s32.totalorder %s13_s12, 4  }
  0xb2   :  { %12 = sbr.rel (!%p10_p4) target bundleno = 1 (0x1), region = 62 }

// kernel: sthg_former.11
= control target key start
LH: loop header
LB: loop body
LE: loop exit
PB: predicated region body
PF: predicated region fallthrough
CT: control target
= control target key end

     0   :  { %s1314_s27 = smov 0   ;;  %s1503_s0 = inlined_call_operand.vmem [shape: f32[16,16,32], index: 0, kind: input, shape index: {}]   ;;  %s1504_s1 = inlined_call_operand.vmem [shape: f32[16,32], index: 1, kind: input, shape index: {}]   ;;  %s1505_s2 = inlined_call_operand.vmem [shape: f32[4,16,16], index: 2, kind: input, shape index: {}]   ;;  %s1506_s3 = inlined_call_operand.vmem [shape: f32[32,96], index: 3, kind: input, shape index: {}]   ;;  %s1507_s4 = inlined_call_operand.vmem [shape: f32[32,32], index: 4, kind: input, shape index: {}]   ;;  %s1508_s5 = inlined_call_operand.vmem [shape: f32[1,32], index: 5, kind: input, shape index: {}]   ;;  %s1509_s6 = inlined_call_operand.vmem [shape: f32[1,32], index: 6, kind: input, shape index: {}]   ;;  %s1510_s7 = inlined_call_operand.vmem [shape: f32[1,32], index: 7, kind: input, shape index: {}]   ;;  %s1511_s8 = inlined_call_operand.vmem [shape: f32[16,16,32], index: 8, kind: output, shape index: {}]  }
   0x1 LB: > { %s1113_s28 = sadd.s32 4294967295, %s1255_s27   ;;  %p1117_p0 = scmp.ge.s32.totalorder %s1255_s27, 1  ;;  %s1255_s27 = sphi %s1314_s27, %s18_s27  }
   0x2   : > { %p262_p1 = scmp.lt.s32.totalorder %s1255_s27, 17 }
   0x4   : > { %p263_p2 = pnand %p1117_p0, %p262_p1 }
   0x5   : > { %p296_p3 = scmp.lt.s32.totalorder (!%p263_p2), %s1113_s28, 15  ;;  %s1257_s23 = smov (!%p263_p2), 96  }
   0x6   : > { %266 = sbr.rel (%p263_p2) target bundleno = 1518 (0x5ee), region = 52  ;;  %s1258_s24 = smov (!%p263_p2), 64  }
   0x7   : > { %s1259_s25 = smov (!%p263_p2), 120   ;;  %s1260_s26 = smov (!%p263_p2), 72  }
   0x8   : > { %s1261_s13 = smov (!%p263_p2), 88   ;;  %s1262_s14 = smov (!%p263_p2), 80  }
   0x9   : > { %s1263_s16 = smov (!%p263_p2), 112   ;;  %s1264_s17 = smov (!%p263_p2), 104  }
   0xa   : > { %s1265_s18 = smov (!%p263_p2), 56   ;;  %s1266_s29 = smov (!%p263_p2), 40  }
   0xb   : > { %v315_v0 = vld [vmem:[%s1506_s3 + $0x18] sm:$0xff]  ;;  %v314_v1 = vld [vmem:[%s1506_s3 + $0x10] sm:$0xff]  ;;  %v313_v2 = vld [vmem:[%s1506_s3 + $0x8] sm:$0xff]  ;;  %s1513_s28 = smov (!%p296_p3, %s1113_s28), 15  ;;  %vm316_vm0 = vcmask 261120   ;;  %vm352_vm1 = vcmask 64512  }
   0xc   : > { %335 = vmatpush.msra.mxu0 %v315_v0  ;;  %v312_v3 = vld [vmem:[%s1506_s3] sm:$0xff]  ;;  %s1164_s15 = sshll.u32 %s1513_s28, 4  ;;  %v309_v8 = vld [vmem:[%s1504_s1 + $0x8] sm:$0xff]  ;;  %vm390_vm2 = vcmask 130048   ;;  %s1267_s12 = smov 48  }
   0xd   : > { %v308_v4 = vld [vmem:[%s1504_s1] sm:$0xff]  ;;  %s300_s20 = scalar_lea.vmem %s1503_s0, %s1164_s15  ;;  %v387_v26 = vld [vmem:[%s1505_s2 + $0x8] sm:$0xff]  ;;  %s305_s30 = scalar_lea.vmem %s1511_s8, %s1164_s15 }
   0xe   : > { %336 = vmatpush.msra.mxu0 %v314_v1  ;;  %v306_v5 = vld [vmem:[%s300_s20] sm:$0xff]  ;;  %v307_v7 = vld [vmem:[%s300_s20 + $0x8] sm:$0xff] }
   0xf   : > { %v1345_v6 = vadd.f32 %v308_v4, %v306_v5  ;;  %v1352_v9 = vadd.f32 %v309_v8, %v307_v7  ;;  %v474_v17 = vld [vmem:[%s1507_s4] sm:$0xff] }
  0x10   : > { %337 = vmatpush.msra.mxu0 %v313_v2  ;;  %v386_v21 = vld [vmem:[%s1505_s2] sm:$0xff] }
  0x12   : > { %338 = vmatpush.msra.mxu0 %v312_v3 }
  0x13   : > { %1122 = vmatmul.msk.f32.vlgmr.msra.gmra.mxu0 %vm316_vm0, %v1345_v6 }
  0x1b   : > { %1123 = vmatmul.msk.f32.gmra.mxu0 %vm316_vm0, %v1352_v9 }
  0x90   : > { %v1356_v10 = vpop.f32.mrf.mxu0 }
  0x98   : > { %v1358_v11 = vpop.f32.mrf.mxu0 }
  0x99   : > { %350 = vrot.lane.b32.xlu0 %v1358_v11, %s1257_s23  ;;  %v1363_v12 = vpack.i.bf16 %v1356_v10, %v1358_v11 }
  0x9b   : > { %1189 = vrot.lane.b32.xlu2 %v1363_v12, %s1258_s24 }
  0xa1   : > { %348 = vrot.lane.b32.xlu0 %v1356_v10, %s1257_s23 }
  0xa3   : > { %477 = vrot.lane.b32.xlu2 %v1358_v11, %s1259_s25 }
  0xa9   : > { %830 = vrot.lane.b32.xlu0 %v1358_v11, %s1260_s26 }
  0xf5   : > { %v1190_v13 = vpop.permute.xlu2 %1189 }
  0xf6   : > { %v1191_v14 = vunpack.i.l.bf16 %v1190_v13  ;;  %v1192_v15 = vunpack.i.h.bf16 %v1190_v13 }
  0xf8   : > { %435 = vmatpush.msrb.mxu0 %v1191_v14  ;;  %1166 = vmatpush.msra.mxu2 %v1191_v14 }
  0xfa   : > { %436 = vmatpush.msrb.mxu0 %v1192_v15  ;;  %1167 = vmatpush.msra.mxu2 %v1192_v15 }
  0xfd   : > { %v478_v43 = vpop.permute.xlu2 %477 }
 0x10b   : > { %v351_v16 = vpop.permute.xlu0 %350 }
 0x10c   : > { %1124 = vmatpush.xpose.msk.msra.mxu1 %vm352_vm1, %v351_v16 }
 0x113   : > { %v349_v18 = vpop.permute.xlu0 %348 }
 0x114   : > { %1125 = vmatpush.xpose.msk.msra.mxu1 %vm352_vm1, %v349_v18 }
 0x117   : > { %1126 = vmatmul.msk.f32.vlgmr.msra.gmra.mxu1 %vm352_vm1, %v1356_v10 }
 0x118   : > { %655 = vmatpush.msrb.mxu1 %v474_v17 }
 0x11b   : > { %v831_v19 = vpop.permute.xlu0 %830 }
 0x11c   : > { %1152 = vmatpush.xpose.msk.msra.mxu1 %vm352_vm1, %v831_v19 }
 0x11f   : > { %1127 = vmatmul.msk.f32.gmra.mxu1 %vm352_vm1, %v1358_v11 }
 0x194   : > { %v378_v20 = vpop.f32.mrf.mxu1 }
 0x195   : > { %v384_v22 = vmul.f32 0.35355338, %v378_v20  ;;  %v1134_v20 = vld [vmem:[%s1505_s2 + $0x10] sm:$0xff] }
 0x197   : > { %v388_v23 = vadd.f32 %v386_v21, %v384_v22 }
 0x199   : > { %v391_v24 = vsel %vm390_vm2, %v388_v23, -inf }
 0x19a   : > { %392 = vmax.xlane.f32.xlu1 %v391_v24 }
 0x19c   : > { %v381_v25 = vpop.f32.mrf.mxu1 }
 0x19d   : > { %v385_v27 = vmul.f32 0.35355338, %v381_v25  ;;  %v1135_v25 = vld [vmem:[%s1505_s2 + $0x18] sm:$0xff] }
 0x19f   : > { %v389_v28 = vadd.f32 %v387_v26, %v385_v27 }
 0x1a1   : > { %v394_v29 = vsel %vm390_vm2, %v389_v28, -inf }
 0x1a2   : > { %395 = vmax.xlane.f32.xlu1 %v394_v29 }
 0x1bb   : > { %481 = vrot.lane.b32.xlu1 %v1358_v11, %s1261_s13 }
 0x1c3   : > { %479 = vrot.lane.b32.xlu1 %v1356_v10, %s1261_s13 }
 0x1cb   : > { %475 = vrot.lane.b32.xlu1 %v1356_v10, %s1259_s25 }
 0x1d3   : > { %669 = vrot.lane.b32.xlu1 %v1358_v11, %s1262_s14 }
 0x1db   : > { %667 = vrot.lane.b32.xlu1 %v1356_v10, %s1262_s14 }
 0x1e3   : > { %828 = vrot.lane.b32.xlu1 %v1356_v10, %s1260_s26 }
 0x1eb   : > { %665 = vrot.lane.b32.xlu1 %v1358_v11, %s1263_s16 }
 0x20d   : > { %v393_v30 = vpop.xlane.xlu1 %392 }
 0x20e   : > { %v397_v31 = vsub.f32 %v388_v23, %v393_v30  ;;  %v1146_v30 = vld [vmem:[%s1505_s2 + $0x20] sm:$0xff] }
 0x210   : > { %v399_v32 = vmul.f32 1.442695, %v397_v31 }
 0x212   : > { %1211 = vpow2.f32 %v399_v32 }
 0x215   : > { %v396_v33 = vpop.xlane.xlu1 %395 }
 0x216   : > { %v398_v34 = vsub.f32 %v389_v28, %v396_v33 }
 0x218   : > { %v1212_v35 = vpop.eup %1211  ;;  %v401_v36 = vmul.f32 1.442695, %v398_v34 }
 0x219   : > { %1128 = vmatmul.msk.f32.vlgmr.msrb.gmra.mxu0 %vm390_vm2, %v1212_v35  ;;  %v403_v37 = vsel %vm390_vm2, %v1212_v35, 0.0 }
 0x21a   : > { %1213 = vpow2.f32 %v401_v36  ;;  %404 = vadd.xlane.f32.xlu2 %v403_v37  ;;  %v1156_v37 = vld [vmem:[%s1505_s2 + $0x30] sm:$0xff] }
 0x220   : > { %v1214_v38 = vpop.eup %1213 }
 0x221   : > { %1129 = vmatmul.msk.f32.vlgmr.msra.gmra.mxu2 %vm390_vm2, %v1214_v38  ;;  %v406_v39 = vsel %vm390_vm2, %v1214_v38, 0.0 }
 0x222   : > { %407 = vadd.xlane.f32.xlu0 %v406_v39 }
 0x22d   : > { %v482_v40 = vpop.permute.xlu1 %481 }
 0x22e   : > { %1130 = vmatpush.xpose.msk.msra.mxu3 %vm352_vm1, %v482_v40 }
 0x232   : > { %663 = vrot.lane.b32.xlu2 %v1356_v10, %s1263_s16 }
 0x235   : > { %v480_v41 = vpop.permute.xlu1 %479 }
 0x236   : > { %824 = vrot.lane.b32.xlu0 %v1356_v10, %s1264_s17  ;;  %1131 = vmatpush.xpose.msk.msra.mxu3 %vm352_vm1, %v480_v41 }
 0x23a   : > { %826 = vrot.lane.b32.xlu2 %v1358_v11, %s1264_s17 }
 0x23d   : > { %v476_v42 = vpop.permute.xlu1 %475 }
 0x23e   : > { %1132 = vmatmul.msk.f32.vlgmr.msra.gmra.mxu3 %vm352_vm1, %v476_v42 }
 0x242   : > { %1194 = vrot.lane.b32.xlu2 %v1363_v12, %s1265_s18 }
 0x245   : > { %v670_v44 = vpop.permute.xlu1 %669 }
 0x246   : > { %1133 = vmatmul.msk.f32.gmra.mxu3 %vm352_vm1, %v478_v43  ;;  %v1147_v43 = vld [vmem:[%s1505_s2 + $0x28] sm:$0xff] }
 0x247   : > { %1142 = vmatpush.xpose.msk.msrb.mxu3 %vm352_vm1, %v670_v44 }
 0x24d   : > { %v668_v45 = vpop.permute.xlu1 %667 }
 0x24e   : > { %1143 = vmatpush.xpose.msk.msrb.mxu3 %vm352_vm1, %v668_v45  ;;  %v1157_v45 = vld [vmem:[%s1505_s2 + $0x38] sm:$0xff] }
 0x255   : > { %v829_v46 = vpop.permute.xlu1 %828 }
 0x256   : > { %1153 = vmatpush.xpose.msk.msra.mxu1 %vm352_vm1, %v829_v46 }
 0x25d   : > { %v666_v59 = vpop.permute.xlu1 %665 }
 0x28d   : > { %v405_v47 = vpop.xlane.xlu2 %404 }
 0x28e   : > { %1215 = vrcp.f32 %v405_v47  ;;  %v455_v53 = vand.u32 2147483648, %v405_v47  ;;  %v453_v55 = vand.u32 2147483647, %v405_v47  ;;  %vm449_vm4 = vweird.f32 %v405_v47 }
 0x290   : > { %v456_v58 = vor.u32 1.1754944e-38, %v455_v53  ;;  %vm454_vm6 = vcmp.eq.f32.partialorder %v453_v55, 8.507059e+37 }
 0x294   : > { %v1216_v48 = vpop.eup %1215 }
 0x295   : > { %v445_v49 = vmul.f32 %v1216_v48, %v405_v47  ;;  %v664_v50 = vpop.permute.xlu2 %663  ;;  %v408_v51 = vpop.xlane.xlu0 %407  ;;  %vm450_vm3 = vweird.f32 %v1216_v48 }
 0x296   : > { %1217 = vrcp.f32 %v408_v51  ;;  %1144 = vmatmul.msk.f32.vlgmr.msrb.gmra.mxu3 %vm352_vm1, %v664_v50  ;;  %vm451_vm5 = vmor %vm449_vm4, %vm450_vm3  ;;  %v438_v63 = vpop.f32.mrf.mxu0  ;;  %v470_v3 = vand.u32 2147483648, %v408_v51  ;;  %v468_v5 = vand.u32 2147483647, %v408_v51  ;;  %vm464_vm8 = vweird.f32 %v408_v51 }
 0x297   : > { %v446_v52 = vsub.f32 1.0, %v445_v49 }
 0x298   : > { %v471_v8 = vor.u32 1.1754944e-38, %v470_v3  ;;  %vm469_vm10 = vcmp.eq.f32.partialorder %v468_v5, 8.507059e+37 }
 0x299   : > { %v447_v54 = vmul.f32 %v1216_v48, %v446_v52 }
 0x29b   : > { %v448_v56 = vadd.f32 %v1216_v48, %v447_v54 }
 0x29c   : > { %v1218_v57 = vpop.eup %1217 }
 0x29d   : > { %v460_v60 = vmul.f32 %v1218_v57, %v408_v51  ;;  %v452_v61 = vsel %vm451_vm5, %v1216_v48, %v448_v56  ;;  %v827_v62 = vpop.permute.xlu2 %826  ;;  %vm465_vm7 = vweird.f32 %v1218_v57 }
 0x29e   : > { %v457_v0 = vsel %vm454_vm6, %v456_v58, %v452_v61  ;;  %1145 = vmatmul.msk.f32.gmra.mxu3 %vm352_vm1, %v666_v59  ;;  %vm466_vm9 = vmor %vm464_vm8, %vm465_vm7 }
 0x29f   : > { %v461_v1 = vsub.f32 1.0, %v460_v60  ;;  %v458_v2 = vmul.f32 %v457_v0, %v438_v63 }
 0x2a1   : > { %1140 = vmatmul.msk.f32.vlgmr.msrb.gmra.mxu1 %vm352_vm1, %v458_v2  ;;  %v462_v4 = vmul.f32 %v1218_v57, %v461_v1 }
 0x2a3   : > { %v463_v7 = vadd.f32 %v1218_v57, %v462_v4 }
 0x2a4   : > { %v441_v13 = vpop.f32.mrf.mxu2 }
 0x2a5   : > { %v467_v10 = vsel %vm466_vm9, %v1218_v57, %v463_v7  ;;  %v1195_v11 = vpop.permute.xlu2 %1194 }
 0x2a6   : > { %v472_v14 = vsel %vm469_vm10, %v471_v8, %v467_v10  ;;  %v1196_v15 = vunpack.i.l.bf16 %v1195_v11  ;;  %v1197_v17 = vunpack.i.h.bf16 %v1195_v11 }
 0x2a7   : > { %v473_v16 = vmul.f32 %v472_v14, %v441_v13 }
 0x2a8   : > { %565 = vmatpush.msrb.mxu2 %v1196_v15  ;;  %v825_v18 = vpop.permute.xlu0 %824 }
 0x2a9   : > { %1141 = vmatmul.msk.f32.gmra.mxu1 %vm352_vm1, %v473_v16 }
 0x2aa   : > { %566 = vmatpush.msrb.mxu2 %v1197_v17 }
 0x2b1   : > { %1154 = vmatmul.msk.f32.vlgmr.msra.gmra.mxu1 %vm352_vm1, %v825_v18 }
 0x2b9   : > { %1155 = vmatmul.msk.f32.gmra.mxu1 %vm352_vm1, %v827_v62 }
 0x2c1   : > { %v508_v19 = vpop.f32.mrf.mxu3 }
 0x2c2   : > { %v514_v21 = vmul.f32 0.35355338, %v508_v19 }
 0x2c4   : > { %v519_v22 = vadd.f32 %v1134_v20, %v514_v21 }
 0x2c6   : > { %v521_v23 = vsel %vm390_vm2, %v519_v22, -inf }
 0x2c7   : > { %522 = vmax.xlane.f32.xlu0 %v521_v23 }
 0x2c9   : > { %v511_v24 = vpop.f32.mrf.mxu3 }
 0x2ca   : > { %v515_v26 = vmul.f32 0.35355338, %v511_v24 }
 0x2cc   : > { %v520_v27 = vadd.f32 %v1135_v25, %v515_v26 }
 0x2ce   : > { %v524_v28 = vsel %vm390_vm2, %v520_v27, -inf }
 0x2cf   : > { %525 = vmax.xlane.f32.xlu1 %v524_v28 }
 0x319   : > { %v696_v29 = vpop.f32.mrf.mxu3 }
 0x31a   : > { %v702_v31 = vmul.f32 0.35355338, %v696_v29 }
 0x31c   : > { %v707_v32 = vadd.f32 %v1146_v30, %v702_v31 }
 0x31e   : > { %v1430_v33 = vpop.f32.mrf.mxu1  ;;  %v709_v34 = vsel %vm390_vm2, %v707_v32, -inf }
 0x31f   : > { %710 = vmax.xlane.f32.xlu0 %v709_v34 }
 0x321   : > { %v699_v39 = vpop.f32.mrf.mxu3 }
 0x322   : > { %v703_v41 = vmul.f32 0.35355338, %v699_v39 }
 0x324   : > { %v708_v47 = vadd.f32 %v1147_v43, %v703_v41 }
 0x326   : > { %v1433_v35 = vpop.f32.mrf.mxu1  ;;  %v712_v51 = vsel %vm390_vm2, %v708_v47, -inf }
 0x32e   : > { %v857_v36 = vpop.f32.mrf.mxu1 }
 0x32f   : > { %v863_v38 = vmul.f32 0.35355338, %v857_v36 }
 0x331   : > { %v868_v40 = vadd.f32 %v1156_v37, %v863_v38 }
 0x333   : > { %1199 = vrot.lane.b32.xlu0 %v1363_v12, %s1266_s29  ;;  %v870_v42 = vsel %vm390_vm2, %v868_v40, -inf }
 0x334   : > { %871 = vmax.xlane.f32.xlu2 %v870_v42 }
 0x336   : > { %v860_v44 = vpop.f32.mrf.mxu1 }
 0x337   : > { %v864_v46 = vmul.f32 0.35355338, %v860_v44 }
 0x339   : > { %v869_v48 = vadd.f32 %v1157_v45, %v864_v46 }
 0x33a   : > { %v523_v49 = vpop.xlane.xlu0 %522 }
 0x33b   : > { %v527_v50 = vsub.f32 %v519_v22, %v523_v49  ;;  %v873_v52 = vsel %vm390_vm2, %v869_v48, -inf }
 0x33c   : > { %713 = vmax.xlane.f32.xlu2 %v712_v51  ;;  %874 = vmax.xlane.f32.xlu1 %v873_v52 }
 0x33d   : > { %v529_v53 = vmul.f32 1.442695, %v527_v50 }
 0x33f   : > { %1219 = vpow2.f32 %v529_v53 }
 0x342   : > { %v526_v54 = vpop.xlane.xlu1 %525 }
 0x343   : > { %v528_v55 = vsub.f32 %v520_v27, %v526_v54  ;;  %v953_v54 = vld [vmem:[%s1507_s4 + $0x18] sm:$0xff] }
 0x345   : > { %v1220_v56 = vpop.eup %1219  ;;  %v531_v57 = vmul.f32 1.442695, %v528_v55 }
 0x346   : > { %1136 = vmatmul.msk.f32.vlgmr.msrb.gmra.mxu2 %vm390_vm2, %v1220_v56  ;;  %v533_v58 = vsel %vm390_vm2, %v1220_v56, 0.0 }
 0x347   : > { %1221 = vpow2.f32 %v531_v57  ;;  %534 = vadd.xlane.f32.xlu2 %v533_v58 }
 0x34d   : > { %v1222_v59 = vpop.eup %1221 }
 0x34e   : > { %1137 = vmatmul.msk.f32.gmra.mxu2 %vm390_vm2, %v1222_v59  ;;  %v536_v60 = vsel %vm390_vm2, %v1222_v59, 0.0 }
 0x34f   : > { %537 = vadd.xlane.f32.xlu2 %v536_v60 }
 0x355   : > { %1204 = vrot.lane.b32.xlu1 %v1363_v12, %s1267_s12  ;;  %v604_v12 = vld [vmem:[%s1507_s4 + $0x8] sm:$0xff] }
 0x356   : > { %626 = vmatpush.msra.mxu0 %v604_v12 }
 0x392   : > { %v711_v61 = vpop.xlane.xlu0 %710 }
 0x393   : > { %v715_v62 = vsub.f32 %v707_v32, %v711_v61  ;;  %v792_v61 = vld [vmem:[%s1507_s4 + $0x10] sm:$0xff] }
 0x394   : > { %814 = vmatpush.msrb.mxu0 %v792_v61 }
 0x395   : > { %v717_v63 = vmul.f32 1.442695, %v715_v62 }
 0x397   : > { %1223 = vpow2.f32 %v717_v63 }
 0x39d   : > { %v1224_v0 = vpop.eup %1223 }
 0x39e   : > { %v721_v1 = vsel %vm390_vm2, %v1224_v0, 0.0 }
 0x39f   : > { %722 = vadd.xlane.f32.xlu2 %v721_v1 }
 0x3a5   : > { %v1200_v2 = vpop.permute.xlu0 %1199 }
 0x3a6   : > { %v1201_v3 = vunpack.i.l.bf16 %v1200_v2  ;;  %v1202_v5 = vunpack.i.h.bf16 %v1200_v2 }
 0x3a7   : > { %v872_v4 = vpop.xlane.xlu2 %871 }
 0x3a8   : > { %v876_v7 = vsub.f32 %v868_v40, %v872_v4  ;;  %914 = vmatpush.msra.mxu3 %v1201_v3 }
 0x3aa   : > { %v878_v8 = vmul.f32 1.442695, %v876_v7  ;;  %915 = vmatpush.msra.mxu3 %v1202_v5 }
 0x3ac   : > { %1225 = vpow2.f32 %v878_v8 }
 0x3af   : > { %v714_v10 = vpop.xlane.xlu2 %713  ;;  %v875_v11 = vpop.xlane.xlu1 %874 }
 0x3b0   : > { %v716_v13 = vsub.f32 %v708_v47, %v714_v10  ;;  %v877_v14 = vsub.f32 %v869_v48, %v875_v11 }
 0x3b2   : > { %v1226_v15 = vpop.eup %1225  ;;  %v719_v16 = vmul.f32 1.442695, %v716_v13  ;;  %v880_v17 = vmul.f32 1.442695, %v877_v14 }
 0x3b3   : > { %1158 = vmatmul.msk.f32.vlgmr.msra.gmra.mxu3 %vm390_vm2, %v1226_v15  ;;  %v882_v18 = vsel %vm390_vm2, %v1226_v15, 0.0 }
 0x3b4   : > { %1227 = vpow2.f32 %v719_v16  ;;  %883 = vadd.xlane.f32.xlu0 %v882_v18 }
 0x3b5   : > { %1229 = vpow2.f32 %v880_v17 }
 0x3ba   : > { %v1228_v19 = vpop.eup %1227  ;;  %v535_v20 = vpop.xlane.xlu2 %534 }
 0x3bb   : > { %v1230_v21 = vpop.eup %1229  ;;  %1231 = vrcp.f32 %v535_v20  ;;  %v724_v22 = vsel %vm390_vm2, %v1228_v19, 0.0  ;;  %v585_v28 = vand.u32 2147483648, %v535_v20  ;;  %v583_v30 = vand.u32 2147483647, %v535_v20 }
 0x3bc   : > { %1159 = vmatmul.msk.f32.gmra.mxu3 %vm390_vm2, %v1230_v21  ;;  %v885_v23 = vsel %vm390_vm2, %v1230_v21, 0.0  ;;  %725 = vadd.xlane.f32.xlu2 %v724_v22  ;;  %vm579_vm12 = vweird.f32 %v535_v20 }
 0x3bd   : > { %886 = vadd.xlane.f32.xlu1 %v885_v23  ;;  %v586_v38 = vor.u32 1.1754944e-38, %v585_v28  ;;  %vm584_vm14 = vcmp.eq.f32.partialorder %v583_v30, 8.507059e+37 }
 0x3c1   : > { %v1232_v24 = vpop.eup %1231 }
 0x3c2   : > { %v575_v25 = vmul.f32 %v1232_v24, %v535_v20  ;;  %v538_v26 = vpop.xlane.xlu2 %537  ;;  %vm580_vm11 = vweird.f32 %v1232_v24 }
 0x3c3   : > { %1233 = vrcp.f32 %v538_v26  ;;  %vm581_vm13 = vmor %vm579_vm12, %vm580_vm11  ;;  %v600_v45 = vand.u32 2147483648, %v538_v26  ;;  %v598_v47 = vand.u32 2147483647, %v538_v26  ;;  %vm594_vm3 = vweird.f32 %v538_v26 }
 0x3c4   : > { %v576_v27 = vsub.f32 1.0, %v575_v25 }
 0x3c5   : > { %v601_v49 = vor.u32 1.1754944e-38, %v600_v45  ;;  %vm599_vm5 = vcmp.eq.f32.partialorder %v598_v47, 8.507059e+37 }
 0x3c6   : > { %v577_v29 = vmul.f32 %v1232_v24, %v576_v27 }
 0x3c7   : > { %v1205_v31 = vpop.permute.xlu1 %1204 }
 0x3c8   : > { %v1206_v32 = vunpack.i.l.bf16 %v1205_v31  ;;  %v578_v34 = vadd.f32 %v1232_v24, %v577_v29  ;;  %v1207_v40 = vunpack.i.h.bf16 %v1205_v31 }
 0x3c9   : > { %v1234_v36 = vpop.eup %1233  ;;  %v568_v37 = vpop.f32.mrf.mxu2 }
 0x3ca   : > { %v590_v39 = vmul.f32 %v1234_v36, %v538_v26  ;;  %v582_v41 = vsel %vm581_vm13, %v1232_v24, %v578_v34  ;;  %753 = vmatpush.msra.mxu2 %v1206_v32  ;;  %vm595_vm15 = vweird.f32 %v1234_v36 }
 0x3cb   : > { %v587_v42 = vsel %vm584_vm14, %v586_v38, %v582_v41  ;;  %vm596_vm4 = vmor %vm594_vm3, %vm595_vm15 }
 0x3cc   : > { %v591_v43 = vsub.f32 1.0, %v590_v39  ;;  %v588_v44 = vmul.f32 %v587_v42, %v568_v37  ;;  %754 = vmatpush.msra.mxu2 %v1207_v40 }
 0x3cd   : > { %1148 = vmatmul.msk.f32.vlgmr.msra.gmra.mxu2 %vm390_vm2, %v1224_v0 }
 0x3ce   : > { %1138 = vmatmul.msk.f32.vlgmr.msra.gmra.mxu0 %vm352_vm1, %v588_v44  ;;  %v592_v46 = vmul.f32 %v1234_v36, %v591_v43  ;;  %975 = vmatpush.msrb.mxu2 %v953_v54  ;;  %v1208_v54 = vld [vmem:[%s1508_s5] ss:$0 sm:$0xff] }
 0x3d0   : > { %v593_v48 = vadd.f32 %v1234_v36, %v592_v46 }
 0x3d1   : > { %v571_v51 = vpop.f32.mrf.mxu2 }
 0x3d2   : > { %v597_v50 = vsel %vm596_vm4, %v1234_v36, %v593_v48 }
 0x3d3   : > { %v602_v52 = vsel %vm599_vm5, %v601_v49, %v597_v50 }
 0x3d4   : > { %v603_v53 = vmul.f32 %v602_v52, %v571_v51 }
 0x3d5   : > { %1149 = vmatmul.msk.f32.gmra.mxu2 %vm390_vm2, %v1228_v19 }
 0x3d6   : > { %1139 = vmatmul.msk.f32.gmra.mxu0 %vm352_vm1, %v603_v53 }
 0x412   : > { %v723_v59 = vpop.xlane.xlu2 %722 }
 0x413   : > { %v773_v30 = vand.u32 2147483648, %v723_v59  ;;  %vm767_vm14 = vweird.f32 %v723_v59  ;;  %v771_v31 = vand.u32 2147483647, %v723_v59 }
 0x415   : > { %v774_v36 = vor.u32 1.1754944e-38, %v773_v30  ;;  %vm772_vm3 = vcmp.eq.f32.partialorder %v771_v31, 8.507059e+37 }
 0x427   : > { %v884_v55 = vpop.xlane.xlu0 %883 }
 0x428   : > { %1235 = vrcp.f32 %v884_v55  ;;  %v934_v62 = vand.u32 2147483648, %v884_v55  ;;  %v932_v0 = vand.u32 2147483647, %v884_v55  ;;  %vm928_vm6 = vweird.f32 %v884_v55 }
 0x42a   : > { %v935_v2 = vor.u32 1.1754944e-38, %v934_v62  ;;  %vm933_vm8 = vcmp.eq.f32.partialorder %v932_v0, 8.507059e+37 }
 0x42e   : > { %v1236_v56 = vpop.eup %1235 }
 0x42f   : > { %v924_v57 = vmul.f32 %v1236_v56, %v884_v55  ;;  %vm929_vm2 = vweird.f32 %v1236_v56  ;;  %v726_v12 = vpop.xlane.xlu2 %725 }
 0x430   : > { %v887_v58 = vpop.xlane.xlu1 %886  ;;  %vm930_vm7 = vmor %vm928_vm6, %vm929_vm2  ;;  %v788_v41 = vand.u32 2147483648, %v726_v12  ;;  %vm782_vm5 = vweird.f32 %v726_v12  ;;  %v786_v42 = vand.u32 2147483647, %v726_v12 }
 0x431   : > { %v925_v60 = vsub.f32 1.0, %v924_v57  ;;  %1237 = vrcp.f32 %v887_v58  ;;  %v949_v14 = vand.u32 2147483648, %v887_v58  ;;  %v947_v16 = vand.u32 2147483647, %v887_v58 }
 0x432   : > { %1239 = vrcp.f32 %v723_v59  ;;  %vm943_vm10 = vweird.f32 %v887_v58  ;;  %v789_v44 = vor.u32 1.1754944e-38, %v788_v41  ;;  %vm787_vm6 = vcmp.eq.f32.partialorder %v786_v42, 8.507059e+37 }
 0x433   : > { %v926_v63 = vmul.f32 %v1236_v56, %v925_v60  ;;  %1241 = vrcp.f32 %v726_v12  ;;  %v950_v19 = vor.u32 1.1754944e-38, %v949_v14  ;;  %vm948_vm12 = vcmp.eq.f32.partialorder %v947_v16, 8.507059e+37 }
 0x435   : > { %v927_v1 = vadd.f32 %v1236_v56, %v926_v63 }
 0x436   : > { %v917_v4 = vpop.f32.mrf.mxu3 }
 0x437   : > { %v1238_v3 = vpop.eup %1237  ;;  %v931_v5 = vsel %vm930_vm7, %v1236_v56, %v927_v1 }
 0x438   : > { %v939_v7 = vmul.f32 %v1238_v3, %v887_v58  ;;  %v936_v8 = vsel %vm933_vm8, %v935_v2, %v931_v5  ;;  %v1240_v11 = vpop.eup %1239  ;;  %vm944_vm9 = vweird.f32 %v1238_v3  ;;  %v1268_v2 = vmov 32.0  }
 0x439   : > { %v937_v10 = vmul.f32 %v936_v8, %v917_v4  ;;  %v763_v17 = vmul.f32 %v1240_v11, %v723_v59  ;;  %vm945_vm11 = vmor %vm943_vm10, %vm944_vm9  ;;  %v1242_v24 = vpop.eup %1241  ;;  %vm768_vm13 = vweird.f32 %v1240_v11  ;;  %1243 = vrcp.f32 %v1268_v2 }
 0x43a   : > { %v940_v13 = vsub.f32 1.0, %v939_v7  ;;  %v778_v26 = vmul.f32 %v1242_v24, %v726_v12  ;;  %vm769_vm15 = vmor %vm767_vm14, %vm768_vm13  ;;  %vm783_vm4 = vweird.f32 %v1242_v24 }
 0x43b   : > { %1160 = vmatmul.msk.f32.vlgmr.msrb.gmra.mxu2 %vm352_vm1, %v937_v10  ;;  %v764_v21 = vsub.f32 1.0, %v763_v17  ;;  %vm784_vm2 = vmor %vm782_vm5, %vm783_vm4 }
 0x43c   : > { %v941_v15 = vmul.f32 %v1238_v3, %v940_v13  ;;  %v779_v28 = vsub.f32 1.0, %v778_v26 }
 0x43d   : > { %v765_v27 = vmul.f32 %v1240_v11, %v764_v21 }
 0x43e   : > { %v942_v18 = vadd.f32 %v1238_v3, %v941_v15  ;;  %v780_v34 = vmul.f32 %v1242_v24, %v779_v28 }
 0x43f   : > { %v920_v22 = vpop.f32.mrf.mxu3  ;;  %v766_v29 = vadd.f32 %v1240_v11, %v765_v27 }
 0x440   : > { %v946_v20 = vsel %vm945_vm11, %v1238_v3, %v942_v18  ;;  %v781_v40 = vadd.f32 %v1242_v24, %v780_v34  ;;  %v1244_v3 = vpop.eup %1243 }
 0x441   : > { %v951_v23 = vsel %vm948_vm12, %v950_v19, %v946_v20  ;;  %v770_v32 = vsel %vm769_vm15, %v1240_v11, %v766_v29  ;;  %v1000_v4 = vmul.f32 32.0, %v1244_v3 }
 0x442   : > { %v952_v25 = vmul.f32 %v951_v23, %v920_v22  ;;  %v775_v38 = vsel %vm772_vm3, %v774_v36, %v770_v32  ;;  %v785_v43 = vsel %vm784_vm2, %v1242_v24, %v781_v40  ;;  %v1209_v32 = vld [vmem:[%s1509_s6] ss:$0 sm:$0xff] }
 0x443   : > { %v790_v46 = vsel %vm787_vm6, %v789_v44, %v785_v43 }
 0x444   : > { %1161 = vmatmul.msk.f32.gmra.mxu2 %vm352_vm1, %v952_v25 }
 0x44b   : > { %v628_v48 = vpop.f32.mrf.mxu0 }
 0x44c   : > { %v658_v50 = vadd.f32 %v1430_v33, %v628_v48 }
 0x450   : > { %v756_v37 = vpop.f32.mrf.mxu2 }
 0x451   : > { %v776_v39 = vmul.f32 %v775_v38, %v756_v37  ;;  %v1210_v37 = vld [vmem:[%s1510_s7] ss:$0 sm:$0xff] }
 0x453   : > { %1150 = vmatmul.msk.f32.vlgmr.msrb.gmra.mxu0 %vm352_vm1, %v776_v39  ;;  %v631_v49 = vpop.f32.mrf.mxu0 }
 0x454   : > { %v661_v57 = vadd.f32 %v1433_v35, %v631_v49  ;;  %v1001_v35 = vsub.f32 1.0, %v1000_v4 }
 0x456   : > { %v1002_v5 = vmul.f32 %v1244_v3, %v1001_v35 }
 0x458   : > { %v759_v45 = vpop.f32.mrf.mxu2 }
 0x459   : > { %v791_v47 = vmul.f32 %v790_v46, %v759_v45 }
 0x45b   : > { %1151 = vmatmul.msk.f32.gmra.mxu0 %vm352_vm1, %v791_v47  ;;  %vm1004_vm1 = vweird.f32 %v1244_v3 }
 0x4be   : > { %v977_v51 = vpop.f32.mrf.mxu2 }
 0x4c7   : > { %v980_v62 = vpop.f32.mrf.mxu2 }
 0x4d0   : > { %v816_v52 = vpop.f32.mrf.mxu0 }
 0x4d1   : > { %v822_v53 = vadd.f32 %v816_v52, %v658_v50 }
 0x4d3   : > { %v983_v55 = vadd.f32 %v977_v51, %v822_v53 }
 0x4d5   : > { %v989_v56 = vadd.f32 %v1208_v54, %v983_v55 }
 0x4d7   : > { %v991_v58 = vadd.f32 %v989_v56, %v1345_v6  ;;  %v1003_v6 = vadd.f32 %v1244_v3, %v1002_v5 }
 0x4d8   : > { %v819_v59 = vpop.f32.mrf.mxu0 }
 0x4d9   : > { %v823_v60 = vadd.f32 %v819_v59, %v661_v57  ;;  %v993_v61 = vsel %vm316_vm0, %v991_v58, 0.0  ;;  %v1005_v7 = vsel %vm1004_vm1, %v1244_v3, %v1003_v6 }
 0x4da   : > { %994 = vadd.xlane.f32.xlu2 %v993_v61 }
 0x4db   : > { %v984_v33 = vadd.f32 %v980_v62, %v823_v60 }
 0x4dd   : > { %v990_v63 = vadd.f32 %v1208_v54, %v984_v33 }
 0x4df   : > { %v992_v0 = vadd.f32 %v990_v63, %v1352_v9 }
 0x4e1   : > { %v996_v1 = vsel %vm316_vm0, %v992_v0, 0.0 }
 0x4e2   : > { %997 = vadd.xlane.f32.xlu2 %v996_v1 }
 0x54d   : > { %v995_v8 = vpop.xlane.xlu2 %994 }
 0x54e   : > { %v1006_v12 = vmul.f32 %v1005_v7, %v995_v8 }
 0x550   : > { %v1008_v10 = vsub.f32 %v991_v58, %v1006_v12 }
 0x552   : > { %v1010_v11 = vmul.f32 %v1008_v10, %v1008_v10 }
 0x554   : > { %v1012_v13 = vsel %vm316_vm0, %v1010_v11, 0.0 }
 0x555   : > { %1013 = vadd.xlane.f32.xlu2 %v1012_v13  ;;  %v998_v9 = vpop.xlane.xlu2 %997 }
 0x556   : > { %v1007_v14 = vmul.f32 %v1005_v7, %v998_v9 }
 0x558   : > { %v1009_v15 = vsub.f32 %v992_v0, %v1007_v14 }
 0x55a   : > { %v1011_v16 = vmul.f32 %v1009_v15, %v1009_v15 }
 0x55c   : > { %v1015_v17 = vsel %vm316_vm0, %v1011_v16, 0.0 }
 0x55d   : > { %1016 = vadd.xlane.f32.xlu0 %v1015_v17 }
 0x5c8   : > { %v1014_v18 = vpop.xlane.xlu2 %1013 }
 0x5c9   : > { %v1018_v19 = vmul.f32 %v1014_v18, %v1005_v7 }
 0x5cb   : > { %v1020_v20 = vadd.f32 1e-05, %v1018_v19 }
 0x5cd   : > { %1245 = vrsqrt.f32 %v1020_v20  ;;  %vm1028_vm8 = vweird.f32 %v1020_v20 }
 0x5d0   : > { %v1017_v21 = vpop.xlane.xlu0 %1016 }
 0x5d1   : > { %v1019_v22 = vmul.f32 %v1017_v21, %v1005_v7 }
 0x5d3   : > { %v1246_v23 = vpop.eup %1245  ;;  %v1021_v24 = vadd.f32 1e-05, %v1019_v22 }
 0x5d4   : > { %v1023_v25 = vmul.f32 %v1246_v23, %v1020_v20  ;;  %vm1029_vm7 = vweird.f32 %v1246_v23 }
 0x5d5   : > { %1247 = vrsqrt.f32 %v1021_v24  ;;  %vm1030_vm9 = vmor %vm1028_vm8, %vm1029_vm7  ;;  %vm1038_vm11 = vweird.f32 %v1021_v24 }
 0x5d6   : > { %v1024_v26 = vmul.f32 %v1246_v23, %v1023_v25 }
 0x5d8   : > { %v1025_v27 = vmul.f32 0.5, %v1024_v26 }
 0x5da   : > { %v1026_v28 = vsub.f32 1.5, %v1025_v27 }
 0x5db   : > { %v1248_v29 = vpop.eup %1247 }
 0x5dc   : > { %v1027_v30 = vmul.f32 %v1246_v23, %v1026_v28  ;;  %v1033_v31 = vmul.f32 %v1248_v29, %v1021_v24  ;;  %vm1039_vm10 = vweird.f32 %v1248_v29 }
 0x5dd   : > { %vm1040_vm12 = vmor %vm1038_vm11, %vm1039_vm10 }
 0x5de   : > { %v1031_v34 = vsel %vm1030_vm9, %v1246_v23, %v1027_v30  ;;  %v1034_v36 = vmul.f32 %v1248_v29, %v1033_v31 }
 0x5df   : > { %v1042_v38 = vmul.f32 %v1031_v34, %v1008_v10 }
 0x5e0   : > { %v1035_v39 = vmul.f32 0.5, %v1034_v36 }
 0x5e1   : > { %v1048_v40 = vmul.f32 %v1209_v32, %v1042_v38 }
 0x5e2   : > { %v1036_v41 = vsub.f32 1.5, %v1035_v39 }
 0x5e3   : > { %v1054_v42 = vadd.f32 %v1210_v37, %v1048_v40 }
 0x5e4   : > { %v1037_v43 = vmul.f32 %v1248_v29, %v1036_v41 }
 0x5e5   : > { %1056 = vst.msk [vmem:[%s305_s30] sm:$0xff] %vm316_vm0, %v1054_v42 }
 0x5e6   : > { %v1041_v44 = vsel %vm1040_vm12, %v1248_v29, %v1037_v43 }
 0x5e7   : > { %v1043_v45 = vmul.f32 %v1041_v44, %v1009_v15 }
 0x5e9   : > { %v1049_v46 = vmul.f32 %v1209_v32, %v1043_v45 }
 0x5eb   : > { %v1055_v47 = vadd.f32 %v1210_v37, %v1049_v46 }
 0x5ed   : > { %1057 = vst.msk [vmem:[%s305_s30 + $0x8] sm:$0xff] %vm316_vm0, %v1055_v47 }
 0x5ee PF: > { %s18_s27 = sadd.s32 1, %s1255_s27  }
 0x5ef   : > { %p15_p4 = scmp.ge.s32.totalorder %s18_s27, 18  }
 0x5f1   :  { %17 = sbr.rel (!%p15_p4) target bundleno = 1 (0x1), region = 85 }

// kernel: sthg_former.12
= control target key start
LH: loop header
LB: loop body
LE: loop exit
PB: predicated region body
PF: predicated region fallthrough
CT: control target
= control target key end

     0   :  { %s1200_s24 = smov 0   ;;  %s1702_s0 = inlined_call_operand.vmem [shape: f32[256,32], index: 0, kind: input, shape index: {}]   ;;  %s1703_s1 = inlined_call_operand.vmem [shape: f32[32,64], index: 1, kind: input, shape index: {}]   ;;  %s1704_s2 = inlined_call_operand.vmem [shape: f32[1,64], index: 2, kind: input, shape index: {}]   ;;  %s1705_s3 = inlined_call_operand.vmem [shape: f32[64,32], index: 3, kind: input, shape index: {}]   ;;  %s1706_s4 = inlined_call_operand.vmem [shape: f32[1,32], index: 4, kind: input, shape index: {}]   ;;  %s1707_s5 = inlined_call_operand.vmem [shape: f32[1,32], index: 5, kind: input, shape index: {}]   ;;  %s1708_s6 = inlined_call_operand.vmem [shape: f32[1,32], index: 6, kind: input, shape index: {}]   ;;  %s1709_s7 = inlined_call_operand.vmem [shape: f32[256,32], index: 7, kind: output, shape index: {}]  }
   0x1 LB: > { %s1049_s25 = sadd.s32 4294967295, %s1157_s24   ;;  %p1053_p0 = scmp.ge.s32.totalorder %s1157_s24, 1  ;;  %s1157_s24 = sphi %s1200_s24, %s17_s24  }
   0x2   : > { %p238_p1 = scmp.lt.s32.totalorder %s1157_s24, 3 }
   0x4   : > { %p239_p2 = pnand %p1053_p0, %p238_p1 }
   0x5   : > { %s1054_s30 = sshll.u32 (!%p239_p2), %s1049_s25, 4 }
   0x6   : > { %242 = sbr.rel (%p239_p2) target bundleno = 674 (0x2a2), region = 48  ;;  %p271_p3 = scmp.lt.s32.totalorder (!%p239_p2), %s1054_s30, 31 }
   0xb   : > { %v301_v0 = vld [vmem:[%s1703_s1 + $0x18] sm:$0xff]  ;;  %v300_v1 = vld [vmem:[%s1703_s1 + $0x10] sm:$0xff]  ;;  %v299_v2 = vld [vmem:[%s1703_s1 + $0x8] sm:$0xff]  ;;  %s1711_s30 = smov (!%p271_p3, %s1054_s30), 31  ;;  %vm306_vm0 = vcmask 261120   ;;  %vm448_vm1 = vcmask 523264  }
   0xc   : > { %367 = vmatpush.msra.mxu0 %v301_v0  ;;  %1092 = vmatpush.msra.mxu3 %v301_v0  ;;  %v298_v3 = vld [vmem:[%s1703_s1] sm:$0xff]  ;;  %s1055_s12 = sshll.u32 %s1711_s30, 3  ;;  %v443_v14 = vld [vmem:[%s1705_s3 + $0x38] sm:$0xff]  ;;  %v442_v15 = vld [vmem:[%s1705_s3 + $0x30] sm:$0xff] }
   0xd   : > { %s1228_s15 = scalar_lea.vmem %s1702_s0, %s1055_s12  ;;  %505 = vmatpush.msra.mxu1 %v443_v14  ;;  %1096 = vmatpush.msra.mxu2 %v443_v14  ;;  %v441_v16 = vld [vmem:[%s1705_s3 + $0x28] sm:$0xff]  ;;  %v440_v18 = vld [vmem:[%s1705_s3 + $0x20] sm:$0xff]  ;;  %v439_v20 = vld [vmem:[%s1705_s3 + $0x18] sm:$0xff]  ;;  %s1607_s22 = scalar_lea.vmem %s1709_s7, %s1055_s12 }
   0xe   : > { %368 = vmatpush.msra.mxu0 %v300_v1  ;;  %1093 = vmatpush.msra.mxu3 %v300_v1  ;;  %v1231_v4 = vld [vmem:[%s1228_s15] sm:$0xff]  ;;  %v1236_v5 = vld [vmem:[%s1228_s15 + $0x8] sm:$0xff]  ;;  %v1241_v6 = vld [vmem:[%s1228_s15 + $0x10] sm:$0xff] }
   0xf   : > { %v1246_v7 = vld [vmem:[%s1228_s15 + $0x18] sm:$0xff]  ;;  %v1251_v8 = vld [vmem:[%s1228_s15 + $0x20] sm:$0xff]  ;;  %v1256_v9 = vld [vmem:[%s1228_s15 + $0x48] sm:$0xff]  ;;  %506 = vmatpush.msra.mxu1 %v442_v15  ;;  %1097 = vmatpush.msra.mxu2 %v442_v15 }
  0x10   : > { %369 = vmatpush.msra.mxu0 %v299_v2  ;;  %1094 = vmatpush.msra.mxu3 %v299_v2  ;;  %v1261_v10 = vld [vmem:[%s1228_s15 + $0x28] sm:$0xff]  ;;  %v1264_v11 = vld [vmem:[%s1228_s15 + $0x50] sm:$0xff]  ;;  %v1274_v13 = vld [vmem:[%s1228_s15 + $0x58] sm:$0xff] }
  0x11   : > { %v1271_v12 = vld [vmem:[%s1228_s15 + $0x30] sm:$0xff]  ;;  %v1290_v17 = vld [vmem:[%s1228_s15 + $0x38] sm:$0xff]  ;;  %v1296_v19 = vld [vmem:[%s1228_s15 + $0x60] sm:$0xff]  ;;  %507 = vmatpush.msra.mxu1 %v441_v16  ;;  %1098 = vmatpush.msra.mxu2 %v441_v16 }
  0x12   : > { %370 = vmatpush.msra.mxu0 %v298_v3  ;;  %1095 = vmatpush.msra.mxu3 %v298_v3  ;;  %v1306_v21 = vld [vmem:[%s1228_s15 + $0x40] sm:$0xff]  ;;  %v1309_v22 = vld [vmem:[%s1228_s15 + $0x68] sm:$0xff]  ;;  %v1316_v23 = vld [vmem:[%s1228_s15 + $0x70] sm:$0xff] }
  0x13   : > { %1058 = vmatmul.msk.f32.vlgmr.msra.gmra.mxu0 %vm306_vm0, %v1231_v4  ;;  %1067 = vmatmul.msk.f32.vlgmr.msra.gmra.mxu3 %vm306_vm0, %v1256_v9  ;;  %v1321_v24 = vld [vmem:[%s1228_s15 + $0x78] sm:$0xff]  ;;  %v438_v25 = vld [vmem:[%s1705_s3 + $0x10] sm:$0xff]  ;;  %v437_v26 = vld [vmem:[%s1705_s3 + $0x8] sm:$0xff] }
  0x14   : > { %508 = vmatpush.msra.mxu1 %v440_v18  ;;  %1099 = vmatpush.msra.mxu2 %v440_v18  ;;  %v436_v27 = vld [vmem:[%s1705_s3] sm:$0xff] }
  0x15   : > { %v1337_v28 = vld [vmem:[%s1704_s2] ss:$0 sm:$0xff] }
  0x16   : > { %509 = vmatpush.msra.mxu1 %v439_v20  ;;  %1100 = vmatpush.msra.mxu2 %v439_v20 }
  0x18   : > { %510 = vmatpush.msra.mxu1 %v438_v25  ;;  %1101 = vmatpush.msra.mxu2 %v438_v25 }
  0x1a   : > { %511 = vmatpush.msra.mxu1 %v437_v26  ;;  %1102 = vmatpush.msra.mxu2 %v437_v26 }
  0x1b   : > { %1059 = vmatmul.msk.f32.gmra.mxu0 %vm306_vm0, %v1236_v5  ;;  %1068 = vmatmul.msk.f32.gmra.mxu3 %vm306_vm0, %v1264_v11 }
  0x1c   : > { %512 = vmatpush.msra.mxu1 %v436_v27  ;;  %1103 = vmatpush.msra.mxu2 %v436_v27 }
  0x23   : > { %1060 = vmatmul.msk.f32.gmra.mxu0 %vm306_vm0, %v1241_v6  ;;  %1069 = vmatmul.msk.f32.gmra.mxu3 %vm306_vm0, %v1274_v13 }
  0x2b   : > { %1061 = vmatmul.msk.f32.gmra.mxu0 %vm306_vm0, %v1246_v7  ;;  %1070 = vmatmul.msk.f32.gmra.mxu3 %vm306_vm0, %v1296_v19 }
  0x33   : > { %1062 = vmatmul.msk.f32.gmra.mxu0 %vm306_vm0, %v1251_v8  ;;  %1071 = vmatmul.msk.f32.gmra.mxu3 %vm306_vm0, %v1309_v22 }
  0x3b   : > { %1063 = vmatmul.msk.f32.gmra.mxu0 %vm306_vm0, %v1261_v10  ;;  %1072 = vmatmul.msk.f32.gmra.mxu3 %vm306_vm0, %v1316_v23 }
  0x43   : > { %1064 = vmatmul.msk.f32.gmra.mxu0 %vm306_vm0, %v1271_v12  ;;  %1073 = vmatmul.msk.f32.gmra.mxu3 %vm306_vm0, %v1321_v24 }
  0x4b   : > { %1065 = vmatmul.msk.f32.gmra.mxu0 %vm306_vm0, %v1290_v17 }
  0x53   : > { %1066 = vmatmul.msk.f32.gmra.mxu0 %vm306_vm0, %v1306_v21 }
  0x90   : > { %v372_v29 = vpop.f32.mrf.mxu0 }
  0x91   : > { %v373_v30 = vadd.f32 %v1337_v28, %v372_v29 }
  0x93   : > { %v420_v31 = vmax.f32 %v373_v30, 0.0  ;;  %v1374_v30 = vld [vmem:[%s1706_s4] ss:$0 sm:$0xff] }
  0x95   : > { %1074 = vmatmul.msk.f32.vlgmr.msra.gmra.mxu1 %vm448_vm1, %v420_v31 }
  0x96   : > { %v399_v50 = vpop.f32.mrf.mxu3 }
  0x97   : > { %v400_v58 = vadd.f32 %v1337_v28, %v399_v50 }
  0x98   : > { %v375_v32 = vpop.f32.mrf.mxu0 }
  0x99   : > { %v376_v33 = vadd.f32 %v1337_v28, %v375_v32  ;;  %v429_v59 = vmax.f32 %v400_v58, 0.0 }
  0x9b   : > { %v421_v34 = vmax.f32 %v376_v33, 0.0 }
  0x9d   : > { %1075 = vmatmul.msk.f32.gmra.mxu1 %vm448_vm1, %v421_v34 }
  0x9e   : > { %v402_v55 = vpop.f32.mrf.mxu3 }
  0x9f   : > { %v403_v61 = vadd.f32 %v1337_v28, %v402_v55 }
  0xa0   : > { %v378_v35 = vpop.f32.mrf.mxu0 }
  0xa1   : > { %v379_v36 = vadd.f32 %v1337_v28, %v378_v35  ;;  %v430_v62 = vmax.f32 %v403_v61, 0.0 }
  0xa3   : > { %v422_v37 = vmax.f32 %v379_v36, 0.0 }
  0xa5   : > { %1076 = vmatmul.msk.f32.gmra.mxu1 %vm448_vm1, %v422_v37 }
  0xa6   : > { %v405_v60 = vpop.f32.mrf.mxu3 }
  0xa7   : > { %v406_v0 = vadd.f32 %v1337_v28, %v405_v60 }
  0xa8   : > { %v381_v38 = vpop.f32.mrf.mxu0 }
  0xa9   : > { %v382_v39 = vadd.f32 %v1337_v28, %v381_v38  ;;  %v431_v1 = vmax.f32 %v406_v0, 0.0 }
  0xab   : > { %v423_v40 = vmax.f32 %v382_v39, 0.0 }
  0xad   : > { %1077 = vmatmul.msk.f32.gmra.mxu1 %vm448_vm1, %v423_v40 }
  0xae   : > { %v408_v63 = vpop.f32.mrf.mxu3 }
  0xaf   : > { %v409_v2 = vadd.f32 %v1337_v28, %v408_v63 }
  0xb0   : > { %v384_v41 = vpop.f32.mrf.mxu0 }
  0xb1   : > { %v385_v42 = vadd.f32 %v1337_v28, %v384_v41  ;;  %v432_v14 = vmax.f32 %v409_v2, 0.0  ;;  %v1159_v2 = vmov 32.0  }
  0xb2   : > { %1117 = vrcp.f32 %v1159_v2 }
  0xb3   : > { %v424_v43 = vmax.f32 %v385_v42, 0.0 }
  0xb5   : > { %1078 = vmatmul.msk.f32.gmra.mxu1 %vm448_vm1, %v424_v43 }
  0xb6   : > { %v411_v3 = vpop.f32.mrf.mxu3 }
  0xb7   : > { %v412_v15 = vadd.f32 %v1337_v28, %v411_v3 }
  0xb8   : > { %v387_v44 = vpop.f32.mrf.mxu0 }
  0xb9   : > { %v388_v45 = vadd.f32 %v1337_v28, %v387_v44  ;;  %v433_v18 = vmax.f32 %v412_v15, 0.0  ;;  %v1118_v15 = vpop.eup %1117 }
  0xba   : > { %vm631_vm2 = vweird.f32 %v1118_v15 }
  0xbb   : > { %v425_v46 = vmax.f32 %v388_v45, 0.0 }
  0xbd   : > { %1079 = vmatmul.msk.f32.gmra.mxu1 %vm448_vm1, %v425_v46 }
  0xbe   : > { %v414_v16 = vpop.f32.mrf.mxu3 }
  0xbf   : > { %v415_v20 = vadd.f32 %v1337_v28, %v414_v16 }
  0xc0   : > { %v390_v47 = vpop.f32.mrf.mxu0 }
  0xc1   : > { %v391_v48 = vadd.f32 %v1337_v28, %v390_v47  ;;  %v434_v25 = vmax.f32 %v415_v20, 0.0 }
  0xc3   : > { %v426_v49 = vmax.f32 %v391_v48, 0.0 }
  0xc5   : > { %1080 = vmatmul.msk.f32.gmra.mxu1 %vm448_vm1, %v426_v49 }
  0xc6   : > { %v417_v26 = vpop.f32.mrf.mxu3 }
  0xc7   : > { %v418_v27 = vadd.f32 %v1337_v28, %v417_v26 }
  0xc8   : > { %v393_v51 = vpop.f32.mrf.mxu0 }
  0xc9   : > { %v394_v52 = vadd.f32 %v1337_v28, %v393_v51  ;;  %v435_v29 = vmax.f32 %v418_v27, 0.0 }
  0xcb   : > { %v427_v53 = vmax.f32 %v394_v52, 0.0 }
  0xcd   : > { %1081 = vmatmul.msk.f32.gmra.mxu1 %vm448_vm1, %v427_v53 }
  0xd0   : > { %v396_v54 = vpop.f32.mrf.mxu0 }
  0xd1   : > { %v397_v56 = vadd.f32 %v1337_v28, %v396_v54 }
  0xd3   : > { %v428_v57 = vmax.f32 %v397_v56, 0.0 }
  0xd5   : > { %1082 = vmatmul.msk.f32.vlgmr.msra.gmra.mxu2 %vm448_vm1, %v428_v57 }
  0xdd   : > { %1083 = vmatmul.msk.f32.gmra.mxu2 %vm448_vm1, %v429_v59 }
  0xe5   : > { %1084 = vmatmul.msk.f32.gmra.mxu2 %vm448_vm1, %v430_v62 }
  0xed   : > { %1085 = vmatmul.msk.f32.gmra.mxu2 %vm448_vm1, %v431_v1 }
  0xf5   : > { %1086 = vmatmul.msk.f32.gmra.mxu2 %vm448_vm1, %v432_v14 }
  0xfd   : > { %1087 = vmatmul.msk.f32.gmra.mxu2 %vm448_vm1, %v433_v18  ;;  %v627_v18 = vmul.f32 32.0, %v1118_v15 }
  0xff   : > { %v628_v26 = vsub.f32 1.0, %v627_v18 }
 0x105   : > { %1088 = vmatmul.msk.f32.gmra.mxu2 %vm448_vm1, %v434_v25 }
 0x10d   : > { %1089 = vmatmul.msk.f32.gmra.mxu2 %vm448_vm1, %v435_v29  ;;  %v629_v29 = vmul.f32 %v1118_v15, %v628_v26 }
 0x112   : > { %v514_v31 = vpop.f32.mrf.mxu1 }
 0x113   : > { %v515_v32 = vadd.f32 %v1374_v30, %v514_v31 }
 0x115   : > { %v1378_v33 = vadd.f32 %v515_v32, %v1231_v4 }
 0x117   : > { %v578_v34 = vsel %vm306_vm0, %v1378_v33, 0.0 }
 0x118   : > { %579 = vadd.xlane.f32.xlu0 %v578_v34  ;;  %v630_v34 = vadd.f32 %v1118_v15, %v629_v29 }
 0x11a   : > { %v517_v35 = vpop.f32.mrf.mxu1 }
 0x11b   : > { %v518_v28 = vadd.f32 %v1374_v30, %v517_v35 }
 0x11d   : > { %v1384_v36 = vadd.f32 %v518_v28, %v1236_v5  ;;  %v1461_v28 = vsel %vm631_vm2, %v1118_v15, %v630_v34 }
 0x11f   : > { %v581_v37 = vsel %vm306_vm0, %v1384_v36, 0.0 }
 0x120   : > { %582 = vadd.xlane.f32.xlu0 %v581_v37 }
 0x122   : > { %v520_v38 = vpop.f32.mrf.mxu1 }
 0x123   : > { %v521_v39 = vadd.f32 %v1374_v30, %v520_v38 }
 0x125   : > { %v1390_v4 = vadd.f32 %v521_v39, %v1241_v6 }
 0x127   : > { %v584_v40 = vsel %vm306_vm0, %v1390_v4, 0.0 }
 0x128   : > { %585 = vadd.xlane.f32.xlu1 %v584_v40 }
 0x12a   : > { %v523_v41 = vpop.f32.mrf.mxu1 }
 0x12b   : > { %v524_v42 = vadd.f32 %v1374_v30, %v523_v41 }
 0x12d   : > { %v1396_v5 = vadd.f32 %v524_v42, %v1246_v7 }
 0x12f   : > { %v587_v43 = vsel %vm306_vm0, %v1396_v5, 0.0 }
 0x130   : > { %588 = vadd.xlane.f32.xlu1 %v587_v43 }
 0x132   : > { %v526_v44 = vpop.f32.mrf.mxu1 }
 0x133   : > { %v527_v45 = vadd.f32 %v1374_v30, %v526_v44 }
 0x135   : > { %v1402_v6 = vadd.f32 %v527_v45, %v1251_v8 }
 0x137   : > { %v590_v46 = vsel %vm306_vm0, %v1402_v6, 0.0 }
 0x138   : > { %591 = vadd.xlane.f32.xlu2 %v590_v46 }
 0x13a   : > { %v529_v47 = vpop.f32.mrf.mxu1 }
 0x13b   : > { %v530_v48 = vadd.f32 %v1374_v30, %v529_v47 }
 0x13d   : > { %v1408_v7 = vadd.f32 %v530_v48, %v1261_v10 }
 0x13f   : > { %v593_v49 = vsel %vm306_vm0, %v1408_v7, 0.0 }
 0x140   : > { %594 = vadd.xlane.f32.xlu2 %v593_v49 }
 0x142   : > { %v532_v50 = vpop.f32.mrf.mxu1 }
 0x143   : > { %v533_v51 = vadd.f32 %v1374_v30, %v532_v50 }
 0x145   : > { %v1414_v8 = vadd.f32 %v533_v51, %v1271_v12 }
 0x147   : > { %v596_v52 = vsel %vm306_vm0, %v1414_v8, 0.0 }
 0x148   : > { %597 = vadd.xlane.f32.xlu0 %v596_v52 }
 0x14a   : > { %v535_v53 = vpop.f32.mrf.mxu1 }
 0x14b   : > { %v536_v54 = vadd.f32 %v1374_v30, %v535_v53 }
 0x14d   : > { %v1420_v10 = vadd.f32 %v536_v54, %v1290_v17 }
 0x14f   : > { %v599_v55 = vsel %vm306_vm0, %v1420_v10, 0.0 }
 0x150   : > { %600 = vadd.xlane.f32.xlu1 %v599_v55 }
 0x158   : > { %v538_v56 = vpop.f32.mrf.mxu2 }
 0x159   : > { %v539_v57 = vadd.f32 %v1374_v30, %v538_v56 }
 0x15b   : > { %v1426_v12 = vadd.f32 %v539_v57, %v1306_v21 }
 0x15d   : > { %v602_v58 = vsel %vm306_vm0, %v1426_v12, 0.0 }
 0x15e   : > { %603 = vadd.xlane.f32.xlu2 %v602_v58 }
 0x160   : > { %v541_v59 = vpop.f32.mrf.mxu2 }
 0x161   : > { %v542_v60 = vadd.f32 %v1374_v30, %v541_v59 }
 0x163   : > { %v1432_v17 = vadd.f32 %v542_v60, %v1256_v9 }
 0x165   : > { %v605_v61 = vsel %vm306_vm0, %v1432_v17, 0.0 }
 0x166   : > { %606 = vadd.xlane.f32.xlu0 %v605_v61 }
 0x168   : > { %v544_v62 = vpop.f32.mrf.mxu2 }
 0x169   : > { %v545_v63 = vadd.f32 %v1374_v30, %v544_v62 }
 0x16b   : > { %v1438_v21 = vadd.f32 %v545_v63, %v1264_v11 }
 0x16d   : > { %v608_v0 = vsel %vm306_vm0, %v1438_v21, 0.0 }
 0x16e   : > { %609 = vadd.xlane.f32.xlu1 %v608_v0 }
 0x170   : > { %v547_v1 = vpop.f32.mrf.mxu2 }
 0x171   : > { %v548_v9 = vadd.f32 %v1374_v30, %v547_v1 }
 0x173   : > { %v1444_v3 = vadd.f32 %v548_v9, %v1274_v13 }
 0x175   : > { %v611_v14 = vsel %vm306_vm0, %v1444_v3, 0.0 }
 0x176   : > { %612 = vadd.xlane.f32.xlu2 %v611_v14 }
 0x178   : > { %v550_v16 = vpop.f32.mrf.mxu2 }
 0x179   : > { %v551_v11 = vadd.f32 %v1374_v30, %v550_v16 }
 0x17b   : > { %v1450_v20 = vadd.f32 %v551_v11, %v1296_v19 }
 0x17d   : > { %v614_v25 = vsel %vm306_vm0, %v1450_v20, 0.0 }
 0x17e   : > { %615 = vadd.xlane.f32.xlu0 %v614_v25 }
 0x180   : > { %v553_v27 = vpop.f32.mrf.mxu2 }
 0x181   : > { %v554_v13 = vadd.f32 %v1374_v30, %v553_v27 }
 0x183   : > { %v1456_v31 = vadd.f32 %v554_v13, %v1309_v22 }
 0x185   : > { %v617_v32 = vsel %vm306_vm0, %v1456_v31, 0.0 }
 0x186   : > { %618 = vadd.xlane.f32.xlu1 %v617_v32 }
 0x188   : > { %v556_v19 = vpop.f32.mrf.mxu2 }
 0x189   : > { %v557_v35 = vadd.f32 %v1374_v30, %v556_v19 }
 0x18b   : > { %v580_v37 = vpop.xlane.xlu0 %579  ;;  %v1464_v38 = vadd.f32 %v557_v35, %v1316_v23 }
 0x18c   : > { %v633_v39 = vmul.f32 %v1461_v28, %v580_v37 }
 0x18d   : > { %v620_v22 = vsel %vm306_vm0, %v1464_v38, 0.0 }
 0x18e   : > { %v1470_v40 = vsub.f32 %v1378_v33, %v633_v39  ;;  %621 = vadd.xlane.f32.xlu2 %v620_v22 }
 0x190   : > { %v559_v41 = vpop.f32.mrf.mxu2  ;;  %v665_v42 = vmul.f32 %v1470_v40, %v1470_v40 }
 0x191   : > { %v560_v43 = vadd.f32 %v1374_v30, %v559_v41 }
 0x192   : > { %v681_v44 = vsel %vm306_vm0, %v665_v42, 0.0 }
 0x193   : > { %682 = vadd.xlane.f32.xlu1 %v681_v44  ;;  %v583_v23 = vpop.xlane.xlu0 %582  ;;  %v1477_v45 = vadd.f32 %v560_v43, %v1321_v24 }
 0x194   : > { %v634_v46 = vmul.f32 %v1461_v28, %v583_v23 }
 0x195   : > { %v623_v33 = vsel %vm306_vm0, %v1477_v45, 0.0 }
 0x196   : > { %v1483_v47 = vsub.f32 %v1384_v36, %v634_v46  ;;  %624 = vadd.xlane.f32.xlu0 %v623_v33 }
 0x198   : > { %v666_v48 = vmul.f32 %v1483_v47, %v1483_v47 }
 0x19a   : > { %v684_v30 = vsel %vm306_vm0, %v666_v48, 0.0 }
 0x19b   : > { %v586_v49 = vpop.xlane.xlu1 %585  ;;  %685 = vadd.xlane.f32.xlu2 %v684_v30 }
 0x19c   : > { %v635_v50 = vmul.f32 %v1461_v28, %v586_v49 }
 0x19e   : > { %v1490_v24 = vsub.f32 %v1390_v4, %v635_v50 }
 0x1a0   : > { %v667_v51 = vmul.f32 %v1490_v24, %v1490_v24 }
 0x1a2   : > { %v687_v52 = vsel %vm306_vm0, %v667_v51, 0.0 }
 0x1a3   : > { %v589_v36 = vpop.xlane.xlu1 %588  ;;  %688 = vadd.xlane.f32.xlu0 %v687_v52 }
 0x1a4   : > { %v636_v53 = vmul.f32 %v1461_v28, %v589_v36 }
 0x1a6   : > { %v1497_v54 = vsub.f32 %v1396_v5, %v636_v53 }
 0x1a8   : > { %v668_v55 = vmul.f32 %v1497_v54, %v1497_v54 }
 0x1aa   : > { %v690_v56 = vsel %vm306_vm0, %v668_v55, 0.0 }
 0x1ab   : > { %v592_v57 = vpop.xlane.xlu2 %591  ;;  %691 = vadd.xlane.f32.xlu1 %v690_v56 }
 0x1ac   : > { %v637_v4 = vmul.f32 %v1461_v28, %v592_v57 }
 0x1ae   : > { %v1504_v58 = vsub.f32 %v1402_v6, %v637_v4 }
 0x1b0   : > { %v669_v59 = vmul.f32 %v1504_v58, %v1504_v58 }
 0x1b2   : > { %v693_v60 = vsel %vm306_vm0, %v669_v59, 0.0 }
 0x1b3   : > { %v595_v61 = vpop.xlane.xlu2 %594  ;;  %694 = vadd.xlane.f32.xlu2 %v693_v60 }
 0x1b4   : > { %v638_v5 = vmul.f32 %v1461_v28, %v595_v61 }
 0x1b6   : > { %v1511_v62 = vsub.f32 %v1408_v7, %v638_v5 }
 0x1b8   : > { %v670_v63 = vmul.f32 %v1511_v62, %v1511_v62 }
 0x1ba   : > { %v696_v0 = vsel %vm306_vm0, %v670_v63, 0.0 }
 0x1bb   : > { %697 = vadd.xlane.f32.xlu0 %v696_v0  ;;  %v598_v6 = vpop.xlane.xlu0 %597 }
 0x1bc   : > { %v639_v1 = vmul.f32 %v1461_v28, %v598_v6 }
 0x1be   : > { %v1518_v2 = vsub.f32 %v1414_v8, %v639_v1 }
 0x1c0   : > { %v671_v9 = vmul.f32 %v1518_v2, %v1518_v2 }
 0x1c2   : > { %v699_v14 = vsel %vm306_vm0, %v671_v9, 0.0 }
 0x1c3   : > { %v601_v15 = vpop.xlane.xlu1 %600  ;;  %700 = vadd.xlane.f32.xlu1 %v699_v14 }
 0x1c4   : > { %v640_v7 = vmul.f32 %v1461_v28, %v601_v15 }
 0x1c6   : > { %v1525_v16 = vsub.f32 %v1420_v10, %v640_v7 }
 0x1c8   : > { %v672_v11 = vmul.f32 %v1525_v16, %v1525_v16 }
 0x1ca   : > { %v702_v18 = vsel %vm306_vm0, %v672_v11, 0.0 }
 0x1cb   : > { %703 = vadd.xlane.f32.xlu2 %v702_v18 }
 0x1d1   : > { %v604_v8 = vpop.xlane.xlu2 %603 }
 0x1d2   : > { %v641_v25 = vmul.f32 %v1461_v28, %v604_v8 }
 0x1d4   : > { %v1532_v26 = vsub.f32 %v1426_v12, %v641_v25 }
 0x1d6   : > { %v673_v27 = vmul.f32 %v1532_v26, %v1532_v26 }
 0x1d8   : > { %v705_v13 = vsel %vm306_vm0, %v673_v27, 0.0  ;;  %v1592_v27 = vld [vmem:[%s1707_s5] ss:$0 sm:$0xff] }
 0x1d9   : > { %706 = vadd.xlane.f32.xlu0 %v705_v13  ;;  %v607_v10 = vpop.xlane.xlu0 %606 }
 0x1da   : > { %v642_v29 = vmul.f32 %v1461_v28, %v607_v10 }
 0x1dc   : > { %v1539_v32 = vsub.f32 %v1432_v17, %v642_v29  ;;  %v1597_v29 = vld [vmem:[%s1708_s6] ss:$0 sm:$0xff] }
 0x1de   : > { %v674_v34 = vmul.f32 %v1539_v32, %v1539_v32 }
 0x1e0   : > { %v708_v19 = vsel %vm306_vm0, %v674_v34, 0.0 }
 0x1e1   : > { %v610_v35 = vpop.xlane.xlu1 %609  ;;  %709 = vadd.xlane.f32.xlu1 %v708_v19 }
 0x1e2   : > { %v643_v12 = vmul.f32 %v1461_v28, %v610_v35 }
 0x1e4   : > { %v1546_v37 = vsub.f32 %v1438_v21, %v643_v12 }
 0x1e6   : > { %v675_v39 = vmul.f32 %v1546_v37, %v1546_v37 }
 0x1e8   : > { %v711_v22 = vsel %vm306_vm0, %v675_v39, 0.0 }
 0x1e9   : > { %v613_v41 = vpop.xlane.xlu2 %612  ;;  %712 = vadd.xlane.f32.xlu2 %v711_v22 }
 0x1ea   : > { %v644_v17 = vmul.f32 %v1461_v28, %v613_v41 }
 0x1ec   : > { %v1553_v42 = vsub.f32 %v1444_v3, %v644_v17 }
 0x1ee   : > { %v676_v43 = vmul.f32 %v1553_v42, %v1553_v42 }
 0x1f0   : > { %v714_v44 = vsel %vm306_vm0, %v676_v43, 0.0 }
 0x1f1   : > { %715 = vadd.xlane.f32.xlu0 %v714_v44  ;;  %v616_v21 = vpop.xlane.xlu0 %615 }
 0x1f2   : > { %v645_v23 = vmul.f32 %v1461_v28, %v616_v21 }
 0x1f4   : > { %v1560_v46 = vsub.f32 %v1450_v20, %v645_v23 }
 0x1f6   : > { %v677_v33 = vmul.f32 %v1560_v46, %v1560_v46 }
 0x1f8   : > { %v717_v48 = vsel %vm306_vm0, %v677_v33, 0.0 }
 0x1f9   : > { %v619_v30 = vpop.xlane.xlu1 %618  ;;  %718 = vadd.xlane.f32.xlu1 %v717_v48 }
 0x1fa   : > { %v646_v3 = vmul.f32 %v1461_v28, %v619_v30 }
 0x1fc   : > { %v1567_v49 = vsub.f32 %v1456_v31, %v646_v3 }
 0x1fe   : > { %v678_v50 = vmul.f32 %v1567_v49, %v1567_v49 }
 0x200   : > { %v720_v51 = vsel %vm306_vm0, %v678_v50, 0.0 }
 0x201   : > { %v622_v52 = vpop.xlane.xlu2 %621  ;;  %721 = vadd.xlane.f32.xlu2 %v720_v51 }
 0x202   : > { %v647_v20 = vmul.f32 %v1461_v28, %v622_v52 }
 0x204   : > { %v1574_v36 = vsub.f32 %v1464_v38, %v647_v20 }
 0x206   : > { %v683_v53 = vpop.xlane.xlu1 %682  ;;  %v679_v55 = vmul.f32 %v1574_v36, %v1574_v36 }
 0x207   : > { %v729_v56 = vmul.f32 %v683_v53, %v1461_v28 }
 0x208   : > { %v723_v31 = vsel %vm306_vm0, %v679_v55, 0.0 }
 0x209   : > { %v745_v57 = vadd.f32 1e-05, %v729_v56  ;;  %724 = vadd.xlane.f32.xlu0 %v723_v31  ;;  %v625_v4 = vpop.xlane.xlu0 %624 }
 0x20a   : > { %v648_v59 = vmul.f32 %v1461_v28, %v625_v4 }
 0x20b   : > { %1119 = vrsqrt.f32 %v745_v57  ;;  %vm767_vm4 = vweird.f32 %v745_v57 }
 0x20c   : > { %v1582_v60 = vsub.f32 %v1477_v45, %v648_v59 }
 0x20e   : > { %v686_v61 = vpop.xlane.xlu2 %685  ;;  %v680_v38 = vmul.f32 %v1582_v60, %v1582_v60 }
 0x20f   : > { %v730_v5 = vmul.f32 %v686_v61, %v1461_v28 }
 0x210   : > { %v726_v63 = vsel %vm306_vm0, %v680_v38, 0.0 }
 0x211   : > { %v1120_v0 = vpop.eup %1119  ;;  %v746_v6 = vadd.f32 1e-05, %v730_v5  ;;  %727 = vadd.xlane.f32.xlu1 %v726_v63 }
 0x212   : > { %v762_v1 = vmul.f32 %v1120_v0, %v745_v57  ;;  %vm768_vm3 = vweird.f32 %v1120_v0 }
 0x213   : > { %1121 = vrsqrt.f32 %v746_v6  ;;  %vm769_vm5 = vmor %vm767_vm4, %vm768_vm3  ;;  %vm777_vm7 = vweird.f32 %v746_v6 }
 0x214   : > { %v763_v9 = vmul.f32 %v1120_v0, %v762_v1 }
 0x216   : > { %v764_v14 = vmul.f32 0.5, %v763_v9  ;;  %v689_v15 = vpop.xlane.xlu0 %688 }
 0x217   : > { %v731_v7 = vmul.f32 %v689_v15, %v1461_v28 }
 0x218   : > { %v765_v45 = vsub.f32 1.5, %v764_v14 }
 0x219   : > { %v1122_v11 = vpop.eup %1121  ;;  %v747_v18 = vadd.f32 1e-05, %v731_v7 }
 0x21a   : > { %v766_v8 = vmul.f32 %v1120_v0, %v765_v45  ;;  %v772_v25 = vmul.f32 %v1122_v11, %v746_v6  ;;  %vm778_vm6 = vweird.f32 %v1122_v11 }
 0x21b   : > { %1123 = vrsqrt.f32 %v747_v18  ;;  %vm779_vm8 = vmor %vm777_vm7, %vm778_vm6  ;;  %vm787_vm10 = vweird.f32 %v747_v18 }
 0x21c   : > { %v770_v13 = vsel %vm769_vm5, %v1120_v0, %v766_v8  ;;  %v773_v10 = vmul.f32 %v1122_v11, %v772_v25 }
 0x21d   : > { %v921_v34 = vmul.f32 %v770_v13, %v1470_v40 }
 0x21e   : > { %v774_v19 = vmul.f32 0.5, %v773_v10  ;;  %v692_v35 = vpop.xlane.xlu1 %691 }
 0x21f   : > { %v941_v12 = vmul.f32 %v1592_v27, %v921_v34  ;;  %v732_v39 = vmul.f32 %v692_v35, %v1461_v28 }
 0x220   : > { %v775_v22 = vsub.f32 1.5, %v774_v19 }
 0x221   : > { %v1124_v41 = vpop.eup %1123  ;;  %v961_v17 = vadd.f32 %v1597_v29, %v941_v12  ;;  %v748_v43 = vadd.f32 1e-05, %v732_v39 }
 0x222   : > { %v776_v40 = vmul.f32 %v1122_v11, %v775_v22  ;;  %v782_v44 = vmul.f32 %v1124_v41, %v747_v18  ;;  %vm788_vm9 = vweird.f32 %v1124_v41 }
 0x223   : > { %977 = vst.msk [vmem:[%s1607_s22] sm:$0xff] %vm306_vm0, %v961_v17  ;;  %1125 = vrsqrt.f32 %v748_v43  ;;  %vm789_vm11 = vmor %vm787_vm10, %vm788_vm9  ;;  %vm797_vm13 = vweird.f32 %v748_v43 }
 0x224   : > { %v780_v21 = vsel %vm779_vm8, %v1122_v11, %v776_v40  ;;  %v783_v23 = vmul.f32 %v1124_v41, %v782_v44 }
 0x225   : > { %v922_v33 = vmul.f32 %v780_v21, %v1483_v47 }
 0x226   : > { %v784_v48 = vmul.f32 0.5, %v783_v23  ;;  %v695_v30 = vpop.xlane.xlu2 %694 }
 0x227   : > { %v942_v3 = vmul.f32 %v1592_v27, %v922_v33  ;;  %v733_v50 = vmul.f32 %v695_v30, %v1461_v28 }
 0x228   : > { %v785_v51 = vsub.f32 1.5, %v784_v48 }
 0x229   : > { %v1126_v52 = vpop.eup %1125  ;;  %v962_v20 = vadd.f32 %v1597_v29, %v942_v3  ;;  %v749_v53 = vadd.f32 1e-05, %v733_v50 }
 0x22a   : > { %v786_v55 = vmul.f32 %v1124_v41, %v785_v51  ;;  %v792_v56 = vmul.f32 %v1126_v52, %v748_v43  ;;  %vm798_vm12 = vweird.f32 %v1126_v52 }
 0x22b   : > { %978 = vst.msk [vmem:[%s1607_s22 + $0x8] sm:$0xff] %vm306_vm0, %v962_v20  ;;  %1127 = vrsqrt.f32 %v749_v53  ;;  %vm799_vm14 = vmor %vm797_vm13, %vm798_vm12  ;;  %vm807_vm1 = vweird.f32 %v749_v53 }
 0x22c   : > { %v790_v47 = vsel %vm789_vm11, %v1124_v41, %v786_v55  ;;  %v793_v31 = vmul.f32 %v1126_v52, %v792_v56 }
 0x22d   : > { %v923_v57 = vmul.f32 %v790_v47, %v1490_v24 }
 0x22e   : > { %v794_v4 = vmul.f32 0.5, %v793_v31  ;;  %v698_v59 = vpop.xlane.xlu0 %697 }
 0x22f   : > { %v943_v61 = vmul.f32 %v1592_v27, %v923_v57  ;;  %v734_v38 = vmul.f32 %v698_v59, %v1461_v28 }
 0x230   : > { %v795_v5 = vsub.f32 1.5, %v794_v4 }
 0x231   : > { %v1128_v63 = vpop.eup %1127  ;;  %v963_v0 = vadd.f32 %v1597_v29, %v943_v61  ;;  %v750_v6 = vadd.f32 1e-05, %v734_v38 }
 0x232   : > { %v796_v1 = vmul.f32 %v1126_v52, %v795_v5  ;;  %v802_v9 = vmul.f32 %v1128_v63, %v749_v53  ;;  %vm808_vm15 = vweird.f32 %v1128_v63 }
 0x233   : > { %979 = vst.msk [vmem:[%s1607_s22 + $0x10] sm:$0xff] %vm306_vm0, %v963_v0  ;;  %1129 = vrsqrt.f32 %v750_v6  ;;  %vm809_vm2 = vmor %vm807_vm1, %vm808_vm15  ;;  %vm817_vm4 = vweird.f32 %v750_v6 }
 0x234   : > { %v800_v24 = vsel %vm799_vm14, %v1126_v52, %v796_v1  ;;  %v803_v14 = vmul.f32 %v1128_v63, %v802_v9 }
 0x235   : > { %v924_v15 = vmul.f32 %v800_v24, %v1497_v54 }
 0x236   : > { %v804_v7 = vmul.f32 0.5, %v803_v14  ;;  %v701_v45 = vpop.xlane.xlu1 %700 }
 0x237   : > { %v944_v11 = vmul.f32 %v1592_v27, %v924_v15  ;;  %v735_v18 = vmul.f32 %v701_v45, %v1461_v28 }
 0x238   : > { %v805_v8 = vsub.f32 1.5, %v804_v7 }
 0x239   : > { %v1130_v25 = vpop.eup %1129  ;;  %v964_v13 = vadd.f32 %v1597_v29, %v944_v11  ;;  %v751_v10 = vadd.f32 1e-05, %v735_v18 }
 0x23a   : > { %v806_v34 = vmul.f32 %v1128_v63, %v805_v8  ;;  %v812_v19 = vmul.f32 %v1130_v25, %v750_v6  ;;  %vm818_vm3 = vweird.f32 %v1130_v25 }
 0x23b   : > { %980 = vst.msk [vmem:[%s1607_s22 + $0x18] sm:$0xff] %vm306_vm0, %v964_v13  ;;  %1131 = vrsqrt.f32 %v751_v10  ;;  %vm819_vm5 = vmor %vm817_vm4, %vm818_vm3  ;;  %vm827_vm7 = vweird.f32 %v751_v10 }
 0x23c   : > { %v810_v54 = vsel %vm809_vm2, %v1128_v63, %v806_v34  ;;  %v813_v35 = vmul.f32 %v1130_v25, %v812_v19 }
 0x23d   : > { %v925_v12 = vmul.f32 %v810_v54, %v1504_v58 }
 0x23e   : > { %v814_v39 = vmul.f32 0.5, %v813_v35  ;;  %v704_v22 = vpop.xlane.xlu2 %703 }
 0x23f   : > { %v945_v41 = vmul.f32 %v1592_v27, %v925_v12  ;;  %v736_v17 = vmul.f32 %v704_v22, %v1461_v28 }
 0x240   : > { %v815_v43 = vsub.f32 1.5, %v814_v39 }
 0x241   : > { %v1132_v40 = vpop.eup %1131  ;;  %v965_v44 = vadd.f32 %v1597_v29, %v945_v41  ;;  %v752_v21 = vadd.f32 1e-05, %v736_v17 }
 0x242   : > { %v816_v23 = vmul.f32 %v1130_v25, %v815_v43  ;;  %v822_v33 = vmul.f32 %v1132_v40, %v751_v10  ;;  %vm828_vm6 = vweird.f32 %v1132_v40 }
 0x243   : > { %981 = vst.msk [vmem:[%s1607_s22 + $0x20] sm:$0xff] %vm306_vm0, %v965_v44  ;;  %1133 = vrsqrt.f32 %v752_v21  ;;  %vm829_vm8 = vmor %vm827_vm7, %vm828_vm6  ;;  %vm837_vm10 = vweird.f32 %v752_v21 }
 0x244   : > { %v820_v58 = vsel %vm819_vm5, %v1130_v25, %v816_v23  ;;  %v823_v48 = vmul.f32 %v1132_v40, %v822_v33 }
 0x245   : > { %v926_v30 = vmul.f32 %v820_v58, %v1511_v62 }
 0x246   : > { %v824_v3 = vmul.f32 0.5, %v823_v48 }
 0x247   : > { %v946_v50 = vmul.f32 %v1592_v27, %v926_v30 }
 0x248   : > { %v825_v51 = vsub.f32 1.5, %v824_v3 }
 0x249   : > { %v1134_v52 = vpop.eup %1133  ;;  %v966_v20 = vadd.f32 %v1597_v29, %v946_v50 }
 0x24a   : > { %v826_v53 = vmul.f32 %v1132_v40, %v825_v51  ;;  %v832_v55 = vmul.f32 %v1134_v52, %v752_v21  ;;  %vm838_vm9 = vweird.f32 %v1134_v52 }
 0x24b   : > { %982 = vst.msk [vmem:[%s1607_s22 + $0x28] sm:$0xff] %vm306_vm0, %v966_v20  ;;  %vm839_vm11 = vmor %vm837_vm10, %vm838_vm9 }
 0x24c   : > { %v830_v56 = vsel %vm829_vm8, %v1132_v40, %v826_v53  ;;  %v833_v47 = vmul.f32 %v1134_v52, %v832_v55  ;;  %v707_v31 = vpop.xlane.xlu0 %706 }
 0x24d   : > { %v927_v62 = vmul.f32 %v830_v56, %v1518_v2  ;;  %v737_v57 = vmul.f32 %v707_v31, %v1461_v28 }
 0x24e   : > { %v834_v4 = vmul.f32 0.5, %v833_v47 }
 0x24f   : > { %v947_v59 = vmul.f32 %v1592_v27, %v927_v62  ;;  %v753_v61 = vadd.f32 1e-05, %v737_v57 }
 0x250   : > { %v835_v38 = vsub.f32 1.5, %v834_v4 }
 0x251   : > { %v967_v5 = vadd.f32 %v1597_v29, %v947_v59  ;;  %1135 = vrsqrt.f32 %v753_v61  ;;  %vm847_vm13 = vweird.f32 %v753_v61 }
 0x252   : > { %v836_v63 = vmul.f32 %v1134_v52, %v835_v38 }
 0x253   : > { %983 = vst.msk [vmem:[%s1607_s22 + $0x30] sm:$0xff] %vm306_vm0, %v967_v5 }
 0x254   : > { %v840_v0 = vsel %vm839_vm11, %v1134_v52, %v836_v63  ;;  %v710_v6 = vpop.xlane.xlu1 %709 }
 0x255   : > { %v928_v2 = vmul.f32 %v840_v0, %v1525_v16  ;;  %v738_v1 = vmul.f32 %v710_v6, %v1461_v28 }
 0x257   : > { %v1136_v9 = vpop.eup %1135  ;;  %v948_v24 = vmul.f32 %v1592_v27, %v928_v2  ;;  %v754_v14 = vadd.f32 1e-05, %v738_v1 }
 0x258   : > { %v842_v15 = vmul.f32 %v1136_v9, %v753_v61  ;;  %vm848_vm12 = vweird.f32 %v1136_v9 }
 0x259   : > { %v968_v7 = vadd.f32 %v1597_v29, %v948_v24  ;;  %1137 = vrsqrt.f32 %v754_v14  ;;  %vm849_vm14 = vmor %vm847_vm13, %vm848_vm12  ;;  %vm857_vm1 = vweird.f32 %v754_v14 }
 0x25a   : > { %v843_v45 = vmul.f32 %v1136_v9, %v842_v15 }
 0x25b   : > { %984 = vst.msk [vmem:[%s1607_s22 + $0x38] sm:$0xff] %vm306_vm0, %v968_v7 }
 0x25c   : > { %v844_v11 = vmul.f32 0.5, %v843_v45  ;;  %v713_v18 = vpop.xlane.xlu2 %712 }
 0x25d   : > { %v739_v8 = vmul.f32 %v713_v18, %v1461_v28 }
 0x25e   : > { %v845_v25 = vsub.f32 1.5, %v844_v11 }
 0x25f   : > { %v1138_v16 = vpop.eup %1137  ;;  %v755_v13 = vadd.f32 1e-05, %v739_v8 }
 0x260   : > { %v846_v10 = vmul.f32 %v1136_v9, %v845_v25  ;;  %v852_v34 = vmul.f32 %v1138_v16, %v754_v14  ;;  %vm858_vm15 = vweird.f32 %v1138_v16 }
 0x261   : > { %1139 = vrsqrt.f32 %v755_v13  ;;  %vm859_vm2 = vmor %vm857_vm1, %vm858_vm15  ;;  %vm867_vm4 = vweird.f32 %v755_v13 }
 0x262   : > { %v850_v19 = vsel %vm849_vm14, %v1136_v9, %v846_v10  ;;  %v853_v54 = vmul.f32 %v1138_v16, %v852_v34 }
 0x263   : > { %v929_v35 = vmul.f32 %v850_v19, %v1532_v26 }
 0x264   : > { %v854_v12 = vmul.f32 0.5, %v853_v54  ;;  %v716_v39 = vpop.xlane.xlu0 %715 }
 0x265   : > { %v949_v22 = vmul.f32 %v1592_v27, %v929_v35  ;;  %v740_v41 = vmul.f32 %v716_v39, %v1461_v28 }
 0x266   : > { %v855_v17 = vsub.f32 1.5, %v854_v12 }
 0x267   : > { %v1140_v43 = vpop.eup %1139  ;;  %v969_v40 = vadd.f32 %v1597_v29, %v949_v22  ;;  %v756_v44 = vadd.f32 1e-05, %v740_v41 }
 0x268   : > { %v856_v21 = vmul.f32 %v1138_v16, %v855_v17  ;;  %v862_v23 = vmul.f32 %v1140_v43, %v755_v13  ;;  %vm868_vm3 = vweird.f32 %v1140_v43 }
 0x269   : > { %985 = vst.msk [vmem:[%s1607_s22 + $0x40] sm:$0xff] %vm306_vm0, %v969_v40  ;;  %1141 = vrsqrt.f32 %v756_v44  ;;  %vm869_vm5 = vmor %vm867_vm4, %vm868_vm3  ;;  %vm877_vm7 = vweird.f32 %v756_v44 }
 0x26a   : > { %v860_v26 = vsel %vm859_vm2, %v1138_v16, %v856_v21  ;;  %v863_v33 = vmul.f32 %v1140_v43, %v862_v23 }
 0x26b   : > { %v930_v58 = vmul.f32 %v860_v26, %v1539_v32 }
 0x26c   : > { %v864_v48 = vmul.f32 0.5, %v863_v33  ;;  %v719_v30 = vpop.xlane.xlu1 %718 }
 0x26d   : > { %v950_v3 = vmul.f32 %v1592_v27, %v930_v58  ;;  %v741_v50 = vmul.f32 %v719_v30, %v1461_v28 }
 0x26e   : > { %v865_v51 = vsub.f32 1.5, %v864_v48 }
 0x26f   : > { %v1142_v52 = vpop.eup %1141  ;;  %v970_v20 = vadd.f32 %v1597_v29, %v950_v3  ;;  %v757_v53 = vadd.f32 1e-05, %v741_v50 }
 0x270   : > { %v866_v55 = vmul.f32 %v1140_v43, %v865_v51  ;;  %v872_v56 = vmul.f32 %v1142_v52, %v756_v44  ;;  %vm878_vm6 = vweird.f32 %v1142_v52 }
 0x271   : > { %986 = vst.msk [vmem:[%s1607_s22 + $0x48] sm:$0xff] %vm306_vm0, %v970_v20  ;;  %1143 = vrsqrt.f32 %v757_v53  ;;  %vm879_vm8 = vmor %vm877_vm7, %vm878_vm6  ;;  %vm887_vm10 = vweird.f32 %v757_v53 }
 0x272   : > { %v870_v32 = vsel %vm869_vm5, %v1140_v43, %v866_v55  ;;  %v873_v47 = vmul.f32 %v1142_v52, %v872_v56 }
 0x273   : > { %v931_v31 = vmul.f32 %v870_v32, %v1546_v37 }
 0x274   : > { %v874_v62 = vmul.f32 0.5, %v873_v47  ;;  %v722_v57 = vpop.xlane.xlu2 %721 }
 0x275   : > { %v951_v4 = vmul.f32 %v1592_v27, %v931_v31  ;;  %v742_v59 = vmul.f32 %v722_v57, %v1461_v28 }
 0x276   : > { %v875_v61 = vsub.f32 1.5, %v874_v62 }
 0x277   : > { %v1144_v38 = vpop.eup %1143  ;;  %v971_v5 = vadd.f32 %v1597_v29, %v951_v4  ;;  %v758_v63 = vadd.f32 1e-05, %v742_v59 }
 0x278   : > { %v876_v0 = vmul.f32 %v1142_v52, %v875_v61  ;;  %v882_v6 = vmul.f32 %v1144_v38, %v757_v53  ;;  %vm888_vm9 = vweird.f32 %v1144_v38 }
 0x279   : > { %987 = vst.msk [vmem:[%s1607_s22 + $0x50] sm:$0xff] %vm306_vm0, %v971_v5  ;;  %1145 = vrsqrt.f32 %v758_v63  ;;  %vm889_vm11 = vmor %vm887_vm10, %vm888_vm9  ;;  %vm897_vm13 = vweird.f32 %v758_v63 }
 0x27a   : > { %v880_v37 = vsel %vm879_vm8, %v1142_v52, %v876_v0  ;;  %v883_v2 = vmul.f32 %v1144_v38, %v882_v6 }
 0x27b   : > { %v932_v1 = vmul.f32 %v880_v37, %v1553_v42 }
 0x27c   : > { %v884_v9 = vmul.f32 0.5, %v883_v2  ;;  %v725_v24 = vpop.xlane.xlu0 %724 }
 0x27d   : > { %v952_v14 = vmul.f32 %v1592_v27, %v932_v1  ;;  %v743_v15 = vmul.f32 %v725_v24, %v1461_v28 }
 0x27e   : > { %v885_v7 = vsub.f32 1.5, %v884_v9 }
 0x27f   : > { %v1146_v45 = vpop.eup %1145  ;;  %v972_v11 = vadd.f32 %v1597_v29, %v952_v14  ;;  %v759_v18 = vadd.f32 1e-05, %v743_v15 }
 0x280   : > { %v886_v8 = vmul.f32 %v1144_v38, %v885_v7  ;;  %v892_v25 = vmul.f32 %v1146_v45, %v758_v63  ;;  %vm898_vm12 = vweird.f32 %v1146_v45 }
 0x281   : > { %988 = vst.msk [vmem:[%s1607_s22 + $0x58] sm:$0xff] %vm306_vm0, %v972_v11  ;;  %1147 = vrsqrt.f32 %v759_v18  ;;  %vm899_vm14 = vmor %vm897_vm13, %vm898_vm12  ;;  %vm907_vm1 = vweird.f32 %v759_v18 }
 0x282   : > { %v890_v42 = vsel %vm889_vm11, %v1144_v38, %v886_v8  ;;  %v893_v16 = vmul.f32 %v1146_v45, %v892_v25 }
 0x283   : > { %v933_v13 = vmul.f32 %v890_v42, %v1560_v46 }
 0x284   : > { %v894_v10 = vmul.f32 0.5, %v893_v16  ;;  %v728_v34 = vpop.xlane.xlu1 %727 }
 0x285   : > { %v953_v19 = vmul.f32 %v1592_v27, %v933_v13  ;;  %v744_v54 = vmul.f32 %v728_v34, %v1461_v28 }
 0x286   : > { %v895_v35 = vsub.f32 1.5, %v894_v10 }
 0x287   : > { %v1148_v12 = vpop.eup %1147  ;;  %v973_v39 = vadd.f32 %v1597_v29, %v953_v19  ;;  %v760_v22 = vadd.f32 1e-05, %v744_v54 }
 0x288   : > { %v896_v41 = vmul.f32 %v1146_v45, %v895_v35  ;;  %v902_v17 = vmul.f32 %v1148_v12, %v759_v18  ;;  %vm908_vm15 = vweird.f32 %v1148_v12 }
 0x289   : > { %989 = vst.msk [vmem:[%s1607_s22 + $0x60] sm:$0xff] %vm306_vm0, %v973_v39  ;;  %1149 = vrsqrt.f32 %v760_v22  ;;  %vm909_vm2 = vmor %vm907_vm1, %vm908_vm15  ;;  %vm917_vm4 = vweird.f32 %v760_v22 }
 0x28a   : > { %v900_v46 = vsel %vm899_vm14, %v1146_v45, %v896_v41  ;;  %v903_v43 = vmul.f32 %v1148_v12, %v902_v17 }
 0x28b   : > { %v934_v40 = vmul.f32 %v900_v46, %v1567_v49 }
 0x28c   : > { %v904_v44 = vmul.f32 0.5, %v903_v43 }
 0x28d   : > { %v954_v28 = vmul.f32 %v1592_v27, %v934_v40 }
 0x28e   : > { %v905_v21 = vsub.f32 1.5, %v904_v44 }
 0x28f   : > { %v1150_v23 = vpop.eup %1149  ;;  %v974_v26 = vadd.f32 %v1597_v29, %v954_v28 }
 0x290   : > { %v906_v33 = vmul.f32 %v1148_v12, %v905_v21  ;;  %v912_v58 = vmul.f32 %v1150_v23, %v760_v22  ;;  %vm918_vm3 = vweird.f32 %v1150_v23 }
 0x291   : > { %990 = vst.msk [vmem:[%s1607_s22 + $0x68] sm:$0xff] %vm306_vm0, %v974_v26  ;;  %vm919_vm5 = vmor %vm917_vm4, %vm918_vm3 }
 0x292   : > { %v910_v48 = vsel %vm909_vm2, %v1148_v12, %v906_v33  ;;  %v913_v30 = vmul.f32 %v1150_v23, %v912_v58 }
 0x293   : > { %v935_v49 = vmul.f32 %v910_v48, %v1574_v36 }
 0x294   : > { %v914_v3 = vmul.f32 0.5, %v913_v30 }
 0x295   : > { %v955_v50 = vmul.f32 %v1592_v27, %v935_v49 }
 0x296   : > { %v915_v51 = vsub.f32 1.5, %v914_v3 }
 0x297   : > { %v975_v52 = vadd.f32 %v1597_v29, %v955_v50 }
 0x298   : > { %v916_v20 = vmul.f32 %v1150_v23, %v915_v51 }
 0x299   : > { %991 = vst.msk [vmem:[%s1607_s22 + $0x70] sm:$0xff] %vm306_vm0, %v975_v52 }
 0x29a   : > { %v920_v53 = vsel %vm919_vm5, %v1150_v23, %v916_v20 }
 0x29b   : > { %v936_v55 = vmul.f32 %v920_v53, %v1582_v60 }
 0x29d   : > { %v956_v56 = vmul.f32 %v1592_v27, %v936_v55 }
 0x29f   : > { %v976_v32 = vadd.f32 %v1597_v29, %v956_v56 }
 0x2a1   : > { %992 = vst.msk [vmem:[%s1607_s22 + $0x78] sm:$0xff] %vm306_vm0, %v976_v32 }
 0x2a2 PF: > { %s17_s24 = sadd.s32 1, %s1157_s24  }
 0x2a3   : > { %p14_p4 = scmp.ge.s32.totalorder %s17_s24, 4  }
 0x2a5   :  { %16 = sbr.rel (!%p14_p4) target bundleno = 1 (0x1), region = 78 }

// kernel: sthg_former.13
= control target key start
LH: loop header
LB: loop body
LE: loop exit
PB: predicated region body
PF: predicated region fallthrough
CT: control target
= control target key end

     0   :  { %s847_s15 = smov 0   ;;  %s1340_s0 = inlined_call_operand.vmem [shape: f32[256,32], index: 0, kind: input, shape index: {}]   ;;  %s1341_s1 = inlined_call_operand.vmem [shape: f32[256,32], index: 1, kind: input, shape index: {}]   ;;  %s1342_s2 = inlined_call_operand.vmem [shape: f32[1,32], index: 2, kind: input, shape index: {}]   ;;  %s1343_s3 = inlined_call_operand.vmem [shape: f32[1,32], index: 3, kind: input, shape index: {}]   ;;  %s1344_s4 = inlined_call_operand.vmem [shape: f32[256,32], index: 4, kind: output, shape index: {}]  }
   0x1 LB: > { %s755_s16 = sadd.s32 4294967295, %s819_s15   ;;  %p759_p0 = scmp.ge.s32.totalorder %s819_s15, 1  ;;  %s819_s15 = sphi %s847_s15, %s14_s15  }
   0x2   : > { %p174_p1 = scmp.lt.s32.totalorder %s819_s15, 3 }
   0x4   : > { %p175_p2 = pnand %p759_p0, %p174_p1 }
   0x5   : > { %s760_s17 = sshll.u32 (!%p175_p2), %s755_s16, 4 }
   0x6   : > { %178 = sbr.rel (%p175_p2) target bundleno = 336 (0x150), region = 36  ;;  %p206_p3 = scmp.lt.s32.totalorder (!%p175_p2), %s760_s17, 31 }
   0xb   : > { %s1346_s17 = smov (!%p206_p3, %s760_s17), 31  ;;  %vm271_vm0 = vcmask 261120  }
   0xc   : > { %s855_s18 = sshll.u32 %s1346_s17, 3 }
   0xd   : > { %s861_s21 = scalar_lea.vmem %s1340_s0, %s855_s18  ;;  %s867_s24 = scalar_lea.vmem %s1341_s1, %s855_s18 }
   0xe   : > { %v227_v0 = vld [vmem:[%s861_s21 + $0x20] sm:$0xff]  ;;  %v225_v2 = vld [vmem:[%s861_s21 + $0x10] sm:$0xff]  ;;  %v228_v9 = vld [vmem:[%s861_s21 + $0x28] sm:$0xff]  ;;  %s1144_s5 = scalar_lea.vmem %s1344_s4, %s855_s18 }
   0xf   : > { %v243_v1 = vld [vmem:[%s867_s24 + $0x20] sm:$0xff]  ;;  %v241_v4 = vld [vmem:[%s867_s24 + $0x10] sm:$0xff]  ;;  %v244_v10 = vld [vmem:[%s867_s24 + $0x28] sm:$0xff] }
  0x10   : > { %v872_v3 = vadd.f32 %v243_v1, %v227_v0  ;;  %v223_v5 = vld [vmem:[%s861_s21] sm:$0xff]  ;;  %v877_v7 = vadd.f32 %v241_v4, %v225_v2  ;;  %v226_v11 = vld [vmem:[%s861_s21 + $0x18] sm:$0xff]  ;;  %v224_v14 = vld [vmem:[%s861_s21 + $0x8] sm:$0xff]  ;;  %v893_v18 = vadd.f32 %v244_v10, %v228_v9  ;;  %v821_v0 = vmov 32.0  }
  0x11   : > { %v239_v6 = vld [vmem:[%s867_s24] sm:$0xff]  ;;  %v242_v13 = vld [vmem:[%s867_s24 + $0x18] sm:$0xff]  ;;  %v240_v15 = vld [vmem:[%s867_s24 + $0x8] sm:$0xff]  ;;  %779 = vrcp.f32 %v821_v0 }
  0x12   : > { %v879_v8 = vadd.f32 %v239_v6, %v223_v5  ;;  %v284_v12 = vsel %vm271_vm0, %v872_v3, 0.0  ;;  %v278_v16 = vsel %vm271_vm0, %v877_v7, 0.0  ;;  %v895_v19 = vadd.f32 %v242_v13, %v226_v11  ;;  %v231_v24 = vld [vmem:[%s861_s21 + $0x40] sm:$0xff]  ;;  %v229_v26 = vld [vmem:[%s861_s21 + $0x30] sm:$0xff]  ;;  %v230_v28 = vld [vmem:[%s861_s21 + $0x38] sm:$0xff] }
  0x13   : > { %285 = vadd.xlane.f32.xlu2 %v284_v12  ;;  %279 = vadd.xlane.f32.xlu1 %v278_v16  ;;  %v897_v20 = vadd.f32 %v240_v15, %v224_v14  ;;  %v287_v21 = vsel %vm271_vm0, %v893_v18, 0.0  ;;  %v247_v25 = vld [vmem:[%s867_s24 + $0x40] sm:$0xff]  ;;  %v245_v27 = vld [vmem:[%s867_s24 + $0x30] sm:$0xff]  ;;  %v246_v29 = vld [vmem:[%s867_s24 + $0x38] sm:$0xff] }
  0x14   : > { %v272_v17 = vsel %vm271_vm0, %v879_v8, 0.0  ;;  %v281_v22 = vsel %vm271_vm0, %v895_v19, 0.0  ;;  %v911_v30 = vadd.f32 %v247_v25, %v231_v24  ;;  %v913_v31 = vadd.f32 %v245_v27, %v229_v26  ;;  %v234_v35 = vld [vmem:[%s861_s21 + $0x58] sm:$0xff]  ;;  %v232_v38 = vld [vmem:[%s861_s21 + $0x48] sm:$0xff]  ;;  %v233_v40 = vld [vmem:[%s861_s21 + $0x50] sm:$0xff] }
  0x15   : > { %273 = vadd.xlane.f32.xlu0 %v272_v17  ;;  %v275_v23 = vsel %vm271_vm0, %v897_v20, 0.0  ;;  %v915_v32 = vadd.f32 %v246_v29, %v230_v28  ;;  %v250_v36 = vld [vmem:[%s867_s24 + $0x58] sm:$0xff]  ;;  %v248_v39 = vld [vmem:[%s867_s24 + $0x48] sm:$0xff]  ;;  %v249_v41 = vld [vmem:[%s867_s24 + $0x50] sm:$0xff] }
  0x16   : > { %v296_v33 = vsel %vm271_vm0, %v911_v30, 0.0  ;;  %v290_v34 = vsel %vm271_vm0, %v913_v31, 0.0  ;;  %v929_v42 = vadd.f32 %v250_v36, %v234_v35  ;;  %v931_v43 = vadd.f32 %v248_v39, %v232_v38  ;;  %v237_v47 = vld [vmem:[%s861_s21 + $0x70] sm:$0xff]  ;;  %v235_v50 = vld [vmem:[%s861_s21 + $0x60] sm:$0xff]  ;;  %v236_v52 = vld [vmem:[%s861_s21 + $0x68] sm:$0xff] }
  0x17   : > { %v293_v37 = vsel %vm271_vm0, %v915_v32, 0.0  ;;  %v933_v44 = vadd.f32 %v249_v41, %v233_v40  ;;  %v253_v48 = vld [vmem:[%s867_s24 + $0x70] sm:$0xff]  ;;  %v251_v51 = vld [vmem:[%s867_s24 + $0x60] sm:$0xff]  ;;  %v252_v53 = vld [vmem:[%s867_s24 + $0x68] sm:$0xff]  ;;  %v780_v1 = vpop.eup %779 }
  0x18   : > { %v305_v45 = vsel %vm271_vm0, %v929_v42, 0.0  ;;  %v299_v46 = vsel %vm271_vm0, %v931_v43, 0.0  ;;  %v947_v54 = vadd.f32 %v253_v48, %v237_v47  ;;  %v949_v55 = vadd.f32 %v251_v51, %v235_v50  ;;  %v238_v60 = vld [vmem:[%s861_s21 + $0x78] sm:$0xff] }
  0x19   : > { %v302_v49 = vsel %vm271_vm0, %v933_v44, 0.0  ;;  %v951_v56 = vadd.f32 %v252_v53, %v236_v52  ;;  %v254_v61 = vld [vmem:[%s867_s24 + $0x78] sm:$0xff]  ;;  %v321_v2 = vmul.f32 32.0, %v780_v1  ;;  %vm325_vm1 = vweird.f32 %v780_v1 }
  0x1a   : > { %v314_v57 = vsel %vm271_vm0, %v947_v54, 0.0  ;;  %v308_v58 = vsel %vm271_vm0, %v949_v55, 0.0  ;;  %v961_v62 = vadd.f32 %v254_v61, %v238_v60 }
  0x1b   : > { %288 = vadd.xlane.f32.xlu2 %v287_v21  ;;  %282 = vadd.xlane.f32.xlu1 %v281_v22  ;;  %v311_v59 = vsel %vm271_vm0, %v951_v56, 0.0  ;;  %v322_v4 = vsub.f32 1.0, %v321_v2 }
  0x1c   : > { %v317_v63 = vsel %vm271_vm0, %v961_v62, 0.0 }
  0x1d   : > { %276 = vadd.xlane.f32.xlu0 %v275_v23  ;;  %v323_v5 = vmul.f32 %v780_v1, %v322_v4 }
  0x1f   : > { %v324_v6 = vadd.f32 %v780_v1, %v323_v5 }
  0x21   : > { %v965_v9 = vsel %vm325_vm1, %v780_v1, %v324_v6 }
  0x23   : > { %297 = vadd.xlane.f32.xlu2 %v296_v33  ;;  %294 = vadd.xlane.f32.xlu1 %v293_v37 }
  0x25   : > { %291 = vadd.xlane.f32.xlu0 %v290_v34 }
  0x2b   : > { %306 = vadd.xlane.f32.xlu2 %v305_v45  ;;  %303 = vadd.xlane.f32.xlu1 %v302_v49 }
  0x2d   : > { %300 = vadd.xlane.f32.xlu0 %v299_v46 }
  0x33   : > { %315 = vadd.xlane.f32.xlu2 %v314_v57  ;;  %312 = vadd.xlane.f32.xlu1 %v311_v59 }
  0x35   : > { %309 = vadd.xlane.f32.xlu0 %v308_v58 }
  0x3d   : > { %318 = vadd.xlane.f32.xlu0 %v317_v63 }
  0x86   : > { %v286_v10 = vpop.xlane.xlu2 %285  ;;  %v280_v11 = vpop.xlane.xlu1 %279 }
  0x87   : > { %v329_v13 = vmul.f32 %v965_v9, %v280_v11  ;;  %v331_v34 = vmul.f32 %v965_v9, %v286_v10 }
  0x88   : > { %v274_v12 = vpop.xlane.xlu0 %273 }
  0x89   : > { %v327_v14 = vmul.f32 %v965_v9, %v274_v12  ;;  %v970_v15 = vsub.f32 %v877_v7, %v329_v13 }
  0x8b   : > { %v973_v16 = vsub.f32 %v879_v8, %v327_v14  ;;  %v361_v17 = vmul.f32 %v970_v15, %v970_v15 }
  0x8d   : > { %v359_v21 = vmul.f32 %v973_v16, %v973_v16  ;;  %v381_v23 = vsel %vm271_vm0, %v361_v17, 0.0 }
  0x8e   : > { %v289_v22 = vpop.xlane.xlu2 %288  ;;  %v283_v26 = vpop.xlane.xlu1 %282  ;;  %382 = vadd.xlane.f32.xlu0 %v381_v23 }
  0x8f   : > { %v375_v24 = vsel %vm271_vm0, %v359_v21, 0.0  ;;  %v332_v25 = vmul.f32 %v965_v9, %v289_v22  ;;  %v330_v8 = vmul.f32 %v965_v9, %v283_v26 }
  0x90   : > { %376 = vadd.xlane.f32.xlu1 %v375_v24  ;;  %v277_v7 = vpop.xlane.xlu0 %276 }
  0x91   : > { %v328_v27 = vmul.f32 %v965_v9, %v277_v7  ;;  %v985_v28 = vsub.f32 %v893_v18, %v332_v25  ;;  %v988_v29 = vsub.f32 %v895_v19, %v330_v8 }
  0x93   : > { %v991_v33 = vsub.f32 %v897_v20, %v328_v27  ;;  %v364_v35 = vmul.f32 %v985_v28, %v985_v28  ;;  %v362_v36 = vmul.f32 %v988_v29, %v988_v29  ;;  %v1004_v20 = vsub.f32 %v872_v3, %v331_v34 }
  0x95   : > { %v360_v37 = vmul.f32 %v991_v33, %v991_v33  ;;  %v390_v18 = vsel %vm271_vm0, %v364_v35, 0.0  ;;  %v384_v19 = vsel %vm271_vm0, %v362_v36, 0.0  ;;  %v363_v50 = vmul.f32 %v1004_v20, %v1004_v20 }
  0x96   : > { %v298_v38 = vpop.xlane.xlu2 %297  ;;  %391 = vadd.xlane.f32.xlu0 %v390_v18  ;;  %v295_v45 = vpop.xlane.xlu1 %294 }
  0x97   : > { %v378_v39 = vsel %vm271_vm0, %v360_v37, 0.0  ;;  %v335_v40 = vmul.f32 %v965_v9, %v298_v38  ;;  %v334_v48 = vmul.f32 %v965_v9, %v295_v45  ;;  %v387_v58 = vsel %vm271_vm0, %v363_v50, 0.0 }
  0x98   : > { %385 = vadd.xlane.f32.xlu1 %v384_v19  ;;  %v292_v41 = vpop.xlane.xlu0 %291  ;;  %379 = vadd.xlane.f32.xlu2 %v378_v39 }
  0x99   : > { %v333_v46 = vmul.f32 %v965_v9, %v292_v41  ;;  %v1009_v47 = vsub.f32 %v911_v30, %v335_v40  ;;  %v1022_v52 = vsub.f32 %v915_v32, %v334_v48 }
  0x9b   : > { %v1013_v49 = vsub.f32 %v913_v31, %v333_v46  ;;  %v367_v3 = vmul.f32 %v1009_v47, %v1009_v47  ;;  %v366_v0 = vmul.f32 %v1022_v52, %v1022_v52 }
  0x9d   : > { %v365_v51 = vmul.f32 %v1013_v49, %v1013_v49  ;;  %v399_v30 = vsel %vm271_vm0, %v367_v3, 0.0  ;;  %v396_v6 = vsel %vm271_vm0, %v366_v0, 0.0 }
  0x9e   : > { %v307_v53 = vpop.xlane.xlu2 %306  ;;  %400 = vadd.xlane.f32.xlu0 %v399_v30  ;;  %v304_v60 = vpop.xlane.xlu1 %303 }
  0x9f   : > { %v393_v57 = vsel %vm271_vm0, %v365_v51, 0.0  ;;  %v338_v31 = vmul.f32 %v965_v9, %v307_v53  ;;  %v337_v32 = vmul.f32 %v965_v9, %v304_v60 }
  0xa0   : > { %394 = vadd.xlane.f32.xlu1 %v393_v57  ;;  %v301_v59 = vpop.xlane.xlu0 %300  ;;  %388 = vadd.xlane.f32.xlu2 %v387_v58 }
  0xa1   : > { %v336_v61 = vmul.f32 %v965_v9, %v301_v59  ;;  %v1030_v63 = vsub.f32 %v929_v42, %v338_v31  ;;  %v1043_v5 = vsub.f32 %v933_v44, %v337_v32 }
  0xa3   : > { %v1036_v1 = vsub.f32 %v931_v43, %v336_v61  ;;  %v370_v2 = vmul.f32 %v1030_v63, %v1030_v63  ;;  %v369_v21 = vmul.f32 %v1043_v5, %v1043_v5 }
  0xa5   : > { %v368_v4 = vmul.f32 %v1036_v1, %v1036_v1  ;;  %v408_v42 = vsel %vm271_vm0, %v370_v2, 0.0  ;;  %v405_v26 = vsel %vm271_vm0, %v369_v21, 0.0 }
  0xa6   : > { %v316_v10 = vpop.xlane.xlu2 %315  ;;  %409 = vadd.xlane.f32.xlu0 %v408_v42  ;;  %v313_v13 = vpop.xlane.xlu1 %312 }
  0xa7   : > { %v402_v11 = vsel %vm271_vm0, %v368_v4, 0.0  ;;  %v341_v12 = vmul.f32 %v965_v9, %v316_v10  ;;  %v340_v44 = vmul.f32 %v965_v9, %v313_v13 }
  0xa8   : > { %403 = vadd.xlane.f32.xlu1 %v402_v11  ;;  %v310_v43 = vpop.xlane.xlu0 %309  ;;  %397 = vadd.xlane.f32.xlu2 %v396_v6 }
  0xa9   : > { %v339_v14 = vmul.f32 %v965_v9, %v310_v43  ;;  %v1051_v17 = vsub.f32 %v947_v54, %v341_v12  ;;  %v1064_v25 = vsub.f32 %v951_v56, %v340_v44 }
  0xab   : > { %v1057_v22 = vsub.f32 %v949_v55, %v339_v14  ;;  %v373_v23 = vmul.f32 %v1051_v17, %v1051_v17  ;;  %v372_v27 = vmul.f32 %v1064_v25, %v1064_v25 }
  0xad   : > { %v371_v24 = vmul.f32 %v1057_v22, %v1057_v22  ;;  %v417_v54 = vsel %vm271_vm0, %v373_v23, 0.0  ;;  %v414_v35 = vsel %vm271_vm0, %v372_v27, 0.0 }
  0xae   : > { %418 = vadd.xlane.f32.xlu0 %v417_v54  ;;  %v1112_v54 = vld [vmem:[%s1342_s2] ss:$0 sm:$0xff] }
  0xaf   : > { %v411_v7 = vsel %vm271_vm0, %v371_v24, 0.0 }
  0xb0   : > { %412 = vadd.xlane.f32.xlu1 %v411_v7  ;;  %v319_v8 = vpop.xlane.xlu0 %318  ;;  %406 = vadd.xlane.f32.xlu2 %v405_v26 }
  0xb1   : > { %v342_v55 = vmul.f32 %v965_v9, %v319_v8 }
  0xb3   : > { %v1073_v34 = vsub.f32 %v961_v62, %v342_v55 }
  0xb5   : > { %v374_v56 = vmul.f32 %v1073_v34, %v1073_v34 }
  0xb7   : > { %v420_v36 = vsel %vm271_vm0, %v374_v56, 0.0 }
  0xb8   : > { %421 = vadd.xlane.f32.xlu1 %v420_v36  ;;  %415 = vadd.xlane.f32.xlu2 %v414_v35  ;;  %v1129_v35 = vld [vmem:[%s1343_s3] ss:$0 sm:$0xff] }
 0x101   : > { %v383_v18 = vpop.xlane.xlu0 %382 }
 0x102   : > { %v425_v19 = vmul.f32 %v383_v18, %v965_v9 }
 0x103   : > { %v377_v37 = vpop.xlane.xlu1 %376 }
 0x104   : > { %v423_v38 = vmul.f32 %v377_v37, %v965_v9  ;;  %v441_v40 = vadd.f32 1e-05, %v425_v19 }
 0x106   : > { %v439_v39 = vadd.f32 1e-05, %v423_v38  ;;  %vm481_vm4 = vweird.f32 %v441_v40 }
 0x108   : > { %781 = vrsqrt.f32 %v439_v39  ;;  %vm461_vm2 = vweird.f32 %v439_v39 }
 0x109   : > { %783 = vrsqrt.f32 %v441_v40  ;;  %v392_v41 = vpop.xlane.xlu0 %391 }
 0x10a   : > { %v428_v48 = vmul.f32 %v392_v41, %v965_v9 }
 0x10b   : > { %v386_v62 = vpop.xlane.xlu1 %385  ;;  %v380_v46 = vpop.xlane.xlu2 %379 }
 0x10c   : > { %v426_v45 = vmul.f32 %v386_v62, %v965_v9  ;;  %v424_v3 = vmul.f32 %v380_v46, %v965_v9  ;;  %v1086_v30 = vadd.f32 1e-05, %v428_v48 }
 0x10e   : > { %v782_v50 = vpop.eup %781  ;;  %v1084_v51 = vadd.f32 1e-05, %v426_v45  ;;  %v1088_v31 = vadd.f32 1e-05, %v424_v3  ;;  %vm511_vm9 = vweird.f32 %v1086_v30 }
 0x10f   : > { %v784_v53 = vpop.eup %783  ;;  %v456_v57 = vmul.f32 %v782_v50, %v439_v39  ;;  %vm462_vm3 = vweird.f32 %v782_v50 }
 0x110   : > { %v476_v58 = vmul.f32 %v784_v53, %v441_v40  ;;  %785 = vrsqrt.f32 %v1084_v51  ;;  %vm482_vm5 = vweird.f32 %v784_v53  ;;  %vm491_vm6 = vweird.f32 %v1084_v51  ;;  %vm463_vm7 = vmor %vm461_vm2, %vm462_vm3 }
 0x111   : > { %v457_v59 = vmul.f32 %v782_v50, %v456_v57  ;;  %787 = vrsqrt.f32 %v1088_v31  ;;  %v401_v0 = vpop.xlane.xlu0 %400  ;;  %vm483_vm8 = vmor %vm481_vm4, %vm482_vm5  ;;  %vm471_vm14 = vweird.f32 %v1088_v31 }
 0x112   : > { %v477_v60 = vmul.f32 %v784_v53, %v476_v58  ;;  %789 = vrsqrt.f32 %v1086_v30  ;;  %v431_v6 = vmul.f32 %v401_v0, %v965_v9 }
 0x113   : > { %v458_v61 = vmul.f32 0.5, %v457_v59  ;;  %v395_v32 = vpop.xlane.xlu1 %394  ;;  %v389_v4 = vpop.xlane.xlu2 %388 }
 0x114   : > { %v478_v2 = vmul.f32 0.5, %v477_v60  ;;  %v429_v42 = vmul.f32 %v395_v32, %v965_v9  ;;  %v427_v11 = vmul.f32 %v389_v4, %v965_v9  ;;  %v1118_v8 = vadd.f32 1e-05, %v431_v6 }
 0x115   : > { %v459_v10 = vsub.f32 1.5, %v458_v61 }
 0x116   : > { %v1096_v12 = vpop.eup %785  ;;  %v479_v43 = vsub.f32 1.5, %v478_v2  ;;  %v1098_v13 = vadd.f32 1e-05, %v429_v42  ;;  %v1105_v23 = vadd.f32 1e-05, %v427_v11  ;;  %vm541_vm4 = vweird.f32 %v1118_v8 }
 0x117   : > { %v1100_v14 = vpop.eup %787  ;;  %v460_v44 = vmul.f32 %v782_v50, %v459_v10  ;;  %v486_v21 = vmul.f32 %v1096_v12, %v1084_v51  ;;  %vm492_vm10 = vweird.f32 %v1096_v12 }
 0x118   : > { %v1107_v24 = vpop.eup %789  ;;  %v480_v26 = vmul.f32 %v784_v53, %v479_v43  ;;  %v466_v7 = vmul.f32 %v1100_v14, %v1088_v31  ;;  %791 = vrsqrt.f32 %v1098_v13  ;;  %vm472_vm11 = vweird.f32 %v1100_v14  ;;  %vm493_vm13 = vmor %vm491_vm6, %vm492_vm10 }
 0x119   : > { %v464_v55 = vsel %vm463_vm7, %v782_v50, %v460_v44  ;;  %v487_v27 = vmul.f32 %v1096_v12, %v486_v21  ;;  %v506_v56 = vmul.f32 %v1107_v24, %v1086_v30  ;;  %793 = vrsqrt.f32 %v1105_v23  ;;  %vm473_vm1 = vmor %vm471_vm14, %vm472_vm11 }
 0x11a   : > { %v615_v36 = vmul.f32 %v464_v55, %v973_v16  ;;  %v484_v37 = vsel %vm483_vm8, %v784_v53, %v480_v26  ;;  %v467_v18 = vmul.f32 %v1100_v14, %v466_v7  ;;  %795 = vrsqrt.f32 %v1118_v8  ;;  %v410_v26 = vpop.xlane.xlu0 %409 }
 0x11b   : > { %v617_v38 = vmul.f32 %v484_v37, %v970_v15  ;;  %v488_v19 = vmul.f32 0.5, %v487_v27  ;;  %v507_v39 = vmul.f32 %v1107_v24, %v506_v56  ;;  %v404_v40 = vpop.xlane.xlu1 %403  ;;  %v398_v16 = vpop.xlane.xlu2 %397  ;;  %vm512_vm12 = vweird.f32 %v1107_v24 }
 0x11c   : > { %v635_v62 = vmul.f32 %v1112_v54, %v615_v36  ;;  %v468_v41 = vmul.f32 0.5, %v467_v18  ;;  %v430_v53 = vmul.f32 %v398_v16, %v965_v9  ;;  %v432_v57 = vmul.f32 %v404_v40, %v965_v9  ;;  %vm513_vm3 = vmor %vm511_vm9, %vm512_vm12 }
 0x11d   : > { %v637_v15 = vmul.f32 %v1112_v54, %v617_v38  ;;  %v489_v45 = vsub.f32 1.5, %v488_v19  ;;  %v508_v46 = vmul.f32 0.5, %v507_v39  ;;  %vm521_vm15 = vweird.f32 %v1098_v13 }
 0x11e   : > { %v1148_v48 = vpop.eup %791  ;;  %v655_v3 = vadd.f32 %v1129_v35, %v635_v62  ;;  %v469_v50 = vsub.f32 1.5, %v468_v41  ;;  %v1168_v2 = vadd.f32 1e-05, %v430_v53  ;;  %vm501_vm2 = vweird.f32 %v1105_v23 }
 0x11f   : > { %v657_v58 = vadd.f32 %v1129_v35, %v637_v15  ;;  %v490_v59 = vmul.f32 %v1096_v12, %v489_v45  ;;  %v509_v60 = vsub.f32 1.5, %v508_v46  ;;  %v516_v61 = vmul.f32 %v1148_v48, %v1098_v13  ;;  %v1157_v32 = vpop.eup %793 }
 0x120   : > { %671 = vst.msk [vmem:[%s1144_s5] sm:$0xff] %vm271_vm0, %v655_v3  ;;  %v470_v0 = vmul.f32 %v1100_v14, %v469_v50  ;;  %v496_v51 = vmul.f32 %v1157_v32, %v1105_v23  ;;  %v1179_v6 = vadd.f32 1e-05, %v432_v57  ;;  %v1181_v31 = vpop.eup %795  ;;  %797 = vrsqrt.f32 %v1168_v2 }
 0x121   : > { %673 = vst.msk [vmem:[%s1144_s5 + $0x10] sm:$0xff] %vm271_vm0, %v657_v58  ;;  %v494_v4 = vsel %vm493_vm13, %v1096_v12, %v490_v59  ;;  %v510_v42 = vmul.f32 %v1107_v24, %v509_v60  ;;  %v517_v12 = vmul.f32 %v1148_v48, %v516_v61  ;;  %vm522_vm5 = vweird.f32 %v1148_v48 }
 0x122   : > { %v618_v10 = vmul.f32 %v494_v4, %v988_v29  ;;  %v474_v11 = vsel %vm473_vm1, %v1100_v14, %v470_v0  ;;  %v497_v21 = vmul.f32 %v1157_v32, %v496_v51  ;;  %v536_v29 = vmul.f32 %v1181_v31, %v1118_v8  ;;  %vm523_vm7 = vmor %vm521_vm15, %vm522_vm5 }
 0x123   : > { %v616_v43 = vmul.f32 %v474_v11, %v991_v33  ;;  %v514_v44 = vsel %vm513_vm3, %v1107_v24, %v510_v42  ;;  %v518_v30 = vmul.f32 0.5, %v517_v12  ;;  %v407_v55 = vpop.xlane.xlu2 %406  ;;  %v413_v56 = vpop.xlane.xlu1 %412  ;;  %799 = vrsqrt.f32 %v1179_v6 }
 0x124   : > { %v638_v14 = vmul.f32 %v1112_v54, %v618_v10  ;;  %v620_v7 = vmul.f32 %v514_v44, %v985_v28  ;;  %v498_v33 = vmul.f32 0.5, %v497_v21  ;;  %v537_v24 = vmul.f32 %v1181_v31, %v536_v29 }
 0x125   : > { %v636_v27 = vmul.f32 %v1112_v54, %v616_v43  ;;  %v519_v18 = vsub.f32 1.5, %v518_v30  ;;  %vm502_vm6 = vweird.f32 %v1157_v32  ;;  %v434_v41 = vmul.f32 %v410_v26, %v965_v9 }
 0x126   : > { %v658_v36 = vadd.f32 %v1129_v35, %v638_v14  ;;  %v640_v37 = vmul.f32 %v1112_v54, %v620_v7  ;;  %v499_v38 = vsub.f32 1.5, %v498_v33  ;;  %v538_v19 = vmul.f32 0.5, %v537_v24  ;;  %v1207_v39 = vpop.eup %797  ;;  %vm503_vm9 = vmor %vm501_vm2, %vm502_vm6 }
 0x127   : > { %v656_v28 = vadd.f32 %v1129_v35, %v636_v27  ;;  %v520_v62 = vmul.f32 %v1148_v48, %v519_v18  ;;  %v433_v16 = vmul.f32 %v407_v55, %v965_v9  ;;  %vm542_vm8 = vweird.f32 %v1181_v31 }
 0x128   : > { %674 = vst.msk [vmem:[%s1144_s5 + $0x18] sm:$0xff] %vm271_vm0, %v658_v36  ;;  %v660_v40 = vadd.f32 %v1129_v35, %v640_v37  ;;  %v500_v15 = vmul.f32 %v1157_v32, %v499_v38  ;;  %v539_v45 = vsub.f32 1.5, %v538_v19  ;;  %v526_v46 = vmul.f32 %v1207_v39, %v1168_v2  ;;  %vm543_vm10 = vmor %vm541_vm4, %vm542_vm8 }
 0x129   : > { %672 = vst.msk [vmem:[%s1144_s5 + $0x8] sm:$0xff] %vm271_vm0, %v656_v28  ;;  %v524_v3 = vsel %vm523_vm7, %v1148_v48, %v520_v62  ;;  %v1232_v50 = vadd.f32 1e-05, %v434_v41  ;;  %v1234_v53 = vadd.f32 1e-05, %v433_v16  ;;  %v435_v13 = vmul.f32 %v413_v56, %v965_v9  ;;  %v800_v61 = vpop.eup %799 }
 0x12a   : > { %676 = vst.msk [vmem:[%s1144_s5 + $0x28] sm:$0xff] %vm271_vm0, %v660_v40  ;;  %v504_v57 = vsel %vm503_vm9, %v1157_v32, %v500_v15  ;;  %v621_v58 = vmul.f32 %v524_v3, %v1013_v49  ;;  %v540_v59 = vmul.f32 %v1181_v31, %v539_v45  ;;  %v527_v60 = vmul.f32 %v1207_v39, %v526_v46  ;;  %v419_v49 = vpop.xlane.xlu0 %418 }
 0x12b   : > { %v619_v23 = vmul.f32 %v504_v57, %v1004_v20  ;;  %801 = vrsqrt.f32 %v1232_v50  ;;  %v546_v32 = vmul.f32 %v800_v61, %v1179_v6  ;;  %v416_v42 = vpop.xlane.xlu2 %415  ;;  %vm532_vm11 = vweird.f32 %v1207_v39  ;;  %v422_v12 = vpop.xlane.xlu1 %421 }
 0x12c   : > { %v641_v48 = vmul.f32 %v1112_v54, %v621_v58  ;;  %v544_v0 = vsel %vm543_vm10, %v1181_v31, %v540_v59  ;;  %v528_v4 = vmul.f32 0.5, %v527_v60  ;;  %803 = vrsqrt.f32 %v1234_v53 }
 0x12d   : > { %v639_v51 = vmul.f32 %v1112_v54, %v619_v23  ;;  %v623_v10 = vmul.f32 %v544_v0, %v1009_v47  ;;  %v547_v11 = vmul.f32 %v800_v61, %v546_v32  ;;  %v1253_v31 = vadd.f32 1e-05, %v435_v13 }
 0x12e   : > { %v661_v20 = vadd.f32 %v1129_v35, %v641_v48  ;;  %v529_v8 = vsub.f32 1.5, %v528_v4  ;;  %v437_v21 = vmul.f32 %v419_v49, %v965_v9  ;;  %v436_v47 = vmul.f32 %v416_v42, %v965_v9 }
 0x12f   : > { %v659_v43 = vadd.f32 %v1129_v35, %v639_v51  ;;  %v643_v44 = vmul.f32 %v1112_v54, %v623_v10  ;;  %vm531_vm12 = vweird.f32 %v1168_v2  ;;  %v548_v26 = vmul.f32 0.5, %v547_v11 }
 0x130   : > { %677 = vst.msk [vmem:[%s1144_s5 + $0x30] sm:$0xff] %vm271_vm0, %v661_v20  ;;  %v530_v29 = vmul.f32 %v1207_v39, %v529_v8  ;;  %805 = vrsqrt.f32 %v1253_v31  ;;  %vm533_vm13 = vmor %vm531_vm12, %vm532_vm11  ;;  %v1269_v30 = vadd.f32 1e-05, %v437_v21  ;;  %v1271_v55 = vadd.f32 1e-05, %v436_v47 }
 0x131   : > { %v802_v14 = vpop.eup %801  ;;  %675 = vst.msk [vmem:[%s1144_s5 + $0x20] sm:$0xff] %vm271_vm0, %v659_v43  ;;  %v663_v7 = vadd.f32 %v1129_v35, %v643_v44  ;;  %v438_v27 = vmul.f32 %v422_v12, %v965_v9  ;;  %v549_v2 = vsub.f32 1.5, %v548_v26  ;;  %vm552_vm14 = vweird.f32 %v800_v61 }
 0x132   : > { %v534_v33 = vsel %vm533_vm13, %v1207_v39, %v530_v29  ;;  %v566_v24 = vmul.f32 %v802_v14, %v1232_v50  ;;  %v804_v56 = vpop.eup %803  ;;  %807 = vrsqrt.f32 %v1269_v30  ;;  %vm551_vm15 = vweird.f32 %v1179_v6 }
 0x133   : > { %679 = vst.msk [vmem:[%s1144_s5 + $0x40] sm:$0xff] %vm271_vm0, %v663_v7  ;;  %v622_v36 = vmul.f32 %v534_v33, %v1022_v52  ;;  %v550_v37 = vmul.f32 %v800_v61, %v549_v2  ;;  %v556_v28 = vmul.f32 %v804_v56, %v1234_v53  ;;  %vm553_vm1 = vmor %vm551_vm15, %vm552_vm14  ;;  %809 = vrsqrt.f32 %v1271_v55 }
 0x134   : > { %v567_v18 = vmul.f32 %v802_v14, %v566_v24  ;;  %v1284_v38 = vadd.f32 1e-05, %v438_v27  ;;  %vm571_vm2 = vweird.f32 %v1232_v50  ;;  %vm572_vm3 = vweird.f32 %v802_v14 }
 0x135   : > { %v642_v9 = vmul.f32 %v1112_v54, %v622_v36  ;;  %v554_v39 = vsel %vm553_vm1, %v800_v61, %v550_v37  ;;  %v557_v52 = vmul.f32 %v804_v56, %v556_v28  ;;  %vm562_vm4 = vweird.f32 %v804_v56  ;;  %vm573_vm5 = vmor %vm571_vm2, %vm572_vm3 }
 0x136   : > { %v806_v19 = vpop.eup %805  ;;  %v568_v40 = vmul.f32 0.5, %v567_v18  ;;  %v624_v41 = vmul.f32 %v554_v39, %v1036_v1  ;;  %811 = vrsqrt.f32 %v1284_v38  ;;  %vm561_vm6 = vweird.f32 %v1234_v53 }
 0x137   : > { %v662_v62 = vadd.f32 %v1129_v35, %v642_v9  ;;  %v576_v6 = vmul.f32 %v806_v19, %v1253_v31  ;;  %v558_v15 = vmul.f32 0.5, %v557_v52  ;;  %vm563_vm7 = vmor %vm561_vm6, %vm562_vm4  ;;  %vm582_vm8 = vweird.f32 %v806_v19 }
 0x138   : > { %v569_v16 = vsub.f32 1.5, %v568_v40  ;;  %v808_v45 = vpop.eup %807  ;;  %v644_v46 = vmul.f32 %v1112_v54, %v624_v41  ;;  %vm581_vm9 = vweird.f32 %v1253_v31  ;;  %vm601_vm11 = vweird.f32 %v1269_v30 }
 0x139   : > { %678 = vst.msk [vmem:[%s1144_s5 + $0x38] sm:$0xff] %vm271_vm0, %v662_v62  ;;  %v577_v3 = vmul.f32 %v806_v19, %v576_v6  ;;  %v559_v57 = vsub.f32 1.5, %v558_v15  ;;  %v596_v1 = vmul.f32 %v808_v45, %v1269_v30  ;;  %v810_v58 = vpop.eup %809  ;;  %vm583_vm10 = vmor %vm581_vm9, %vm582_vm8  ;;  %vm602_vm12 = vweird.f32 %v808_v45 }
 0x13a   : > { %v570_v13 = vmul.f32 %v802_v14, %v569_v16  ;;  %v664_v59 = vadd.f32 %v1129_v35, %v644_v46  ;;  %v586_v0 = vmul.f32 %v810_v58, %v1271_v55  ;;  %vm592_vm13 = vweird.f32 %v810_v58  ;;  %vm603_vm14 = vmor %vm601_vm11, %vm602_vm12 }
 0x13b   : > { %v578_v60 = vmul.f32 0.5, %v577_v3  ;;  %v560_v23 = vmul.f32 %v804_v56, %v559_v57  ;;  %v597_v48 = vmul.f32 %v808_v45, %v596_v1  ;;  %vm591_vm15 = vweird.f32 %v1271_v55 }
 0x13c   : > { %v574_v61 = vsel %vm573_vm5, %v802_v14, %v570_v13  ;;  %680 = vst.msk [vmem:[%s1144_s5 + $0x48] sm:$0xff] %vm271_vm0, %v664_v59  ;;  %v812_v49 = vpop.eup %811  ;;  %v587_v51 = vmul.f32 %v810_v58, %v586_v0  ;;  %vm593_vm1 = vmor %vm591_vm15, %vm592_vm13  ;;  %vm611_vm3 = vweird.f32 %v1284_v38 }
 0x13d   : > { %v626_v4 = vmul.f32 %v574_v61, %v1030_v63  ;;  %v579_v32 = vsub.f32 1.5, %v578_v60  ;;  %v564_v42 = vsel %vm563_vm7, %v804_v56, %v560_v23  ;;  %v598_v50 = vmul.f32 0.5, %v597_v48 }
 0x13e   : > { %v625_v10 = vmul.f32 %v564_v42, %v1043_v5  ;;  %v606_v8 = vmul.f32 %v812_v49, %v1284_v38  ;;  %v588_v63 = vmul.f32 0.5, %v587_v51  ;;  %vm612_vm2 = vweird.f32 %v812_v49 }
 0x13f   : > { %v646_v53 = vmul.f32 %v1112_v54, %v626_v4  ;;  %v580_v20 = vmul.f32 %v806_v19, %v579_v32  ;;  %v599_v11 = vsub.f32 1.5, %v598_v50  ;;  %vm613_vm4 = vmor %vm611_vm3, %vm612_vm2 }
 0x140   : > { %v645_v31 = vmul.f32 %v1112_v54, %v625_v10  ;;  %v607_v44 = vmul.f32 %v812_v49, %v606_v8  ;;  %v589_v47 = vsub.f32 1.5, %v588_v63 }
 0x141   : > { %v666_v12 = vadd.f32 %v1129_v35, %v646_v53  ;;  %v584_v43 = vsel %vm583_vm10, %v806_v19, %v580_v20  ;;  %v600_v5 = vmul.f32 %v808_v45, %v599_v11 }
 0x142   : > { %v627_v21 = vmul.f32 %v584_v43, %v1057_v22  ;;  %v665_v29 = vadd.f32 %v1129_v35, %v645_v31  ;;  %v608_v26 = vmul.f32 0.5, %v607_v44  ;;  %v590_v30 = vmul.f32 %v810_v58, %v589_v47 }
 0x143   : > { %682 = vst.msk [vmem:[%s1144_s5 + $0x58] sm:$0xff] %vm271_vm0, %v666_v12  ;;  %v604_v7 = vsel %vm603_vm14, %v808_v45, %v600_v5 }
 0x144   : > { %v647_v14 = vmul.f32 %v1112_v54, %v627_v21  ;;  %681 = vst.msk [vmem:[%s1144_s5 + $0x50] sm:$0xff] %vm271_vm0, %v665_v29  ;;  %v629_v22 = vmul.f32 %v604_v7, %v1051_v17  ;;  %v609_v27 = vsub.f32 1.5, %v608_v26  ;;  %v594_v2 = vsel %vm593_vm1, %v810_v58, %v590_v30 }
 0x145   : > { %v628_v56 = vmul.f32 %v594_v2, %v1064_v25 }
 0x146   : > { %v667_v33 = vadd.f32 %v1129_v35, %v647_v14  ;;  %v649_v24 = vmul.f32 %v1112_v54, %v629_v22  ;;  %v610_v36 = vmul.f32 %v812_v49, %v609_v27 }
 0x147   : > { %v648_v55 = vmul.f32 %v1112_v54, %v628_v56 }
 0x148   : > { %683 = vst.msk [vmem:[%s1144_s5 + $0x60] sm:$0xff] %vm271_vm0, %v667_v33  ;;  %v669_v17 = vadd.f32 %v1129_v35, %v649_v24  ;;  %v614_v37 = vsel %vm613_vm4, %v812_v49, %v610_v36 }
 0x149   : > { %v630_v18 = vmul.f32 %v614_v37, %v1073_v34  ;;  %v668_v28 = vadd.f32 %v1129_v35, %v648_v55 }
 0x14a   : > { %685 = vst.msk [vmem:[%s1144_s5 + $0x70] sm:$0xff] %vm271_vm0, %v669_v17 }
 0x14b   : > { %v650_v9 = vmul.f32 %v1112_v54, %v630_v18  ;;  %684 = vst.msk [vmem:[%s1144_s5 + $0x68] sm:$0xff] %vm271_vm0, %v668_v28 }
 0x14d   : > { %v670_v25 = vadd.f32 %v1129_v35, %v650_v9 }
 0x14f   : > { %686 = vst.msk [vmem:[%s1144_s5 + $0x78] sm:$0xff] %vm271_vm0, %v670_v25 }
 0x150 PF: > { %s14_s15 = sadd.s32 1, %s819_s15  }
 0x151   : > { %p11_p4 = scmp.ge.s32.totalorder %s14_s15, 4  }
 0x153   :  { %13 = sbr.rel (!%p11_p4) target bundleno = 1 (0x1), region = 69 }

// kernel: sthg_former.14
= control target key start
LH: loop header
LB: loop body
LE: loop exit
PB: predicated region body
PF: predicated region fallthrough
CT: control target
= control target key end

     0   :  { %vm39_vm0 = vcmask 130048   ;;  %vm144_vm8 = vcmask 123904   ;;  %s252_s1 = inlined_call_operand.vmem [shape: f32[16,16], index: 1, kind: input, shape index: {}]   ;;  %s253_s0 = inlined_call_operand.vmem [shape: f32[2,16], index: 0, kind: input, shape index: {}]   ;;  %s254_s2 = inlined_call_operand.vmem [shape: f32[1,16], index: 2, kind: input, shape index: {}]   ;;  %s255_s5 = inlined_call_operand.vmem [shape: f32[1,16], index: 5, kind: input, shape index: {}]   ;;  %s256_s3 = inlined_call_operand.vmem [shape: f32[1,16], index: 3, kind: input, shape index: {}]   ;;  %s257_s4 = inlined_call_operand.vmem [shape: f32[1,16], index: 4, kind: input, shape index: {}]   ;;  %s258_s8 = inlined_call_operand.vmem [shape: f32[1,16], index: 8, kind: input, shape index: {}]   ;;  %s259_s6 = inlined_call_operand.vmem [shape: f32[1,16], index: 6, kind: input, shape index: {}]   ;;  %s260_s7 = inlined_call_operand.vmem [shape: f32[16,16], index: 7, kind: input, shape index: {}]   ;;  %s261_s9 = inlined_call_operand.vmem [shape: f32[2,16], index: 9, kind: output, shape index: {}]  }
   0x1   :  { %v34_v0 = vld [vmem:[%s252_s1 + $0x8] sm:$0xff]  ;;  %v33_v1 = vld [vmem:[%s252_s1] sm:$0xff] }
   0x2   :  { %57 = vmatpush.msra.mxu0 %v34_v0  ;;  %v32_v2 = vld [vmem:[%s253_s0] sm:$0x3]  ;;  %v96_v5 = vld [vmem:[%s260_s7 + $0x8] sm:$0xff] }
   0x3   :  { %v68_v3 = vld [vmem:[%s259_s6] sm:$0x1]  ;;  %118 = vmatpush.msra.mxu1 %v96_v5 }
   0x4   :  { %58 = vmatpush.msra.mxu0 %v33_v1  ;;  %v69_v4 = vadd.f32 1e-05, %v68_v3  ;;  %v95_v6 = vld [vmem:[%s260_s7] sm:$0xff] }
   0x5   :  { %150 = vmatmul.msk.f32.vlgmr.msra.gmra.mxu0 %vm39_vm0, %v32_v2  ;;  %119 = vmatpush.msra.mxu1 %v95_v6  ;;  %v153_v13 = vld [vmem:[%s254_s2] ss:$0 sm:$0xff] }
   0x6   :  { %158 = vrsqrt.f32 %v69_v4  ;;  %vm76_vm1 = vweird.f32 %v69_v4  ;;  %v154_v15 = vld [vmem:[%s255_s5] ss:$0 sm:$0xff] }
   0x7   :  { %v155_v20 = vld [vmem:[%s256_s3] ss:$0 sm:$0xff] }
   0x8   :  { %v156_v22 = vld [vmem:[%s257_s4] ss:$0 sm:$0xff] }
   0x9   :  { %v157_v26 = vld [vmem:[%s258_s8] ss:$0 sm:$0xff] }
   0xc   :  { %v159_v7 = vpop.eup %158 }
   0xd   :  { %v71_v8 = vmul.f32 %v159_v7, %v69_v4  ;;  %vm77_vm2 = vweird.f32 %v159_v7 }
   0xe   :  { %vm78_vm3 = vmor %vm76_vm1, %vm77_vm2 }
   0xf   :  { %v72_v9 = vmul.f32 %v159_v7, %v71_v8 }
  0x11   :  { %v73_v10 = vmul.f32 0.5, %v72_v9 }
  0x13   :  { %v74_v11 = vsub.f32 1.5, %v73_v10 }
  0x15   :  { %v75_v12 = vmul.f32 %v159_v7, %v74_v11 }
  0x17   :  { %v79_v14 = vsel %vm78_vm3, %v159_v7, %v75_v12 }
  0x18   :  { %v81_v18 = vperm.slane %v79_v14, 0 }
  0x82   :  { %v60_v16 = vpop.f32.mrf.mxu0 }
  0x83   :  { %v61_v17 = vadd.f32 %v153_v13, %v60_v16 }
  0x85   :  { %v67_v19 = vsub.f32 %v61_v17, %v154_v15 }
  0x87   :  { %v83_v21 = vmul.f32 %v81_v18, %v67_v19 }
  0x89   :  { %v88_v23 = vmul.f32 %v155_v20, %v83_v21 }
  0x8b   :  { %v93_v24 = vadd.f32 %v156_v22, %v88_v23 }
  0x8d   :  { %v94_v25 = vmax.f32 %v93_v24, 0.0 }
  0x8f   :  { %151 = vmatmul.msk.f32.vlgmr.msra.gmra.mxu1 %vm39_vm0, %v94_v25 }
 0x10c   :  { %v121_v27 = vpop.f32.mrf.mxu1 }
 0x10d   :  { %v122_v28 = vadd.f32 %v157_v26, %v121_v27 }
 0x10f   :  { %v152_v29 = vmul.f32 -1.442695, %v122_v28 }
 0x111   :  { %160 = vpow2.f32 %v152_v29 }
 0x117   :  { %v161_v30 = vpop.eup %160 }
 0x118   :  { %v127_v31 = vadd.f32 1.0, %v161_v30 }
 0x11a   :  { %162 = vrcp.f32 %v127_v31  ;;  %v139_v35 = vand.u32 2147483648, %v127_v31  ;;  %v137_v37 = vand.u32 2147483647, %v127_v31  ;;  %vm133_vm5 = vweird.f32 %v127_v31 }
 0x11c   :  { %v140_v39 = vor.u32 1.1754944e-38, %v139_v35  ;;  %vm138_vm7 = vcmp.eq.f32.partialorder %v137_v37, 8.507059e+37 }
 0x120   :  { %v163_v32 = vpop.eup %162 }
 0x121   :  { %v129_v33 = vmul.f32 %v163_v32, %v127_v31  ;;  %vm134_vm4 = vweird.f32 %v163_v32 }
 0x122   :  { %vm135_vm6 = vmor %vm133_vm5, %vm134_vm4 }
 0x123   :  { %v130_v34 = vsub.f32 1.0, %v129_v33 }
 0x125   :  { %v131_v36 = vmul.f32 %v163_v32, %v130_v34 }
 0x127   :  { %v132_v38 = vadd.f32 %v163_v32, %v131_v36 }
 0x129   :  { %v136_v40 = vsel %vm135_vm6, %v163_v32, %v132_v38 }
 0x12a   :  { %v141_v41 = vsel %vm138_vm7, %v140_v39, %v136_v40 }
 0x12b   :  { %v143_v42 = vmul.f32 %v141_v41, %v32_v2 }
 0x12d   :  { %145 = vst.msk [vmem:[%s261_s9] sm:$0x3] %vm144_vm8, %v143_v42 }

// kernel: sthg_former.17
= control target key start
LH: loop header
LB: loop body
LE: loop exit
PB: predicated region body
PF: predicated region fallthrough
CT: control target
= control target key end

     0   :  { %s847_s15 = smov 0   ;;  %s1345_s0 = inlined_call_operand.vmem [shape: f32[256,32], index: 0, kind: input, shape index: {}]   ;;  %s1346_s1 = inlined_call_operand.vmem [shape: f32[256,32], index: 1, kind: input, shape index: {}]   ;;  %s1347_s2 = inlined_call_operand.vmem [shape: f32[1,32], index: 2, kind: input, shape index: {}]   ;;  %s1348_s3 = inlined_call_operand.vmem [shape: f32[1,32], index: 3, kind: input, shape index: {}]   ;;  %s1349_s4 = inlined_call_operand.vmem [shape: f32[256,32], index: 4, kind: output, shape index: {}]  }
   0x1 LB: > { %s755_s16 = sadd.s32 4294967295, %s819_s15   ;;  %p759_p0 = scmp.ge.s32.totalorder %s819_s15, 1  ;;  %s819_s15 = sphi %s847_s15, %s14_s15  }
   0x2   : > { %p174_p1 = scmp.lt.s32.totalorder %s819_s15, 3 }
   0x4   : > { %p175_p2 = pnand %p759_p0, %p174_p1 }
   0x5   : > { %s760_s17 = sshll.u32 (!%p175_p2), %s755_s16, 4 }
   0x6   : > { %178 = sbr.rel (%p175_p2) target bundleno = 336 (0x150), region = 36  ;;  %p206_p3 = scmp.lt.s32.totalorder (!%p175_p2), %s760_s17, 31 }
   0xb   : > { %s1353_s17 = smov (!%p206_p3, %s760_s17), 31  ;;  %vm255_vm0 = vcmask 261120   ;;  %v821_v32 = vmov 32.0  }
   0xc   : > { %s855_s18 = sshll.u32 %s1353_s17, 3  ;;  %779 = vrcp.f32 %v821_v32 }
   0xd   : > { %s861_s21 = scalar_lea.vmem %s1345_s0, %s855_s18  ;;  %s1096_s26 = scalar_lea.vmem %s1346_s1, %s855_s18 }
   0xe   : > { %v864_v0 = vld [vmem:[%s861_s21 + $0x20] sm:$0xff]  ;;  %v225_v1 = vld [vmem:[%s861_s21 + $0x10] sm:$0xff]  ;;  %v873_v6 = vld [vmem:[%s861_s21 + $0x28] sm:$0xff]  ;;  %s1123_s5 = scalar_lea.vmem %s1349_s4, %s855_s18 }
   0xf   : > { %v223_v2 = vld [vmem:[%s861_s21] sm:$0xff]  ;;  %v268_v3 = vsel %vm255_vm0, %v864_v0, 0.0  ;;  %v262_v4 = vsel %vm255_vm0, %v225_v1, 0.0  ;;  %v876_v7 = vld [vmem:[%s861_s21 + $0x18] sm:$0xff]  ;;  %v879_v8 = vld [vmem:[%s861_s21 + $0x8] sm:$0xff]  ;;  %v271_v9 = vsel %vm255_vm0, %v873_v6, 0.0 }
  0x10   : > { %v256_v5 = vsel %vm255_vm0, %v223_v2, 0.0  ;;  %269 = vadd.xlane.f32.xlu2 %v268_v3  ;;  %263 = vadd.xlane.f32.xlu1 %v262_v4  ;;  %v265_v10 = vsel %vm255_vm0, %v876_v7, 0.0  ;;  %v259_v11 = vsel %vm255_vm0, %v879_v8, 0.0  ;;  %v888_v12 = vld [vmem:[%s861_s21 + $0x40] sm:$0xff]  ;;  %v891_v13 = vld [vmem:[%s861_s21 + $0x38] sm:$0xff]  ;;  %v894_v14 = vld [vmem:[%s861_s21 + $0x30] sm:$0xff] }
  0x11   : > { %257 = vadd.xlane.f32.xlu0 %v256_v5  ;;  %v280_v15 = vsel %vm255_vm0, %v888_v12, 0.0  ;;  %v277_v16 = vsel %vm255_vm0, %v891_v13, 0.0  ;;  %v274_v17 = vsel %vm255_vm0, %v894_v14, 0.0  ;;  %v903_v18 = vld [vmem:[%s861_s21 + $0x58] sm:$0xff]  ;;  %v906_v19 = vld [vmem:[%s861_s21 + $0x50] sm:$0xff]  ;;  %v909_v20 = vld [vmem:[%s861_s21 + $0x48] sm:$0xff] }
  0x12   : > { %v289_v21 = vsel %vm255_vm0, %v903_v18, 0.0  ;;  %v286_v22 = vsel %vm255_vm0, %v906_v19, 0.0  ;;  %v283_v23 = vsel %vm255_vm0, %v909_v20, 0.0  ;;  %v918_v24 = vld [vmem:[%s861_s21 + $0x70] sm:$0xff]  ;;  %v921_v25 = vld [vmem:[%s861_s21 + $0x68] sm:$0xff]  ;;  %v924_v26 = vld [vmem:[%s861_s21 + $0x60] sm:$0xff]  ;;  %v780_v33 = vpop.eup %779 }
  0x13   : > { %v298_v27 = vsel %vm255_vm0, %v918_v24, 0.0  ;;  %v295_v28 = vsel %vm255_vm0, %v921_v25, 0.0  ;;  %v292_v29 = vsel %vm255_vm0, %v924_v26, 0.0  ;;  %v933_v30 = vld [vmem:[%s861_s21 + $0x78] sm:$0xff]  ;;  %v305_v34 = vmul.f32 32.0, %v780_v33 }
  0x14   : > { %v301_v31 = vsel %vm255_vm0, %v933_v30, 0.0  ;;  %vm309_vm1 = vweird.f32 %v780_v33 }
  0x15   : > { %v306_v35 = vsub.f32 1.0, %v305_v34 }
  0x17   : > { %v307_v36 = vmul.f32 %v780_v33, %v306_v35 }
  0x18   : > { %272 = vadd.xlane.f32.xlu2 %v271_v9  ;;  %266 = vadd.xlane.f32.xlu1 %v265_v10 }
  0x19   : > { %260 = vadd.xlane.f32.xlu0 %v259_v11  ;;  %v308_v37 = vadd.f32 %v780_v33, %v307_v36 }
  0x1b   : > { %v937_v38 = vsel %vm309_vm1, %v780_v33, %v308_v37 }
  0x20   : > { %281 = vadd.xlane.f32.xlu2 %v280_v15  ;;  %278 = vadd.xlane.f32.xlu1 %v277_v16 }
  0x21   : > { %275 = vadd.xlane.f32.xlu0 %v274_v17 }
  0x28   : > { %290 = vadd.xlane.f32.xlu2 %v289_v21  ;;  %287 = vadd.xlane.f32.xlu1 %v286_v22 }
  0x29   : > { %284 = vadd.xlane.f32.xlu0 %v283_v23 }
  0x30   : > { %299 = vadd.xlane.f32.xlu2 %v298_v27  ;;  %296 = vadd.xlane.f32.xlu1 %v295_v28 }
  0x31   : > { %293 = vadd.xlane.f32.xlu0 %v292_v29 }
  0x39   : > { %302 = vadd.xlane.f32.xlu0 %v301_v31 }
  0x83   : > { %v270_v39 = vpop.xlane.xlu2 %269  ;;  %v264_v40 = vpop.xlane.xlu1 %263 }
  0x84   : > { %v313_v41 = vmul.f32 %v937_v38, %v264_v40  ;;  %v258_v42 = vpop.xlane.xlu0 %257  ;;  %v315_v58 = vmul.f32 %v937_v38, %v270_v39 }
  0x85   : > { %v311_v43 = vmul.f32 %v937_v38, %v258_v42 }
  0x86   : > { %v941_v44 = vsub.f32 %v225_v1, %v313_v41 }
  0x87   : > { %v943_v45 = vsub.f32 %v223_v2, %v311_v43  ;;  %v973_v2 = vsub.f32 %v864_v0, %v315_v58 }
  0x88   : > { %v345_v46 = vmul.f32 %v941_v44, %v941_v44 }
  0x89   : > { %v343_v47 = vmul.f32 %v943_v45, %v943_v45  ;;  %v347_v11 = vmul.f32 %v973_v2, %v973_v2 }
  0x8a   : > { %v365_v48 = vsel %vm255_vm0, %v345_v46, 0.0 }
  0x8b   : > { %v273_v49 = vpop.xlane.xlu2 %272  ;;  %v267_v50 = vpop.xlane.xlu1 %266  ;;  %366 = vadd.xlane.f32.xlu0 %v365_v48  ;;  %v359_v51 = vsel %vm255_vm0, %v343_v47, 0.0 }
  0x8c   : > { %v316_v52 = vmul.f32 %v937_v38, %v273_v49  ;;  %v314_v53 = vmul.f32 %v937_v38, %v267_v50  ;;  %360 = vadd.xlane.f32.xlu1 %v359_v51  ;;  %v261_v54 = vpop.xlane.xlu0 %260 }
  0x8d   : > { %v312_v55 = vmul.f32 %v937_v38, %v261_v54 }
  0x8e   : > { %v955_v56 = vsub.f32 %v873_v6, %v316_v52  ;;  %v958_v57 = vsub.f32 %v876_v7, %v314_v53 }
  0x8f   : > { %v962_v59 = vsub.f32 %v879_v8, %v312_v55 }
  0x90   : > { %v348_v60 = vmul.f32 %v955_v56, %v955_v56  ;;  %v346_v61 = vmul.f32 %v958_v57, %v958_v57 }
  0x91   : > { %v344_v62 = vmul.f32 %v962_v59, %v962_v59 }
  0x92   : > { %v374_v63 = vsel %vm255_vm0, %v348_v60, 0.0  ;;  %v368_v1 = vsel %vm255_vm0, %v346_v61, 0.0 }
  0x93   : > { %v282_v3 = vpop.xlane.xlu2 %281  ;;  %375 = vadd.xlane.f32.xlu0 %v374_v63  ;;  %v362_v4 = vsel %vm255_vm0, %v344_v62, 0.0  ;;  %v279_v5 = vpop.xlane.xlu1 %278 }
  0x94   : > { %v319_v6 = vmul.f32 %v937_v38, %v282_v3  ;;  %369 = vadd.xlane.f32.xlu1 %v368_v1  ;;  %363 = vadd.xlane.f32.xlu2 %v362_v4  ;;  %v276_v7 = vpop.xlane.xlu0 %275  ;;  %v318_v9 = vmul.f32 %v937_v38, %v279_v5 }
  0x95   : > { %v317_v8 = vmul.f32 %v937_v38, %v276_v7 }
  0x96   : > { %v980_v10 = vsub.f32 %v888_v12, %v319_v6  ;;  %v990_v16 = vsub.f32 %v891_v13, %v318_v9  ;;  %v371_v12 = vsel %vm255_vm0, %v347_v11, 0.0 }
  0x97   : > { %v983_v0 = vsub.f32 %v894_v14, %v317_v8 }
  0x98   : > { %v351_v15 = vmul.f32 %v980_v10, %v980_v10  ;;  %v350_v31 = vmul.f32 %v990_v16, %v990_v16 }
  0x99   : > { %v349_v17 = vmul.f32 %v983_v0, %v983_v0 }
  0x9a   : > { %v383_v21 = vsel %vm255_vm0, %v351_v15, 0.0  ;;  %v380_v36 = vsel %vm255_vm0, %v350_v31, 0.0 }
  0x9b   : > { %v291_v22 = vpop.xlane.xlu2 %290  ;;  %384 = vadd.xlane.f32.xlu0 %v383_v21  ;;  %v377_v14 = vsel %vm255_vm0, %v349_v17, 0.0  ;;  %v288_v23 = vpop.xlane.xlu1 %287 }
  0x9c   : > { %v322_v27 = vmul.f32 %v937_v38, %v291_v22  ;;  %372 = vadd.xlane.f32.xlu2 %v371_v12  ;;  %378 = vadd.xlane.f32.xlu1 %v377_v14  ;;  %v285_v28 = vpop.xlane.xlu0 %284  ;;  %v321_v29 = vmul.f32 %v937_v38, %v288_v23 }
  0x9d   : > { %v320_v13 = vmul.f32 %v937_v38, %v285_v28 }
  0x9e   : > { %v1003_v32 = vsub.f32 %v903_v18, %v322_v27  ;;  %v1011_v35 = vsub.f32 %v906_v19, %v321_v29 }
  0x9f   : > { %v1006_v33 = vsub.f32 %v909_v20, %v320_v13 }
  0xa0   : > { %v354_v34 = vmul.f32 %v1003_v32, %v1003_v32  ;;  %v353_v46 = vmul.f32 %v1011_v35, %v1011_v35 }
  0xa1   : > { %v352_v37 = vmul.f32 %v1006_v33, %v1006_v33 }
  0xa2   : > { %v392_v39 = vsel %vm255_vm0, %v354_v34, 0.0  ;;  %v389_v51 = vsel %vm255_vm0, %v353_v46, 0.0 }
  0xa3   : > { %v300_v40 = vpop.xlane.xlu2 %299  ;;  %393 = vadd.xlane.f32.xlu0 %v392_v39  ;;  %v386_v18 = vsel %vm255_vm0, %v352_v37, 0.0  ;;  %v297_v41 = vpop.xlane.xlu1 %296 }
  0xa4   : > { %v325_v20 = vmul.f32 %v937_v38, %v300_v40  ;;  %381 = vadd.xlane.f32.xlu2 %v380_v36  ;;  %387 = vadd.xlane.f32.xlu1 %v386_v18  ;;  %v294_v42 = vpop.xlane.xlu0 %293  ;;  %v324_v43 = vmul.f32 %v937_v38, %v297_v41 }
  0xa5   : > { %v323_v19 = vmul.f32 %v937_v38, %v294_v42 }
  0xa6   : > { %v1024_v47 = vsub.f32 %v918_v24, %v325_v20  ;;  %v1032_v50 = vsub.f32 %v921_v25, %v324_v43 }
  0xa7   : > { %v1027_v48 = vsub.f32 %v924_v26, %v323_v19 }
  0xa8   : > { %v357_v49 = vmul.f32 %v1024_v47, %v1024_v47  ;;  %v356_v55 = vmul.f32 %v1032_v50, %v1032_v50 }
  0xa9   : > { %v355_v52 = vmul.f32 %v1027_v48, %v1027_v48 }
  0xaa   : > { %v401_v53 = vsel %vm255_vm0, %v357_v49, 0.0  ;;  %v398_v58 = vsel %vm255_vm0, %v356_v55, 0.0 }
  0xab   : > { %402 = vadd.xlane.f32.xlu0 %v401_v53  ;;  %v395_v24 = vsel %vm255_vm0, %v355_v52, 0.0 }
  0xac   : > { %390 = vadd.xlane.f32.xlu2 %v389_v51  ;;  %396 = vadd.xlane.f32.xlu1 %v395_v24  ;;  %v303_v26 = vpop.xlane.xlu0 %302  ;;  %v1079_v51 = vld [vmem:[%s1347_s2] ss:$0 sm:$0xff] }
  0xad   : > { %v326_v54 = vmul.f32 %v937_v38, %v303_v26 }
  0xaf   : > { %v1043_v25 = vsub.f32 %v933_v30, %v326_v54 }
  0xb1   : > { %v358_v60 = vmul.f32 %v1043_v25, %v1043_v25 }
  0xb3   : > { %v404_v61 = vsel %vm255_vm0, %v358_v60, 0.0  ;;  %v1101_v60 = vld [vmem:[%s1348_s3] ss:$0 sm:$0xff] }
  0xb4   : > { %399 = vadd.xlane.f32.xlu2 %v398_v58  ;;  %405 = vadd.xlane.f32.xlu1 %v404_v61 }
  0xfe   : > { %v367_v62 = vpop.xlane.xlu0 %366 }
  0xff   : > { %v361_v63 = vpop.xlane.xlu1 %360  ;;  %v409_v1 = vmul.f32 %v367_v62, %v937_v38 }
 0x100   : > { %v407_v3 = vmul.f32 %v361_v63, %v937_v38 }
 0x101   : > { %v425_v4 = vadd.f32 1e-05, %v409_v1 }
 0x102   : > { %v423_v5 = vadd.f32 1e-05, %v407_v3 }
 0x103   : > { %781 = vrsqrt.f32 %v425_v4  ;;  %vm465_vm4 = vweird.f32 %v425_v4 }
 0x104   : > { %783 = vrsqrt.f32 %v423_v5  ;;  %vm445_vm5 = vweird.f32 %v423_v5 }
 0x106   : > { %v376_v30 = vpop.xlane.xlu0 %375 }
 0x107   : > { %v370_v6 = vpop.xlane.xlu1 %369  ;;  %v364_v7 = vpop.xlane.xlu2 %363  ;;  %v412_v8 = vmul.f32 %v376_v30, %v937_v38 }
 0x108   : > { %v410_v9 = vmul.f32 %v370_v6, %v937_v38  ;;  %v408_v11 = vmul.f32 %v364_v7, %v937_v38  ;;  %v241_v7 = vld [vmem:[%s1096_s26 + $0x10] sm:$0xff] }
 0x109   : > { %v782_v15 = vpop.eup %781  ;;  %v1054_v17 = vadd.f32 1e-05, %v412_v8 }
 0x10a   : > { %v784_v21 = vpop.eup %783  ;;  %v460_v22 = vmul.f32 %v782_v15, %v425_v4  ;;  %v1056_v12 = vadd.f32 1e-05, %v410_v9  ;;  %v1058_v14 = vadd.f32 1e-05, %v408_v11  ;;  %vm466_vm2 = vweird.f32 %v782_v15 }
 0x10b   : > { %v440_v23 = vmul.f32 %v784_v21, %v423_v5  ;;  %785 = vrsqrt.f32 %v1054_v17  ;;  %vm446_vm3 = vweird.f32 %v784_v21  ;;  %vm467_vm6 = vmor %vm465_vm4, %vm466_vm2  ;;  %vm495_vm7 = vweird.f32 %v1054_v17 }
 0x10c   : > { %v461_v27 = vmul.f32 %v782_v15, %v460_v22  ;;  %787 = vrsqrt.f32 %v1056_v12  ;;  %vm447_vm8 = vmor %vm445_vm5, %vm446_vm3  ;;  %vm475_vm9 = vweird.f32 %v1056_v12  ;;  %vm455_vm13 = vweird.f32 %v1058_v14 }
 0x10d   : > { %v441_v28 = vmul.f32 %v784_v21, %v440_v23  ;;  %789 = vrsqrt.f32 %v1058_v14 }
 0x10e   : > { %v462_v13 = vmul.f32 0.5, %v461_v27  ;;  %v385_v29 = vpop.xlane.xlu0 %384 }
 0x10f   : > { %v442_v31 = vmul.f32 0.5, %v441_v28  ;;  %v373_v34 = vpop.xlane.xlu2 %372  ;;  %v379_v36 = vpop.xlane.xlu1 %378  ;;  %v415_v18 = vmul.f32 %v385_v29, %v937_v38 }
 0x110   : > { %v463_v37 = vsub.f32 1.5, %v462_v13  ;;  %v411_v39 = vmul.f32 %v373_v34, %v937_v38  ;;  %v413_v40 = vmul.f32 %v379_v36, %v937_v38 }
 0x111   : > { %v1066_v41 = vpop.eup %785  ;;  %v443_v20 = vsub.f32 1.5, %v442_v31  ;;  %v1090_v58 = vadd.f32 1e-05, %v415_v18 }
 0x112   : > { %v1068_v42 = vpop.eup %787  ;;  %v464_v19 = vmul.f32 %v782_v15, %v463_v37  ;;  %v490_v43 = vmul.f32 %v1066_v41, %v1054_v17  ;;  %v1072_v46 = vadd.f32 1e-05, %v411_v39  ;;  %v1085_v24 = vadd.f32 1e-05, %v413_v40 }
 0x113   : > { %v1074_v49 = vpop.eup %789  ;;  %v444_v52 = vmul.f32 %v784_v21, %v443_v20  ;;  %v470_v53 = vmul.f32 %v1068_v42, %v1056_v12  ;;  %vm496_vm10 = vweird.f32 %v1066_v41  ;;  %vm476_vm11 = vweird.f32 %v1068_v42 }
 0x114   : > { %v468_v26 = vsel %vm467_vm6, %v782_v15, %v464_v19  ;;  %v450_v54 = vmul.f32 %v1074_v49, %v1058_v14  ;;  %v491_v55 = vmul.f32 %v1066_v41, %v490_v43  ;;  %791 = vrsqrt.f32 %v1072_v46  ;;  %vm497_vm14 = vmor %vm495_vm7, %vm496_vm10 }
 0x115   : > { %v448_v61 = vsel %vm447_vm8, %v784_v21, %v444_v52  ;;  %v601_v62 = vmul.f32 %v468_v26, %v941_v44  ;;  %v471_v63 = vmul.f32 %v1068_v42, %v470_v53  ;;  %793 = vrsqrt.f32 %v1085_v24  ;;  %vm1142_vm15 = vmor %vm475_vm9, %vm476_vm11 }
 0x116   : > { %v599_v1 = vmul.f32 %v448_v61, %v943_v45  ;;  %v451_v3 = vmul.f32 %v1074_v49, %v450_v54  ;;  %v492_v4 = vmul.f32 0.5, %v491_v55  ;;  %795 = vrsqrt.f32 %v1090_v58  ;;  %v239_v45 = vld [vmem:[%s1096_s26] sm:$0xff]  ;;  %v394_v40 = vpop.xlane.xlu0 %393 }
 0x117   : > { %v621_v5 = vmul.f32 %v1079_v51, %v601_v62  ;;  %v472_v30 = vmul.f32 0.5, %v471_v63  ;;  %v382_v44 = vpop.xlane.xlu2 %381  ;;  %vm456_vm12 = vweird.f32 %v1074_v49  ;;  %v388_v28 = vpop.xlane.xlu1 %387  ;;  %vm485_vm1 = vweird.f32 %v1072_v46 }
 0x118   : > { %v619_v6 = vmul.f32 %v1079_v51, %v599_v1  ;;  %v452_v8 = vmul.f32 0.5, %v451_v3  ;;  %v493_v9 = vsub.f32 1.5, %v492_v4  ;;  %v414_v21 = vmul.f32 %v382_v44, %v937_v38  ;;  %vm457_vm2 = vmor %vm455_vm13, %vm456_vm12  ;;  %v242_v1 = vld [vmem:[%s1096_s26 + $0x18] sm:$0xff] }
 0x119   : > { %v641_v11 = vadd.f32 %v1101_v60, %v621_v5  ;;  %v473_v15 = vsub.f32 1.5, %v472_v30  ;;  %vm525_vm3 = vweird.f32 %v1090_v58  ;;  %v416_v20 = vmul.f32 %v388_v28, %v937_v38  ;;  %v240_v30 = vld [vmem:[%s1096_s26 + $0x8] sm:$0xff] }
 0x11a   : > { %v639_v22 = vadd.f32 %v1101_v60, %v619_v6  ;;  %v453_v23 = vsub.f32 1.5, %v452_v8  ;;  %v494_v27 = vmul.f32 %v1066_v41, %v493_v9  ;;  %v1128_v13 = vpop.eup %791  ;;  %v1136_v34 = vadd.f32 1e-05, %v414_v21 }
 0x11b   : > { %v657_v29 = vadd.f32 %v641_v11, %v241_v7  ;;  %v474_v31 = vmul.f32 %v1068_v42, %v473_v15  ;;  %v480_v17 = vmul.f32 %v1128_v13, %v1072_v46  ;;  %v1151_v18 = vpop.eup %793  ;;  %v418_v55 = vmul.f32 %v394_v40, %v937_v38 }
 0x11c   : > { %v655_v36 = vadd.f32 %v639_v22, %v239_v45  ;;  %v454_v39 = vmul.f32 %v1074_v49, %v453_v23  ;;  %v498_v14 = vsel %vm497_vm14, %v1066_v41, %v494_v27  ;;  %797 = vrsqrt.f32 %v1136_v34  ;;  %v1164_v19 = vpop.eup %795 }
 0x11d   : > { %673 = vst.msk [vmem:[%s1123_s5 + $0x10] sm:$0xff] %vm255_vm0, %v657_v29  ;;  %v478_v12 = vsel %vm1142_vm15, %v1068_v42, %v474_v31  ;;  %v604_v41 = vmul.f32 %v498_v14, %v955_v56  ;;  %v481_v52 = vmul.f32 %v1128_v13, %v480_v17  ;;  %v500_v56 = vmul.f32 %v1151_v18, %v1085_v24 }
 0x11e   : > { %671 = vst.msk [vmem:[%s1123_s5] sm:$0xff] %vm255_vm0, %v655_v36  ;;  %v602_v43 = vmul.f32 %v478_v12, %v958_v57  ;;  %v458_v42 = vsel %vm457_vm2, %v1074_v49, %v454_v39  ;;  %v520_v54 = vmul.f32 %v1164_v19, %v1090_v58  ;;  %v244_v57 = vld [vmem:[%s1096_s26 + $0x28] sm:$0xff]  ;;  %vm486_vm4 = vweird.f32 %v1128_v13  ;;  %v403_v14 = vpop.xlane.xlu0 %402 }
 0x11f   : > { %v600_v53 = vmul.f32 %v458_v42, %v962_v59  ;;  %v624_v26 = vmul.f32 %v1079_v51, %v604_v41  ;;  %v482_v62 = vmul.f32 0.5, %v481_v52  ;;  %v501_v49 = vmul.f32 %v1151_v18, %v500_v56  ;;  %v391_v63 = vpop.xlane.xlu2 %390  ;;  %vm487_vm6 = vmor %vm485_vm1, %vm486_vm4  ;;  %v397_v31 = vpop.xlane.xlu1 %396 }
 0x120   : > { %v622_v61 = vmul.f32 %v1079_v51, %v602_v43  ;;  %vm506_vm5 = vweird.f32 %v1151_v18  ;;  %v521_v4 = vmul.f32 %v1164_v19, %v520_v54  ;;  %v1189_v7 = vadd.f32 1e-05, %v416_v20 }
 0x121   : > { %v620_v59 = vmul.f32 %v1079_v51, %v600_v53  ;;  %v644_v3 = vadd.f32 %v1101_v60, %v624_v26  ;;  %v483_v44 = vsub.f32 1.5, %v482_v62  ;;  %v502_v6 = vmul.f32 0.5, %v501_v49 }
 0x122   : > { %v642_v5 = vadd.f32 %v1101_v60, %v622_v61  ;;  %v1191_v8 = vpop.eup %797  ;;  %v522_v11 = vmul.f32 0.5, %v521_v4  ;;  %v1194_v15 = vadd.f32 1e-05, %v418_v55  ;;  %vm526_vm7 = vweird.f32 %v1164_v19 }
 0x123   : > { %v640_v9 = vadd.f32 %v1101_v60, %v620_v59  ;;  %v660_v45 = vadd.f32 %v644_v3, %v244_v57  ;;  %v484_v22 = vmul.f32 %v1128_v13, %v483_v44  ;;  %v503_v23 = vsub.f32 1.5, %v502_v6  ;;  %vm527_vm10 = vmor %vm525_vm3, %vm526_vm7 }
 0x124   : > { %v658_v21 = vadd.f32 %v642_v5, %v242_v1  ;;  %v510_v27 = vmul.f32 %v1191_v8, %v1136_v34  ;;  %v523_v29 = vsub.f32 1.5, %v522_v11  ;;  %799 = vrsqrt.f32 %v1189_v7  ;;  %v247_v1 = vld [vmem:[%s1096_s26 + $0x40] sm:$0xff] }
 0x125   : > { %v656_v28 = vadd.f32 %v640_v9, %v240_v30  ;;  %676 = vst.msk [vmem:[%s1123_s5 + $0x28] sm:$0xff] %vm255_vm0, %v660_v45  ;;  %v488_v36 = vsel %vm487_vm6, %v1128_v13, %v484_v22  ;;  %v504_v37 = vmul.f32 %v1151_v18, %v503_v23  ;;  %vm505_vm8 = vweird.f32 %v1085_v24  ;;  %v246_v22 = vld [vmem:[%s1096_s26 + $0x38] sm:$0xff] }
 0x126   : > { %674 = vst.msk [vmem:[%s1123_s5 + $0x18] sm:$0xff] %vm255_vm0, %v658_v21  ;;  %v511_v39 = vmul.f32 %v1191_v8, %v510_v27  ;;  %v603_v46 = vmul.f32 %v488_v36, %v973_v2  ;;  %vm507_vm9 = vmor %vm505_vm8, %vm506_vm5  ;;  %v524_v17 = vmul.f32 %v1164_v19, %v523_v29  ;;  %801 = vrsqrt.f32 %v1194_v15 }
 0x127   : > { %672 = vst.msk [vmem:[%s1123_s5 + $0x8] sm:$0xff] %vm255_vm0, %v656_v28  ;;  %v508_v13 = vsel %vm507_vm9, %v1151_v18, %v504_v37  ;;  %v417_v40 = vmul.f32 %v391_v63, %v937_v38  ;;  %v419_v12 = vmul.f32 %v397_v31, %v937_v38  ;;  %v421_v43 = vmul.f32 %v403_v14, %v937_v38  ;;  %v243_v18 = vld [vmem:[%s1096_s26 + $0x20] sm:$0xff]  ;;  %v400_v56 = vpop.xlane.xlu2 %399  ;;  %v406_v6 = vpop.xlane.xlu1 %405 }
 0x128   : > { %v512_v24 = vmul.f32 0.5, %v511_v39  ;;  %v623_v2 = vmul.f32 %v1079_v51, %v603_v46  ;;  %v605_v41 = vmul.f32 %v508_v13, %v983_v0  ;;  %v528_v20 = vsel %vm527_vm10, %v1164_v19, %v524_v17  ;;  %v245_v19 = vld [vmem:[%s1096_s26 + $0x30] sm:$0xff] }
 0x129   : > { %v607_v42 = vmul.f32 %v528_v20, %v980_v10  ;;  %vm516_vm11 = vweird.f32 %v1191_v8  ;;  %v1234_v58 = vadd.f32 1e-05, %v417_v40  ;;  %vm515_vm12 = vweird.f32 %v1136_v34 }
 0x12a   : > { %v513_v52 = vsub.f32 1.5, %v512_v24  ;;  %v800_v53 = vpop.eup %799  ;;  %v643_v26 = vadd.f32 %v1101_v60, %v623_v2  ;;  %v625_v54 = vmul.f32 %v1079_v51, %v605_v41  ;;  %v1239_v0 = vadd.f32 1e-05, %v419_v12  ;;  %vm517_vm13 = vmor %vm515_vm12, %vm516_vm11 }
 0x12b   : > { %v627_v10 = vmul.f32 %v1079_v51, %v607_v42  ;;  %v530_v61 = vmul.f32 %v800_v53, %v1189_v7  ;;  %v1245_v57 = vadd.f32 1e-05, %v421_v43  ;;  %803 = vrsqrt.f32 %v1234_v58 }
 0x12c   : > { %v514_v55 = vmul.f32 %v1191_v8, %v513_v52  ;;  %v802_v62 = vpop.eup %801  ;;  %v659_v49 = vadd.f32 %v643_v26, %v243_v18  ;;  %v645_v63 = vadd.f32 %v1101_v60, %v625_v54  ;;  %v420_v34 = vmul.f32 %v400_v56, %v937_v38 }
 0x12d   : > { %v647_v59 = vadd.f32 %v1101_v60, %v627_v10  ;;  %v531_v4 = vmul.f32 %v800_v53, %v530_v61  ;;  %v550_v5 = vmul.f32 %v802_v62, %v1194_v15  ;;  %805 = vrsqrt.f32 %v1239_v0 }
 0x12e   : > { %v518_v3 = vsel %vm517_vm13, %v1191_v8, %v514_v55  ;;  %675 = vst.msk [vmem:[%s1123_s5 + $0x20] sm:$0xff] %vm255_vm0, %v659_v49  ;;  %v661_v30 = vadd.f32 %v645_v63, %v245_v19  ;;  %807 = vrsqrt.f32 %v1245_v57  ;;  %v1264_v8 = vadd.f32 1e-05, %v420_v34  ;;  %v250_v19 = vld [vmem:[%s1096_s26 + $0x58] sm:$0xff] }
 0x12f   : > { %v606_v44 = vmul.f32 %v518_v3, %v990_v16  ;;  %v663_v9 = vadd.f32 %v647_v59, %v247_v1  ;;  %v532_v45 = vmul.f32 0.5, %v531_v4  ;;  %v551_v11 = vmul.f32 %v802_v62, %v550_v5 }
 0x130   : > { %677 = vst.msk [vmem:[%s1123_s5 + $0x30] sm:$0xff] %vm255_vm0, %v661_v30  ;;  %vm536_vm14 = vweird.f32 %v800_v53  ;;  %v422_v27 = vmul.f32 %v406_v6, %v937_v38  ;;  %vm535_vm15 = vweird.f32 %v1189_v7  ;;  %vm555_vm1 = vweird.f32 %v1194_v15 }
 0x131   : > { %v626_v21 = vmul.f32 %v1079_v51, %v606_v44  ;;  %679 = vst.msk [vmem:[%s1123_s5 + $0x40] sm:$0xff] %vm255_vm0, %v663_v9  ;;  %v533_v23 = vsub.f32 1.5, %v532_v45  ;;  %v552_v16 = vmul.f32 0.5, %v551_v11  ;;  %v804_v28 = vpop.eup %803  ;;  %809 = vrsqrt.f32 %v1264_v8  ;;  %vm537_vm3 = vmor %vm535_vm15, %vm536_vm14 }
 0x132   : > { %vm556_vm2 = vweird.f32 %v802_v62  ;;  %v540_v37 = vmul.f32 %v804_v28, %v1234_v58  ;;  %v1275_v46 = vadd.f32 1e-05, %v422_v27  ;;  %vm545_vm5 = vweird.f32 %v1234_v58  ;;  %v251_v27 = vld [vmem:[%s1096_s26 + $0x60] sm:$0xff] }
 0x133   : > { %v646_v29 = vadd.f32 %v1101_v60, %v626_v21  ;;  %v534_v31 = vmul.f32 %v800_v53, %v533_v23  ;;  %v553_v36 = vsub.f32 1.5, %v552_v16  ;;  %v806_v39 = vpop.eup %805  ;;  %vm557_vm4 = vmor %vm555_vm1, %vm556_vm2  ;;  %vm546_vm6 = vweird.f32 %v804_v28 }
 0x134   : > { %v541_v13 = vmul.f32 %v804_v28, %v540_v37  ;;  %v560_v7 = vmul.f32 %v806_v39, %v1239_v0  ;;  %v808_v24 = vpop.eup %807  ;;  %811 = vrsqrt.f32 %v1275_v46  ;;  %vm565_vm7 = vweird.f32 %v1239_v0  ;;  %vm547_vm9 = vmor %vm545_vm5, %vm546_vm6  ;;  %v249_v0 = vld [vmem:[%s1096_s26 + $0x50] sm:$0xff] }
 0x135   : > { %v662_v14 = vadd.f32 %v646_v29, %v246_v22  ;;  %v538_v38 = vsel %vm537_vm3, %v800_v53, %v534_v31  ;;  %v554_v17 = vmul.f32 %v802_v62, %v553_v36  ;;  %v580_v20 = vmul.f32 %v808_v24, %v1245_v57 }
 0x136   : > { %v608_v40 = vmul.f32 %v538_v38, %v1006_v33  ;;  %v542_v2 = vmul.f32 0.5, %v541_v13  ;;  %v561_v41 = vmul.f32 %v806_v39, %v560_v7  ;;  %v248_v33 = vld [vmem:[%s1096_s26 + $0x48] sm:$0xff]  ;;  %vm566_vm8 = vweird.f32 %v806_v39 }
 0x137   : > { %678 = vst.msk [vmem:[%s1123_s5 + $0x38] sm:$0xff] %vm255_vm0, %v662_v14  ;;  %v558_v12 = vsel %vm557_vm4, %v802_v62, %v554_v17  ;;  %v810_v43 = vpop.eup %809  ;;  %v581_v56 = vmul.f32 %v808_v24, %v580_v20  ;;  %vm585_vm10 = vweird.f32 %v1245_v57  ;;  %vm586_vm11 = vweird.f32 %v808_v24  ;;  %vm567_vm12 = vmor %vm565_vm7, %vm566_vm8  ;;  %v252_v38 = vld [vmem:[%s1096_s26 + $0x68] sm:$0xff] }
 0x138   : > { %v628_v18 = vmul.f32 %v1079_v51, %v608_v40  ;;  %v610_v42 = vmul.f32 %v558_v12, %v1003_v32  ;;  %v543_v52 = vsub.f32 1.5, %v542_v2  ;;  %v562_v15 = vmul.f32 0.5, %v561_v41  ;;  %vm587_vm14 = vmor %vm585_vm10, %vm586_vm11  ;;  %v254_v2 = vld [vmem:[%s1096_s26 + $0x78] sm:$0xff] }
 0x139   : > { %v570_v53 = vmul.f32 %v810_v43, %v1264_v8  ;;  %v582_v55 = vmul.f32 0.5, %v581_v56  ;;  %vm576_vm13 = vweird.f32 %v810_v43  ;;  %vm575_vm15 = vweird.f32 %v1264_v8  ;;  %v253_v8 = vld [vmem:[%s1096_s26 + $0x70] sm:$0xff] }
 0x13a   : > { %v648_v26 = vadd.f32 %v1101_v60, %v628_v18  ;;  %v630_v54 = vmul.f32 %v1079_v51, %v610_v42  ;;  %v544_v10 = vmul.f32 %v804_v28, %v543_v52  ;;  %v563_v32 = vsub.f32 1.5, %v562_v15  ;;  %v812_v62 = vpop.eup %811  ;;  %vm577_vm1 = vmor %vm575_vm15, %vm576_vm13 }
 0x13b   : > { %v571_v61 = vmul.f32 %v810_v43, %v570_v53  ;;  %v583_v59 = vsub.f32 1.5, %v582_v55  ;;  %v590_v58 = vmul.f32 %v812_v62, %v1275_v46  ;;  %vm596_vm2 = vweird.f32 %v812_v62 }
 0x13c   : > { %v664_v49 = vadd.f32 %v648_v26, %v248_v33  ;;  %v650_v63 = vadd.f32 %v1101_v60, %v630_v54  ;;  %v548_v1 = vsel %vm547_vm9, %v804_v28, %v544_v10  ;;  %v564_v34 = vmul.f32 %v806_v39, %v563_v32 }
 0x13d   : > { %v572_v3 = vmul.f32 0.5, %v571_v61  ;;  %v609_v5 = vmul.f32 %v548_v1, %v1011_v35  ;;  %v584_v44 = vmul.f32 %v808_v24, %v583_v59  ;;  %v591_v35 = vmul.f32 %v812_v62, %v590_v58 }
 0x13e   : > { %680 = vst.msk [vmem:[%s1123_s5 + $0x48] sm:$0xff] %vm255_vm0, %v664_v49  ;;  %v666_v4 = vadd.f32 %v650_v63, %v250_v19  ;;  %v568_v30 = vsel %vm567_vm12, %v806_v39, %v564_v34  ;;  %vm595_vm3 = vweird.f32 %v1275_v46 }
 0x13f   : > { %v573_v6 = vsub.f32 1.5, %v572_v3  ;;  %v629_v9 = vmul.f32 %v1079_v51, %v609_v5  ;;  %v611_v45 = vmul.f32 %v568_v30, %v1027_v48  ;;  %v588_v11 = vsel %vm587_vm14, %v808_v24, %v584_v44  ;;  %vm597_vm4 = vmor %vm595_vm3, %vm596_vm2 }
 0x140   : > { %682 = vst.msk [vmem:[%s1123_s5 + $0x58] sm:$0xff] %vm255_vm0, %v666_v4  ;;  %v613_v16 = vmul.f32 %v588_v11, %v1024_v47  ;;  %v592_v48 = vmul.f32 0.5, %v591_v35 }
 0x141   : > { %v574_v21 = vmul.f32 %v810_v43, %v573_v6  ;;  %v649_v22 = vadd.f32 %v1101_v60, %v629_v9  ;;  %v631_v23 = vmul.f32 %v1079_v51, %v611_v45 }
 0x142   : > { %v633_v31 = vmul.f32 %v1079_v51, %v613_v16  ;;  %v593_v37 = vsub.f32 1.5, %v592_v48 }
 0x143   : > { %v578_v57 = vsel %vm577_vm1, %v810_v43, %v574_v21  ;;  %v665_v28 = vadd.f32 %v649_v22, %v249_v0  ;;  %v651_v29 = vadd.f32 %v1101_v60, %v631_v23 }
 0x144   : > { %v612_v36 = vmul.f32 %v578_v57, %v1032_v50  ;;  %v653_v39 = vadd.f32 %v1101_v60, %v633_v31  ;;  %v594_v17 = vmul.f32 %v812_v62, %v593_v37 }
 0x145   : > { %681 = vst.msk [vmem:[%s1123_s5 + $0x50] sm:$0xff] %vm255_vm0, %v665_v28  ;;  %v667_v47 = vadd.f32 %v651_v29, %v251_v27 }
 0x146   : > { %v632_v14 = vmul.f32 %v1079_v51, %v612_v36  ;;  %v669_v50 = vadd.f32 %v653_v39, %v253_v8  ;;  %v598_v7 = vsel %vm597_vm4, %v812_v62, %v594_v17 }
 0x147   : > { %683 = vst.msk [vmem:[%s1123_s5 + $0x60] sm:$0xff] %vm255_vm0, %v667_v47  ;;  %v614_v40 = vmul.f32 %v598_v7, %v1043_v25 }
 0x148   : > { %v652_v13 = vadd.f32 %v1101_v60, %v632_v14  ;;  %685 = vst.msk [vmem:[%s1123_s5 + $0x70] sm:$0xff] %vm255_vm0, %v669_v50 }
 0x149   : > { %v634_v12 = vmul.f32 %v1079_v51, %v614_v40 }
 0x14a   : > { %v668_v24 = vadd.f32 %v652_v13, %v252_v38 }
 0x14b   : > { %v654_v41 = vadd.f32 %v1101_v60, %v634_v12 }
 0x14c   : > { %684 = vst.msk [vmem:[%s1123_s5 + $0x68] sm:$0xff] %vm255_vm0, %v668_v24 }
 0x14d   : > { %v670_v46 = vadd.f32 %v654_v41, %v254_v2 }
 0x14f   : > { %686 = vst.msk [vmem:[%s1123_s5 + $0x78] sm:$0xff] %vm255_vm0, %v670_v46 }
 0x150 PF: > { %s14_s15 = sadd.s32 1, %s819_s15  }
 0x151   : > { %p11_p4 = scmp.ge.s32.totalorder %s14_s15, 4  }
 0x153   :  { %13 = sbr.rel (!%p11_p4) target bundleno = 1 (0x1), region = 69 }

// kernel: sthg_former.18
= control target key start
LH: loop header
LB: loop body
LE: loop exit
PB: predicated region body
PF: predicated region fallthrough
CT: control target
= control target key end

     0   :  { %v251_v2 = vmov 0   ;;  %vm58_vm0 = vcmask 261120   ;;  %vm185_vm1 = vcmask 1041409   ;;  %vm187_vm2 = vcmask 1042434   ;;  %s386_s0 = inlined_call_operand.vmem [shape: f32[16,8,32], index: 0, kind: input, shape index: {}]   ;;  %s387_s1 = inlined_call_operand.vmem [shape: f32[1,32], index: 1, kind: input, shape index: {}]   ;;  %s388_s2 = inlined_call_operand.<no memory space> [shape: f32[1,1], index: 2, kind: input, shape index: {}]   ;;  %s389_s4 = inlined_call_operand.vmem [shape: f32[1,4], index: 4, kind: input, shape index: {}]   ;;  %s390_s3 = inlined_call_operand.vmem [shape: f32[8,4], index: 3, kind: input, shape index: {}]   ;;  %s391_s5 = inlined_call_operand.vmem [shape: f32[16,4], index: 5, kind: output, shape index: {}]  }
   0x1   :  { %v30_v0 = vld [vmem:[%s386_s0 + $0x40] sm:$0xff]  ;;  %247 = vset.pattern.permute.xlu0 %v251_v2  ;;  %v10_v3 = vstv %s388_s2  ;;  %v24_v4 = vld [vmem:[%s386_s0 + $0x10] sm:$0xff]  ;;  %v31_v9 = vld [vmem:[%s386_s0 + $0x48] sm:$0xff]  ;;  %vm189_vm3 = vcmask 1043459   ;;  %vm191_vm4 = vcmask 1044484   ;;  %vm193_vm5 = vcmask 1045509  }
   0x2   :  { %v288_v1 = vld [vmem:[%s387_s1] ss:$0 sm:$0xff]  ;;  %11 = vst [vmem:[#allocation2] sm:$0x1] %v10_v3  ;;  %v32_v10 = vld [vmem:[%s386_s0 + $0x50] sm:$0xff]  ;;  %v23_v14 = vld [vmem:[%s386_s0 + $0x8] sm:$0xff] }
   0x3   :  { %v22_v5 = vld [vmem:[%s386_s0] sm:$0xff]  ;;  %v50_v6 = vmul.f32 %v288_v1, %v30_v0  ;;  %v44_v7 = vmul.f32 %v288_v1, %v24_v4  ;;  %v51_v15 = vmul.f32 %v288_v1, %v31_v9  ;;  %v52_v16 = vmul.f32 %v288_v1, %v32_v10  ;;  %v25_v21 = vld [vmem:[%s386_s0 + $0x18] sm:$0xff]  ;;  %v27_v33 = vld [vmem:[%s386_s0 + $0x28] sm:$0xff] }
   0x4   :  { %v42_v8 = vmul.f32 %v288_v1, %v22_v5  ;;  %v43_v17 = vmul.f32 %v288_v1, %v23_v14  ;;  %v33_v22 = vld [vmem:[%s386_s0 + $0x58] sm:$0xff]  ;;  %v45_v23 = vmul.f32 %v288_v1, %v25_v21  ;;  %v26_v27 = vld [vmem:[%s386_s0 + $0x20] sm:$0xff]  ;;  %v35_v34 = vld [vmem:[%s386_s0 + $0x68] sm:$0xff]  ;;  %v47_v36 = vmul.f32 %v288_v1, %v27_v33 }
   0x5   :  { %v83_v11 = vsel %vm58_vm0, %v50_v6, 0.0  ;;  %v65_v12 = vsel %vm58_vm0, %v44_v7, 0.0  ;;  %v86_v18 = vsel %vm58_vm0, %v51_v15, 0.0  ;;  %v89_v19 = vsel %vm58_vm0, %v52_v16, 0.0  ;;  %v34_v28 = vld [vmem:[%s386_s0 + $0x60] sm:$0xff]  ;;  %v28_v40 = vld [vmem:[%s386_s0 + $0x30] sm:$0xff] }
   0x6   :  { %v59_v13 = vsel %vm58_vm0, %v42_v8, 0.0  ;;  %84 = vadd.xlane.f32.xlu1 %v83_v11  ;;  %66 = vadd.xlane.f32.xlu2 %v65_v12  ;;  %v62_v20 = vsel %vm58_vm0, %v43_v17, 0.0  ;;  %v53_v24 = vmul.f32 %v288_v1, %v33_v22  ;;  %v68_v25 = vsel %vm58_vm0, %v45_v23, 0.0  ;;  %v36_v41 = vld [vmem:[%s386_s0 + $0x70] sm:$0xff]  ;;  %v29_v46 = vld [vmem:[%s386_s0 + $0x38] sm:$0xff]  ;;  %v146_v60 = vld [vmem:[%s390_s3] sm:$0xff] }
   0x7   :  { %60 = vadd.xlane.f32.xlu0 %v59_v13  ;;  %v46_v29 = vmul.f32 %v288_v1, %v26_v27  ;;  %v54_v30 = vmul.f32 %v288_v1, %v34_v28  ;;  %v55_v37 = vmul.f32 %v288_v1, %v35_v34  ;;  %v74_v38 = vsel %vm58_vm0, %v47_v36, 0.0  ;;  %v37_v47 = vld [vmem:[%s386_s0 + $0x78] sm:$0xff]  ;;  %226 = vmatpush.msra.mxu0 %v146_v60 }
   0x8   :  { %v92_v26 = vsel %vm58_vm0, %v53_v24, 0.0  ;;  %v48_v42 = vmul.f32 %v288_v1, %v28_v40  ;;  %v56_v43 = vmul.f32 %v288_v1, %v36_v41  ;;  %v49_v48 = vmul.f32 %v288_v1, %v29_v46  ;;  %245 = vmatpush.msra.mxu1 %v146_v60 }
   0x9   :  { %v71_v31 = vsel %vm58_vm0, %v46_v29, 0.0  ;;  %v95_v32 = vsel %vm58_vm0, %v54_v30, 0.0  ;;  %v249_v35 = vld [vmem:[#allocation2] ss:$0 sm:$0xff]  ;;  %v98_v39 = vsel %vm58_vm0, %v55_v37, 0.0  ;;  %v57_v49 = vmul.f32 %v288_v1, %v37_v47 }
   0xa   :  { %v77_v44 = vsel %vm58_vm0, %v48_v42, 0.0  ;;  %v101_v45 = vsel %vm58_vm0, %v56_v43, 0.0  ;;  %v80_v50 = vsel %vm58_vm0, %v49_v48, 0.0  ;;  %v167_v0 = vlaneseq }
   0xb   :  { %v104_v51 = vsel %vm58_vm0, %v57_v49, 0.0  ;;  %vm195_vm6 = vcmask 1046534   ;;  %vm197_vm7 = vcmask 1047559   ;;  %vm206_vm8 = vcmask 64512  }
   0xc   :  { %v168_v9 = vand.u32 127, %v167_v0  ;;  %vm236_vm9 = vcmask 31744  }
   0xe   :  { %87 = vadd.xlane.f32.xlu1 %v86_v18  ;;  %90 = vadd.xlane.f32.xlu2 %v89_v19 }
   0xf   :  { %63 = vadd.xlane.f32.xlu0 %v62_v20 }
  0x16   :  { %69 = vadd.xlane.f32.xlu1 %v68_v25  ;;  %93 = vadd.xlane.f32.xlu2 %v92_v26 }
  0x1e   :  { %72 = vadd.xlane.f32.xlu1 %v71_v31  ;;  %96 = vadd.xlane.f32.xlu2 %v95_v32 }
  0x23   :  { %111 = vperm.xlu0 %247, %v249_v35  }
  0x26   :  { %75 = vadd.xlane.f32.xlu1 %v74_v38  ;;  %99 = vadd.xlane.f32.xlu2 %v98_v39 }
  0x2e   :  { %78 = vadd.xlane.f32.xlu1 %v77_v44  ;;  %102 = vadd.xlane.f32.xlu2 %v101_v45 }
  0x36   :  { %81 = vadd.xlane.f32.xlu1 %v80_v50  ;;  %105 = vadd.xlane.f32.xlu2 %v104_v51 }
  0x79   :  { %v85_v52 = vpop.xlane.xlu1 %84  ;;  %v67_v53 = vpop.xlane.xlu2 %66 }
  0x7a   :  { %v61_v54 = vpop.xlane.xlu0 %60 }
  0x81   :  { %v88_v55 = vpop.xlane.xlu1 %87  ;;  %v91_v56 = vpop.xlane.xlu2 %90 }
  0x82   :  { %v64_v59 = vpop.xlane.xlu0 %63 }
  0x89   :  { %v70_v57 = vpop.xlane.xlu1 %69  ;;  %v94_v58 = vpop.xlane.xlu2 %93 }
  0x91   :  { %v73_v61 = vpop.xlane.xlu1 %72  ;;  %v97_v62 = vpop.xlane.xlu2 %96 }
  0x95   :  { %v112_v63 = vpop.permute.xlu0 %111 }
  0x96   :  { %v114_v1 = vadd.f32 %v112_v63, %v61_v54  ;;  %v115_v2 = vadd.f32 %v112_v63, %v64_v59  ;;  %v122_v3 = vadd.f32 %v112_v63, %v85_v52  ;;  %v123_v4 = vadd.f32 %v112_v63, %v88_v55 }
  0x97   :  { %v116_v7 = vadd.f32 %v112_v63, %v67_v53  ;;  %v124_v8 = vadd.f32 %v112_v63, %v91_v56  ;;  %v117_v14 = vadd.f32 %v112_v63, %v70_v57  ;;  %v125_v16 = vadd.f32 %v112_v63, %v94_v58 }
  0x98   :  { %v130_v10 = vmax.f32 %v114_v1, 0.0  ;;  %v131_v11 = vmax.f32 %v115_v2, 0.0  ;;  %v138_v12 = vmax.f32 %v122_v3, 0.0  ;;  %v139_v13 = vmax.f32 %v123_v4, 0.0 }
  0x99   :  { %v76_v5 = vpop.xlane.xlu1 %75  ;;  %v100_v6 = vpop.xlane.xlu2 %99  ;;  %v132_v15 = vmax.f32 %v116_v7, 0.0  ;;  %v140_v17 = vmax.f32 %v124_v8, 0.0  ;;  %v118_v22 = vadd.f32 %v112_v63, %v73_v61  ;;  %v133_v23 = vmax.f32 %v117_v14, 0.0 }
  0x9a   :  { %v169_v18 = vperm.slane %v130_v10, %v168_v9  ;;  %v170_v19 = vperm.slane %v131_v11, %v168_v9  ;;  %v177_v20 = vperm.slane %v138_v12, %v168_v9  ;;  %v178_v21 = vperm.slane %v139_v13, %v168_v9 }
  0x9b   :  { %v119_v24 = vadd.f32 %v112_v63, %v76_v5  ;;  %v171_v27 = vperm.slane %v132_v15, %v168_v9  ;;  %v126_v28 = vadd.f32 %v112_v63, %v97_v62  ;;  %v179_v29 = vperm.slane %v140_v17, %v168_v9 }
  0x9c   :  { %v127_v30 = vadd.f32 %v112_v63, %v100_v6  ;;  %v186_v31 = vsel %vm185_vm1, %v170_v19, %v169_v18  ;;  %v141_v32 = vmax.f32 %v125_v16, 0.0  ;;  %v199_v33 = vsel %vm185_vm1, %v178_v21, %v177_v20 }
  0x9d   :  { %v134_v36 = vmax.f32 %v118_v22, 0.0  ;;  %v188_v37 = vsel %vm187_vm2, %v171_v27, %v186_v31  ;;  %v142_v38 = vmax.f32 %v126_v28, 0.0  ;;  %v200_v39 = vsel %vm187_vm2, %v179_v29, %v199_v33 }
  0x9e   :  { %v135_v40 = vmax.f32 %v119_v24, 0.0  ;;  %v143_v41 = vmax.f32 %v127_v30, 0.0  ;;  %v172_v42 = vperm.slane %v133_v23, %v168_v9  ;;  %v180_v43 = vperm.slane %v141_v32, %v168_v9 }
  0x9f   :  { %v173_v50 = vperm.slane %v134_v36, %v168_v9  ;;  %v181_v51 = vperm.slane %v142_v38, %v168_v9 }
  0xa0   :  { %v190_v46 = vsel %vm189_vm3, %v172_v42, %v188_v37  ;;  %v201_v47 = vsel %vm189_vm3, %v180_v43, %v200_v39  ;;  %v174_v52 = vperm.slane %v135_v40, %v168_v9  ;;  %v182_v53 = vperm.slane %v143_v41, %v168_v9 }
  0xa1   :  { %v79_v25 = vpop.xlane.xlu1 %78  ;;  %v103_v26 = vpop.xlane.xlu2 %102  ;;  %v192_v58 = vsel %vm191_vm4, %v173_v50, %v190_v46  ;;  %v202_v59 = vsel %vm191_vm4, %v181_v51, %v201_v47 }
  0xa2   :  { %v120_v34 = vadd.f32 %v112_v63, %v79_v25  ;;  %v128_v35 = vadd.f32 %v112_v63, %v103_v26  ;;  %v194_v1 = vsel %vm193_vm5, %v174_v52, %v192_v58  ;;  %v203_v2 = vsel %vm193_vm5, %v182_v53, %v202_v59 }
  0xa4   :  { %v136_v44 = vmax.f32 %v120_v34, 0.0  ;;  %v144_v45 = vmax.f32 %v128_v35, 0.0 }
  0xa6   :  { %v175_v56 = vperm.slane %v136_v44, %v168_v9  ;;  %v183_v57 = vperm.slane %v144_v45, %v168_v9 }
  0xa8   :  { %v196_v3 = vsel %vm195_vm6, %v175_v56, %v194_v1  ;;  %v204_v4 = vsel %vm195_vm6, %v183_v57, %v203_v2 }
  0xa9   :  { %v82_v48 = vpop.xlane.xlu1 %81  ;;  %v106_v49 = vpop.xlane.xlu2 %105 }
  0xaa   :  { %v121_v54 = vadd.f32 %v112_v63, %v82_v48  ;;  %v129_v55 = vadd.f32 %v112_v63, %v106_v49  ;;  %v250_v63 = vld [vmem:[%s389_s4] ss:$0 sm:$0xff] }
  0xac   :  { %v137_v60 = vmax.f32 %v121_v54, 0.0  ;;  %v145_v61 = vmax.f32 %v129_v55, 0.0 }
  0xae   :  { %v176_v62 = vperm.slane %v137_v60, %v168_v9  ;;  %v184_v0 = vperm.slane %v145_v61, %v168_v9 }
  0xb0   :  { %v198_v5 = vsel %vm197_vm7, %v176_v62, %v196_v3  ;;  %v205_v6 = vsel %vm197_vm7, %v184_v0, %v204_v4 }
  0xb1   :  { %243 = vmatmul.msk.f32.vlgmr.msra.gmra.mxu0 %vm206_vm8, %v198_v5  ;;  %244 = vmatmul.msk.f32.vlgmr.msra.gmra.mxu1 %vm206_vm8, %v205_v6 }
 0x12e   :  { %v228_v7 = vpop.f32.mrf.mxu0  ;;  %v231_v8 = vpop.f32.mrf.mxu1 }
 0x12f   :  { %v229_v10 = vadd.f32 %v250_v63, %v228_v7  ;;  %v232_v11 = vadd.f32 %v250_v63, %v231_v8 }
 0x131   :  { %v234_v9 = vmax.f32 %v229_v10, 0.0  ;;  %v235_v12 = vmax.f32 %v232_v11, 0.0 }
 0x133   :  { %237 = vst.msk [vmem:[%s391_s5] sm:$0xff] %vm236_vm9, %v234_v9 }
 0x134   :  { %238 = vst.msk [vmem:[%s391_s5 + $0x8] sm:$0xff] %vm236_vm9, %v235_v12 }

// kernel: sthg_former.15
= control target key start
LH: loop header
LB: loop body
LE: loop exit
PB: predicated region body
PF: predicated region fallthrough
CT: control target
= control target key end

     0   :  { %s7891_s13 = smov 0   ;;  %s7893_s14 = smov 0   ;;  %s11502_s0 = inlined_call_operand.vmem [shape: f32[2,16,8,32], index: 0, kind: input, shape index: {}]   ;;  %s11503_s1 = inlined_call_operand.vmem [shape: f32[2,16,8,32], index: 1, kind: input, shape index: {}]   ;;  %s11504_s2 = inlined_call_operand.vmem [shape: f32[2,16,1], index: 2, kind: input, shape index: {}]   ;;  %s11505_s3 = inlined_call_operand.vmem [shape: f32[8,32], index: 3, kind: input, shape index: {}]   ;;  %s11506_s4 = inlined_call_operand.vmem [shape: f32[2,1,32], index: 4, kind: input, shape index: {}]   ;;  %s11507_s5 = inlined_call_operand.vmem [shape: f32[32,96], index: 5, kind: input, shape index: {}]   ;;  %s11508_s6 = inlined_call_operand.vmem [shape: f32[32,32], index: 6, kind: input, shape index: {}]   ;;  %s11509_s7 = inlined_call_operand.vmem [shape: f32[1,32], index: 7, kind: input, shape index: {}]   ;;  %s11510_s8 = inlined_call_operand.vmem [shape: f32[1,32], index: 8, kind: input, shape index: {}]   ;;  %s11511_s9 = inlined_call_operand.vmem [shape: f32[1,32], index: 9, kind: input, shape index: {}]   ;;  %s11512_s10 = inlined_call_operand.vmem [shape: f32[2,16,8,32], index: 10, kind: output, shape index: {}]  }
   0x1   :  { %s7895_s15 = smov 0  }
   0x2 LB: > { %s32_s16 = sadd.s32 1, %s7816_s14  ;;  %p7014_p0 = scmp.ge.s32.totalorder %s7820_s15, 1  ;;  %s7820_s15 = sphi %s7895_s15, %s20_s15   ;;  %s7816_s14 = sphi %s7893_s14, %s11824_s14   ;;  %s7812_s13 = sphi %s7891_s13, %s11823_s13  }
   0x3   : > { %p34_p1 = scmp.ge.s32.totalorder %s32_s16, 2  ;;  %p375_p2 = scmp.lt.s32.totalorder %s7820_s15, 3 }
   0x5   : > { %s11826_s16 = smov (%p34_p1, %s32_s16), 0  ;;  %p376_p3 = pnand %p7014_p0, %p375_p2 }
   0x7   : > { %379 = sbr.rel (%p376_p3) target bundleno = 2365 (0x93d), region = 60 }
   0xc   : > { %v783_v0 = vld [vmem:[%s11507_s5 + $0x18] sm:$0xff]  ;;  %v782_v1 = vld [vmem:[%s11507_s5 + $0x10] sm:$0xff]  ;;  %p443_p4 = scmp.lt.s32.totalorder %s7812_s13, 1  ;;  %v781_v2 = vld [vmem:[%s11507_s5 + $0x8] sm:$0xff]  ;;  %vm784_vm0 = vcmask 261120   ;;  %s7822_s18 = smov 96  }
   0xd   : > { %845 = vmatpush.msra.mxu0 %v783_v0  ;;  %v780_v3 = vld [vmem:[%s11507_s5] sm:$0xff]  ;;  %s7823_s19 = smov 88   ;;  %s7824_s20 = smov 64   ;;  %vm901_vm1 = vcmask 64512  }
   0xe   : > { %s11828_s13 = smov (!%p443_p4, %s7812_s13), 1  ;;  %v7933_v4 = vld [vmem:[%s11505_s3] sm:$0xff]  ;;  %s7825_s21 = smov 120  }
   0xf   : > { %846 = vmatpush.msra.mxu0 %v782_v1  ;;  %s7924_s25 = sshll.u32 %s11828_s13, 7  ;;  %s474_s28 = scalar_lea.vmem %s11506_s4, %s11828_s13 }
  0x10   : > { %s7939_s17 = scalar_lea.vmem %s11502_s0, %s7924_s25  ;;  %v7941_v5 = vld [vmem:[%s474_s28] ss:$0 sm:$0xff]  ;;  %s7826_s22 = smov 56  }
  0x11   : > { %847 = vmatpush.msra.mxu0 %v781_v2  ;;  %v485_v6 = vld [vmem:[%s7939_s17] sm:$0xff]  ;;  %v486_v8 = vld [vmem:[%s7939_s17 + $0x8] sm:$0xff]  ;;  %v487_v12 = vld [vmem:[%s7939_s17 + $0x10] sm:$0xff]  ;;  %s7827_s23 = smov 112   ;;  %s7828_s24 = smov 80  }
  0x12   : > { %v502_v7 = vadd.f32 %v7933_v4, %v485_v6  ;;  %v503_v10 = vadd.f32 %v7933_v4, %v486_v8  ;;  %v504_v13 = vadd.f32 %v7933_v4, %v487_v12  ;;  %v488_v15 = vld [vmem:[%s7939_s17 + $0x18] sm:$0xff]  ;;  %v489_v18 = vld [vmem:[%s7939_s17 + $0x20] sm:$0xff]  ;;  %v490_v21 = vld [vmem:[%s7939_s17 + $0x28] sm:$0xff]  ;;  %s7829_s26 = smov 48   ;;  %s7830_s27 = smov 72  }
  0x13   : > { %848 = vmatpush.msra.mxu0 %v780_v3  ;;  %v505_v16 = vadd.f32 %v7933_v4, %v488_v15  ;;  %v506_v19 = vadd.f32 %v7933_v4, %v489_v18  ;;  %v507_v22 = vadd.f32 %v7933_v4, %v490_v21  ;;  %v491_v24 = vld [vmem:[%s7939_s17 + $0x30] sm:$0xff]  ;;  %v492_v27 = vld [vmem:[%s7939_s17 + $0x38] sm:$0xff]  ;;  %v493_v30 = vld [vmem:[%s7939_s17 + $0x40] sm:$0xff]  ;;  %s7831_s28 = smov 104   ;;  %s7832_s11 = smov 40  }
  0x14   : > { %v522_v9 = vadd.f32 %v7941_v5, %v502_v7  ;;  %v523_v11 = vadd.f32 %v7941_v5, %v503_v10  ;;  %v524_v14 = vadd.f32 %v7941_v5, %v504_v13  ;;  %v508_v25 = vadd.f32 %v7933_v4, %v491_v24  ;;  %v494_v33 = vld [vmem:[%s7939_s17 + $0x48] sm:$0xff]  ;;  %v495_v36 = vld [vmem:[%s7939_s17 + $0x50] sm:$0xff]  ;;  %v496_v39 = vld [vmem:[%s7939_s17 + $0x58] sm:$0xff] }
  0x15   : > { %v525_v17 = vadd.f32 %v7941_v5, %v505_v16  ;;  %v526_v20 = vadd.f32 %v7941_v5, %v506_v19  ;;  %v527_v23 = vadd.f32 %v7941_v5, %v507_v22  ;;  %v509_v28 = vadd.f32 %v7933_v4, %v492_v27  ;;  %v497_v42 = vld [vmem:[%s7939_s17 + $0x60] sm:$0xff]  ;;  %v498_v45 = vld [vmem:[%s7939_s17 + $0x68] sm:$0xff]  ;;  %v499_v48 = vld [vmem:[%s7939_s17 + $0x70] sm:$0xff] }
  0x16   : > { %7023 = vmatmul.msk.f32.vlgmr.msra.gmra.mxu0 %vm784_vm0, %v522_v9  ;;  %v528_v26 = vadd.f32 %v7941_v5, %v508_v25  ;;  %v510_v31 = vadd.f32 %v7933_v4, %v493_v30  ;;  %v511_v34 = vadd.f32 %v7933_v4, %v494_v33  ;;  %v512_v37 = vadd.f32 %v7933_v4, %v495_v36  ;;  %v500_v51 = vld [vmem:[%s7939_s17 + $0x78] sm:$0xff] }
  0x17   : > { %v529_v29 = vadd.f32 %v7941_v5, %v509_v28  ;;  %v513_v40 = vadd.f32 %v7933_v4, %v496_v39  ;;  %v514_v43 = vadd.f32 %v7933_v4, %v497_v42  ;;  %v515_v46 = vadd.f32 %v7933_v4, %v498_v45 }
  0x18   : > { %v530_v32 = vadd.f32 %v7941_v5, %v510_v31  ;;  %v531_v35 = vadd.f32 %v7941_v5, %v511_v34  ;;  %v532_v38 = vadd.f32 %v7941_v5, %v512_v37  ;;  %v516_v49 = vadd.f32 %v7933_v4, %v499_v48 }
  0x19   : > { %v533_v41 = vadd.f32 %v7941_v5, %v513_v40  ;;  %v534_v44 = vadd.f32 %v7941_v5, %v514_v43  ;;  %v535_v47 = vadd.f32 %v7941_v5, %v515_v46  ;;  %v517_v52 = vadd.f32 %v7933_v4, %v500_v51 }
  0x1a   : > { %v536_v50 = vadd.f32 %v7941_v5, %v516_v49 }
  0x1b   : > { %v537_v53 = vadd.f32 %v7941_v5, %v517_v52 }
  0x1e   : > { %7024 = vmatmul.msk.f32.gmra.mxu0 %vm784_vm0, %v523_v11 }
  0x26   : > { %7025 = vmatmul.msk.f32.gmra.mxu0 %vm784_vm0, %v524_v14 }
  0x2e   : > { %7026 = vmatmul.msk.f32.gmra.mxu0 %vm784_vm0, %v525_v17 }
  0x36   : > { %7027 = vmatmul.msk.f32.gmra.mxu0 %vm784_vm0, %v526_v20 }
  0x3e   : > { %7028 = vmatmul.msk.f32.gmra.mxu0 %vm784_vm0, %v527_v23 }
  0x46   : > { %7029 = vmatmul.msk.f32.gmra.mxu0 %vm784_vm0, %v528_v26 }
  0x4e   : > { %7030 = vmatmul.msk.f32.gmra.mxu0 %vm784_vm0, %v529_v29 }
  0x56   : > { %7031 = vmatmul.msk.f32.gmra.mxu0 %vm784_vm0, %v530_v32 }
  0x5e   : > { %7032 = vmatmul.msk.f32.gmra.mxu0 %vm784_vm0, %v531_v35 }
  0x66   : > { %7033 = vmatmul.msk.f32.gmra.mxu0 %vm784_vm0, %v532_v38 }
  0x6e   : > { %7034 = vmatmul.msk.f32.gmra.mxu0 %vm784_vm0, %v533_v41 }
  0x76   : > { %7035 = vmatmul.msk.f32.gmra.mxu0 %vm784_vm0, %v534_v44 }
  0x7e   : > { %7036 = vmatmul.msk.f32.gmra.mxu0 %vm784_vm0, %v535_v47 }
  0x86   : > { %7037 = vmatmul.msk.f32.gmra.mxu0 %vm784_vm0, %v536_v50 }
  0x8e   : > { %7038 = vmatmul.msk.f32.gmra.mxu0 %vm784_vm0, %v537_v53 }
  0x93   : > { %v8007_v54 = vpop.f32.mrf.mxu0 }
  0x94   : > { %11540 = vst [vmem:[#allocation2_spill] sm:$0xff] %v8007_v54  ;;  %899 = vrot.lane.b32.xlu0 %v8007_v54, %s7822_s18 }
  0x9b   : > { %v8011_v55 = vpop.f32.mrf.mxu0 }
  0x9c   : > { %11541 = vst [vmem:[#allocation3_spill] sm:$0xff] %v8011_v55  ;;  %2150 = vrot.lane.b32.xlu0 %v8007_v54, %s7823_s19  ;;  %v8017_v56 = vpack.i.bf16 %v8011_v55, %v8007_v54 }
  0x9e   : > { %11542 = vst [vmem:[#allocation4_spill] sm:$0xff] %v8017_v56  ;;  %7342 = vrot.lane.b32.xlu2 %v8017_v56, %s7824_s20 }
  0xa3   : > { %v8021_v57 = vpop.f32.mrf.mxu0 }
  0xa4   : > { %11543 = vst [vmem:[#allocation5_spill] sm:$0xff] %v8021_v57  ;;  %927 = vrot.lane.b32.xlu0 %v8011_v55, %s7822_s18  ;;  %954 = vrot.lane.b32.xlu1 %v8021_v57, %s7822_s18 }
  0xa6   : > { %2206 = vrot.lane.b32.xlu2 %v8021_v57, %s7823_s19 }
  0xab   : > { %v8029_v58 = vpop.f32.mrf.mxu0 }
  0xac   : > { %11544 = vst [vmem:[#allocation6_spill] sm:$0xff] %v8029_v58  ;;  %981 = vrot.lane.b32.xlu1 %v8029_v58, %s7822_s18  ;;  %v7346_v59 = vpack.i.bf16 %v8021_v57, %v8029_v58 }
  0xae   : > { %7347 = vrot.lane.b32.xlu0 %v7346_v59, %s7824_s20 }
  0xb3   : > { %v8036_v60 = vpop.f32.mrf.mxu0 }
  0xb4   : > { %11545 = vst [vmem:[#allocation7_spill] sm:$0xff] %v8036_v60  ;;  %1008 = vrot.lane.b32.xlu2 %v8036_v60, %s7822_s18 }
  0xbb   : > { %v8040_v61 = vpop.f32.mrf.mxu0 }
  0xbc   : > { %1035 = vrot.lane.b32.xlu2 %v8040_v61, %s7822_s18 }
  0xc3   : > { %v8044_v62 = vpop.f32.mrf.mxu0 }
  0xc4   : > { %1062 = vrot.lane.b32.xlu0 %v8044_v62, %s7822_s18  ;;  %v7351_v63 = vpack.i.bf16 %v8044_v62, %v8036_v60 }
  0xc6   : > { %7352 = vrot.lane.b32.xlu1 %v7351_v63, %s7824_s20 }
  0xcb   : > { %v8051_v0 = vpop.f32.mrf.mxu0 }
  0xcc   : > { %v8055_v1 = vpack.i.bf16 %v8051_v0, %v8040_v61 }
  0xce   : > { %11546 = vst [vmem:[#allocation8_spill] sm:$0xff] %v8055_v1  ;;  %7357 = vrot.lane.b32.xlu2 %v8055_v1, %s7824_s20  ;;  %1089 = vrot.lane.b32.xlu1 %v8051_v0, %s7822_s18 }
  0xd3   : > { %v8061_v2 = vpop.f32.mrf.mxu0 }
  0xd6   : > { %1116 = vrot.lane.b32.xlu2 %v8061_v2, %s7822_s18 }
  0xdb   : > { %v8065_v3 = vpop.f32.mrf.mxu0 }
  0xdc   : > { %1143 = vrot.lane.b32.xlu0 %v8065_v3, %s7822_s18  ;;  %v7361_v4 = vpack.i.bf16 %v8061_v2, %v8065_v3 }
  0xe3   : > { %v8071_v5 = vpop.f32.mrf.mxu0 }
  0xe4   : > { %7362 = vrot.lane.b32.xlu0 %v7361_v4, %s7824_s20  ;;  %1170 = vrot.lane.b32.xlu1 %v8071_v5, %s7822_s18 }
  0xeb   : > { %v8076_v6 = vpop.f32.mrf.mxu0 }
  0xec   : > { %1197 = vrot.lane.b32.xlu2 %v8076_v6, %s7822_s18 }
  0xf3   : > { %v8080_v7 = vpop.f32.mrf.mxu0 }
  0xf4   : > { %1224 = vrot.lane.b32.xlu0 %v8080_v7, %s7822_s18  ;;  %v7366_v8 = vpack.i.bf16 %v8080_v7, %v8071_v5 }
  0xf6   : > { %7367 = vrot.lane.b32.xlu1 %v7366_v8, %s7824_s20 }
  0xf8   : > { %v8089_v10 = vpop.permute.xlu2 %7342 }
  0xf9   : > { %v7345_v34 = vunpack.i.h.bf16 %v8089_v10  ;;  %v7344_v39 = vunpack.i.l.bf16 %v8089_v10 }
  0xfb   : > { %v8087_v9 = vpop.f32.mrf.mxu0 }
  0xfc   : > { %v7371_v11 = vpack.i.bf16 %v8087_v9, %v8076_v6 }
  0xfe   : > { %7372 = vrot.lane.b32.xlu2 %v7371_v11, %s7824_s20  ;;  %1251 = vrot.lane.b32.xlu1 %v8087_v9, %s7822_s18 }
 0x100   : > { %v8098_v13 = vpop.permute.xlu2 %2206 }
 0x103   : > { %v8096_v12 = vpop.f32.mrf.mxu0 }
 0x104   : > { %11547 = vst [vmem:[#allocation9_spill] sm:$0xff] %v8096_v12 }
 0x106   : > { %v900_v14 = vpop.permute.xlu0 %899  ;;  %2178 = vrot.lane.b32.xlu1 %v8011_v55, %s7823_s19  ;;  %1278 = vrot.lane.b32.xlu2 %v8096_v12, %s7822_s18 }
 0x107   : > { %7039 = vmatpush.xpose.msk.msra.mxu1 %vm901_vm1, %v900_v14 }
 0x10a   : > { %7040 = vmatmul.msk.f32.vlgmr.msra.gmra.mxu1 %vm901_vm1, %v8007_v54 }
 0x10b   : > { %v8107_v15 = vpop.f32.mrf.mxu0 }
 0x10c   : > { %11548 = vst [vmem:[#allocation10_spill] sm:$0xff] %v8107_v15  ;;  %1305 = vrot.lane.b32.xlu0 %v8107_v15, %s7822_s18  ;;  %v7376_v30 = vpack.i.bf16 %v8096_v12, %v8107_v15 }
 0x10e   : > { %v8111_v16 = vpop.permute.xlu0 %2150  ;;  %v1009_v17 = vpop.permute.xlu2 %1008  ;;  %2318 = vrot.lane.b32.xlu1 %v8044_v62, %s7823_s19  ;;  %2204 = vrot.lane.b32.xlu2 %v8021_v57, %s7825_s21 }
 0x10f   : > { %7047 = vmatpush.xpose.msk.msra.mxu2 %vm901_vm1, %v1009_v17 }
 0x112   : > { %7048 = vmatmul.msk.f32.vlgmr.msra.gmra.mxu2 %vm901_vm1, %v8036_v60 }
 0x114   : > { %2148 = vrot.lane.b32.xlu0 %v8007_v54, %s7825_s21 }
 0x116   : > { %v928_v18 = vpop.permute.xlu0 %927  ;;  %v955_v19 = vpop.permute.xlu1 %954  ;;  %2316 = vrot.lane.b32.xlu1 %v8044_v62, %s7825_s21  ;;  %2290 = vrot.lane.b32.xlu2 %v8040_v61, %s7823_s19 }
 0x117   : > { %7041 = vmatpush.xpose.msk.msra.mxu3 %vm901_vm1, %v928_v18  ;;  %v1036_v20 = vpop.permute.xlu2 %1035 }
 0x11a   : > { %7042 = vmatmul.msk.f32.vlgmr.msra.gmra.mxu3 %vm901_vm1, %v8011_v55 }
 0x11b   : > { %7043 = vmatpush.xpose.msk.msrb.mxu3 %vm901_vm1, %v955_v19 }
 0x11c   : > { %2234 = vrot.lane.b32.xlu0 %v8029_v58, %s7823_s19 }
 0x11e   : > { %v982_v21 = vpop.permute.xlu1 %981  ;;  %2458 = vrot.lane.b32.xlu1 %v8076_v6, %s7823_s19  ;;  %2232 = vrot.lane.b32.xlu2 %v8029_v58, %s7825_s21 }
 0x11f   : > { %7049 = vmatpush.xpose.msk.msra.mxu3 %vm901_vm1, %v1036_v20  ;;  %7045 = vmatpush.xpose.msk.msrb.mxu1 %vm901_vm1, %v982_v21 }
 0x120   : > { %v7348_v23 = vpop.permute.xlu0 %7347 }
 0x121   : > { %v7349_v41 = vunpack.i.l.bf16 %v7348_v23  ;;  %v7350_v42 = vunpack.i.h.bf16 %v7348_v23 }
 0x122   : > { %7044 = vmatmul.msk.f32.vlgmr.msrb.gmra.mxu3 %vm901_vm1, %v8021_v57  ;;  %7046 = vmatmul.msk.f32.vlgmr.msrb.gmra.mxu1 %vm901_vm1, %v8029_v58 }
 0x124   : > { %2176 = vrot.lane.b32.xlu0 %v8011_v55, %s7825_s21 }
 0x126   : > { %2430 = vrot.lane.b32.xlu1 %v8071_v5, %s7823_s19  ;;  %2262 = vrot.lane.b32.xlu2 %v8036_v60, %s7823_s19 }
 0x128   : > { %v8148_v22 = vpop.permute.xlu2 %7357 }
 0x129   : > { %v7359_v44 = vunpack.i.l.bf16 %v8148_v22 }
 0x12a   : > { %7050 = vmatmul.msk.f32.vlgmr.msra.gmra.mxu3 %vm901_vm1, %v8040_v61 }
 0x12c   : > { %2288 = vrot.lane.b32.xlu0 %v8040_v61, %s7825_s21 }
 0x12e   : > { %2540 = vrot.lane.b32.xlu1 %v8096_v12, %s7825_s21  ;;  %2260 = vrot.lane.b32.xlu2 %v8036_v60, %s7825_s21 }
 0x130   : > { %v1117_v24 = vpop.permute.xlu2 %1116 }
 0x131   : > { %7055 = vmatpush.xpose.msk.msrb.mxu3 %vm901_vm1, %v1117_v24 }
 0x134   : > { %7056 = vmatmul.msk.f32.vlgmr.msrb.gmra.mxu3 %vm901_vm1, %v8061_v2  ;;  %2374 = vrot.lane.b32.xlu0 %v8061_v2, %s7823_s19 }
 0x136   : > { %v1063_v25 = vpop.permute.xlu0 %1062  ;;  %2346 = vrot.lane.b32.xlu2 %v8051_v0, %s7823_s19 }
 0x137   : > { %7051 = vmatpush.xpose.msk.msra.mxu1 %vm901_vm1, %v1063_v25 }
 0x138   : > { %v8166_v26 = vpop.permute.xlu1 %7352 }
 0x139   : > { %v7354_v36 = vunpack.i.l.bf16 %v8166_v26 }
 0x13a   : > { %7052 = vmatmul.msk.f32.vlgmr.msra.gmra.mxu1 %vm901_vm1, %v8044_v62 }
 0x13c   : > { %2372 = vrot.lane.b32.xlu0 %v8061_v2, %s7825_s21 }
 0x13e   : > { %2456 = vrot.lane.b32.xlu2 %v8076_v6, %s7825_s21 }
 0x140   : > { %v1090_v27 = vpop.permute.xlu1 %1089 }
 0x141   : > { %7053 = vmatpush.xpose.msk.msrb.mxu2 %vm901_vm1, %v1090_v27 }
 0x144   : > { %7054 = vmatmul.msk.f32.vlgmr.msrb.gmra.mxu2 %vm901_vm1, %v8051_v0  ;;  %2344 = vrot.lane.b32.xlu0 %v8051_v0, %s7825_s21 }
 0x146   : > { %v1198_v28 = vpop.permute.xlu2 %1197  ;;  %2428 = vrot.lane.b32.xlu2 %v8071_v5, %s7825_s21 }
 0x147   : > { %7061 = vmatpush.xpose.msk.msra.mxu3 %vm901_vm1, %v1198_v28 }
 0x14a   : > { %7062 = vmatmul.msk.f32.vlgmr.msra.gmra.mxu3 %vm901_vm1, %v8076_v6 }
 0x14c   : > { %2542 = vrot.lane.b32.xlu0 %v8096_v12, %s7823_s19 }
 0x14e   : > { %v1144_v29 = vpop.permute.xlu0 %1143 }
 0x14f   : > { %7057 = vmatpush.xpose.msk.msrb.mxu1 %vm901_vm1, %v1144_v29 }
 0x152   : > { %7058 = vmatmul.msk.f32.vlgmr.msrb.gmra.mxu1 %vm901_vm1, %v8065_v3 }
 0x154   : > { %7377 = vrot.lane.b32.xlu0 %v7376_v30, %s7824_s20 }
 0x156   : > { %v1171_v31 = vpop.permute.xlu1 %1170  ;;  %v8197_v33 = vpop.permute.xlu0 %7362 }
 0x157   : > { %7059 = vmatpush.xpose.msk.msra.mxu2 %vm901_vm1, %v1171_v31 }
 0x158   : > { %v8193_v32 = vpop.permute.xlu2 %7372 }
 0x15a   : > { %7060 = vmatmul.msk.f32.vlgmr.msra.gmra.mxu2 %vm901_vm1, %v8071_v5 }
 0x160   : > { %v1279_v35 = vpop.permute.xlu2 %1278 }
 0x161   : > { %7067 = vmatpush.xpose.msk.msrb.mxu3 %vm901_vm1, %v1279_v35 }
 0x164   : > { %7068 = vmatmul.msk.f32.vlgmr.msrb.gmra.mxu3 %vm901_vm1, %v8096_v12 }
 0x165   : > { %1538 = vmatpush.msra.mxu3 %v7345_v34 }
 0x166   : > { %v1225_v37 = vpop.permute.xlu0 %1224 }
 0x167   : > { %1616 = vmatpush.msrb.mxu3 %v7354_v36  ;;  %7063 = vmatpush.xpose.msk.msra.mxu1 %vm901_vm1, %v1225_v37 }
 0x168   : > { %v8205_v38 = vpop.permute.xlu1 %7367  ;;  %v8247_v18 = vpop.permute.xlu2 %2204 }
 0x16a   : > { %7064 = vmatmul.msk.f32.vlgmr.msra.gmra.mxu1 %vm901_vm1, %v8080_v7 }
 0x170   : > { %v1252_v40 = vpop.permute.xlu1 %1251  ;;  %v8253_v21 = vpop.permute.xlu2 %2290 }
 0x171   : > { %7065 = vmatpush.xpose.msk.msrb.mxu2 %vm901_vm1, %v1252_v40 }
 0x174   : > { %7066 = vmatmul.msk.f32.vlgmr.msrb.gmra.mxu2 %vm901_vm1, %v8087_v9 }
 0x175   : > { %1512 = vmatpush.msra.mxu2 %v7344_v39 }
 0x177   : > { %1590 = vmatpush.msrb.mxu2 %v7349_v41 }
 0x178   : > { %v8245_v17 = vpop.permute.xlu1 %2178  ;;  %v8259_v27 = vpop.permute.xlu2 %2232 }
 0x17e   : > { %v1306_v43 = vpop.permute.xlu0 %1305 }
 0x17f   : > { %7069 = vmatpush.xpose.msk.msrb.mxu1 %vm901_vm1, %v1306_v43 }
 0x180   : > { %v8251_v20 = vpop.permute.xlu1 %2318  ;;  %v8269_v40 = vpop.permute.xlu2 %2262 }
 0x182   : > { %7070 = vmatmul.msk.f32.vlgmr.msrb.gmra.mxu1 %vm901_vm1, %v8107_v15 }
 0x183   : > { %1564 = vmatpush.msra.mxu1 %v7350_v42 }
 0x185   : > { %1642 = vmatpush.msrb.mxu1 %v7359_v44 }
 0x186   : > { %v8239_v14 = vpop.permute.xlu0 %2148 }
 0x187   : > { %v923_v45 = vpop.f32.mrf.mxu1 }
 0x188   : > { %v8217_v46 = vmul.f32 0.35355338, %v923_v45  ;;  %v8257_v25 = vpop.permute.xlu1 %2316 }
 0x18a   : > { %v1347_v47 = vsel %vm901_vm1, %v8217_v46, -inf }
 0x18b   : > { %1348 = vmax.xlane.f32.xlu1 %v1347_v47 }
 0x18e   : > { %v8249_v19 = vpop.permute.xlu0 %2234 }
 0x190   : > { %v8265_v35 = vpop.permute.xlu1 %2458 }
 0x191   : > { %11549 = vst [vmem:[#allocation11_spill] sm:$0xff] %v8265_v35 }
 0x195   : > { %v1031_v59 = vpop.f32.mrf.mxu2 }
 0x196   : > { %v8229_v4 = vmul.f32 0.35355338, %v1031_v59  ;;  %v8255_v23 = vpop.permute.xlu0 %2176  ;;  %v8289_v59 = vpop.permute.xlu2 %2260 }
 0x198   : > { %v1359_v11 = vsel %vm901_vm1, %v8229_v4, -inf }
 0x19d   : > { %v950_v48 = vpop.f32.mrf.mxu3 }
 0x19e   : > { %v8221_v49 = vmul.f32 0.35355338, %v950_v48  ;;  %v8261_v31 = vpop.permute.xlu0 %2288 }
 0x19f   : > { %v1004_v50 = vpop.f32.mrf.mxu1 }
 0x1a0   : > { %v8223_v51 = vmul.f32 0.35355338, %v1004_v50  ;;  %v1350_v52 = vsel %vm901_vm1, %v8221_v49, -inf }
 0x1a1   : > { %1351 = vmax.xlane.f32.xlu2 %v1350_v52  ;;  %v8285_v52 = vpop.permute.xlu1 %2430 }
 0x1a2   : > { %v1356_v53 = vsel %vm901_vm1, %v8223_v51, -inf }
 0x1a3   : > { %1357 = vmax.xlane.f32.xlu0 %v1356_v53 }
 0x1a5   : > { %v977_v63 = vpop.f32.mrf.mxu3 }
 0x1a6   : > { %v8231_v8 = vmul.f32 0.35355338, %v977_v63  ;;  %v8275_v43 = vpop.permute.xlu0 %2374 }
 0x1a8   : > { %v1353_v10 = vsel %vm901_vm1, %v8231_v8, -inf }
 0x1a9   : > { %1354 = vmax.xlane.f32.xlu1 %v1353_v10 }
 0x1ab   : > { %1360 = vmax.xlane.f32.xlu0 %v1359_v11 }
 0x1ad   : > { %v1058_v24 = vpop.f32.mrf.mxu3 }
 0x1ae   : > { %v8277_v44 = vmul.f32 0.35355338, %v1058_v24  ;;  %v8293_v11 = vpop.permute.xlu0 %2372 }
 0x1af   : > { %11550 = vst [vmem:[#allocation12_spill] sm:$0xff] %v8293_v11 }
 0x1b0   : > { %v1362_v50 = vsel %vm901_vm1, %v8277_v44, -inf }
 0x1b7   : > { %v1085_v28 = vpop.f32.mrf.mxu1  ;;  %v1139_v29 = vpop.f32.mrf.mxu3 }
 0x1b8   : > { %v8271_v41 = vmul.f32 0.35355338, %v1139_v29  ;;  %v8291_v63 = vmul.f32 0.35355338, %v1085_v28 }
 0x1b9   : > { %2400 = vrot.lane.b32.xlu2 %v8065_v3, %s7825_s21 }
 0x1ba   : > { %v1371_v45 = vsel %vm901_vm1, %v8271_v41, -inf  ;;  %v1365_v29 = vsel %vm901_vm1, %v8291_v63, -inf }
 0x1bf   : > { %2402 = vrot.lane.b32.xlu0 %v8065_v3, %s7823_s19 }
 0x1c2   : > { %2486 = vrot.lane.b32.xlu1 %v8080_v7, %s7823_s19 }
 0x1c7   : > { %v1112_v30 = vpop.f32.mrf.mxu2 }
 0x1c8   : > { %v8263_v34 = vmul.f32 0.35355338, %v1112_v30  ;;  %v8299_v30 = vpop.permute.xlu1 %2540 }
 0x1c9   : > { %11551 = vst [vmem:[#allocation13_spill] sm:$0xff] %v8299_v30 }
 0x1ca   : > { %v1368_v36 = vsel %vm901_vm1, %v8263_v34, -inf }
 0x1cd   : > { %v1220_v37 = vpop.f32.mrf.mxu3 }
 0x1ce   : > { %v8273_v42 = vmul.f32 0.35355338, %v1220_v37 }
 0x1cf   : > { %v1166_v39 = vpop.f32.mrf.mxu1 }
 0x1d0   : > { %v1380_v47 = vsel %vm901_vm1, %v8273_v42, -inf }
 0x1dd   : > { %v1193_v10 = vpop.f32.mrf.mxu2 }
 0x1e2   : > { %1369 = vmax.xlane.f32.xlu2 %v1368_v36  ;;  %v8301_v36 = vmul.f32 0.35355338, %v1166_v39 }
 0x1e7   : > { %v1247_v48 = vpop.f32.mrf.mxu1  ;;  %v1301_v11 = vpop.f32.mrf.mxu3 }
 0x1e8   : > { %v8287_v53 = vmul.f32 0.35355338, %v1247_v48 }
 0x1e9   : > { %1372 = vmax.xlane.f32.xlu0 %v1371_v45  ;;  %v8303_v45 = vpop.permute.xlu2 %2346 }
 0x1ea   : > { %1381 = vmax.xlane.f32.xlu2 %v1380_v47  ;;  %v1383_v24 = vsel %vm901_vm1, %v8287_v53, -inf  ;;  %v8307_v47 = vpop.permute.xlu0 %2344 }
 0x1ec   : > { %1363 = vmax.xlane.f32.xlu1 %v1362_v50  ;;  %v1374_v50 = vsel %vm901_vm1, %v8301_v36, -inf }
 0x1f1   : > { %v8316_v56 = vpop.permute.xlu2 %2456 }
 0x1f2   : > { %1384 = vmax.xlane.f32.xlu2 %v1383_v24  ;;  %11552 = vst [vmem:[#allocation14_spill] sm:$0xff] %v8316_v56  ;;  %v8320_v30 = vpop.permute.xlu0 %2542  ;;  %v7396_v56 = vpack.i.bf16 %v8107_v15, %v8076_v6 }
 0x1f3   : > { %11553 = vst [vmem:[#allocation15_spill] sm:$0xff] %v8320_v30 }
 0x1f4   : > { %1366 = vmax.xlane.f32.xlu1 %v1365_v29  ;;  %v8313_v29 = vmul.f32 0.35355338, %v1193_v10  ;;  %v7355_v10 = vunpack.i.h.bf16 %v8166_v26  ;;  %v7386_v26 = vpack.i.bf16 %v8096_v12, %v8071_v5 }
 0x1f7   : > { %v1274_v37 = vpop.f32.mrf.mxu2 }
 0x1f8   : > { %v8305_v28 = vmul.f32 0.35355338, %v1274_v37  ;;  %v1377_v37 = vsel %vm901_vm1, %v8313_v29, -inf }
 0x1fa   : > { %v1386_v48 = vsel %vm901_vm1, %v8305_v28, -inf }
 0x1fb   : > { %1387 = vmax.xlane.f32.xlu0 %v1386_v48  ;;  %v8322_v48 = vmul.f32 0.35355338, %v1301_v11  ;;  %v8335_v11 = vpop.permute.xlu0 %7377 }
 0x1fc   : > { %1375 = vmax.xlane.f32.xlu1 %v1374_v50 }
 0x1fe   : > { %v1349_v24 = vpop.xlane.xlu1 %1348 }
 0x1ff   : > { %v1395_v39 = vsub.f32 %v8217_v46, %v1349_v24  ;;  %v8333_v46 = vpop.permute.xlu2 %2428  ;;  %v1328_v50 = vpop.f32.mrf.mxu1 }
 0x200   : > { %11555 = vst [vmem:[#allocation17_spill] sm:$0xff] %v8333_v46  ;;  %v8337_v24 = vmul.f32 0.35355338, %v1328_v50 }
 0x201   : > { %v1411_v1 = vmul.f32 1.442695, %v1395_v39 }
 0x202   : > { %v1392_v39 = vsel %vm901_vm1, %v8337_v24, -inf }
 0x203   : > { %7508 = vpow2.f32 %v1411_v1  ;;  %v1389_v1 = vsel %vm901_vm1, %v8322_v48, -inf }
 0x204   : > { %1378 = vmax.xlane.f32.xlu1 %v1377_v37 }
 0x209   : > { %v8324_v35 = vpop.eup %7508 }
 0x20a   : > { %11554 = vst [vmem:[#allocation16_spill] sm:$0xff] %v8324_v35  ;;  %7071 = vmatmul.msk.f32.vlgmr.msra.gmra.mxu2 %vm901_vm1, %v8324_v35  ;;  %2570 = vrot.lane.b32.xlu2 %v8107_v15, %s7823_s19 }
 0x20b   : > { %1668 = vmatpush.msra.mxu2 %v7355_v10 }
 0x20c   : > { %1390 = vmax.xlane.f32.xlu1 %v1389_v1 }
 0x20f   : > { %2484 = vrot.lane.b32.xlu0 %v8080_v7, %s7825_s21 }
 0x212   : > { %7387 = vrot.lane.b32.xlu2 %v7386_v26, %s7826_s22 }
 0x214   : > { %v1352_v37 = vpop.xlane.xlu2 %1351  ;;  %1393 = vmax.xlane.f32.xlu1 %v1392_v39 }
 0x215   : > { %v1396_v10 = vsub.f32 %v8221_v49, %v1352_v37  ;;  %v7391_v49 = vpack.i.bf16 %v8051_v0, %v8029_v58 }
 0x216   : > { %v1358_v1 = vpop.xlane.xlu0 %1357 }
 0x217   : > { %v1413_v35 = vmul.f32 1.442695, %v1396_v10  ;;  %v1398_v50 = vsub.f32 %v8223_v51, %v1358_v1  ;;  %2514 = vrot.lane.b32.xlu0 %v8087_v9, %s7823_s19  ;;  %v7360_v51 = vunpack.i.h.bf16 %v8148_v22 }
 0x219   : > { %7510 = vpow2.f32 %v1413_v35  ;;  %v1417_v30 = vmul.f32 1.442695, %v1398_v50 }
 0x21a   : > { %7397 = vrot.lane.b32.xlu2 %v7396_v56, %s7826_s22 }
 0x21b   : > { %7512 = vpow2.f32 %v1417_v30 }
 0x21c   : > { %v1355_v26 = vpop.xlane.xlu1 %1354  ;;  %v8409_v50 = vpop.permute.xlu2 %2400 }
 0x21d   : > { %v1397_v39 = vsub.f32 %v8231_v8, %v1355_v26  ;;  %v7364_v8 = vunpack.i.l.bf16 %v8197_v33 }
 0x21e   : > { %v1361_v37 = vpop.xlane.xlu0 %1360 }
 0x21f   : > { %v8356_v10 = vpop.eup %7510  ;;  %v1415_v1 = vmul.f32 1.442695, %v1397_v39  ;;  %v1399_v46 = vsub.f32 %v8229_v4, %v1361_v37  ;;  %7392 = vrot.lane.b32.xlu0 %v7391_v49, %s7826_s22  ;;  %v7365_v4 = vunpack.i.h.bf16 %v8197_v33  ;;  %v7381_v33 = vpack.i.bf16 %v8044_v62, %v8021_v57 }
 0x220   : > { %7072 = vmatmul.msk.f32.vlgmr.msra.gmra.mxu3 %vm901_vm1, %v8356_v10 }
 0x221   : > { %v8363_v56 = vpop.eup %7512  ;;  %7514 = vpow2.f32 %v1415_v1  ;;  %v1419_v35 = vmul.f32 1.442695, %v1399_v46  ;;  %1694 = vmatpush.msra.mxu3 %v7360_v51  ;;  %v7369_v46 = vunpack.i.l.bf16 %v8205_v38 }
 0x222   : > { %3695 = vrot.lane.b32.xlu2 %v8021_v57, %s7827_s23  ;;  %7074 = vmatmul.msk.f32.vlgmr.msrb.gmra.mxu2 %vm901_vm1, %v8363_v56 }
 0x223   : > { %7516 = vpow2.f32 %v1419_v35  ;;  %1746 = vmatpush.msrb.mxu2 %v7364_v8  ;;  %v7375_v8 = vunpack.i.h.bf16 %v8193_v32 }
 0x227   : > { %v8370_v22 = vpop.eup %7514  ;;  %3639 = vrot.lane.b32.xlu0 %v8007_v54, %s7827_s23 }
 0x228   : > { %7073 = vmatmul.msk.f32.vlgmr.msra.gmra.mxu1 %vm901_vm1, %v8370_v22 }
 0x229   : > { %v8377_v30 = vpop.eup %7516  ;;  %1720 = vmatpush.msra.mxu1 %v7365_v4 }
 0x22a   : > { %3667 = vrot.lane.b32.xlu2 %v8011_v55, %s7827_s23  ;;  %7075 = vmatmul.msk.f32.vlgmr.msrb.gmra.mxu3 %vm901_vm1, %v8377_v30 }
 0x22b   : > { %1772 = vmatpush.msrb.mxu3 %v7369_v46 }
 0x22d   : > { %2568 = vrot.lane.b32.xlu1 %v8107_v15, %s7825_s21 }
 0x22f   : > { %3697 = vrot.lane.b32.xlu0 %v8021_v57, %s7828_s24 }
 0x231   : > { %v8424_v37 = vpop.permute.xlu0 %2402 }
 0x232   : > { %3809 = vrot.lane.b32.xlu2 %v8044_v62, %s7828_s24 }
 0x234   : > { %v8420_v49 = vpop.permute.xlu1 %2486 }
 0x235   : > { %7382 = vrot.lane.b32.xlu1 %v7381_v33, %s7826_s22 }
 0x237   : > { %3669 = vrot.lane.b32.xlu0 %v8011_v55, %s7828_s24 }
 0x23a   : > { %3781 = vrot.lane.b32.xlu2 %v8040_v61, %s7828_s24 }
 0x23d   : > { %2512 = vrot.lane.b32.xlu1 %v8087_v9, %s7825_s21  ;;  %s11324_s21 = scalar_lea.vmem %s11512_s10, %s7924_s25 }
 0x23f   : > { %3751 = vrot.lane.b32.xlu0 %v8036_v60, %s7827_s23 }
 0x242   : > { %3863 = vrot.lane.b32.xlu2 %v8061_v2, %s7827_s23 }
 0x245   : > { %3641 = vrot.lane.b32.xlu1 %v8007_v54, %s7828_s24 }
 0x247   : > { %3723 = vrot.lane.b32.xlu0 %v8029_v58, %s7827_s23 }
 0x24a   : > { %3835 = vrot.lane.b32.xlu2 %v8051_v0, %s7827_s23 }
 0x24d   : > { %3753 = vrot.lane.b32.xlu1 %v8036_v60, %s7828_s24 }
 0x24f   : > { %3865 = vrot.lane.b32.xlu0 %v8061_v2, %s7828_s24 }
 0x252   : > { %3977 = vrot.lane.b32.xlu2 %v8080_v7, %s7828_s24 }
 0x255   : > { %v1370_v26 = vpop.xlane.xlu2 %1369  ;;  %3725 = vrot.lane.b32.xlu1 %v8029_v58, %s7828_s24 }
 0x256   : > { %v1402_v39 = vsub.f32 %v8263_v34, %v1370_v26 }
 0x257   : > { %3837 = vrot.lane.b32.xlu0 %v8051_v0, %s7828_s24 }
 0x258   : > { %v1425_v51 = vmul.f32 1.442695, %v1402_v39 }
 0x25a   : > { %7518 = vpow2.f32 %v1425_v51  ;;  %3949 = vrot.lane.b32.xlu2 %v8076_v6, %s7828_s24 }
 0x25c   : > { %v1373_v35 = vpop.xlane.xlu0 %1372 }
 0x25d   : > { %3807 = vrot.lane.b32.xlu1 %v8044_v62, %s7827_s23  ;;  %v1403_v33 = vsub.f32 %v8271_v41, %v1373_v35  ;;  %v1382_v26 = vpop.xlane.xlu2 %1381 }
 0x25e   : > { %v1406_v41 = vsub.f32 %v8273_v42, %v1382_v26  ;;  %v7370_v42 = vunpack.i.h.bf16 %v8205_v38  ;;  %v7380_v26 = vunpack.i.h.bf16 %v8335_v11 }
 0x25f   : > { %v1364_v1 = vpop.xlane.xlu1 %1363  ;;  %3919 = vrot.lane.b32.xlu0 %v8071_v5, %s7827_s23  ;;  %v1427_v39 = vmul.f32 1.442695, %v1403_v33 }
 0x260   : > { %v8432_v34 = vpop.eup %7518  ;;  %v1400_v4 = vsub.f32 %v8277_v44, %v1364_v1 }
 0x261   : > { %7078 = vmatmul.msk.f32.vlgmr.msra.gmra.mxu3 %vm901_vm1, %v8432_v34 }
 0x262   : > { %v1421_v46 = vmul.f32 1.442695, %v1400_v4  ;;  %1850 = vmatpush.msra.mxu3 %v7375_v8  ;;  %4031 = vrot.lane.b32.xlu2 %v8096_v12, %s7827_s23  ;;  %v7374_v8 = vunpack.i.l.bf16 %v8193_v32 }
 0x264   : > { %7520 = vpow2.f32 %v1421_v46 }
 0x265   : > { %3779 = vrot.lane.b32.xlu1 %v8040_v61, %s7827_s23  ;;  %7522 = vpow2.f32 %v1427_v39  ;;  %v1385_v32 = vpop.xlane.xlu2 %1384 }
 0x267   : > { %v1367_v51 = vpop.xlane.xlu1 %1366  ;;  %3891 = vrot.lane.b32.xlu0 %v8065_v3, %s7827_s23 }
 0x268   : > { %v1401_v44 = vsub.f32 %v8291_v63, %v1367_v51  ;;  %v1433_v63 = vmul.f32 1.442695, %v1406_v41 }
 0x26a   : > { %v8446_v1 = vpop.eup %7520  ;;  %v1423_v4 = vmul.f32 1.442695, %v1401_v44  ;;  %4061 = vrot.lane.b32.xlu2 %v8107_v15, %s7828_s24  ;;  %v1407_v44 = vsub.f32 %v8287_v53, %v1385_v32 }
 0x26b   : > { %7076 = vmatmul.msk.f32.vlgmr.msrb.gmra.mxu1 %vm901_vm1, %v8446_v1  ;;  %v8459_v33 = vpop.eup %7522 }
 0x26c   : > { %7524 = vpow2.f32 %v1423_v4  ;;  %1798 = vmatpush.msrb.mxu1 %v7374_v8 }
 0x26d   : > { %3921 = vrot.lane.b32.xlu1 %v8071_v5, %s7828_s24  ;;  %7526 = vpow2.f32 %v1433_v63  ;;  %v7379_v63 = vunpack.i.l.bf16 %v8335_v11 }
 0x26e   : > { %v1388_v8 = vpop.xlane.xlu0 %1387 }
 0x26f   : > { %v1376_v35 = vpop.xlane.xlu1 %1375  ;;  %4033 = vrot.lane.b32.xlu0 %v8096_v12, %s7828_s24  ;;  %v1408_v32 = vsub.f32 %v8305_v28, %v1388_v8 }
 0x270   : > { %v1404_v46 = vsub.f32 %v8301_v36, %v1376_v35  ;;  %v1435_v36 = vmul.f32 1.442695, %v1407_v44 }
 0x272   : > { %v8461_v39 = vpop.eup %7524  ;;  %v1429_v51 = vmul.f32 1.442695, %v1404_v46 }
 0x273   : > { %7077 = vmatmul.msk.f32.vlgmr.msra.gmra.mxu2 %vm901_vm1, %v8461_v39  ;;  %7079 = vmatmul.msk.f32.vlgmr.msra.gmra.mxu1 %vm901_vm1, %v8459_v33  ;;  %v8475_v4 = vpop.eup %7526 }
 0x274   : > { %7528 = vpow2.f32 %v1429_v51  ;;  %1824 = vmatpush.msra.mxu2 %v7370_v42  ;;  %1876 = vmatpush.msra.mxu1 %v7380_v26 }
 0x275   : > { %3893 = vrot.lane.b32.xlu1 %v8065_v3, %s7828_s24  ;;  %7530 = vpow2.f32 %v1435_v36 }
 0x277   : > { %v1379_v38 = vpop.xlane.xlu1 %1378  ;;  %4005 = vrot.lane.b32.xlu0 %v8087_v9, %s7828_s24 }
 0x278   : > { %v1405_v53 = vsub.f32 %v8313_v29, %v1379_v38  ;;  %v1437_v29 = vmul.f32 1.442695, %v1408_v32 }
 0x27a   : > { %v8477_v41 = vpop.eup %7528  ;;  %v1431_v35 = vmul.f32 1.442695, %v1405_v53 }
 0x27b   : > { %7080 = vmatmul.msk.f32.vlgmr.msrb.gmra.mxu2 %vm901_vm1, %v8477_v41  ;;  %7082 = vmatmul.msk.f32.vlgmr.msrb.gmra.mxu1 %vm901_vm1, %v8475_v4  ;;  %v7531_v46 = vpop.eup %7530 }
 0x27c   : > { %7532 = vpow2.f32 %v1431_v35  ;;  %1902 = vmatpush.msrb.mxu2 %v7379_v63  ;;  %7089 = vmatpush.xpose.msk.msrb.mxu1 %vm901_vm1, %v8245_v17  ;;  %v7401_v17 = vpack.i.bf16 %v8040_v61, %v8011_v55 }
 0x27d   : > { %3975 = vrot.lane.b32.xlu1 %v8080_v7, %s7827_s23  ;;  %7534 = vpow2.f32 %v1437_v29 }
 0x27f   : > { %v1391_v11 = vpop.xlane.xlu1 %1390  ;;  %4059 = vrot.lane.b32.xlu0 %v8107_v15, %s7827_s23 }
 0x280   : > { %v1409_v28 = vsub.f32 %v8322_v48, %v1391_v11  ;;  %v11564_v11 = vld [vmem:[#allocation13_spill] sm:$0xff] }
 0x281   : > { %v8492_v42 = vpop.permute.xlu0 %2484 }
 0x282   : > { %v8494_v26 = vpop.eup %7532  ;;  %v1439_v51 = vmul.f32 1.442695, %v1409_v28 }
 0x283   : > { %7081 = vmatmul.msk.f32.vlgmr.msrb.gmra.mxu3 %vm901_vm1, %v8494_v26  ;;  %7083 = vmatmul.msk.f32.vlgmr.msra.gmra.mxu2 %vm901_vm1, %v7531_v46  ;;  %v7535_v36 = vpop.eup %7534 }
 0x284   : > { %7536 = vpow2.f32 %v1439_v51  ;;  %7087 = vmatpush.xpose.msk.msrb.mxu3 %vm901_vm1, %v8111_v16  ;;  %7091 = vmatpush.xpose.msk.msra.mxu2 %vm901_vm1, %v8098_v13 }
 0x285   : > { %3947 = vrot.lane.b32.xlu1 %v8076_v6, %s7827_s23 }
 0x287   : > { %7402 = vrot.lane.b32.xlu0 %v7401_v17, %s7826_s22  ;;  %v1394_v48 = vpop.xlane.xlu1 %1393 }
 0x288   : > { %v1410_v44 = vsub.f32 %v8337_v24, %v1394_v48 }
 0x289   : > { %v2515_v38 = vpop.permute.xlu0 %2514 }
 0x28a   : > { %v7537_v8 = vpop.eup %7536  ;;  %v1441_v53 = vmul.f32 1.442695, %v1410_v44 }
 0x28b   : > { %7084 = vmatmul.msk.f32.vlgmr.msra.gmra.mxu3 %vm901_vm1, %v7535_v36  ;;  %7085 = vmatmul.msk.f32.vlgmr.msra.gmra.mxu1 %vm901_vm1, %v7537_v8  ;;  %v1485_v24 = vsel %vm901_vm1, %v7537_v8, 0.0 }
 0x28c   : > { %7538 = vpow2.f32 %v1441_v53  ;;  %7093 = vmatpush.xpose.msk.msra.mxu3 %vm901_vm1, %v8249_v19  ;;  %7095 = vmatpush.xpose.msk.msra.mxu1 %vm901_vm1, %v8269_v40  ;;  %v11560_v40 = vld [vmem:[#allocation15_spill] sm:$0xff] }
 0x28d   : > { %4003 = vrot.lane.b32.xlu1 %v8087_v9, %s7827_s23 }
 0x291   : > { %v7393_v13 = vpop.permute.xlu0 %7392 }
 0x292   : > { %v7539_v16 = vpop.eup %7538  ;;  %v7394_v63 = vunpack.i.l.bf16 %v7393_v13  ;;  %v7395_v35 = vunpack.i.h.bf16 %v7393_v13 }
 0x293   : > { %1486 = vadd.xlane.f32.xlu2 %v1485_v24  ;;  %7086 = vmatmul.msk.f32.vlgmr.msrb.gmra.mxu2 %vm901_vm1, %v7539_v16  ;;  %v1488_v28 = vsel %vm901_vm1, %v7539_v16, 0.0 }
 0x294   : > { %7088 = vmatmul.msk.f32.vlgmr.msrb.gmra.mxu3 %vm901_vm1, %v8239_v14  ;;  %7090 = vmatmul.msk.f32.vlgmr.msrb.gmra.mxu1 %vm901_vm1, %v8255_v23 }
 0x295   : > { %7097 = vmatpush.xpose.msk.msrb.mxu2 %vm901_vm1, %v8253_v21  ;;  %7099 = vmatpush.xpose.msk.msrb.mxu3 %vm901_vm1, %v8251_v20 }
 0x296   : > { %7101 = vmatpush.xpose.msk.msrb.mxu1 %vm901_vm1, %v8303_v45  ;;  %2855 = vmatpush.msrb.mxu0 %v7394_v63 }
 0x298   : > { %2959 = vmatpush.msra.mxu0 %v7395_v35 }
 0x299   : > { %v8529_v19 = vpop.permute.xlu0 %3639 }
 0x29a   : > { %11556 = vst [vmem:[#allocation18_spill] sm:$0xff] %v8529_v19 }
 0x29b   : > { %7092 = vmatmul.msk.f32.vlgmr.msra.gmra.mxu2 %vm901_vm1, %v8247_v18  ;;  %v11557_v18 = vld [vmem:[#allocation11_spill] sm:$0xff] }
 0x29c   : > { %7094 = vmatmul.msk.f32.vlgmr.msra.gmra.mxu3 %vm901_vm1, %v8259_v27  ;;  %7096 = vmatmul.msk.f32.vlgmr.msra.gmra.mxu1 %vm901_vm1, %v8289_v59  ;;  %v11558_v27 = vld [vmem:[#allocation12_spill] sm:$0xff] }
 0x29d   : > { %7103 = vmatpush.xpose.msk.msra.mxu2 %vm901_vm1, %v8275_v43  ;;  %7105 = vmatpush.xpose.msk.msra.mxu3 %vm901_vm1, %v8424_v37  ;;  %v1479_v43 = vsel %vm901_vm1, %v7531_v46, 0.0  ;;  %v1482_v37 = vsel %vm901_vm1, %v7535_v36, 0.0 }
 0x29e   : > { %7107 = vmatpush.xpose.msk.msra.mxu1 %vm901_vm1, %v8285_v52 }
 0x29f   : > { %v2569_v14 = vpop.permute.xlu1 %2568 }
 0x2a1   : > { %v8543_v20 = vpop.permute.xlu0 %3697 }
 0x2a3   : > { %7098 = vmatmul.msk.f32.vlgmr.msrb.gmra.mxu2 %vm901_vm1, %v8261_v31  ;;  %v2571_v31 = vpop.permute.xlu2 %2570  ;;  %v8602_v53 = vpop.f32.mrf.mxu3 }
 0x2a4   : > { %7100 = vmatmul.msk.f32.vlgmr.msrb.gmra.mxu3 %vm901_vm1, %v8257_v25  ;;  %7102 = vmatmul.msk.f32.vlgmr.msrb.gmra.mxu1 %vm901_vm1, %v8307_v47  ;;  %v11559_v25 = vld [vmem:[#allocation17_spill] sm:$0xff]  ;;  %v11562_v47 = vld [vmem:[#allocation14_spill] sm:$0xff] }
 0x2a5   : > { %7109 = vmatpush.xpose.msk.msrb.mxu2 %vm901_vm1, %v11557_v18  ;;  %7111 = vmatpush.xpose.msk.msrb.mxu3 %vm901_vm1, %v8420_v49  ;;  %v8594_v44 = vpop.f32.mrf.mxu1 }
 0x2a6   : > { %7113 = vmatpush.xpose.msk.msrb.mxu1 %vm901_vm1, %v2515_v38  ;;  %v8598_v38 = vpop.f32.mrf.mxu2 }
 0x2a7   : > { %v7383_v21 = vpop.permute.xlu1 %7382 }
 0x2a8   : > { %v7384_v59 = vunpack.i.l.bf16 %v7383_v21  ;;  %v7385_v29 = vunpack.i.h.bf16 %v7383_v21 }
 0x2a9   : > { %v8556_v23 = vpop.permute.xlu0 %3669 }
 0x2ab   : > { %7104 = vmatmul.msk.f32.vlgmr.msra.gmra.mxu2 %vm901_vm1, %v11558_v27 }
 0x2ac   : > { %7106 = vmatmul.msk.f32.vlgmr.msra.gmra.mxu3 %vm901_vm1, %v8409_v50  ;;  %7108 = vmatmul.msk.f32.vlgmr.msra.gmra.mxu1 %vm901_vm1, %v11559_v25  ;;  %v11563_v50 = vld [vmem:[#allocation16_spill] sm:$0xff] }
 0x2ad   : > { %7115 = vmatpush.xpose.msk.msra.mxu2 %vm901_vm1, %v11560_v40  ;;  %7117 = vmatpush.xpose.msk.msra.mxu3 %vm901_vm1, %v2571_v31  ;;  %v1443_v49 = vsel %vm901_vm1, %v11563_v50, 0.0  ;;  %v8608_v24 = vpop.f32.mrf.mxu3 }
 0x2ae   : > { %v8606_v16 = vpop.f32.mrf.mxu2 }
 0x2af   : > { %v2513_v45 = vpop.permute.xlu1 %2512 }
 0x2b1   : > { %1480 = vadd.xlane.f32.xlu0 %v1479_v43  ;;  %v8568_v52 = vpop.permute.xlu0 %3751 }
 0x2b2   : > { %11561 = vst [vmem:[#allocation11_spill] sm:$0xff] %v8568_v52 }
 0x2b3   : > { %7110 = vmatmul.msk.f32.vlgmr.msrb.gmra.mxu2 %vm901_vm1, %v11562_v47 }
 0x2b4   : > { %7112 = vmatmul.msk.f32.vlgmr.msrb.gmra.mxu3 %vm901_vm1, %v8492_v42  ;;  %7114 = vmatmul.msk.f32.vlgmr.msrb.gmra.mxu1 %vm901_vm1, %v2513_v45 }
 0x2b5   : > { %2829 = vmatpush.msrb.mxu3 %v7384_v59 }
 0x2b7   : > { %1444 = vadd.xlane.f32.xlu1 %v1443_v49 }
 0x2b9   : > { %1483 = vadd.xlane.f32.xlu0 %v1482_v37  ;;  %v8578_v32 = vpop.permute.xlu0 %3723 }
 0x2bb   : > { %7116 = vmatmul.msk.f32.vlgmr.msra.gmra.mxu2 %vm901_vm1, %v11564_v11 }
 0x2bc   : > { %7118 = vmatmul.msk.f32.vlgmr.msra.gmra.mxu3 %vm901_vm1, %v2569_v14 }
 0x2bd   : > { %2933 = vmatpush.msra.mxu3 %v7385_v29 }
 0x2c1   : > { %1489 = vadd.xlane.f32.xlu0 %v1488_v28  ;;  %v8584_v46 = vpop.permute.xlu0 %3865  ;;  %v8638_v28 = vpop.permute.xlu1 %3641 }
 0x2c2   : > { %11565 = vst [vmem:[#allocation12_spill] sm:$0xff] %v8584_v46 }
 0x2c9   : > { %v8586_v42 = vpop.permute.xlu0 %3837 }
 0x2d1   : > { %v8588_v51 = vpop.permute.xlu0 %3919 }
 0x2d2   : > { %11566 = vst [vmem:[#allocation17_spill] sm:$0xff] %v8588_v51 }
 0x2d9   : > { %v8590_v17 = vpop.permute.xlu0 %3891 }
 0x2da   : > { %11567 = vst [vmem:[#allocation15_spill] sm:$0xff] %v8590_v17 }
 0x2e1   : > { %v8592_v48 = vpop.permute.xlu0 %4033 }
 0x2e2   : > { %11568 = vst [vmem:[#allocation14_spill] sm:$0xff] %v8592_v48 }
 0x2e4   : > { %v8614_v27 = vpop.f32.mrf.mxu3 }
 0x2e5   : > { %11574 = vst [vmem:[#allocation22_spill] sm:$0xff] %v8614_v27 }
 0x2e8   : > { %v8600_v8 = vpop.f32.mrf.mxu1 }
 0x2e9   : > { %v8596_v36 = vpop.permute.xlu0 %4005  ;;  %11570 = vst [vmem:[#allocation13_spill] sm:$0xff] %v8600_v8 }
 0x2ea   : > { %11569 = vst [vmem:[#allocation16_spill] sm:$0xff] %v8596_v36  ;;  %v11594_v36 = vld [vmem:[#allocation4_spill] sm:$0xff] }
 0x2f0   : > { %v8610_v63 = vpop.f32.mrf.mxu1 }
 0x2f1   : > { %v8604_v13 = vpop.permute.xlu0 %4059  ;;  %11572 = vst [vmem:[#allocation20_spill] sm:$0xff] %v8610_v63 }
 0x2f2   : > { %11571 = vst [vmem:[#allocation19_spill] sm:$0xff] %v8604_v13 }
 0x2f6   : > { %v8612_v14 = vpop.f32.mrf.mxu2 }
 0x2f7   : > { %11573 = vst [vmem:[#allocation21_spill] sm:$0xff] %v8612_v14 }
 0x2f8   : > { %v8616_v31 = vpop.f32.mrf.mxu1 }
 0x2f9   : > { %v7403_v35 = vpop.permute.xlu0 %7402  ;;  %11575 = vst [vmem:[#allocation23_spill] sm:$0xff] %v8616_v31  ;;  %v8642_v31 = vpop.permute.xlu2 %7387 }
 0x2fa   : > { %v7405_v18 = vunpack.i.h.bf16 %v7403_v35  ;;  %v7404_v21 = vunpack.i.l.bf16 %v7403_v35 }
 0x2fc   : > { %2803 = vmatpush.msrb.mxu2 %v7404_v21 }
 0x2fe   : > { %2907 = vmatpush.msra.mxu2 %v7405_v18  ;;  %v8618_v25 = vpop.f32.mrf.mxu2 }
 0x2ff   : > { %11576 = vst [vmem:[#allocation24_spill] sm:$0xff] %v8618_v25 }
 0x301   : > { %v8654_v63 = vpop.permute.xlu2 %7397 }
 0x306   : > { %v8620_v40 = vpop.f32.mrf.mxu3  ;;  %v8624_v59 = vpop.f32.mrf.mxu2 }
 0x307   : > { %11577 = vst [vmem:[#allocation25_spill] sm:$0xff] %v8620_v40  ;;  %v8650_v40 = vpop.permute.xlu1 %3753 }
 0x308   : > { %v8622_v43 = vpop.f32.mrf.mxu1  ;;  %11580 = vst [vmem:[#allocation28_spill] sm:$0xff] %v8650_v40 }
 0x30e   : > { %v8626_v45 = vpop.f32.mrf.mxu3 }
 0x311   : > { %v2201_v47 = vpop.f32.mrf.mxu1 }
 0x312   : > { %v8628_v50 = vmul.f32 0.35355338, %v2201_v47 }
 0x314   : > { %v2615_v49 = vsel %vm901_vm1, %v8628_v50, -inf }
 0x315   : > { %2616 = vmax.xlane.f32.xlu1 %v2615_v49 }
 0x316   : > { %v8632_v37 = vpop.f32.mrf.mxu2 }
 0x317   : > { %11578 = vst [vmem:[#allocation26_spill] sm:$0xff] %v8632_v37  ;;  %v8634_v29 = vpop.f32.mrf.mxu3  ;;  %v7389_v37 = vunpack.i.l.bf16 %v8642_v31 }
 0x319   : > { %v8636_v11 = vpop.f32.mrf.mxu1 }
 0x31a   : > { %11579 = vst [vmem:[#allocation27_spill] sm:$0xff] %v8636_v11 }
 0x31e   : > { %v2229_v35 = vpop.f32.mrf.mxu2 }
 0x31f   : > { %v8640_v18 = vmul.f32 0.35355338, %v2229_v35  ;;  %v2257_v21 = vpop.f32.mrf.mxu3 }
 0x320   : > { %v8644_v47 = vmul.f32 0.35355338, %v2257_v21 }
 0x321   : > { %v2369_v48 = vpop.f32.mrf.mxu1  ;;  %v2618_v49 = vsel %vm901_vm1, %v8640_v18, -inf }
 0x322   : > { %v2621_v51 = vsel %vm901_vm1, %v8644_v47, -inf  ;;  %2619 = vmax.xlane.f32.xlu0 %v2618_v49  ;;  %v8662_v49 = vmul.f32 0.35355338, %v2369_v48  ;;  %v1449_v48 = vsel %vm901_vm1, %v8370_v22, 0.0 }
 0x323   : > { %2622 = vmax.xlane.f32.xlu1 %v2621_v51 }
 0x324   : > { %v2633_v27 = vsel %vm901_vm1, %v8662_v49, -inf }
 0x327   : > { %v2341_v11 = vpop.f32.mrf.mxu3 }
 0x328   : > { %v8652_v25 = vmul.f32 0.35355338, %v2341_v11  ;;  %v8666_v11 = vpop.permute.xlu1 %3725 }
 0x329   : > { %v2453_v35 = vpop.f32.mrf.mxu1 }
 0x32a   : > { %v8656_v13 = vmul.f32 0.35355338, %v2453_v35  ;;  %v2630_v21 = vsel %vm901_vm1, %v8652_v25, -inf  ;;  %v2313_v35 = vpop.f32.mrf.mxu2 }
 0x32b   : > { %2631 = vmax.xlane.f32.xlu2 %v2630_v21  ;;  %v8672_v21 = vpop.permute.xlu2 %3695  ;;  %v8674_v40 = vmul.f32 0.35355338, %v2313_v35  ;;  %v7406_v35 = vpack.i.bf16 %v8087_v9, %v8065_v3 }
 0x32c   : > { %v2642_v46 = vsel %vm901_vm1, %v8656_v13, -inf  ;;  %11581 = vst [vmem:[#allocation29_spill] sm:$0xff] %v8672_v21 }
 0x32d   : > { %2643 = vmax.xlane.f32.xlu1 %v2642_v46  ;;  %v2627_v46 = vsel %vm901_vm1, %v8674_v40, -inf }
 0x32f   : > { %v2425_v51 = vpop.f32.mrf.mxu3 }
 0x330   : > { %v8664_v52 = vmul.f32 0.35355338, %v2425_v51  ;;  %v8680_v51 = vpop.permute.xlu1 %3807 }
 0x331   : > { %11582 = vst [vmem:[#allocation30_spill] sm:$0xff] %v8680_v51 }
 0x332   : > { %v2639_v14 = vsel %vm901_vm1, %v8664_v52, -inf }
 0x333   : > { %2634 = vmax.xlane.f32.xlu2 %v2633_v27  ;;  %2640 = vmax.xlane.f32.xlu0 %v2639_v14  ;;  %v8682_v19 = vpop.permute.xlu2 %3667  ;;  %v1446_v27 = vsel %vm901_vm1, %v8356_v10, 0.0  ;;  %v1455_v14 = vsel %vm901_vm1, %v8377_v30, 0.0  ;;  %v1461_v10 = vsel %vm901_vm1, %v8461_v39, 0.0  ;;  %v1464_v39 = vsel %vm901_vm1, %v8432_v34, 0.0 }
 0x338   : > { %v8690_v21 = vpop.permute.xlu1 %3779 }
 0x33b   : > { %2628 = vmax.xlane.f32.xlu2 %v2627_v46  ;;  %1450 = vadd.xlane.f32.xlu0 %v1449_v48  ;;  %v8693_v22 = vpop.permute.xlu2 %3809  ;;  %v1452_v46 = vsel %vm901_vm1, %v8363_v56, 0.0  ;;  %v8701_v48 = vpop.f32.mrf.mxu2 }
 0x33c   : > { %11583 = vst [vmem:[#allocation31_spill] sm:$0xff] %v8693_v22 }
 0x33d   : > { %11585 = vst [vmem:[#allocation33_spill] sm:$0xff] %v8701_v48 }
 0x340   : > { %v8699_v30 = vpop.permute.xlu1 %3921 }
 0x341   : > { %11584 = vst [vmem:[#allocation32_spill] sm:$0xff] %v8699_v30 }
 0x343   : > { %1447 = vadd.xlane.f32.xlu2 %v1446_v27  ;;  %1456 = vadd.xlane.f32.xlu0 %v1455_v14  ;;  %v8703_v27 = vpop.permute.xlu2 %3781  ;;  %v1458_v14 = vsel %vm901_vm1, %v8446_v1, 0.0  ;;  %v8719_v1 = vpop.f32.mrf.mxu3 }
 0x344   : > { %11587 = vst [vmem:[#allocation35_spill] sm:$0xff] %v8719_v1 }
 0x346   : > { %7407 = vrot.lane.b32.xlu1 %v7406_v35, %s7826_s22  ;;  %v1467_v35 = vsel %vm901_vm1, %v8459_v33, 0.0 }
 0x348   : > { %v8709_v56 = vpop.permute.xlu1 %3893 }
 0x34b   : > { %1453 = vadd.xlane.f32.xlu2 %v1452_v46  ;;  %1462 = vadd.xlane.f32.xlu0 %v1461_v10  ;;  %v2481_v46 = vpop.f32.mrf.mxu2  ;;  %v1470_v10 = vsel %vm901_vm1, %v8477_v41, 0.0  ;;  %v8715_v48 = vpop.permute.xlu2 %3863 }
 0x34c   : > { %11586 = vst [vmem:[#allocation34_spill] sm:$0xff] %v8715_v48  ;;  %v8717_v30 = vmul.f32 0.35355338, %v2481_v46 }
 0x34e   : > { %v2645_v33 = vsel %vm901_vm1, %v8717_v30, -inf }
 0x350   : > { %v8725_v34 = vpop.permute.xlu1 %3975 }
 0x351   : > { %11588 = vst [vmem:[#allocation36_spill] sm:$0xff] %v8725_v34 }
 0x353   : > { %1459 = vadd.xlane.f32.xlu2 %v1458_v14  ;;  %1468 = vadd.xlane.f32.xlu0 %v1467_v35  ;;  %v2537_v14 = vpop.f32.mrf.mxu1  ;;  %v1473_v35 = vsel %vm901_vm1, %v8494_v26, 0.0  ;;  %v8727_v41 = vpop.permute.xlu2 %3835 }
 0x354   : > { %v2565_v1 = vpop.f32.mrf.mxu2 }
 0x355   : > { %v8737_v22 = vmul.f32 0.35355338, %v2565_v1  ;;  %v8750_v1 = vpop.xlane.xlu0 %1480 }
 0x356   : > { %vm2092_vm8 = vweird.f32 %v8750_v1 }
 0x358   : > { %v8735_v51 = vpop.permute.xlu1 %3947 }
 0x359   : > { %11589 = vst [vmem:[#allocation37_spill] sm:$0xff] %v8735_v51 }
 0x35b   : > { %1465 = vadd.xlane.f32.xlu2 %v1464_v39  ;;  %1471 = vadd.xlane.f32.xlu0 %v1470_v10  ;;  %v8729_v39 = vmul.f32 0.35355338, %v2537_v14  ;;  %v2593_v10 = vpop.f32.mrf.mxu3  ;;  %v2654_v14 = vsel %vm901_vm1, %v8737_v22, -inf }
 0x35c   : > { %v8733_v48 = vmul.f32 0.35355338, %v2593_v10 }
 0x35d   : > { %v2651_v46 = vsel %vm901_vm1, %v8729_v39, -inf }
 0x35e   : > { %v2657_v26 = vsel %vm901_vm1, %v8733_v48, -inf }
 0x360   : > { %v8747_v10 = vpop.permute.xlu1 %4003 }
 0x361   : > { %11591 = vst [vmem:[#allocation39_spill] sm:$0xff] %v8747_v10 }
 0x363   : > { %2646 = vmax.xlane.f32.xlu2 %v2645_v33  ;;  %1474 = vadd.xlane.f32.xlu0 %v1473_v35  ;;  %v8741_v33 = vpop.permute.xlu2 %3977  ;;  %v7421_v35 = vpack.i.bf16 %v8040_v61, %v8036_v60 }
 0x364   : > { %11590 = vst [vmem:[#allocation38_spill] sm:$0xff] %v8741_v33  ;;  %v8764_v33 = vpack.i.bf16 %v8107_v15, %v8096_v12 }
 0x366   : > { %11593 = vst [vmem:[#allocation41_spill] sm:$0xff] %v8764_v33 }
 0x368   : > { %v8754_v34 = vpop.xlane.xlu1 %1444 }
 0x369   : > { %vm1912_vm3 = vweird.f32 %v8754_v34 }
 0x36b   : > { %2652 = vmax.xlane.f32.xlu2 %v2651_v46  ;;  %v8752_v46 = vpop.permute.xlu2 %3949 }
 0x370   : > { %2658 = vmax.xlane.f32.xlu1 %v2657_v26  ;;  %v8758_v26 = vpop.xlane.xlu0 %1483 }
 0x373   : > { %2655 = vmax.xlane.f32.xlu2 %v2654_v14  ;;  %v8760_v14 = vpop.permute.xlu2 %4031 }
 0x374   : > { %11592 = vst [vmem:[#allocation40_spill] sm:$0xff] %v8760_v14 }
 0x377   : > { %7422 = vrot.lane.b32.xlu0 %v7421_v35, %s7829_s26  ;;  %v7416_v35 = vpack.i.bf16 %v8029_v58, %v8021_v57 }
 0x378   : > { %v8774_v14 = vpop.xlane.xlu0 %1489 }
 0x37b   : > { %v8776_v15 = vpop.permute.xlu2 %4061 }
 0x37c   : > { %11595 = vst [vmem:[#allocation4_spill] sm:$0xff] %v8776_v15 }
 0x37f   : > { %5035 = vrot.lane.b32.xlu0 %v8007_v54, %s7830_s27 }
 0x387   : > { %7447 = vrot.lane.b32.xlu0 %v8764_v33, %s7829_s26 }
 0x388   : > { %v2617_v10 = vpop.xlane.xlu1 %2616 }
 0x389   : > { %v2661_v51 = vsub.f32 %v8628_v50, %v2617_v10  ;;  %7417 = vrot.lane.b32.xlu1 %v7416_v35, %s7829_s26 }
 0x38b   : > { %v2678_v8 = vmul.f32 1.442695, %v2661_v51  ;;  %7412 = vrot.lane.b32.xlu2 %v11594_v36, %s7829_s26  ;;  %v8786_v51 = vpop.xlane.xlu2 %1486 }
 0x38d   : > { %7540 = vpow2.f32 %v2678_v8 }
 0x38f   : > { %5117 = vrot.lane.b32.xlu0 %v8029_v58, %s7831_s28 }
 0x391   : > { %5033 = vrot.lane.b32.xlu1 %v8007_v54, %s7831_s28 }
 0x393   : > { %v8782_v33 = vpop.eup %7540 }
 0x394   : > { %11596 = vst [vmem:[#allocation42_spill] sm:$0xff] %v8782_v33  ;;  %7120 = vmatmul.msk.f32.vlgmr.msrb.gmra.mxu2 %vm901_vm1, %v8782_v33 }
 0x395   : > { %v2620_v50 = vpop.xlane.xlu0 %2619 }
 0x396   : > { %v2623_v36 = vpop.xlane.xlu1 %2622  ;;  %v2662_v8 = vsub.f32 %v8640_v18, %v2620_v50  ;;  %v7399_v50 = vunpack.i.l.bf16 %v8654_v63 }
 0x397   : > { %v2663_v10 = vsub.f32 %v8644_v47, %v2623_v36  ;;  %5203 = vrot.lane.b32.xlu0 %v8044_v62, %s7830_s27 }
 0x398   : > { %v2680_v35 = vmul.f32 1.442695, %v2662_v8 }
 0x399   : > { %v2682_v12 = vmul.f32 1.442695, %v2663_v10  ;;  %5119 = vrot.lane.b32.xlu1 %v8029_v58, %s7830_s27 }
 0x39a   : > { %7542 = vpow2.f32 %v2680_v35  ;;  %v7390_v35 = vunpack.i.h.bf16 %v8642_v31  ;;  %v7400_v31 = vunpack.i.h.bf16 %v8654_v63 }
 0x39b   : > { %7544 = vpow2.f32 %v2682_v12 }
 0x39e   : > { %v2632_v15 = vpop.xlane.xlu2 %2631 }
 0x39f   : > { %v2666_v33 = vsub.f32 %v8652_v25, %v2632_v15  ;;  %5091 = vrot.lane.b32.xlu0 %v8021_v57, %s7830_s27 }
 0x3a0   : > { %v8795_v17 = vpop.eup %7542  ;;  %v2644_v18 = vpop.xlane.xlu1 %2643 }
 0x3a1   : > { %11597 = vst [vmem:[#allocation43_spill] sm:$0xff] %v8795_v17  ;;  %v8800_v47 = vpop.eup %7544  ;;  %v2688_v36 = vmul.f32 1.442695, %v2666_v33  ;;  %5063 = vrot.lane.b32.xlu1 %v8011_v55, %s7830_s27  ;;  %7121 = vmatmul.msk.f32.vlgmr.msrb.gmra.mxu3 %vm901_vm1, %v8795_v17  ;;  %v2670_v12 = vsub.f32 %v8656_v13, %v2644_v18 }
 0x3a2   : > { %11598 = vst [vmem:[#allocation44_spill] sm:$0xff] %v8800_v47  ;;  %7122 = vmatmul.msk.f32.vlgmr.msrb.gmra.mxu0 %vm901_vm1, %v8800_v47  ;;  %3037 = vmatpush.msrb.mxu3 %v7389_v37 }
 0x3a3   : > { %7546 = vpow2.f32 %v2688_v36  ;;  %3063 = vmatpush.msrb.mxu0 %v7399_v50  ;;  %v2696_v15 = vmul.f32 1.442695, %v2670_v12 }
 0x3a5   : > { %7548 = vpow2.f32 %v2696_v15 }
 0x3a6   : > { %v2635_v25 = vpop.xlane.xlu2 %2634  ;;  %v2641_v10 = vpop.xlane.xlu0 %2640 }
 0x3a7   : > { %v2667_v8 = vsub.f32 %v8662_v49, %v2635_v25  ;;  %5089 = vrot.lane.b32.xlu0 %v8021_v57, %s7831_s28 }
 0x3a9   : > { %v8813_v33 = vpop.eup %7546  ;;  %v2690_v58 = vmul.f32 1.442695, %v2667_v8  ;;  %5061 = vrot.lane.b32.xlu1 %v8011_v55, %s7831_s28 }
 0x3aa   : > { %11599 = vst [vmem:[#allocation45_spill] sm:$0xff] %v8813_v33  ;;  %7125 = vmatmul.msk.f32.vlgmr.msra.gmra.mxu3 %vm901_vm1, %v8813_v33 }
 0x3ab   : > { %7550 = vpow2.f32 %v2690_v58  ;;  %3141 = vmatpush.msra.mxu3 %v7390_v35  ;;  %v8821_v49 = vpop.eup %7548  ;;  %v2669_v58 = vsub.f32 %v8664_v52, %v2641_v10 }
 0x3ac   : > { %11600 = vst [vmem:[#allocation46_spill] sm:$0xff] %v8821_v49 }
 0x3ad   : > { %v2694_v63 = vmul.f32 1.442695, %v2669_v58 }
 0x3ae   : > { %v2629_v13 = vpop.xlane.xlu2 %2628  ;;  %v8823_v18 = vpop.xlane.xlu0 %1450 }
 0x3af   : > { %v2665_v37 = vsub.f32 %v8674_v40, %v2629_v13  ;;  %v1476_v40 = vsel %vm901_vm1, %v8475_v4, 0.0 }
 0x3b1   : > { %v8825_v50 = vpop.eup %7550  ;;  %v2686_v36 = vmul.f32 1.442695, %v2665_v37  ;;  %5147 = vrot.lane.b32.xlu1 %v8036_v60, %s7830_s27 }
 0x3b2   : > { %11601 = vst [vmem:[#allocation47_spill] sm:$0xff] %v8825_v50  ;;  %7126 = vmatmul.msk.f32.vlgmr.msra.gmra.mxu0 %vm901_vm1, %v8825_v50  ;;  %7129 = vmatmul.msk.f32.vlgmr.msrb.gmra.mxu3 %vm901_vm1, %v8821_v49 }
 0x3b3   : > { %7552 = vpow2.f32 %v2686_v36  ;;  %3167 = vmatpush.msra.mxu0 %v7400_v31  ;;  %v7426_v31 = vpack.i.bf16 %v8051_v0, %v8044_v62  ;;  %v8865_v36 = vmul.f32 0.35355338, %v8634_v29  ;;  %v8882_v29 = vpack.i.bf16 %v8065_v3, %v8061_v2 }
 0x3b4   : > { %1477 = vadd.xlane.f32.xlu2 %v1476_v40  ;;  %7554 = vpow2.f32 %v2694_v63  ;;  %v7451_v63 = vpack.i.bf16 %v8036_v60, %v8007_v54 }
 0x3b5   : > { %7556 = vrcp.f32 %v8754_v34  ;;  %11604 = vst [vmem:[#allocation50_spill] sm:$0xff] %v8882_v29 }
 0x3b6   : > { %v8837_v12 = vpop.xlane.xlu2 %1447  ;;  %v8843_v13 = vpop.xlane.xlu0 %1456  ;;  %7558 = vrcp.f32 %v8750_v1 }
 0x3b7   : > { %7560 = vrcp.f32 %v8837_v12  ;;  %vm1927_vm10 = vweird.f32 %v8837_v12 }
 0x3b8   : > { %v7408_v15 = vpop.permute.xlu1 %7407 }
 0x3b9   : > { %v8839_v25 = vpop.eup %7552  ;;  %v7410_v8 = vunpack.i.h.bf16 %v7408_v15  ;;  %v7409_v35 = vunpack.i.l.bf16 %v7408_v15  ;;  %5145 = vrot.lane.b32.xlu1 %v8036_v60, %s7831_s28  ;;  %v2147_v15 = vld [vmem:[%s11508_s6] sm:$0xff] }
 0x3ba   : > { %11602 = vst [vmem:[#allocation48_spill] sm:$0xff] %v8839_v25  ;;  %7124 = vmatmul.msk.f32.vlgmr.msra.gmra.mxu2 %vm901_vm1, %v8839_v25  ;;  %v8849_v52 = vpop.eup %7554  ;;  %7301 = vmatpush.msrb.mxu3 %v2147_v15 }
 0x3bb   : > { %3011 = vmatpush.msrb.mxu2 %v7409_v35  ;;  %11603 = vst [vmem:[#allocation49_spill] sm:$0xff] %v8849_v52  ;;  %v8886_v35 = vpop.eup %7556 }
 0x3bc   : > { %vm1913_vm2 = vweird.f32 %v8886_v35 }
 0x3bd   : > { %3115 = vmatpush.msra.mxu2 %v7410_v8  ;;  %vm8944_vm4 = vmor %vm1912_vm3, %vm1913_vm2  ;;  %vm2107_vm2 = vweird.f32 %v8758_v26  ;;  %vm1942_vm3 = vweird.f32 %v8823_v18 }
 0x3be   : > { %v8847_v4 = vpop.xlane.xlu2 %1453  ;;  %v8855_v10 = vpop.xlane.xlu0 %1462 }
 0x3c1   : > { %5175 = vrot.lane.b32.xlu1 %v8040_v61, %s7830_s27 }
 0x3c2   : > { %7128 = vmatmul.msk.f32.vlgmr.msrb.gmra.mxu2 %vm901_vm1, %v8849_v52  ;;  %v8899_v52 = vpack.i.bf16 %v8076_v6, %v8071_v5 }
 0x3c3   : > { %3589 = vmatpush.msrb.mxu2 %v2147_v15  ;;  %v1908_v15 = vmul.f32 %v8886_v35, %v8754_v34 }
 0x3c4   : > { %11605 = vst [vmem:[#allocation51_spill] sm:$0xff] %v8899_v52 }
 0x3c6   : > { %v8857_v37 = vpop.xlane.xlu2 %1459  ;;  %v8867_v58 = vpop.xlane.xlu0 %1468 }
 0x3c9   : > { %5173 = vrot.lane.b32.xlu1 %v8040_v61, %s7831_s28  ;;  %v2612_v61 = vsel %vm901_vm1, %v8865_v36, -inf }
 0x3cc   : > { %7427 = vrot.lane.b32.xlu2 %v7426_v31, %s7829_s26 }
 0x3ce   : > { %v8869_v40 = vpop.xlane.xlu2 %1465 }
 0x3d1   : > { %7452 = vrot.lane.b32.xlu1 %v7451_v63, %s7826_s22  ;;  %2613 = vmax.xlane.f32.xlu0 %v2612_v61  ;;  %v8890_v63 = vpop.xlane.xlu0 %1471 }
 0x3d4   : > { %7432 = vrot.lane.b32.xlu2 %v8882_v29, %s7829_s26 }
 0x3d6   : > { %v2647_v8 = vpop.xlane.xlu2 %2646 }
 0x3d7   : > { %v2671_v31 = vsub.f32 %v8717_v30, %v2647_v8  ;;  %v8903_v30 = vpop.eup %7558  ;;  %v1909_v8 = vsub.f32 1.0, %v1908_v15 }
 0x3d8   : > { %v8905_v57 = vpop.eup %7560  ;;  %v2088_v54 = vmul.f32 %v8903_v30, %v8750_v1  ;;  %vm2093_vm6 = vweird.f32 %v8903_v30 }
 0x3d9   : > { %v2698_v61 = vmul.f32 1.442695, %v2671_v31  ;;  %5287 = vrot.lane.b32.xlu1 %v8065_v3, %s7830_s27  ;;  %v1923_v15 = vmul.f32 %v8905_v57, %v8837_v12  ;;  %v8917_v49 = vpop.xlane.xlu0 %1474  ;;  %vm1928_vm7 = vweird.f32 %v8905_v57  ;;  %vm8981_vm9 = vmor %vm2092_vm8, %vm2093_vm6 }
 0x3da   : > { %vm8999_vm11 = vmor %vm1927_vm10, %vm1928_vm7  ;;  %vm2122_vm10 = vweird.f32 %v8786_v51 }
 0x3db   : > { %7562 = vpow2.f32 %v2698_v61  ;;  %v1924_v17 = vsub.f32 1.0, %v1923_v15 }
 0x3dc   : > { %7437 = vrot.lane.b32.xlu2 %v8899_v52, %s7829_s26  ;;  %7564 = vrcp.f32 %v8758_v26  ;;  %v1910_v52 = vmul.f32 %v8886_v35, %v1909_v8  ;;  %v2089_v8 = vsub.f32 1.0, %v2088_v54 }
 0x3dd   : > { %7566 = vrcp.f32 %v8823_v18 }
 0x3de   : > { %v2653_v29 = vpop.xlane.xlu2 %2652 }
 0x3df   : > { %v2673_v31 = vsub.f32 %v8729_v39, %v2653_v29  ;;  %v8923_v39 = vpack.i.bf16 %v8087_v9, %v8080_v7 }
 0x3e1   : > { %v8909_v55 = vpop.eup %7562  ;;  %v2702_v61 = vmul.f32 1.442695, %v2673_v31  ;;  %11607 = vst [vmem:[#allocation53_spill] sm:$0xff] %v8923_v39 }
 0x3e2   : > { %11606 = vst [vmem:[#allocation52_spill] sm:$0xff] %v8909_v55  ;;  %7130 = vmatmul.msk.f32.vlgmr.msrb.gmra.mxu0 %vm901_vm1, %v8909_v55  ;;  %v8931_v47 = vpop.eup %7564  ;;  %v1911_v55 = vadd.f32 %v8886_v35, %v1910_v52  ;;  %v2090_v52 = vmul.f32 %v8903_v30, %v2089_v8  ;;  %v1925_v8 = vmul.f32 %v8905_v57, %v1924_v17 }
 0x3e3   : > { %7568 = vpow2.f32 %v2702_v61  ;;  %7169 = vmatpush.xpose.msk.msrb.mxu0 %vm901_vm1, %v8556_v23  ;;  %v2659_v29 = vpop.xlane.xlu1 %2658  ;;  %v8935_v33 = vpop.eup %7566  ;;  %v1918_v23 = vand.u32 2147483648, %v8754_v34  ;;  %v2103_v15 = vmul.f32 %v8931_v47, %v8758_v26  ;;  %vm2108_vm14 = vweird.f32 %v8931_v47 }
 0x3e4   : > { %v2675_v31 = vsub.f32 %v8733_v48, %v2659_v29  ;;  %7442 = vrot.lane.b32.xlu2 %v8923_v39, %s7829_s26  ;;  %7570 = vrcp.f32 %v8786_v51  ;;  %v1916_v29 = vand.u32 2147483647, %v8754_v34  ;;  %v1926_v50 = vadd.f32 %v8905_v57, %v1925_v8 }
 0x3e5   : > { %v1919_v25 = vor.u32 1.1754944e-38, %v1918_v23  ;;  %vm1943_vm15 = vweird.f32 %v8935_v33 }
 0x3e6   : > { %v2706_v61 = vmul.f32 1.442695, %v2675_v31  ;;  %v2656_v60 = vpop.xlane.xlu2 %2655  ;;  %vm1917_vm5 = vcmp.eq.f32.partialorder %v1916_v29, 8.507059e+37  ;;  %v2096_v29 = vand.u32 2147483647, %v8750_v1 }
 0x3e7   : > { %v2674_v48 = vsub.f32 %v8737_v22, %v2656_v60  ;;  %v1915_v60 = vsel %vm8944_vm4, %v8886_v35, %v1911_v55  ;;  %v1938_v22 = vmul.f32 %v8935_v33, %v8823_v18  ;;  %v2091_v55 = vadd.f32 %v8903_v30, %v2090_v52  ;;  %vm9040_vm4 = vmor %vm2107_vm2, %vm2108_vm14 }
 0x3e8   : > { %7572 = vpow2.f32 %v2706_v61  ;;  %v2104_v35 = vsub.f32 1.0, %v2103_v15  ;;  %v1920_v39 = vsel %vm1917_vm5, %v1919_v25, %v1915_v60  ;;  %v2098_v52 = vand.u32 2147483648, %v8750_v1  ;;  %vm9050_vm5 = vmor %vm1942_vm3, %vm1943_vm15 }
 0x3e9   : > { %v8941_v54 = vpop.eup %7568  ;;  %7574 = vrcp.f32 %v8847_v4  ;;  %v2704_v31 = vmul.f32 1.442695, %v2674_v48  ;;  %v8956_v34 = vpop.permute.xlu0 %7422  ;;  %v1939_v17 = vsub.f32 1.0, %v1938_v22  ;;  %v1933_v25 = vand.u32 2147483648, %v8837_v12 }
 0x3ea   : > { %11608 = vst [vmem:[#allocation54_spill] sm:$0xff] %v8941_v54  ;;  %7132 = vmatmul.msk.f32.vlgmr.msra.gmra.mxu2 %vm901_vm1, %v8941_v54  ;;  %v8961_v61 = vpop.eup %7570  ;;  %v1931_v1 = vand.u32 2147483647, %v8837_v12  ;;  %v2095_v22 = vsel %vm8981_vm9, %v8903_v30, %v2091_v55  ;;  %v1930_v30 = vsel %vm8999_vm11, %v8905_v57, %v1926_v50  ;;  %vm2097_vm12 = vcmp.eq.f32.partialorder %v2096_v29, 8.507059e+37 }
 0x3eb   : > { %7576 = vpow2.f32 %v2704_v31  ;;  %v2118_v54 = vmul.f32 %v8961_v61, %v8786_v51  ;;  %v1921_v31 = vmul.f32 %v1920_v39, %v8598_v38  ;;  %v2105_v38 = vmul.f32 %v8931_v47, %v2104_v35 }
 0x3ec   : > { %5201 = vrot.lane.b32.xlu2 %v8044_v62, %s7831_s28  ;;  %7578 = vrcp.f32 %v8774_v14  ;;  %v1940_v55 = vmul.f32 %v8935_v33, %v1939_v17  ;;  %v2099_v39 = vor.u32 1.1754944e-38, %v2098_v52  ;;  %v1934_v35 = vor.u32 1.1754944e-38, %v1933_v25 }
 0x3ed   : > { %7580 = vrcp.f32 %v8843_v13  ;;  %v2119_v15 = vsub.f32 1.0, %v2118_v54  ;;  %vm1932_vm13 = vcmp.eq.f32.partialorder %v1931_v1, 8.507059e+37  ;;  %v2106_v8 = vadd.f32 %v8931_v47, %v2105_v38 }
 0x3ee   : > { %v8967_v48 = vpop.eup %7572  ;;  %v1948_v54 = vand.u32 2147483648, %v8823_v18  ;;  %v2111_v29 = vand.u32 2147483647, %v8758_v26  ;;  %v2113_v52 = vand.u32 2147483648, %v8758_v26  ;;  %7582 = vrcp.f32 %v8857_v37 }
 0x3ef   : > { %11611 = vst [vmem:[#allocation55_spill] sm:$0xff] %v8967_v48  ;;  %v8973_v23 = vpop.eup %7574  ;;  %7134 = vmatmul.msk.f32.vlgmr.msra.gmra.mxu0 %vm901_vm1, %v8967_v48  ;;  %v2100_v48 = vsel %vm2097_vm12, %v2099_v39, %v2095_v22  ;;  %v1946_v22 = vand.u32 2147483647, %v8823_v18  ;;  %v2120_v38 = vmul.f32 %v8961_v61, %v2119_v15  ;;  %vm2123_vm6 = vweird.f32 %v8961_v61 }
 0x3f0   : > { %7173 = vmatpush.xpose.msk.msra.mxu0 %vm901_vm1, %v8666_v11  ;;  %v1953_v11 = vmul.f32 %v8973_v23, %v8847_v4  ;;  %v2101_v1 = vmul.f32 %v2100_v48, %v8624_v59  ;;  %v2110_v59 = vsel %vm9040_vm4, %v8931_v47, %v2106_v8  ;;  %v2114_v47 = vor.u32 1.1754944e-38, %v2113_v52  ;;  %vm9085_vm11 = vmor %vm2122_vm10, %vm2123_vm6 }
 0x3f1   : > { %v8991_v60 = vpop.eup %7576  ;;  %v5036_v12 = vpop.permute.xlu0 %5035  ;;  %vm1947_vm7 = vcmp.eq.f32.partialorder %v1946_v22, 8.507059e+37  ;;  %vm2112_vm8 = vcmp.eq.f32.partialorder %v2111_v29, 8.507059e+37  ;;  %vm1958_vm9 = vweird.f32 %v8973_v23  ;;  %v1963_v8 = vand.u32 2147483648, %v8847_v4 }
 0x3f2   : > { %7133 = vmatmul.msk.f32.vlgmr.msra.gmra.mxu3 %vm901_vm1, %v8991_v60  ;;  %7151 = vmatmul.msk.f32.vlgmr.msrb.gmra.mxu2 %vm901_vm1, %v1921_v31  ;;  %v1935_v31 = vsel %vm1932_vm13, %v1934_v35, %v1930_v30  ;;  %v9020_v57 = vpop.eup %7578  ;;  %v1954_v50 = vsub.f32 1.0, %v1953_v11  ;;  %v2121_v30 = vadd.f32 %v8961_v61, %v2120_v38  ;;  %v2115_v39 = vsel %vm2112_vm8, %v2114_v47, %v2110_v59 }
 0x3f3   : > { %7167 = vmatpush.xpose.msk.msra.mxu3 %vm901_vm1, %v8638_v28  ;;  %7231 = vmatpush.xpose.msk.msra.mxu2 %vm901_vm1, %v5036_v12  ;;  %v1941_v28 = vadd.f32 %v8935_v33, %v1940_v55  ;;  %v9024_v17 = vpop.eup %7580  ;;  %v1936_v25 = vmul.f32 %v1935_v31, %v8602_v53  ;;  %v2133_v26 = vmul.f32 %v9020_v57, %v8774_v14  ;;  %v1949_v12 = vor.u32 1.1754944e-38, %v1948_v54 }
 0x3f4   : > { %5231 = vrot.lane.b32.xlu2 %v8051_v0, %s7830_s27  ;;  %v1955_v48 = vmul.f32 %v8973_v23, %v1954_v50  ;;  %v2128_v35 = vand.u32 2147483648, %v8786_v51  ;;  %v9076_v31 = vpop.eup %7582  ;;  %v2116_v54 = vmul.f32 %v2115_v39, %v8626_v45  ;;  %vm1957_vm12 = vweird.f32 %v8847_v4 }
 0x3f5   : > { %v1945_v18 = vsel %vm9050_vm5, %v8935_v33, %v1941_v28  ;;  %v2134_v55 = vsub.f32 1.0, %v2133_v26  ;;  %7584 = vrcp.f32 %v8855_v10  ;;  %vm1959_vm13 = vmor %vm1957_vm12, %vm1958_vm9  ;;  %v1964_v52 = vor.u32 1.1754944e-38, %v1963_v8 }
 0x3f6   : > { %v1950_v33 = vsel %vm1947_vm7, %v1949_v12, %v1945_v18  ;;  %vm2138_vm2 = vweird.f32 %v9020_v57  ;;  %vm1973_vm3 = vweird.f32 %v9024_v17  ;;  %vm2137_vm4 = vweird.f32 %v8774_v14 }
 0x3f7   : > { %7170 = vmatmul.msk.f32.vlgmr.msrb.gmra.mxu0 %vm901_vm1, %v8682_v19  ;;  %v1951_v28 = vmul.f32 %v1950_v33, %v8594_v44  ;;  %v2135_v29 = vmul.f32 %v9020_v57, %v2134_v55  ;;  %v1983_v44 = vmul.f32 %v9076_v31, %v8857_v37  ;;  %v2143_v53 = vand.u32 2147483648, %v8774_v14  ;;  %vm9124_vm5 = vmor %vm2137_vm4, %vm2138_vm2 }
 0x3f8   : > { %7177 = vmatpush.xpose.msk.msrb.mxu0 %vm901_vm1, %v8703_v27  ;;  %v1968_v27 = vmul.f32 %v9024_v17, %v8843_v13  ;;  %v1978_v59 = vand.u32 2147483648, %v8843_v13  ;;  %vm1972_vm6 = vweird.f32 %v8843_v13  ;;  %7586 = vrcp.f32 %v8869_v40 }
 0x3f9   : > { %v2136_v22 = vadd.f32 %v9020_v57, %v2135_v29  ;;  %v1984_v19 = vsub.f32 1.0, %v1983_v44  ;;  %vm1974_vm7 = vmor %vm1972_vm6, %vm1973_vm3  ;;  %vm1988_vm10 = vweird.f32 %v9076_v31  ;;  %7588 = vrcp.f32 %v8867_v58  ;;  %v11627_v44 = vld [vmem:[#allocation13_spill] sm:$0xff] }
 0x3fa   : > { %7152 = vmatmul.msk.f32.gmra.mxu2 %vm901_vm1, %v1936_v25  ;;  %7163 = vmatmul.msk.f32.vlgmr.msrb.gmra.mxu3 %vm901_vm1, %v2101_v1  ;;  %v1969_v15 = vsub.f32 1.0, %v1968_v27  ;;  %v1979_v47 = vor.u32 1.1754944e-38, %v1978_v59  ;;  %v2008_v29 = vand.u32 2147483648, %v8855_v10  ;;  %7590 = vrcp.f32 %v8890_v63 }
 0x3fb   : > { %7171 = vmatpush.xpose.msk.msrb.mxu3 %vm901_vm1, %v8543_v20  ;;  %v9067_v11 = vpop.permute.xlu1 %7417  ;;  %v1956_v20 = vadd.f32 %v8973_v23, %v1955_v48  ;;  %v2141_v48 = vand.u32 2147483647, %v8774_v14  ;;  %7592 = vrcp.f32 %v8917_v49 }
 0x3fc   : > { %5229 = vrot.lane.b32.xlu2 %v8051_v0, %s7831_s28  ;;  %v2126_v0 = vand.u32 2147483647, %v8786_v51  ;;  %v1961_v51 = vand.u32 2147483647, %v8847_v4  ;;  %v1970_v4 = vmul.f32 %v9024_v17, %v1969_v15  ;;  %v11624_v15 = vld [vmem:[#allocation26_spill] sm:$0xff] }
 0x3fd   : > { %v1960_v45 = vsel %vm1959_vm13, %v8973_v23, %v1956_v20  ;;  %v9116_v23 = vpop.eup %7584  ;;  %vm2142_vm9 = vcmp.eq.f32.partialorder %v2141_v48, 8.507059e+37  ;;  %v11630_v48 = vld [vmem:[#allocation37_spill] sm:$0xff] }
 0x3fe   : > { %vm2127_vm14 = vcmp.eq.f32.partialorder %v2126_v0, 8.507059e+37  ;;  %vm1962_vm15 = vcmp.eq.f32.partialorder %v1961_v51, 8.507059e+37  ;;  %v1971_v38 = vadd.f32 %v9024_v17, %v1970_v4  ;;  %v1998_v12 = vmul.f32 %v9116_v23, %v8855_v10  ;;  %v9149_v39 = vpop.eup %7586 }
 0x3ff   : > { %7174 = vmatmul.msk.f32.vlgmr.msra.gmra.mxu0 %vm901_vm1, %v8578_v32  ;;  %v2125_v32 = vsel %vm9085_vm11, %v8961_v61, %v2121_v30  ;;  %v1965_v1 = vsel %vm1962_vm15, %v1964_v52, %v1960_v45  ;;  %vm1987_vm11 = vweird.f32 %v8857_v37  ;;  %v1991_v0 = vand.u32 2147483647, %v8857_v37 }
 0x400   : > { %7181 = vmatpush.xpose.msk.msra.mxu0 %vm901_vm1, %v8586_v42  ;;  %v2129_v42 = vor.u32 1.1754944e-38, %v2128_v35  ;;  %v1966_v18 = vmul.f32 %v1965_v1, %v8606_v16  ;;  %v1975_v16 = vsel %vm1974_vm7, %v9024_v17, %v1971_v38  ;;  %v1999_v55 = vsub.f32 1.0, %v1998_v12  ;;  %vm1989_vm12 = vmor %vm1987_vm11, %vm1988_vm10  ;;  %v11628_v1 = vld [vmem:[#allocation18_spill] sm:$0xff]  ;;  %v11629_v38 = vld [vmem:[#allocation28_spill] sm:$0xff] }
 0x401   : > { %v1993_v17 = vand.u32 2147483648, %v8857_v37  ;;  %v2013_v50 = vmul.f32 %v9149_v39, %v8869_v40  ;;  %vm1992_vm13 = vcmp.eq.f32.partialorder %v1991_v0, 8.507059e+37  ;;  %vm2002_vm15 = vweird.f32 %v8855_v10  ;;  %v11632_v12 = vld [vmem:[#allocation21_spill] sm:$0xff] }
 0x402   : > { %7153 = vmatmul.msk.f32.gmra.mxu2 %vm901_vm1, %v1951_v28  ;;  %7164 = vmatmul.msk.f32.gmra.mxu3 %vm901_vm1, %v2116_v54  ;;  %v2130_v25 = vsel %vm2127_vm14, %v2129_v42, %v2125_v32  ;;  %v2000_v8 = vmul.f32 %v9116_v23, %v1999_v55  ;;  %v9169_v28 = vpop.permute.xlu0 %7447  ;;  %vm2003_vm14 = vweird.f32 %v9116_v23  ;;  %v9173_v32 = vpop.eup %7588  ;;  %v11625_v42 = vld [vmem:[#allocation15_spill] sm:$0xff]  ;;  %v2006_v4 = vand.u32 2147483647, %v8855_v10 }
 0x403   : > { %v9108_v61 = vpop.permute.xlu1 %5033  ;;  %v2131_v26 = vmul.f32 %v2130_v25, %v8622_v43  ;;  %v1976_v43 = vand.u32 2147483647, %v8843_v13  ;;  %v2144_v13 = vor.u32 1.1754944e-38, %v2143_v53  ;;  %v2014_v54 = vsub.f32 1.0, %v2013_v50  ;;  %vm2004_vm2 = vmor %vm2002_vm15, %vm2003_vm14  ;;  %v9197_v27 = vpop.eup %7590  ;;  %v11634_v55 = vld [vmem:[#allocation31_spill] sm:$0xff]  ;;  %v11636_v50 = vld [vmem:[#allocation22_spill] sm:$0xff] }
 0x404   : > { %5259 = vrot.lane.b32.xlu2 %v8061_v2, %s7830_s27  ;;  %v2001_v51 = vadd.f32 %v9116_v23, %v2000_v8  ;;  %v2028_v52 = vmul.f32 %v9173_v32, %v8867_v58  ;;  %vm2007_vm3 = vcmp.eq.f32.partialorder %v2006_v4, 8.507059e+37  ;;  %vm2018_vm4 = vweird.f32 %v9149_v39 }
 0x405   : > { %vm1977_vm8 = vcmp.eq.f32.partialorder %v1976_v43, 8.507059e+37  ;;  %v2015_v25 = vmul.f32 %v9149_v39, %v2014_v54  ;;  %v9200_v43 = vpop.permute.xlu2 %7412  ;;  %v2038_v0 = vand.u32 2147483648, %v8867_v58 }
 0x406   : > { %v2029_v53 = vsub.f32 1.0, %v2028_v52  ;;  %v7420_v52 = vunpack.i.h.bf16 %v9067_v11 }
 0x407   : > { %7178 = vmatmul.msk.f32.vlgmr.msrb.gmra.mxu0 %vm901_vm1, %v8690_v21  ;;  %v2140_v21 = vsel %vm9124_vm5, %v9020_v57, %v2136_v22  ;;  %v1980_v57 = vsel %vm1977_vm8, %v1979_v47, %v1975_v16  ;;  %v2005_v22 = vsel %vm2004_vm2, %v9116_v23, %v2001_v51  ;;  %v2016_v59 = vadd.f32 %v9149_v39, %v2015_v25  ;;  %v11633_v47 = vld [vmem:[#allocation29_spill] sm:$0xff] }
 0x408   : > { %7185 = vmatpush.xpose.msk.msrb.mxu0 %vm901_vm1, %v8709_v56  ;;  %v1985_v56 = vmul.f32 %v9076_v31, %v1984_v19  ;;  %v2145_v30 = vsel %vm2142_vm9, %v2144_v13, %v2140_v21  ;;  %v1981_v35 = vmul.f32 %v1980_v57, %v8608_v24  ;;  %v2009_v19 = vor.u32 1.1754944e-38, %v2008_v29  ;;  %v11631_v21 = vld [vmem:[#allocation4_spill] sm:$0xff]  ;;  %v11637_v29 = vld [vmem:[#allocation11_spill] sm:$0xff] }
 0x409   : > { %v2146_v20 = vmul.f32 %v2145_v30, %v11624_v15  ;;  %vm2017_vm5 = vweird.f32 %v8869_v40  ;;  %v2021_v16 = vand.u32 2147483647, %v8869_v40  ;;  %v2030_v13 = vmul.f32 %v9173_v32, %v2029_v53 }
 0x40a   : > { %7154 = vmatmul.msk.f32.gmra.mxu2 %vm901_vm1, %v1966_v18  ;;  %7165 = vmatmul.msk.f32.gmra.mxu3 %vm901_vm1, %v2131_v26  ;;  %v1986_v33 = vadd.f32 %v9076_v31, %v1985_v56  ;;  %v2010_v26 = vsel %vm2007_vm3, %v2009_v19, %v2005_v22  ;;  %v2023_v18 = vand.u32 2147483648, %v8869_v40  ;;  %v9202_v23 = vpop.permute.xlu0 %5117  ;;  %vm2019_vm6 = vmor %vm2017_vm5, %vm2018_vm4  ;;  %vm2033_vm8 = vweird.f32 %v9173_v32  ;;  %v11639_v19 = vld [vmem:[#allocation19_spill] sm:$0xff] }
 0x40b   : > { %v5120_v14 = vpop.permute.xlu1 %5119  ;;  %v2011_v56 = vmul.f32 %v2010_v26, %v11632_v12  ;;  %v2020_v57 = vsel %vm2019_vm6, %v9149_v39, %v2016_v59  ;;  %vm2022_vm7 = vcmp.eq.f32.partialorder %v2021_v16, 8.507059e+37  ;;  %v2031_v15 = vadd.f32 %v9173_v32, %v2030_v13  ;;  %v11635_v39 = vld [vmem:[#allocation39_spill] sm:$0xff] }
 0x40c   : > { %7237 = vmatpush.xpose.msk.msrb.mxu2 %vm901_vm1, %v5120_v14  ;;  %5257 = vrot.lane.b32.xlu2 %v8061_v2, %s7831_s28  ;;  %v2043_v14 = vmul.f32 %v9197_v27, %v8890_v63  ;;  %v2024_v30 = vor.u32 1.1754944e-38, %v2023_v18  ;;  %vm2032_vm9 = vweird.f32 %v8867_v58  ;;  %v2053_v22 = vand.u32 2147483648, %v8890_v63  ;;  %v11641_v18 = vld [vmem:[#allocation30_spill] sm:$0xff] }
 0x40d   : > { %vm2034_vm10 = vmor %vm2032_vm9, %vm2033_vm8  ;;  %v2051_v26 = vand.u32 2147483647, %v8890_v63  ;;  %vm2062_vm3 = vweird.f32 %v8917_v49 }
 0x40f   : > { %7182 = vmatmul.msk.f32.vlgmr.msra.gmra.mxu0 %vm901_vm1, %v8727_v41  ;;  %v1990_v41 = vsel %vm1989_vm12, %v9076_v31, %v1986_v33  ;;  %v11626_v31 = vld [vmem:[#allocation16_spill] sm:$0xff]  ;;  %v2025_v33 = vsel %vm2022_vm7, %v2024_v30, %v2020_v57  ;;  %vm2048_vm12 = vweird.f32 %v9197_v27  ;;  %vm2052_vm15 = vcmp.eq.f32.partialorder %v2051_v26, 8.507059e+37 }
 0x410   : > { %7189 = vmatpush.xpose.msk.msra.mxu0 %vm901_vm1, %v8752_v46  ;;  %v1994_v46 = vor.u32 1.1754944e-38, %v1993_v17  ;;  %v2044_v17 = vsub.f32 1.0, %v2043_v14  ;;  %v2066_v30 = vand.u32 2147483647, %v8917_v49 }
 0x412   : > { %7155 = vmatmul.msk.f32.gmra.mxu2 %vm901_vm1, %v1981_v35  ;;  %7166 = vmatmul.msk.f32.gmra.mxu3 %vm901_vm1, %v2146_v20  ;;  %v1995_v37 = vsel %vm1992_vm13, %v1994_v46, %v1990_v41  ;;  %v7415_v35 = vunpack.i.h.bf16 %v9200_v43  ;;  %v9226_v20 = vpop.eup %7592  ;;  %v2026_v41 = vmul.f32 %v2025_v33, %v11636_v50  ;;  %v2036_v46 = vand.u32 2147483647, %v8867_v58 }
 0x413   : > { %v9167_v24 = vpop.permute.xlu1 %5063  ;;  %v1996_v45 = vmul.f32 %v1995_v37, %v11627_v44  ;;  %v9236_v37 = vpop.permute.xlu0 %5203  ;;  %v2045_v54 = vmul.f32 %v9197_v27, %v2044_v17  ;;  %v2058_v51 = vmul.f32 %v9226_v20, %v8917_v49  ;;  %v11638_v44 = vld [vmem:[#allocation12_spill] sm:$0xff]  ;;  %vm2047_vm13 = vweird.f32 %v8890_v63  ;;  %v11644_v17 = vld [vmem:[#allocation34_spill] sm:$0xff] }
 0x414   : > { %vm2037_vm11 = vcmp.eq.f32.partialorder %v2036_v46, 8.507059e+37  ;;  %vm2049_vm14 = vmor %vm2047_vm13, %vm2048_vm12  ;;  %vm2063_vm2 = vweird.f32 %v9226_v20  ;;  %vm2067_vm5 = vcmp.eq.f32.partialorder %v2066_v30, 8.507059e+37 }
 0x415   : > { %v2059_v4 = vsub.f32 1.0, %v2058_v51  ;;  %v2046_v25 = vadd.f32 %v9197_v27, %v2045_v54  ;;  %vm2064_vm4 = vmor %vm2062_vm3, %vm2063_vm2  ;;  %v11646_v54 = vld [vmem:[#allocation25_spill] sm:$0xff] }
 0x417   : > { %7186 = vmatmul.msk.f32.vlgmr.msrb.gmra.mxu0 %vm901_vm1, %v11625_v42  ;;  %v2035_v42 = vsel %vm2034_vm10, %v9173_v32, %v2031_v15  ;;  %v11640_v32 = vld [vmem:[#allocation20_spill] sm:$0xff]  ;;  %v2060_v53 = vmul.f32 %v9226_v20, %v2059_v4 }
 0x418   : > { %7193 = vmatpush.xpose.msk.msrb.mxu0 %vm901_vm1, %v11626_v31  ;;  %v2039_v31 = vor.u32 1.1754944e-38, %v2038_v0  ;;  %v11645_v0 = vld [vmem:[#allocation38_spill] sm:$0xff] }
 0x419   : > { %v2061_v14 = vadd.f32 %v9226_v20, %v2060_v53  ;;  %v11650_v53 = vld [vmem:[#allocation36_spill] sm:$0xff] }
 0x41a   : > { %7156 = vmatmul.msk.f32.gmra.mxu2 %vm901_vm1, %v1996_v45  ;;  %7168 = vmatmul.msk.f32.vlgmr.msra.gmra.mxu3 %vm901_vm1, %v11628_v1  ;;  %v2040_v45 = vsel %vm2037_vm11, %v2039_v31, %v2035_v42 }
 0x41b   : > { %7175 = vmatpush.xpose.msk.msra.mxu3 %vm901_vm1, %v11629_v38  ;;  %v9193_v10 = vpop.permute.xlu1 %5061  ;;  %v2041_v38 = vmul.f32 %v2040_v45, %v11640_v32  ;;  %v9265_v12 = vpop.permute.xlu0 %5091  ;;  %v11648_v45 = vld [vmem:[#allocation14_spill] sm:$0xff] }
 0x41f   : > { %7190 = vmatmul.msk.f32.vlgmr.msra.gmra.mxu0 %vm901_vm1, %v11630_v48  ;;  %v2050_v48 = vsel %vm2049_vm14, %v9197_v27, %v2046_v25  ;;  %v11643_v27 = vld [vmem:[#allocation24_spill] sm:$0xff] }
 0x420   : > { %7197 = vmatpush.xpose.msk.msra.mxu0 %vm901_vm1, %v11631_v21  ;;  %v2054_v21 = vor.u32 1.1754944e-38, %v2053_v22 }
 0x422   : > { %7157 = vmatmul.msk.f32.gmra.mxu2 %vm901_vm1, %v2011_v56  ;;  %7172 = vmatmul.msk.f32.vlgmr.msrb.gmra.mxu3 %vm901_vm1, %v11633_v47  ;;  %v11642_v56 = vld [vmem:[#allocation32_spill] sm:$0xff]  ;;  %v2055_v63 = vsel %vm2052_vm15, %v2054_v21, %v2050_v48  ;;  %v2068_v47 = vand.u32 2147483648, %v8917_v49 }
 0x423   : > { %7179 = vmatpush.xpose.msk.msrb.mxu3 %vm901_vm1, %v11634_v55  ;;  %v9221_v40 = vpop.permute.xlu1 %5147  ;;  %v2056_v57 = vmul.f32 %v2055_v63, %v11643_v27  ;;  %v9287_v50 = vpop.permute.xlu0 %5089  ;;  %v11651_v48 = vld [vmem:[#allocation40_spill] sm:$0xff] }
 0x424   : > { %v2069_v15 = vor.u32 1.1754944e-38, %v2068_v47 }
 0x427   : > { %7194 = vmatmul.msk.f32.vlgmr.msrb.gmra.mxu0 %vm901_vm1, %v11635_v39  ;;  %v9231_v8 = vpop.xlane.xlu2 %1477 }
 0x428   : > { %4294 = vmatpush.msrb.mxu0 %v7415_v35  ;;  %7594 = vrcp.f32 %v9231_v8  ;;  %v2065_v35 = vsel %vm2064_vm4, %v9226_v20, %v2061_v14  ;;  %v2083_v46 = vand.u32 2147483648, %v9231_v8  ;;  %vm2077_vm7 = vweird.f32 %v9231_v8 }
 0x429   : > { %v2070_v49 = vsel %vm2067_vm5, %v2069_v15, %v2065_v35  ;;  %v2081_v20 = vand.u32 2147483647, %v9231_v8 }
 0x42a   : > { %7158 = vmatmul.msk.f32.gmra.mxu2 %vm901_vm1, %v2026_v41  ;;  %7176 = vmatmul.msk.f32.vlgmr.msra.gmra.mxu3 %vm901_vm1, %v11637_v29  ;;  %v2071_v51 = vmul.f32 %v2070_v49, %v11646_v54  ;;  %v11647_v29 = vld [vmem:[#allocation17_spill] sm:$0xff]  ;;  %v2084_v31 = vor.u32 1.1754944e-38, %v2083_v46 }
 0x42b   : > { %7183 = vmatpush.xpose.msk.msra.mxu3 %vm901_vm1, %v11638_v44  ;;  %v9248_v58 = vpop.permute.xlu1 %5145  ;;  %vm2082_vm9 = vcmp.eq.f32.partialorder %v2081_v20, 8.507059e+37 }
 0x42e   : > { %v7595_v1 = vpop.eup %7594 }
 0x42f   : > { %7198 = vmatmul.msk.f32.vlgmr.msra.gmra.mxu0 %vm901_vm1, %v11639_v19  ;;  %v2073_v59 = vmul.f32 %v7595_v1, %v9231_v8  ;;  %v9277_v55 = vpop.permute.xlu2 %7427  ;;  %vm2078_vm6 = vweird.f32 %v7595_v1 }
 0x430   : > { %4346 = vmatpush.msra.mxu0 %v7420_v52  ;;  %vm2079_vm8 = vmor %vm2077_vm7, %vm2078_vm6 }
 0x431   : > { %v2074_v13 = vsub.f32 1.0, %v2073_v59 }
 0x432   : > { %7159 = vmatmul.msk.f32.gmra.mxu2 %vm901_vm1, %v2041_v38  ;;  %7180 = vmatmul.msk.f32.vlgmr.msrb.gmra.mxu3 %vm901_vm1, %v11641_v18  ;;  %v11649_v38 = vld [vmem:[#allocation23_spill] sm:$0xff] }
 0x433   : > { %7187 = vmatpush.xpose.msk.msrb.mxu3 %vm901_vm1, %v11642_v56  ;;  %v9269_v16 = vpop.permute.xlu1 %5175  ;;  %v2075_v33 = vmul.f32 %v7595_v1, %v2074_v13  ;;  %v9323_v56 = vpop.f32.mrf.mxu3 }
 0x435   : > { %v2076_v41 = vadd.f32 %v7595_v1, %v2075_v33 }
 0x437   : > { %v2080_v42 = vsel %vm2079_vm8, %v7595_v1, %v2076_v41  ;;  %v9296_v44 = vpop.permute.xlu2 %7432  ;;  %v7414_v1 = vunpack.i.l.bf16 %v9200_v43  ;;  %v9319_v43 = vpop.f32.mrf.mxu0 }
 0x438   : > { %v2085_v19 = vsel %vm2082_vm9, %v2084_v31, %v2080_v42 }
 0x439   : > { %v2086_v26 = vmul.f32 %v2085_v19, %v11649_v38 }
 0x43a   : > { %7160 = vmatmul.msk.f32.gmra.mxu2 %vm901_vm1, %v2056_v57  ;;  %7184 = vmatmul.msk.f32.vlgmr.msra.gmra.mxu3 %vm901_vm1, %v11644_v17 }
 0x43b   : > { %7191 = vmatpush.xpose.msk.msra.mxu3 %vm901_vm1, %v11645_v0  ;;  %v9285_v39 = vpop.permute.xlu1 %5173 }
 0x43f   : > { %v9306_v59 = vpop.permute.xlu2 %7437  ;;  %v9328_v63 = vpop.f32.mrf.mxu0 }
 0x442   : > { %7161 = vmatmul.msk.f32.gmra.mxu2 %vm901_vm1, %v2071_v51  ;;  %7188 = vmatmul.msk.f32.vlgmr.msrb.gmra.mxu3 %vm901_vm1, %v11647_v29 }
 0x443   : > { %7195 = vmatpush.xpose.msk.msrb.mxu3 %vm901_vm1, %v11648_v45  ;;  %v7453_v4 = vpop.permute.xlu1 %7452 }
 0x444   : > { %v7455_v52 = vunpack.i.h.bf16 %v7453_v4  ;;  %v7454_v25 = vunpack.i.l.bf16 %v7453_v4  ;;  %v2614_v22 = vpop.xlane.xlu0 %2613 }
 0x445   : > { %v2660_v8 = vsub.f32 %v8865_v36, %v2614_v22  ;;  %v7419_v36 = vunpack.i.l.bf16 %v9067_v11 }
 0x446   : > { %2777 = vmatpush.msra.mxu1 %v7454_v25 }
 0x447   : > { %v2676_v32 = vmul.f32 1.442695, %v2660_v8  ;;  %v9321_v21 = vpop.permute.xlu2 %7442 }
 0x448   : > { %2881 = vmatpush.msrb.mxu1 %v7455_v52 }
 0x449   : > { %7596 = vpow2.f32 %v2676_v32 }
 0x44a   : > { %7162 = vmatmul.msk.f32.gmra.mxu2 %vm901_vm1, %v2086_v26  ;;  %7192 = vmatmul.msk.f32.vlgmr.msra.gmra.mxu3 %vm901_vm1, %v11650_v53 }
 0x44b   : > { %4268 = vmatpush.msra.mxu3 %v7414_v1  ;;  %v5288_v11 = vpop.permute.xlu1 %5287 }
 0x44f   : > { %v9308_v18 = vpop.eup %7596  ;;  %v5202_v13 = vpop.permute.xlu2 %5201 }
 0x450   : > { %7119 = vmatmul.msk.f32.vlgmr.msra.gmra.mxu1 %vm901_vm1, %v9308_v18 }
 0x452   : > { %7196 = vmatmul.msk.f32.vlgmr.msrb.gmra.mxu3 %vm901_vm1, %v11651_v48  ;;  %7232 = vmatmul.msk.f32.vlgmr.msra.gmra.mxu2 %vm901_vm1, %v9108_v61  ;;  %v9331_v61 = vpop.f32.mrf.mxu3 }
 0x453   : > { %4320 = vmatpush.msrb.mxu3 %v7419_v36  ;;  %7243 = vmatpush.xpose.msk.msra.mxu2 %vm901_vm1, %v9236_v37 }
 0x45a   : > { %7238 = vmatmul.msk.f32.vlgmr.msrb.gmra.mxu2 %vm901_vm1, %v9202_v23  ;;  %v9337_v47 = vpop.f32.mrf.mxu3 }
 0x45b   : > { %7249 = vmatpush.xpose.msk.msrb.mxu2 %vm901_vm1, %v5288_v11 }
 0x45f   : > { %v9333_v37 = vpop.f32.mrf.mxu0 }
 0x462   : > { %7244 = vmatmul.msk.f32.vlgmr.msra.gmra.mxu2 %vm901_vm1, %v5202_v13 }
 0x46c   : > { %v9335_v14 = vpop.f32.mrf.mxu0 }
 0x474   : > { %v3692_v27 = vpop.f32.mrf.mxu0 }
 0x475   : > { %v9339_v57 = vmul.f32 0.35355338, %v3692_v27  ;;  %v9341_v30 = vpop.f32.mrf.mxu3 }
 0x477   : > { %v4106_v23 = vsel %vm901_vm1, %v9339_v57, -inf }
 0x478   : > { %4107 = vmax.xlane.f32.xlu0 %v4106_v23  ;;  %v9399_v23 = vpop.permute.xlu2 %5231 }
 0x47c   : > { %v3748_v33 = vpop.f32.mrf.mxu0 }
 0x47d   : > { %v9345_v17 = vmul.f32 0.35355338, %v3748_v33  ;;  %v9347_v35 = vpop.f32.mrf.mxu3 }
 0x47e   : > { %11652 = vst [vmem:[#allocation26_spill] sm:$0xff] %v9347_v35 }
 0x47f   : > { %v4112_v15 = vsel %vm901_vm1, %v9345_v17, -inf }
 0x480   : > { %4113 = vmax.xlane.f32.xlu0 %v4112_v15 }
 0x484   : > { %v3804_v0 = vpop.f32.mrf.mxu0 }
 0x485   : > { %v9351_v49 = vmul.f32 0.35355338, %v3804_v0  ;;  %v9353_v41 = vpop.f32.mrf.mxu3 }
 0x486   : > { %11653 = vst [vmem:[#allocation15_spill] sm:$0xff] %v9353_v41 }
 0x487   : > { %v4118_v46 = vsel %vm901_vm1, %v9351_v49, -inf }
 0x488   : > { %4119 = vmax.xlane.f32.xlu2 %v4118_v46 }
 0x48c   : > { %v3860_v54 = vpop.f32.mrf.mxu0 }
 0x48d   : > { %v9357_v51 = vmul.f32 0.35355338, %v3860_v54  ;;  %v9359_v20 = vpop.f32.mrf.mxu3  ;;  %v11656_v54 = vld [vmem:[#allocation27_spill] sm:$0xff] }
 0x48e   : > { %11654 = vst [vmem:[#allocation16_spill] sm:$0xff] %v9359_v20  ;;  %v11662_v20 = vld [vmem:[#allocation35_spill] sm:$0xff] }
 0x48f   : > { %v4124_v29 = vsel %vm901_vm1, %v9357_v51, -inf  ;;  %v9510_v41 = vmul.f32 0.35355338, %v11662_v20 }
 0x490   : > { %4125 = vmax.xlane.f32.xlu1 %v4124_v29  ;;  %v9408_v29 = vmul.f32 0.35355338, %v11656_v54 }
 0x494   : > { %5313 = vrot.lane.b32.xlu0 %v8071_v5, %s7831_s28  ;;  %v3916_v42 = vpop.f32.mrf.mxu0 }
 0x495   : > { %v9365_v31 = vmul.f32 0.35355338, %v3916_v42  ;;  %v9367_v45 = vpop.f32.mrf.mxu3  ;;  %v9410_v42 = vpop.permute.xlu2 %5229 }
 0x496   : > { %11655 = vst [vmem:[#allocation13_spill] sm:$0xff] %v9367_v45 }
 0x497   : > { %v4130_v4 = vsel %vm901_vm1, %v9365_v31, -inf }
 0x498   : > { %4131 = vmax.xlane.f32.xlu1 %v4130_v4 }
 0x49c   : > { %v3972_v19 = vpop.f32.mrf.mxu0 }
 0x49d   : > { %v3664_v52 = vpop.f32.mrf.mxu3  ;;  %v9379_v32 = vmul.f32 0.35355338, %v3972_v19  ;;  %v9416_v19 = vpop.permute.xlu2 %5259 }
 0x49e   : > { %v9371_v25 = vmul.f32 0.35355338, %v3664_v52  ;;  %v2624_v52 = vsel %vm901_vm1, %v9408_v29, -inf }
 0x49f   : > { %v4136_v38 = vsel %vm901_vm1, %v9379_v32, -inf }
 0x4a0   : > { %5315 = vrot.lane.b32.xlu2 %v8071_v5, %s7830_s27  ;;  %v4103_v22 = vsel %vm901_vm1, %v9371_v25, -inf }
 0x4a1   : > { %4104 = vmax.xlane.f32.xlu1 %v4103_v22 }
 0x4a4   : > { %v4028_v26 = vpop.f32.mrf.mxu0 }
 0x4a5   : > { %v3720_v8 = vpop.f32.mrf.mxu3  ;;  %v9385_v5 = vmul.f32 0.35355338, %v4028_v26 }
 0x4a6   : > { %v9391_v48 = vmul.f32 0.35355338, %v3720_v8 }
 0x4a7   : > { %v4142_v53 = vsel %vm901_vm1, %v9385_v5, -inf }
 0x4a8   : > { %5343 = vrot.lane.b32.xlu2 %v8076_v6, %s7830_s27  ;;  %v4109_v13 = vsel %vm901_vm1, %v9391_v48, -inf }
 0x4ad   : > { %v3776_v1 = vpop.f32.mrf.mxu3 }
 0x4ae   : > { %v9389_v36 = vmul.f32 0.35355338, %v3776_v1 }
 0x4b5   : > { %v3832_v11 = vpop.f32.mrf.mxu3 }
 0x4b6   : > { %v9397_v27 = vmul.f32 0.35355338, %v3832_v11 }
 0x4b8   : > { %v4121_v33 = vsel %vm901_vm1, %v9397_v27, -inf }
 0x4ba   : > { %5285 = vrot.lane.b32.xlu1 %v8065_v3, %s7831_s28  ;;  %v4115_v3 = vsel %vm901_vm1, %v9389_v36, -inf }
 0x4bd   : > { %v3888_v15 = vpop.f32.mrf.mxu3 }
 0x4be   : > { %4137 = vmax.xlane.f32.xlu0 %v4136_v38  ;;  %v9403_v0 = vmul.f32 0.35355338, %v3888_v15 }
 0x4c0   : > { %v4127_v46 = vsel %vm901_vm1, %v9403_v0, -inf }
 0x4c5   : > { %v3944_v4 = vpop.f32.mrf.mxu3 }
 0x4c6   : > { %4143 = vmax.xlane.f32.xlu0 %v4142_v53  ;;  %v9414_v22 = vmul.f32 0.35355338, %v3944_v4 }
 0x4c8   : > { %v4133_v26 = vsel %vm901_vm1, %v9414_v22, -inf }
 0x4cd   : > { %v4000_v8 = vpop.f32.mrf.mxu3 }
 0x4ce   : > { %4116 = vmax.xlane.f32.xlu0 %v4115_v3  ;;  %v9423_v11 = vmul.f32 0.35355338, %v4000_v8  ;;  %v9427_v3 = vpop.permute.xlu2 %5257 }
 0x4d1   : > { %4110 = vmax.xlane.f32.xlu2 %v4109_v13 }
 0x4d5   : > { %v4056_v15 = vpop.f32.mrf.mxu3 }
 0x4d6   : > { %4122 = vmax.xlane.f32.xlu0 %v4121_v33  ;;  %v4139_v33 = vsel %vm901_vm1, %v9423_v11, -inf }
 0x4de   : > { %4128 = vmax.xlane.f32.xlu0 %v4127_v46 }
 0x4e4   : > { %2625 = vmax.xlane.f32.xlu1 %v2624_v52  ;;  %v9435_v52 = vmul.f32 0.35355338, %v4056_v15 }
 0x4e9   : > { %5371 = vrot.lane.b32.xlu2 %v8080_v7, %s7830_s27 }
 0x4eb   : > { %v4108_v38 = vpop.xlane.xlu0 %4107 }
 0x4ec   : > { %v4152_v1 = vsub.f32 %v9339_v57, %v4108_v38  ;;  %4134 = vmax.xlane.f32.xlu1 %v4133_v26  ;;  %v7425_v57 = vunpack.i.h.bf16 %v8956_v34 }
 0x4ee   : > { %v4169_v53 = vmul.f32 1.442695, %v4152_v1  ;;  %v7430_v1 = vunpack.i.h.bf16 %v9277_v55 }
 0x4f0   : > { %7598 = vpow2.f32 %v4169_v53 }
 0x4f2   : > { %5341 = vrot.lane.b32.xlu0 %v8076_v6, %s7831_s28  ;;  %v9439_v6 = vpop.f32.mrf.mxu2 }
 0x4f3   : > { %v4114_v13 = vpop.xlane.xlu0 %4113 }
 0x4f4   : > { %v4154_v46 = vsub.f32 %v9345_v17, %v4114_v13  ;;  %4140 = vmax.xlane.f32.xlu1 %v4139_v33  ;;  %v4145_v17 = vsel %vm901_vm1, %v9435_v52, -inf  ;;  %v11657_v33 = vld [vmem:[#allocation9_spill] sm:$0xff] }
 0x4f6   : > { %v9432_v54 = vpop.eup %7598  ;;  %v4173_v4 = vmul.f32 1.442695, %v4154_v46 }
 0x4f7   : > { %7200 = vmatmul.msk.f32.vlgmr.msrb.gmra.mxu0 %vm901_vm1, %v9432_v54 }
 0x4f8   : > { %7600 = vpow2.f32 %v4173_v4  ;;  %4398 = vmatpush.msrb.mxu0 %v7425_v57  ;;  %v7435_v57 = vunpack.i.h.bf16 %v9296_v44 }
 0x4fa   : > { %5399 = vrot.lane.b32.xlu0 %v8087_v9, %s7830_s27  ;;  %v9451_v13 = vpop.f32.mrf.mxu2 }
 0x4fb   : > { %v4120_v8 = vpop.xlane.xlu2 %4119 }
 0x4fc   : > { %v4156_v38 = vsub.f32 %v9351_v49, %v4120_v8  ;;  %4146 = vmax.xlane.f32.xlu1 %v4145_v17  ;;  %v4084_v17 = vpop.f32.mrf.mxu0 }
 0x4fe   : > { %v9446_v26 = vpop.eup %7600  ;;  %v4177_v53 = vmul.f32 1.442695, %v4156_v38 }
 0x4ff   : > { %7202 = vmatmul.msk.f32.vlgmr.msra.gmra.mxu0 %vm901_vm1, %v9446_v26 }
 0x500   : > { %7602 = vpow2.f32 %v4177_v53  ;;  %4450 = vmatpush.msra.mxu0 %v7430_v1 }
 0x502   : > { %5427 = vrot.lane.b32.xlu0 %v11657_v33, %s7830_s27  ;;  %v9461_v8 = vpop.f32.mrf.mxu2 }
 0x503   : > { %v4126_v15 = vpop.xlane.xlu1 %4125  ;;  %v9504_v45 = vpop.permute.xlu2 %5315 }
 0x504   : > { %v4158_v46 = vsub.f32 %v9357_v51, %v4126_v15  ;;  %v9466_v51 = vmul.f32 0.35355338, %v4084_v17  ;;  %v7440_v15 = vunpack.i.h.bf16 %v9306_v59 }
 0x506   : > { %v9456_v49 = vpop.eup %7602  ;;  %v4181_v4 = vmul.f32 1.442695, %v4158_v46 }
 0x507   : > { %7204 = vmatmul.msk.f32.vlgmr.msrb.gmra.mxu0 %vm901_vm1, %v9456_v49 }
 0x508   : > { %7604 = vpow2.f32 %v4181_v4  ;;  %4502 = vmatpush.msrb.mxu0 %v7435_v57  ;;  %v7456_v57 = vpack.i.bf16 %v8080_v7, %v8061_v2 }
 0x50a   : > { %5425 = vrot.lane.b32.xlu0 %v11657_v33, %s7831_s28  ;;  %v4148_v33 = vsel %vm901_vm1, %v9466_v51, -inf  ;;  %v9477_v4 = vpop.f32.mrf.mxu2 }
 0x50b   : > { %v4132_v38 = vpop.xlane.xlu1 %4131 }
 0x50c   : > { %v4160_v1 = vsub.f32 %v9365_v31, %v4132_v38  ;;  %v11658_v38 = vld [vmem:[#allocation10_spill] sm:$0xff] }
 0x50e   : > { %v9468_v53 = vpop.eup %7604  ;;  %v4185_v46 = vmul.f32 1.442695, %v4160_v1 }
 0x50f   : > { %7206 = vmatmul.msk.f32.vlgmr.msra.gmra.mxu0 %vm901_vm1, %v9468_v53 }
 0x510   : > { %7606 = vpow2.f32 %v4185_v46  ;;  %4554 = vmatpush.msra.mxu0 %v7440_v15  ;;  %v7445_v15 = vunpack.i.h.bf16 %v9321_v21 }
 0x512   : > { %4149 = vmax.xlane.f32.xlu2 %v4148_v33  ;;  %7457 = vrot.lane.b32.xlu0 %v7456_v57, %s7826_s22  ;;  %v9488_v2 = vpop.f32.mrf.mxu2  ;;  %v7424_v57 = vunpack.i.l.bf16 %v8956_v34  ;;  %s7299_s22 = sshll.u32 %s11828_s13, 4 }
 0x513   : > { %11659 = vst [vmem:[#allocation18_spill] sm:$0xff] %v9488_v2  ;;  %s10133_s13 = scalar_lea.vmem %s11504_s2, %s7299_s22 }
 0x514   : > { %v4105_v31 = vpop.xlane.xlu1 %4104 }
 0x515   : > { %v4151_v17 = vsub.f32 %v9371_v25, %v4105_v31  ;;  %5453 = vrot.lane.b32.xlu1 %v11658_v38, %s7831_s28  ;;  %v9497_v31 = vpop.permute.xlu0 %5313 }
 0x516   : > { %v9483_v1 = vpop.eup %7606 }
 0x517   : > { %v4167_v46 = vmul.f32 1.442695, %v4151_v17  ;;  %7208 = vmatmul.msk.f32.vlgmr.msrb.gmra.mxu0 %vm901_vm1, %v9483_v1 }
 0x518   : > { %4606 = vmatpush.msrb.mxu0 %v7445_v15 }
 0x519   : > { %7608 = vpow2.f32 %v4167_v46 }
 0x51a   : > { %v9495_v25 = vpop.f32.mrf.mxu2 }
 0x51b   : > { %11660 = vst [vmem:[#allocation28_spill] sm:$0xff] %v9495_v25 }
 0x51f   : > { %v9490_v33 = vpop.eup %7608 }
 0x520   : > { %7199 = vmatmul.msk.f32.vlgmr.msra.gmra.mxu3 %vm901_vm1, %v9490_v33 }
 0x521   : > { %4372 = vmatpush.msra.mxu3 %v7424_v57 }
 0x522   : > { %v9502_v15 = vpop.f32.mrf.mxu2 }
 0x523   : > { %11661 = vst [vmem:[#allocation37_spill] sm:$0xff] %v9502_v15  ;;  %v2648_v15 = vsel %vm901_vm1, %v9510_v41, -inf }
 0x52a   : > { %5369 = vrot.lane.b32.xlu2 %v8080_v7, %s7831_s28  ;;  %v9512_v7 = vpop.f32.mrf.mxu2 }
 0x52b   : > { %11663 = vst [vmem:[#allocation4_spill] sm:$0xff] %v9512_v7 }
 0x52c   : > { %v5286_v17 = vpop.permute.xlu1 %5285 }
 0x52d   : > { %7250 = vmatmul.msk.f32.vlgmr.msrb.gmra.mxu2 %vm901_vm1, %v5286_v17 }
 0x531   : > { %v4138_v46 = vpop.xlane.xlu0 %4137 }
 0x532   : > { %v4162_v34 = vsub.f32 %v9379_v32, %v4138_v46  ;;  %5397 = vrot.lane.b32.xlu2 %v8087_v9, %s7831_s28  ;;  %v7450_v9 = vunpack.i.h.bf16 %v9169_v28  ;;  %v9522_v46 = vpop.permute.xlu2 %5343  ;;  %v9532_v7 = vpop.f32.mrf.mxu2  ;;  %s10970_s28 = scalar_lea.vmem %s11503_s1, %s7924_s25 }
 0x533   : > { %11665 = vst [vmem:[#allocation21_spill] sm:$0xff] %v9532_v7 }
 0x534   : > { %v4189_v57 = vmul.f32 1.442695, %v4162_v34 }
 0x536   : > { %7610 = vpow2.f32 %v4189_v57 }
 0x539   : > { %v4144_v35 = vpop.xlane.xlu0 %4143 }
 0x53a   : > { %v4164_v17 = vsub.f32 %v9385_v5, %v4144_v35  ;;  %5455 = vrot.lane.b32.xlu2 %v11658_v38, %s7830_s27  ;;  %v2708_v35 = vsel %vm901_vm1, %v9308_v18, 0.0  ;;  %v11664_v5 = vld [vmem:[#allocation47_spill] sm:$0xff]  ;;  %v11666_v18 = vld [vmem:[#allocation48_spill] sm:$0xff] }
 0x53b   : > { %v2729_v38 = vsel %vm901_vm1, %v11664_v5, 0.0 }
 0x53c   : > { %v9519_v32 = vpop.eup %7610  ;;  %v4193_v34 = vmul.f32 1.442695, %v4164_v17  ;;  %2649 = vmax.xlane.f32.xlu0 %v2648_v15  ;;  %v2723_v17 = vsel %vm901_vm1, %v11666_v18, 0.0 }
 0x53d   : > { %7210 = vmatmul.msk.f32.vlgmr.msra.gmra.mxu0 %vm901_vm1, %v9519_v32 }
 0x53e   : > { %7612 = vpow2.f32 %v4193_v34  ;;  %4658 = vmatpush.msra.mxu0 %v7450_v9 }
 0x53f   : > { %2709 = vadd.xlane.f32.xlu1 %v2708_v35 }
 0x541   : > { %v4117_v20 = vpop.xlane.xlu0 %4116 }
 0x542   : > { %v4155_v34 = vsub.f32 %v9389_v36, %v4117_v20 }
 0x544   : > { %v9530_v57 = vpop.eup %7612  ;;  %v4111_v25 = vpop.xlane.xlu2 %4110  ;;  %2730 = vadd.xlane.f32.xlu0 %v2729_v38  ;;  %v4175_v7 = vmul.f32 1.442695, %v4155_v34 }
 0x545   : > { %v4153_v15 = vsub.f32 %v9391_v48, %v4111_v25  ;;  %7212 = vmatmul.msk.f32.vlgmr.msrb.gmra.mxu0 %vm901_vm1, %v9530_v57  ;;  %v9543_v48 = vpop.f32.mrf.mxu2  ;;  %v11668_v25 = vld [vmem:[#allocation45_spill] sm:$0xff] }
 0x546   : > { %7235 = vmatpush.xpose.msk.msrb.mxu0 %vm901_vm1, %v9265_v12  ;;  %11667 = vst [vmem:[#allocation29_spill] sm:$0xff] %v9543_v48  ;;  %v2726_v38 = vsel %vm901_vm1, %v11668_v25, 0.0  ;;  %v7429_v12 = vunpack.i.l.bf16 %v9277_v55 }
 0x547   : > { %v4171_v9 = vmul.f32 1.442695, %v4153_v15  ;;  %2724 = vadd.xlane.f32.xlu1 %v2723_v17  ;;  %v7434_v17 = vunpack.i.l.bf16 %v9296_v44  ;;  %v7439_v44 = vunpack.i.l.bf16 %v9306_v59 }
 0x549   : > { %7614 = vpow2.f32 %v4171_v9  ;;  %v4123_v35 = vpop.xlane.xlu0 %4122 }
 0x54a   : > { %7616 = vpow2.f32 %v4175_v7  ;;  %v4157_v36 = vsub.f32 %v9397_v27, %v4123_v35  ;;  %v11670_v35 = vld [vmem:[#allocation33_spill] sm:$0xff] }
 0x54b   : > { %v9563_v25 = vmul.f32 0.35355338, %v11670_v35 }
 0x54c   : > { %v5372_v5 = vpop.permute.xlu2 %5371  ;;  %v4179_v20 = vmul.f32 1.442695, %v4157_v36 }
 0x54d   : > { %7255 = vmatpush.xpose.msk.msra.mxu2 %vm901_vm1, %v5372_v5  ;;  %v9556_v34 = vpop.f32.mrf.mxu2 }
 0x54e   : > { %11669 = vst [vmem:[#allocation31_spill] sm:$0xff] %v9556_v34  ;;  %7618 = vpow2.f32 %v4179_v20  ;;  %v2636_v20 = vsel %vm901_vm1, %v9563_v25, -inf }
 0x54f   : > { %v9547_v2 = vpop.eup %7614  ;;  %2727 = vadd.xlane.f32.xlu1 %v2726_v38 }
 0x550   : > { %7201 = vmatmul.msk.f32.vlgmr.msrb.gmra.mxu3 %vm901_vm1, %v9547_v2  ;;  %v9553_v18 = vpop.eup %7616 }
 0x551   : > { %4424 = vmatpush.msrb.mxu3 %v7429_v12  ;;  %v4129_v15 = vpop.xlane.xlu0 %4128 }
 0x552   : > { %v4159_v55 = vsub.f32 %v9403_v0, %v4129_v15 }
 0x554   : > { %v4183_v7 = vmul.f32 1.442695, %v4159_v55  ;;  %v9565_v38 = vpop.eup %7618 }
 0x555   : > { %v9571_v36 = vpop.f32.mrf.mxu2 }
 0x556   : > { %11671 = vst [vmem:[#allocation39_spill] sm:$0xff] %v9571_v36 }
 0x557   : > { %v2626_v9 = vpop.xlane.xlu1 %2625 }
 0x558   : > { %v2664_v5 = vsub.f32 %v9408_v29, %v2626_v9  ;;  %7203 = vmatmul.msk.f32.vlgmr.msra.gmra.mxu3 %vm901_vm1, %v9553_v18 }
 0x559   : > { %4476 = vmatpush.msra.mxu3 %v7434_v17  ;;  %v11672_v17 = vld [vmem:[#allocation7_spill] sm:$0xff] }
 0x55a   : > { %v2684_v27 = vmul.f32 1.442695, %v2664_v5  ;;  %v7471_v9 = vpack.i.bf16 %v11672_v17, %v8044_v62 }
 0x55c   : > { %7620 = vpow2.f32 %v2684_v27 }
 0x55d   : > { %7622 = vpow2.f32 %v4183_v7  ;;  %v11673_v7 = vld [vmem:[#allocation42_spill] sm:$0xff]  ;;  %v9589_v62 = vpop.f32.mrf.mxu2 }
 0x55e   : > { %v2711_v35 = vsel %vm901_vm1, %v11673_v7, 0.0  ;;  %11674 = vst [vmem:[#allocation22_spill] sm:$0xff] %v9589_v62 }
 0x55f   : > { %v4135_v12 = vpop.xlane.xlu1 %4134 }
 0x560   : > { %7205 = vmatmul.msk.f32.vlgmr.msrb.gmra.mxu3 %vm901_vm1, %v9565_v38  ;;  %v4161_v29 = vsub.f32 %v9414_v22, %v4135_v12  ;;  %v7444_v22 = vunpack.i.l.bf16 %v9321_v21 }
 0x561   : > { %4528 = vmatpush.msrb.mxu3 %v7439_v44 }
 0x562   : > { %v7621_v0 = vpop.eup %7620  ;;  %v4187_v59 = vmul.f32 1.442695, %v4161_v29  ;;  %v7449_v29 = vunpack.i.l.bf16 %v9169_v28  ;;  %v11677_v28 = vld [vmem:[#allocation44_spill] sm:$0xff] }
 0x563   : > { %7123 = vmatmul.msk.f32.vlgmr.msrb.gmra.mxu1 %vm901_vm1, %v7621_v0  ;;  %2637 = vmax.xlane.f32.xlu2 %v2636_v20  ;;  %v9580_v5 = vpop.eup %7622 }
 0x564   : > { %v9576_v15 = vpop.permute.xlu0 %5341  ;;  %7624 = vpow2.f32 %v4187_v59  ;;  %v11675_v59 = vld [vmem:[#allocation43_spill] sm:$0xff] }
 0x565   : > { %v2714_v17 = vsel %vm901_vm1, %v11675_v59, 0.0 }
 0x567   : > { %v4141_v55 = vpop.xlane.xlu1 %4140 }
 0x568   : > { %7207 = vmatmul.msk.f32.vlgmr.msra.gmra.mxu3 %vm901_vm1, %v9580_v5  ;;  %7472 = vrot.lane.b32.xlu1 %v7471_v9, %s7832_s11  ;;  %v4163_v27 = vsub.f32 %v9423_v11, %v4141_v55  ;;  %v9599_v55 = vpop.f32.mrf.mxu2 }
 0x569   : > { %4580 = vmatpush.msra.mxu3 %v7444_v22  ;;  %11676 = vst [vmem:[#allocation11_spill] sm:$0xff] %v9599_v55 }
 0x56a   : > { %v4191_v12 = vmul.f32 1.442695, %v4163_v27  ;;  %v9591_v21 = vpop.eup %7624 }
 0x56b   : > { %2712 = vadd.xlane.f32.xlu2 %v2711_v35 }
 0x56c   : > { %v5400_v44 = vpop.permute.xlu0 %5399  ;;  %7626 = vpow2.f32 %v4191_v12 }
 0x56f   : > { %v4147_v20 = vpop.xlane.xlu1 %4146 }
 0x570   : > { %7209 = vmatmul.msk.f32.vlgmr.msrb.gmra.mxu3 %vm901_vm1, %v9591_v21  ;;  %v4165_v11 = vsub.f32 %v9435_v52, %v4147_v20  ;;  %v2717_v52 = vsel %vm901_vm1, %v11677_v28, 0.0  ;;  %v9611_v12 = vpop.f32.mrf.mxu2 }
 0x571   : > { %4632 = vmatpush.msrb.mxu3 %v7449_v29  ;;  %11678 = vst [vmem:[#allocation12_spill] sm:$0xff] %v9611_v12  ;;  %v2720_v29 = vsel %vm901_vm1, %v7621_v0, 0.0 }
 0x572   : > { %v4195_v22 = vmul.f32 1.442695, %v4165_v11  ;;  %v9601_v27 = vpop.eup %7626 }
 0x573   : > { %2715 = vadd.xlane.f32.xlu2 %v2714_v17 }
 0x574   : > { %v5428_v9 = vpop.permute.xlu0 %5427  ;;  %7628 = vpow2.f32 %v4195_v22 }
 0x578   : > { %7211 = vmatmul.msk.f32.vlgmr.msra.gmra.mxu3 %vm901_vm1, %v9601_v27  ;;  %v9623_v28 = vpop.f32.mrf.mxu2 }
 0x579   : > { %7233 = vmatpush.xpose.msk.msra.mxu3 %vm901_vm1, %v9167_v24  ;;  %11679 = vst [vmem:[#allocation19_spill] sm:$0xff] %v9623_v28 }
 0x57a   : > { %v9609_v35 = vpop.eup %7628 }
 0x57b   : > { %2718 = vadd.xlane.f32.xlu2 %v2717_v52 }
 0x57c   : > { %v5426_v7 = vpop.permute.xlu0 %5425 }
 0x580   : > { %7213 = vmatmul.msk.f32.vlgmr.msrb.gmra.mxu3 %vm901_vm1, %v9609_v35 }
 0x581   : > { %7239 = vmatpush.xpose.msk.msrb.mxu3 %vm901_vm1, %v9221_v40 }
 0x583   : > { %2721 = vadd.xlane.f32.xlu2 %v2720_v29 }
 0x584   : > { %v7458_v20 = vpop.permute.xlu0 %7457 }
 0x585   : > { %v7460_v24 = vunpack.i.h.bf16 %v7458_v20  ;;  %v7459_v11 = vunpack.i.l.bf16 %v7458_v20  ;;  %v4150_v59 = vpop.xlane.xlu2 %4149 }
 0x586   : > { %v4166_v17 = vsub.f32 %v9466_v51, %v4150_v59  ;;  %v9638_v51 = vpop.f32.mrf.mxu2  ;;  %v9678_v59 = vpop.f32.mrf.mxu0 }
 0x587   : > { %2985 = vmatpush.msra.mxu1 %v7459_v11 }
 0x588   : > { %v4197_v22 = vmul.f32 1.442695, %v4166_v17  ;;  %7234 = vmatmul.msk.f32.vlgmr.msra.gmra.mxu3 %vm901_vm1, %v9193_v10  ;;  %v11680_v10 = vld [vmem:[#allocation46_spill] sm:$0xff] }
 0x589   : > { %3089 = vmatpush.msrb.mxu1 %v7460_v24  ;;  %7245 = vmatpush.xpose.msk.msra.mxu3 %vm901_vm1, %v9399_v23  ;;  %v2738_v23 = vsel %vm901_vm1, %v11680_v10, 0.0  ;;  %v5454_v24 = vpop.permute.xlu1 %5453 }
 0x58a   : > { %7630 = vpow2.f32 %v4197_v22  ;;  %v2750_v22 = vsel %vm901_vm1, %v8991_v60, 0.0 }
 0x58d   : > { %v5370_v40 = vpop.permute.xlu2 %5369 }
 0x58e   : > { %7256 = vmatmul.msk.f32.vlgmr.msra.gmra.mxu2 %vm901_vm1, %v5370_v40  ;;  %v9650_v20 = vpop.f32.mrf.mxu2  ;;  %v9686_v40 = vpop.f32.mrf.mxu0 }
 0x58f   : > { %11687 = vst [vmem:[#allocation30_spill] sm:$0xff] %v9686_v40 }
 0x590   : > { %v9626_v0 = vpop.eup %7630  ;;  %7240 = vmatmul.msk.f32.vlgmr.msrb.gmra.mxu3 %vm901_vm1, %v9248_v58  ;;  %v11681_v58 = vld [vmem:[#allocation2_spill] sm:$0xff] }
 0x591   : > { %7251 = vmatpush.xpose.msk.msrb.mxu3 %vm901_vm1, %v9504_v45  ;;  %7214 = vmatmul.msk.f32.vlgmr.msra.gmra.mxu0 %vm901_vm1, %v9626_v0  ;;  %v11682_v45 = vld [vmem:[#allocation6_spill] sm:$0xff] }
 0x592   : > { %7241 = vmatpush.xpose.msk.msra.mxu0 %vm901_vm1, %v9269_v16  ;;  %2739 = vadd.xlane.f32.xlu1 %v2738_v23  ;;  %v7461_v29 = vpack.i.bf16 %v11682_v45, %v11681_v58 }
 0x595   : > { %v5398_v52 = vpop.permute.xlu2 %5397 }
 0x598   : > { %7246 = vmatmul.msk.f32.vlgmr.msra.gmra.mxu3 %vm901_vm1, %v9410_v42  ;;  %v11684_v42 = vld [vmem:[#allocation5_spill] sm:$0xff] }
 0x599   : > { %7257 = vmatpush.xpose.msk.msra.mxu3 %vm901_vm1, %v5400_v44  ;;  %7236 = vmatmul.msk.f32.vlgmr.msrb.gmra.mxu0 %vm901_vm1, %v9287_v50  ;;  %v11683_v50 = vld [vmem:[#allocation3_spill] sm:$0xff] }
 0x59a   : > { %7247 = vmatpush.xpose.msk.msrb.mxu0 %vm901_vm1, %v9416_v19  ;;  %v7466_v44 = vpack.i.bf16 %v11684_v42, %v11683_v50  ;;  %v9663_v19 = vpop.f32.mrf.mxu2  ;;  %v3412_v42 = vld [vmem:[%s11508_s6 + $0x8] sm:$0xff] }
 0x59b   : > { %7462 = vrot.lane.b32.xlu2 %v7461_v29, %s7832_s11 }
 0x59d   : > { %v5456_v16 = vpop.permute.xlu2 %5455 }
 0x59e   : > { %7261 = vmatpush.xpose.msk.msrb.mxu2 %vm901_vm1, %v5456_v16  ;;  %v9692_v16 = vpop.f32.mrf.mxu0 }
 0x59f   : > { %11689 = vst [vmem:[#allocation24_spill] sm:$0xff] %v9692_v16 }
 0x5a0   : > { %7252 = vmatmul.msk.f32.vlgmr.msrb.gmra.mxu3 %vm901_vm1, %v9497_v31 }
 0x5a1   : > { %7242 = vmatmul.msk.f32.vlgmr.msra.gmra.mxu0 %vm901_vm1, %v9285_v39  ;;  %7262 = vmatmul.msk.f32.vlgmr.msrb.gmra.mxu2 %vm901_vm1, %v5454_v24  ;;  %v11685_v39 = vld [vmem:[#allocation50_spill] sm:$0xff] }
 0x5a2   : > { %7253 = vmatpush.xpose.msk.msra.mxu0 %vm901_vm1, %v9522_v46 }
 0x5a3   : > { %7467 = vrot.lane.b32.xlu2 %v7466_v44, %s7832_s11 }
 0x5a8   : > { %7258 = vmatmul.msk.f32.vlgmr.msra.gmra.mxu3 %vm901_vm1, %v5398_v52 }
 0x5a9   : > { %7248 = vmatmul.msk.f32.vlgmr.msrb.gmra.mxu0 %vm901_vm1, %v9427_v3  ;;  %v9680_v3 = vpop.f32.mrf.mxu3 }
 0x5aa   : > { %7259 = vmatpush.xpose.msk.msrb.mxu0 %vm901_vm1, %v5428_v9 }
 0x5ab   : > { %7482 = vrot.lane.b32.xlu2 %v11685_v39, %s7832_s11 }
 0x5af   : > { %v2650_v52 = vpop.xlane.xlu0 %2649 }
 0x5b0   : > { %v5310_v31 = vpop.f32.mrf.mxu2  ;;  %v2672_v45 = vsub.f32 %v9510_v41, %v2650_v52  ;;  %v9701_v52 = vpop.f32.mrf.mxu0 }
 0x5b1   : > { %v9671_v11 = vmul.f32 0.35355338, %v5310_v31  ;;  %7254 = vmatmul.msk.f32.vlgmr.msra.gmra.mxu0 %vm901_vm1, %v9576_v15  ;;  %11691 = vst [vmem:[#allocation38_spill] sm:$0xff] %v9701_v52 }
 0x5b2   : > { %v2710_v9 = vpop.xlane.xlu1 %2709  ;;  %v2700_v60 = vmul.f32 1.442695, %v2672_v45 }
 0x5b3   : > { %v5524_v46 = vsel %vm901_vm1, %v9671_v11, -inf  ;;  %7632 = vrcp.f32 %v2710_v9  ;;  %vm3177_vm11 = vweird.f32 %v2710_v9 }
 0x5b4   : > { %5525 = vmax.xlane.f32.xlu1 %v5524_v46 }
 0x5b9   : > { %7260 = vmatmul.msk.f32.vlgmr.msrb.gmra.mxu0 %vm901_vm1, %v5426_v7  ;;  %v7633_v10 = vpop.eup %7632 }
 0x5ba   : > { %v3173_v58 = vmul.f32 %v7633_v10, %v2710_v9  ;;  %vm3178_vm10 = vweird.f32 %v7633_v10 }
 0x5bb   : > { %vm3179_vm12 = vmor %vm3177_vm11, %vm3178_vm10 }
 0x5bc   : > { %v3174_v24 = vsub.f32 1.0, %v3173_v58 }
 0x5d3   : > { %v9682_v17 = vpop.f32.mrf.mxu3 }
 0x5d4   : > { %11686 = vst [vmem:[#allocation20_spill] sm:$0xff] %v9682_v17  ;;  %2751 = vadd.xlane.f32.xlu2 %v2750_v22 }
 0x5d6   : > { %v2638_v15 = vpop.xlane.xlu2 %2637 }
 0x5d7   : > { %v2668_v23 = vsub.f32 %v9563_v25, %v2638_v15  ;;  %v3175_v25 = vmul.f32 %v7633_v10, %v3174_v24 }
 0x5d9   : > { %v2692_v7 = vmul.f32 1.442695, %v2668_v23  ;;  %v3176_v46 = vadd.f32 %v7633_v10, %v3175_v25  ;;  %v3183_v23 = vand.u32 2147483648, %v2710_v9 }
 0x5db   : > { %7634 = vpow2.f32 %v2692_v7  ;;  %v9690_v29 = vpop.f32.mrf.mxu3  ;;  %v3181_v7 = vand.u32 2147483647, %v2710_v9  ;;  %v3180_v24 = vsel %vm3179_vm12, %v7633_v10, %v3176_v46  ;;  %v2779_v9 = vpop.f32.mrf.mxu1 }
 0x5dc   : > { %11688 = vst [vmem:[#allocation32_spill] sm:$0xff] %v9690_v29  ;;  %v4205_v29 = vsel %vm901_vm1, %v9547_v2, 0.0 }
 0x5dd   : > { %vm3182_vm13 = vcmp.eq.f32.partialorder %v3181_v7, 8.507059e+37 }
 0x5de   : > { %v2713_v50 = vpop.xlane.xlu2 %2712 }
 0x5df   : > { %7636 = vrcp.f32 %v2713_v50  ;;  %vm3192_vm15 = vweird.f32 %v2713_v50 }
 0x5e0   : > { %7638 = vpow2.f32 %v2700_v60 }
 0x5e1   : > { %v7635_v44 = vpop.eup %7634 }
 0x5e2   : > { %7127 = vmatmul.msk.f32.vlgmr.msra.gmra.mxu1 %vm901_vm1, %v7635_v44  ;;  %v2732_v39 = vsel %vm901_vm1, %v7635_v44, 0.0 }
 0x5e3   : > { %2733 = vadd.xlane.f32.xlu0 %v2732_v39  ;;  %v9699_v41 = vpop.f32.mrf.mxu3  ;;  %3476 = vmatpush.msra.mxu1 %v3412_v42  ;;  %v3184_v42 = vor.u32 1.1754944e-38, %v3183_v23  ;;  %v9712_v23 = vpop.f32.mrf.mxu0 }
 0x5e4   : > { %11690 = vst [vmem:[#allocation34_spill] sm:$0xff] %v9699_v41 }
 0x5e5   : > { %v7637_v31 = vpop.eup %7636  ;;  %v3185_v39 = vsel %vm3182_vm13, %v3184_v42, %v3180_v24  ;;  %11693 = vst [vmem:[#allocation17_spill] sm:$0xff] %v9712_v23  ;;  %v9715_v24 = vpop.xlane.xlu1 %2724 }
 0x5e6   : > { %v3188_v22 = vmul.f32 %v7637_v31, %v2713_v50  ;;  %v2716_v15 = vpop.xlane.xlu2 %2715  ;;  %v9703_v45 = vpop.eup %7638  ;;  %vm3193_vm14 = vweird.f32 %v7637_v31  ;;  %v3186_v46 = vmul.f32 %v3185_v39, %v2779_v9  ;;  %v11695_v9 = vld [vmem:[#allocation8_spill] sm:$0xff] }
 0x5e7   : > { %7640 = vrcp.f32 %v2716_v15  ;;  %vm3194_vm2 = vmor %vm3192_vm15, %vm3193_vm14  ;;  %v3213_v39 = vand.u32 2147483648, %v2716_v15  ;;  %vm3207_vm5 = vweird.f32 %v2716_v15 }
 0x5e8   : > { %v3189_v58 = vsub.f32 1.0, %v3188_v22  ;;  %v3198_v22 = vand.u32 2147483648, %v2713_v50 }
 0x5ea   : > { %v3190_v60 = vmul.f32 %v7637_v31, %v3189_v58  ;;  %7131 = vmatmul.msk.f32.vlgmr.msrb.gmra.mxu1 %vm901_vm1, %v9703_v45  ;;  %v3196_v58 = vand.u32 2147483647, %v2713_v50  ;;  %v3199_v42 = vor.u32 1.1754944e-38, %v3198_v22  ;;  %v3211_v22 = vand.u32 2147483647, %v2716_v15 }
 0x5eb   : > { %v9707_v44 = vpop.f32.mrf.mxu3 }
 0x5ec   : > { %11692 = vst [vmem:[#allocation25_spill] sm:$0xff] %v9707_v44  ;;  %v3191_v55 = vadd.f32 %v7637_v31, %v3190_v60  ;;  %vm3197_vm3 = vcmp.eq.f32.partialorder %v3196_v58, 8.507059e+37  ;;  %v3214_v58 = vor.u32 1.1754944e-38, %v3213_v39  ;;  %vm3212_vm7 = vcmp.eq.f32.partialorder %v3211_v22, 8.507059e+37 }
 0x5ed   : > { %v7641_v25 = vpop.eup %7640 }
 0x5ee   : > { %v3203_v28 = vmul.f32 %v7641_v25, %v2716_v15  ;;  %v9709_v12 = vpop.xlane.xlu2 %2718  ;;  %v3195_v7 = vsel %vm3194_vm2, %v7637_v31, %v3191_v55  ;;  %vm3208_vm4 = vweird.f32 %v7641_v25 }
 0x5ef   : > { %7642 = vrcp.f32 %v9709_v12  ;;  %v3200_v36 = vsel %vm3197_vm3, %v3199_v42, %v3195_v7  ;;  %vm3209_vm6 = vmor %vm3207_vm5, %vm3208_vm4  ;;  %vm3222_vm9 = vweird.f32 %v9709_v12  ;;  %v3226_v22 = vand.u32 2147483647, %v9709_v12 }
 0x5f0   : > { %v3204_v10 = vsub.f32 1.0, %v3203_v28  ;;  %v3201_v31 = vmul.f32 %v3200_v36, %v9439_v6  ;;  %vm3252_vm3 = vweird.f32 %v9715_v24 }
 0x5f1   : > { %vm3227_vm11 = vcmp.eq.f32.partialorder %v3226_v22, 8.507059e+37 }
 0x5f2   : > { %v3205_v62 = vmul.f32 %v7641_v25, %v3204_v10  ;;  %7135 = vmatmul.msk.f32.vlgmr.msra.gmra.mxu1 %vm901_vm1, %v3186_v46 }
 0x5f3   : > { %v9717_v60 = vpop.f32.mrf.mxu3 }
 0x5f4   : > { %11694 = vst [vmem:[#allocation14_spill] sm:$0xff] %v9717_v60  ;;  %v3206_v50 = vadd.f32 %v7641_v25, %v3205_v62  ;;  %v9728_v62 = vpop.f32.mrf.mxu0 }
 0x5f5   : > { %v7643_v48 = vpop.eup %7642  ;;  %11696 = vst [vmem:[#allocation23_spill] sm:$0xff] %v9728_v62 }
 0x5f6   : > { %v3218_v34 = vmul.f32 %v7643_v48, %v9709_v12  ;;  %v9720_v28 = vpop.xlane.xlu2 %2721  ;;  %v3210_v46 = vsel %vm3209_vm6, %v7641_v25, %v3206_v50  ;;  %vm3223_vm8 = vweird.f32 %v7643_v48 }
 0x5f7   : > { %7644 = vrcp.f32 %v9720_v28  ;;  %7477 = vrot.lane.b32.xlu0 %v11695_v9, %s7832_s11  ;;  %v9732_v9 = vpop.xlane.xlu1 %2727  ;;  %vm3224_vm10 = vmor %vm3222_vm9, %vm3223_vm8  ;;  %vm3237_vm13 = vweird.f32 %v9720_v28 }
 0x5f8   : > { %v3219_v55 = vsub.f32 1.0, %v3218_v34  ;;  %7646 = vrcp.f32 %v9715_v24  ;;  %v3215_v34 = vsel %vm3212_vm7, %v3214_v58, %v3210_v46  ;;  %vm3267_vm7 = vweird.f32 %v9732_v9 }
 0x5f9   : > { %7648 = vrcp.f32 %v9732_v9 }
 0x5fa   : > { %v3220_v10 = vmul.f32 %v7643_v48, %v3219_v55  ;;  %7136 = vmatmul.msk.f32.gmra.mxu1 %vm901_vm1, %v3201_v31  ;;  %v3228_v55 = vand.u32 2147483648, %v9709_v12  ;;  %v3216_v31 = vmul.f32 %v3215_v34, %v9323_v56 }
 0x5fb   : > { %v9730_v7 = vpop.f32.mrf.mxu3 }
 0x5fc   : > { %11697 = vst [vmem:[#allocation36_spill] sm:$0xff] %v9730_v7  ;;  %v3221_v15 = vadd.f32 %v7643_v48, %v3220_v10  ;;  %v9745_v7 = vpop.xlane.xlu0 %2730 }
 0x5fd   : > { %v7645_v42 = vpop.eup %7644  ;;  %7650 = vrcp.f32 %v9745_v7 }
 0x5fe   : > { %v3233_v6 = vmul.f32 %v7645_v42, %v9720_v28  ;;  %v7463_v36 = vpop.permute.xlu2 %7462  ;;  %v9735_v60 = vpop.eup %7646  ;;  %v3225_v58 = vsel %vm3224_vm10, %v7643_v48, %v3221_v15  ;;  %vm3238_vm12 = vweird.f32 %v7645_v42 }
 0x5ff   : > { %v7465_v25 = vunpack.i.h.bf16 %v7463_v36  ;;  %v7464_v50 = vunpack.i.l.bf16 %v7463_v36  ;;  %v3248_v10 = vmul.f32 %v9735_v60, %v9715_v24  ;;  %v3229_v36 = vor.u32 1.1754944e-38, %v3228_v55  ;;  %v9749_v56 = vpop.permute.xlu1 %7472  ;;  %vm3239_vm14 = vmor %vm3237_vm13, %vm3238_vm12 }
 0x600   : > { %v3234_v39 = vsub.f32 1.0, %v3233_v6  ;;  %v9747_v6 = vpop.f32.mrf.mxu0  ;;  %v7475_v55 = vunpack.i.h.bf16 %v9749_v56  ;;  %vm3253_vm2 = vweird.f32 %v9735_v60 }
 0x601   : > { %5662 = vmatpush.msrb.mxu3 %v7464_v50  ;;  %11698 = vst [vmem:[#allocation40_spill] sm:$0xff] %v9747_v6  ;;  %v3230_v12 = vsel %vm3227_vm11, %v3229_v36, %v3225_v58  ;;  %v3249_v34 = vsub.f32 1.0, %v3248_v10  ;;  %vm3254_vm4 = vmor %vm3252_vm3, %vm3253_vm2  ;;  %vm3282_vm11 = vweird.f32 %v9745_v7 }
 0x602   : > { %v3235_v46 = vmul.f32 %v7645_v42, %v3234_v39  ;;  %7137 = vmatmul.msk.f32.gmra.mxu1 %vm901_vm1, %v3216_v31  ;;  %v9753_v39 = vpop.eup %7648  ;;  %v3241_v31 = vand.u32 2147483647, %v9720_v28  ;;  %v3231_v22 = vmul.f32 %v3230_v12, %v9319_v43 }
 0x603   : > { %5740 = vmatpush.msra.mxu3 %v7465_v25  ;;  %v9751_v62 = vpop.f32.mrf.mxu3  ;;  %v3243_v25 = vand.u32 2147483648, %v9720_v28  ;;  %v3250_v10 = vmul.f32 %v9735_v60, %v3249_v34  ;;  %v3258_v34 = vand.u32 2147483648, %v9715_v24  ;;  %vm3268_vm6 = vweird.f32 %v9753_v39 }
 0x604   : > { %v3236_v50 = vadd.f32 %v7645_v42, %v3235_v46  ;;  %11699 = vst [vmem:[#allocation27_spill] sm:$0xff] %v9751_v62  ;;  %v3263_v46 = vmul.f32 %v9753_v39, %v9732_v9  ;;  %vm3242_vm15 = vcmp.eq.f32.partialorder %v3241_v31, 8.507059e+37  ;;  %vm3269_vm8 = vmor %vm3267_vm7, %vm3268_vm6 }
 0x605   : > { %v3244_v58 = vor.u32 1.1754944e-38, %v3243_v25  ;;  %v3251_v28 = vadd.f32 %v9735_v60, %v3250_v10 }
 0x606   : > { %v7468_v23 = vpop.permute.xlu2 %7467  ;;  %v3264_v43 = vsub.f32 1.0, %v3263_v46 }
 0x607   : > { %v7470_v48 = vunpack.i.h.bf16 %v7468_v23  ;;  %v7469_v15 = vunpack.i.l.bf16 %v7468_v23  ;;  %v3240_v23 = vsel %vm3239_vm14, %v7645_v42, %v3236_v50  ;;  %v3255_v46 = vsel %vm3254_vm4, %v9735_v60, %v3251_v28 }
 0x608   : > { %v3245_v36 = vsel %vm3242_vm15, %v3244_v58, %v3240_v23  ;;  %v3265_v31 = vmul.f32 %v9753_v39, %v3264_v43  ;;  %v3259_v23 = vor.u32 1.1754944e-38, %v3258_v34  ;;  %v3273_v43 = vand.u32 2147483648, %v9732_v9 }
 0x609   : > { %5688 = vmatpush.msra.mxu0 %v7469_v15  ;;  %5714 = vmatpush.msra.mxu2 %v7470_v48  ;;  %v7651_v48 = vpop.eup %7650  ;;  %v2883_v15 = vpop.f32.mrf.mxu1 }
 0x60a   : > { %7138 = vmatmul.msk.f32.gmra.mxu1 %vm901_vm1, %v3231_v22  ;;  %v3256_v22 = vand.u32 2147483647, %v9715_v24  ;;  %v3246_v42 = vmul.f32 %v3245_v36, %v2883_v15  ;;  %v3278_v25 = vmul.f32 %v7651_v48, %v9745_v7  ;;  %v3266_v15 = vadd.f32 %v9753_v39, %v3265_v31 }
 0x60b   : > { %5766 = vmatpush.msrb.mxu0 %v7475_v55  ;;  %v9772_v55 = vpop.f32.mrf.mxu3  ;;  %vm3283_vm10 = vweird.f32 %v7651_v48 }
 0x60c   : > { %vm3257_vm5 = vcmp.eq.f32.partialorder %v3256_v22, 8.507059e+37  ;;  %v3279_v36 = vsub.f32 1.0, %v3278_v25  ;;  %v3274_v25 = vor.u32 1.1754944e-38, %v3273_v43  ;;  %vm3284_vm12 = vmor %vm3282_vm11, %vm3283_vm10 }
 0x60d   : > { %v3260_v58 = vsel %vm3257_vm5, %v3259_v23, %v3255_v46  ;;  %v11701_v23 = vld [vmem:[#allocation49_spill] sm:$0xff] }
 0x60e   : > { %v9767_v12 = vpop.f32.mrf.mxu0  ;;  %v3261_v28 = vmul.f32 %v3260_v58, %v9451_v13  ;;  %v3280_v34 = vmul.f32 %v7651_v48, %v3279_v36  ;;  %v3288_v13 = vand.u32 2147483648, %v9745_v7  ;;  %v3286_v58 = vand.u32 2147483647, %v9745_v7 }
 0x60f   : > { %11700 = vst [vmem:[#allocation9_spill] sm:$0xff] %v9767_v12 }
 0x610   : > { %v3289_v43 = vor.u32 1.1754944e-38, %v3288_v13  ;;  %vm3287_vm13 = vcmp.eq.f32.partialorder %v3286_v58, 8.507059e+37 }
 0x611   : > { %v5394_v50 = vpop.f32.mrf.mxu2 }
 0x612   : > { %v9776_v10 = vmul.f32 0.35355338, %v5394_v50  ;;  %7139 = vmatmul.msk.f32.gmra.mxu1 %vm901_vm1, %v3246_v42  ;;  %v3271_v42 = vand.u32 2147483647, %v9732_v9  ;;  %v3270_v50 = vsel %vm3269_vm8, %v9753_v39, %v3266_v15  ;;  %v3281_v9 = vadd.f32 %v7651_v48, %v3280_v34 }
 0x613   : > { %v9790_v22 = vpop.f32.mrf.mxu3 }
 0x614   : > { %v5533_v24 = vsel %vm901_vm1, %v9776_v10, -inf  ;;  %vm3272_vm9 = vcmp.eq.f32.partialorder %v3271_v42, 8.507059e+37  ;;  %v3285_v15 = vsel %vm3284_vm12, %v7651_v48, %v3281_v9 }
 0x615   : > { %5534 = vmax.xlane.f32.xlu1 %v5533_v24  ;;  %v3275_v46 = vsel %vm3272_vm9, %v3274_v25, %v3270_v50  ;;  %v2735_v24 = vsel %vm901_vm1, %v11701_v23, 0.0  ;;  %v3290_v7 = vsel %vm3287_vm13, %v3289_v43, %v3285_v15 }
 0x616   : > { %v5114_v12 = vpop.f32.mrf.mxu0  ;;  %v3276_v36 = vmul.f32 %v3275_v46, %v9331_v61  ;;  %v3291_v48 = vmul.f32 %v3290_v7, %v9328_v63 }
 0x617   : > { %v9787_v60 = vmul.f32 0.35355338, %v5114_v12 }
 0x619   : > { %v5503_v31 = vsel %vm901_vm1, %v9787_v60, -inf }
 0x61a   : > { %7140 = vmatmul.msk.f32.gmra.mxu1 %vm901_vm1, %v3261_v28 }
 0x61b   : > { %v5254_v42 = vpop.f32.mrf.mxu3 }
 0x61c   : > { %v9815_v9 = vmul.f32 0.35355338, %v5254_v42 }
 0x61d   : > { %5504 = vmax.xlane.f32.xlu1 %v5503_v31  ;;  %v11702_v31 = vld [vmem:[#allocation52_spill] sm:$0xff] }
 0x61e   : > { %v5198_v12 = vpop.f32.mrf.mxu0  ;;  %v2741_v46 = vsel %vm901_vm1, %v11702_v31, 0.0  ;;  %v5518_v58 = vsel %vm901_vm1, %v9815_v9, -inf }
 0x61f   : > { %v9801_v39 = vmul.f32 0.35355338, %v5198_v12  ;;  %v9818_v12 = vmul.f32 0.35355338, %v9638_v51  ;;  %v9831_v51 = vmul.f32 0.35355338, %v9650_v20 }
 0x621   : > { %2736 = vadd.xlane.f32.xlu0 %v2735_v24  ;;  %v5512_v34 = vsel %vm901_vm1, %v9801_v39, -inf }
 0x622   : > { %7141 = vmatmul.msk.f32.gmra.mxu1 %vm901_vm1, %v3276_v36  ;;  %v5497_v36 = vsel %vm901_vm1, %v9818_v12, -inf }
 0x623   : > { %v5338_v13 = vpop.f32.mrf.mxu3 }
 0x624   : > { %v5478_v28 = vpop.f32.mrf.mxu2  ;;  %v9828_v15 = vmul.f32 0.35355338, %v5338_v13 }
 0x625   : > { %v9807_v50 = vmul.f32 0.35355338, %v5478_v28  ;;  %5513 = vmax.xlane.f32.xlu1 %v5512_v34  ;;  %v5506_v28 = vsel %vm901_vm1, %v9831_v51, -inf  ;;  %v2744_v34 = vsel %vm901_vm1, %v9703_v45, 0.0 }
 0x626   : > { %v5282_v25 = vpop.f32.mrf.mxu0  ;;  %v5527_v43 = vsel %vm901_vm1, %v9828_v15, -inf }
 0x627   : > { %v5542_v61 = vsel %vm901_vm1, %v9807_v50, -inf  ;;  %v9850_v13 = vmul.f32 0.35355338, %v5282_v25 }
 0x628   : > { %5543 = vmax.xlane.f32.xlu2 %v5542_v61  ;;  %v9842_v61 = vmul.f32 0.35355338, %v9663_v19  ;;  %v9855_v19 = vmul.f32 0.35355338, %v9772_v55 }
 0x629   : > { %2742 = vadd.xlane.f32.xlu0 %v2741_v46  ;;  %v11703_v46 = vld [vmem:[#allocation54_spill] sm:$0xff]  ;;  %v5521_v45 = vsel %vm901_vm1, %v9850_v13, -inf }
 0x62a   : > { %7142 = vmatmul.msk.f32.gmra.mxu1 %vm901_vm1, %v3291_v48  ;;  %v5515_v31 = vsel %vm901_vm1, %v9842_v61, -inf  ;;  %v2747_v48 = vsel %vm901_vm1, %v11703_v46, 0.0 }
 0x62b   : > { %v5422_v42 = vpop.f32.mrf.mxu3 }
 0x62c   : > { %v9839_v7 = vmul.f32 0.35355338, %v5422_v42 }
 0x62e   : > { %v5366_v23 = vpop.f32.mrf.mxu0  ;;  %v5536_v20 = vsel %vm901_vm1, %v9839_v7, -inf }
 0x62f   : > { %v9820_v24 = vmul.f32 0.35355338, %v5366_v23  ;;  %v5500_v23 = vsel %vm901_vm1, %v9855_v19, -inf }
 0x630   : > { %5519 = vmax.xlane.f32.xlu2 %v5518_v58  ;;  %v9860_v58 = vmul.f32 0.35355338, %v9790_v22 }
 0x631   : > { %5498 = vmax.xlane.f32.xlu0 %v5497_v36  ;;  %v5530_v63 = vsel %vm901_vm1, %v9820_v24, -inf }
 0x632   : > { %5531 = vmax.xlane.f32.xlu1 %v5530_v63  ;;  %v11704_v63 = vld [vmem:[#allocation41_spill] sm:$0xff]  ;;  %v5509_v25 = vsel %vm901_vm1, %v9860_v58, -inf }
 0x638   : > { %5528 = vmax.xlane.f32.xlu2 %v5527_v43  ;;  %v11705_v43 = vld [vmem:[#allocation53_spill] sm:$0xff] }
 0x639   : > { %5507 = vmax.xlane.f32.xlu0 %v5506_v28 }
 0x63a   : > { %2745 = vadd.xlane.f32.xlu1 %v2744_v34 }
 0x640   : > { %5537 = vmax.xlane.f32.xlu2 %v5536_v20 }
 0x641   : > { %5516 = vmax.xlane.f32.xlu0 %v5515_v31 }
 0x642   : > { %2748 = vadd.xlane.f32.xlu1 %v2747_v48 }
 0x649   : > { %5522 = vmax.xlane.f32.xlu0 %v5521_v45 }
 0x651   : > { %5501 = vmax.xlane.f32.xlu0 %v5500_v23 }
 0x656   : > { %v2734_v36 = vpop.xlane.xlu0 %2733 }
 0x657   : > { %7652 = vrcp.f32 %v2734_v36  ;;  %v3303_v34 = vand.u32 2147483648, %v2734_v36  ;;  %v3301_v22 = vand.u32 2147483647, %v2734_v36  ;;  %vm3297_vm15 = vweird.f32 %v2734_v36 }
 0x658   : > { %7497 = vrot.lane.b32.xlu2 %v11704_v63, %s7832_s11 }
 0x659   : > { %5510 = vmax.xlane.f32.xlu0 %v5509_v25  ;;  %v3304_v46 = vor.u32 1.1754944e-38, %v3303_v34  ;;  %vm3302_vm3 = vcmp.eq.f32.partialorder %v3301_v22, 8.507059e+37  ;;  %v11707_v34 = vld [vmem:[#allocation55_spill] sm:$0xff] }
 0x65b   : > { %7492 = vrot.lane.b32.xlu1 %v11705_v43, %s7832_s11 }
 0x65d   : > { %v7653_v55 = vpop.eup %7652 }
 0x65e   : > { %v3293_v42 = vmul.f32 %v7653_v55, %v2734_v36  ;;  %vm3298_vm14 = vweird.f32 %v7653_v55 }
 0x65f   : > { %vm3299_vm2 = vmor %vm3297_vm15, %vm3298_vm14  ;;  %v2987_v45 = vpop.f32.mrf.mxu1 }
 0x660   : > { %v3294_v28 = vsub.f32 1.0, %v3293_v42  ;;  %v11706_v42 = vld [vmem:[#allocation51_spill] sm:$0xff] }
 0x662   : > { %v3295_v20 = vmul.f32 %v7653_v55, %v3294_v28  ;;  %v9874_v28 = vpop.xlane.xlu1 %2739 }
 0x663   : > { %7654 = vrcp.f32 %v9874_v28  ;;  %vm3327_vm9 = vweird.f32 %v9874_v28 }
 0x664   : > { %v3296_v31 = vadd.f32 %v7653_v55, %v3295_v20  ;;  %v2753_v20 = vsel %vm901_vm1, %v11707_v34, 0.0 }
 0x666   : > { %v3300_v48 = vsel %vm3299_vm2, %v7653_v55, %v3296_v31  ;;  %v4202_v55 = vsel %vm901_vm1, %v9432_v54, 0.0  ;;  %v4223_v31 = vsel %vm901_vm1, %v9580_v5, 0.0  ;;  %v5450_v54 = vpop.f32.mrf.mxu0 }
 0x667   : > { %v3305_v23 = vsel %vm3302_vm3, %v3304_v46, %v3300_v48  ;;  %v9886_v46 = vpop.permute.xlu2 %7482  ;;  %v4211_v48 = vsel %vm901_vm1, %v9553_v18, 0.0 }
 0x668   : > { %v3306_v63 = vmul.f32 %v3305_v23, %v2987_v45 }
 0x669   : > { %v9868_v25 = vpop.permute.xlu0 %7477  ;;  %v9896_v5 = vpop.eup %7654 }
 0x66a   : > { %v7479_v43 = vunpack.i.l.bf16 %v9868_v25  ;;  %7143 = vmatmul.msk.f32.gmra.mxu1 %vm901_vm1, %v3306_v63  ;;  %v9876_v36 = vpop.xlane.xlu1 %5525  ;;  %v9892_v63 = vmul.f32 0.35355338, %v5450_v54  ;;  %v3323_v34 = vmul.f32 %v9896_v5, %v9874_v28  ;;  %vm3328_vm6 = vweird.f32 %v9896_v5 }
 0x66b   : > { %vm3329_vm10 = vmor %vm3327_vm9, %vm3328_vm6 }
 0x66c   : > { %5792 = vmatpush.msrb.mxu2 %v7479_v43  ;;  %v5539_v18 = vsel %vm901_vm1, %v9892_v63, -inf  ;;  %v3324_v62 = vsub.f32 1.0, %v3323_v34 }
 0x66d   : > { %7487 = vrot.lane.b32.xlu0 %v11706_v42, %s7832_s11 }
 0x66e   : > { %v3325_v6 = vmul.f32 %v9896_v5, %v3324_v62 }
 0x66f   : > { %v9894_v43 = vpop.xlane.xlu2 %2751 }
 0x681   : > { %4203 = vadd.xlane.f32.xlu2 %v4202_v55 }
 0x685   : > { %2754 = vadd.xlane.f32.xlu1 %v2753_v20 }
 0x688   : > { %v9882_v22 = vpop.xlane.xlu1 %5534 }
 0x689   : > { %4224 = vadd.xlane.f32.xlu2 %v4223_v31 }
 0x68d   : > { %4212 = vadd.xlane.f32.xlu1 %v4211_v48  ;;  %v7484_v48 = vunpack.i.l.bf16 %v9886_v46 }
 0x690   : > { %v5505_v45 = vpop.xlane.xlu1 %5504 }
 0x691   : > { %v5547_v23 = vsub.f32 %v9787_v60, %v5505_v45 }
 0x693   : > { %v5565_v42 = vmul.f32 1.442695, %v5547_v23  ;;  %v4903_v23 = vld [vmem:[%s11508_s6 + $0x10] sm:$0xff] }
 0x694   : > { %v2737_v55 = vpop.xlane.xlu0 %2736  ;;  %4967 = vmatpush.msrb.mxu1 %v4903_v23 }
 0x695   : > { %7656 = vpow2.f32 %v5565_v42  ;;  %v3318_v52 = vand.u32 2147483648, %v2737_v55  ;;  %v3316_v41 = vand.u32 2147483647, %v2737_v55  ;;  %vm3312_vm5 = vweird.f32 %v2737_v55 }
 0x696   : > { %7658 = vrcp.f32 %v2737_v55 }
 0x697   : > { %5540 = vmax.xlane.f32.xlu0 %v5539_v18  ;;  %v3319_v62 = vor.u32 1.1754944e-38, %v3318_v52  ;;  %vm3317_vm8 = vcmp.eq.f32.partialorder %v3316_v41, 8.507059e+37 }
 0x698   : > { %v5514_v20 = vpop.xlane.xlu1 %5513 }
 0x699   : > { %v5550_v60 = vsub.f32 %v9801_v39, %v5514_v20  ;;  %v4199_v20 = vsel %vm901_vm1, %v9490_v33, 0.0  ;;  %v3333_v33 = vand.u32 2147483648, %v9874_v28 }
 0x69b   : > { %v9903_v31 = vpop.eup %7656  ;;  %v5571_v54 = vmul.f32 1.442695, %v5550_v60  ;;  %v9906_v45 = vpop.xlane.xlu2 %5543 }
 0x69c   : > { %v7659_v42 = vpop.eup %7658  ;;  %v9911_v18 = vpop.xlane.xlu0 %2742  ;;  %7265 = vmatmul.msk.f32.vlgmr.msra.gmra.mxu2 %vm901_vm1, %v9903_v31 }
 0x69d   : > { %v3308_v39 = vmul.f32 %v7659_v42, %v2737_v55  ;;  %7660 = vpow2.f32 %v5571_v54  ;;  %5870 = vmatpush.msra.mxu2 %v7484_v48  ;;  %vm3313_vm4 = vweird.f32 %v7659_v42  ;;  %v3326_v54 = vadd.f32 %v9896_v5, %v3325_v6 }
 0x69e   : > { %7662 = vrcp.f32 %v9911_v18  ;;  %vm3314_vm7 = vmor %vm3312_vm5, %vm3313_vm4  ;;  %v3331_v6 = vand.u32 2147483647, %v9874_v28  ;;  %vm3342_vm13 = vweird.f32 %v9911_v18 }
 0x69f   : > { %v3309_v60 = vsub.f32 1.0, %v3308_v39  ;;  %4200 = vadd.xlane.f32.xlu0 %v4199_v20 }
 0x6a0   : > { %vm3332_vm11 = vcmp.eq.f32.partialorder %v3331_v6, 8.507059e+37 }
 0x6a1   : > { %v3310_v34 = vmul.f32 %v7659_v42, %v3309_v60 }
 0x6a3   : > { %v9919_v44 = vpop.eup %7660  ;;  %v3311_v16 = vadd.f32 %v7659_v42, %v3310_v34  ;;  %v9921_v23 = vpop.xlane.xlu2 %5519 }
 0x6a4   : > { %v9923_v48 = vpop.eup %7662  ;;  %v5499_v39 = vpop.xlane.xlu0 %5498  ;;  %7268 = vmatmul.msk.f32.vlgmr.msrb.gmra.mxu2 %vm901_vm1, %v9919_v44 }
 0x6a5   : > { %v3338_v55 = vmul.f32 %v9923_v48, %v9911_v18  ;;  %v5545_v20 = vsub.f32 %v9818_v12, %v5499_v39  ;;  %v5532_v60 = vpop.xlane.xlu1 %5531  ;;  %v3315_v34 = vsel %vm3314_vm7, %v7659_v42, %v3311_v16  ;;  %v3330_v12 = vsel %vm3329_vm10, %v9896_v5, %v3326_v54 }
 0x6a6   : > { %v3320_v52 = vsel %vm3317_vm8, %v3319_v62, %v3315_v34  ;;  %v3334_v39 = vor.u32 1.1754944e-38, %v3333_v33  ;;  %v7474_v42 = vunpack.i.l.bf16 %v9749_v56  ;;  %vm3343_vm12 = vweird.f32 %v9923_v48 }
 0x6a7   : > { %v3339_v40 = vsub.f32 1.0, %v3338_v55  ;;  %v5561_v41 = vmul.f32 1.442695, %v5545_v20  ;;  %4206 = vadd.xlane.f32.xlu0 %v4205_v29  ;;  %v3321_v17 = vmul.f32 %v3320_v52, %v9461_v8  ;;  %v4208_v29 = vsel %vm901_vm1, %v9446_v26, 0.0  ;;  %vm3344_vm14 = vmor %vm3342_vm13, %vm3343_vm12 }
 0x6a8   : > { %v3335_v2 = vsel %vm3332_vm11, %v3334_v39, %v3330_v12  ;;  %v3348_v54 = vand.u32 2147483648, %v9911_v18  ;;  %v3346_v26 = vand.u32 2147483647, %v9911_v18  ;;  %v5557_v18 = vsub.f32 %v9776_v10, %v9882_v22 }
 0x6a9   : > { %v3340_v16 = vmul.f32 %v9923_v48, %v3339_v40  ;;  %7664 = vpow2.f32 %v5561_v41  ;;  %7144 = vmatmul.msk.f32.gmra.mxu1 %vm901_vm1, %v3321_v17  ;;  %v5556_v40 = vsub.f32 %v9820_v24, %v5532_v60  ;;  %v3336_v56 = vmul.f32 %v3335_v2, %v9337_v47 }
 0x6aa   : > { %v3349_v20 = vor.u32 1.1754944e-38, %v3348_v54  ;;  %vm3347_vm15 = vcmp.eq.f32.partialorder %v3346_v26, 8.507059e+37  ;;  %v4214_v10 = vsel %vm901_vm1, %v9456_v49, 0.0  ;;  %vm3387_vm11 = vweird.f32 %v9894_v43 }
 0x6ab   : > { %v5529_v28 = vpop.xlane.xlu2 %5528  ;;  %v3341_v8 = vadd.f32 %v9923_v48, %v3340_v16 }
 0x6ac   : > { %v5555_v62 = vsub.f32 %v9828_v15, %v5529_v28  ;;  %v5508_v55 = vpop.xlane.xlu0 %5507  ;;  %v5552_v28 = vsub.f32 %v9815_v9, %v9921_v23 }
 0x6ad   : > { %v5548_v5 = vsub.f32 %v9831_v51, %v5508_v55  ;;  %v9951_v17 = vpop.xlane.xlu1 %2745  ;;  %v5583_v51 = vmul.f32 1.442695, %v5556_v40  ;;  %v3345_v47 = vsel %vm3344_vm14, %v9923_v48, %v3341_v8  ;;  %v7485_v48 = vunpack.i.h.bf16 %v9886_v46 }
 0x6ae   : > { %v5581_v33 = vmul.f32 1.442695, %v5555_v62  ;;  %7666 = vrcp.f32 %v9951_v17  ;;  %v3350_v6 = vsel %vm3347_vm15, %v3349_v20, %v3345_v47  ;;  %v5554_v46 = vsub.f32 %v9671_v11, %v9876_v36  ;;  %v3091_v20 = vpop.f32.mrf.mxu1 }
 0x6af   : > { %v9956_v15 = vpop.eup %7664  ;;  %7668 = vrcp.f32 %v9894_v43  ;;  %v5567_v24 = vmul.f32 1.442695, %v5548_v5  ;;  %4209 = vadd.xlane.f32.xlu0 %v4208_v29  ;;  %v3351_v62 = vmul.f32 %v3350_v6, %v9333_v37  ;;  %v5585_v55 = vmul.f32 1.442695, %v5557_v18 }
 0x6b0   : > { %7670 = vpow2.f32 %v5581_v33  ;;  %7263 = vmatmul.msk.f32.vlgmr.msrb.gmra.mxu3 %vm901_vm1, %v9956_v15  ;;  %v3363_v9 = vand.u32 2147483648, %v9951_v17  ;;  %v3361_v23 = vand.u32 2147483647, %v9951_v17  ;;  %v5575_v29 = vmul.f32 1.442695, %v5552_v28 }
 0x6b1   : > { %7672 = vpow2.f32 %v5567_v24  ;;  %7145 = vmatmul.msk.f32.gmra.mxu1 %vm901_vm1, %v3336_v56  ;;  %5818 = vmatpush.msrb.mxu3 %v7474_v42  ;;  %vm3357_vm3 = vweird.f32 %v9951_v17  ;;  %v5579_v5 = vmul.f32 1.442695, %v5554_v46  ;;  %v4217_v56 = vsel %vm901_vm1, %v9565_v38, 0.0 }
 0x6b2   : > { %7674 = vpow2.f32 %v5583_v51  ;;  %v3364_v54 = vor.u32 1.1754944e-38, %v3363_v9  ;;  %vm3362_vm5 = vcmp.eq.f32.partialorder %v3361_v23, 8.507059e+37  ;;  %v4220_v9 = vsel %vm901_vm1, %v9468_v53, 0.0 }
 0x6b3   : > { %v5538_v8 = vpop.xlane.xlu2 %5537  ;;  %v3391_v53 = vand.u32 2147483647, %v9894_v43 }
 0x6b4   : > { %v7667_v60 = vpop.eup %7666  ;;  %v5517_v34 = vpop.xlane.xlu0 %5516 }
 0x6b5   : > { %v9967_v52 = vpop.eup %7668  ;;  %v3353_v41 = vmul.f32 %v7667_v60, %v9951_v17  ;;  %v5551_v12 = vsub.f32 %v9842_v61, %v5517_v34  ;;  %v9971_v39 = vpop.xlane.xlu1 %2748  ;;  %vm3358_vm2 = vweird.f32 %v7667_v60  ;;  %v5558_v17 = vsub.f32 %v9839_v7, %v5538_v8 }
 0x6b6   : > { %v9973_v16 = vpop.eup %7670  ;;  %7676 = vrcp.f32 %v9971_v39  ;;  %v3383_v37 = vmul.f32 %v9967_v52, %v9894_v43  ;;  %vm3359_vm4 = vmor %vm3357_vm3, %vm3358_vm2  ;;  %v3376_v7 = vand.u32 2147483647, %v9971_v39  ;;  %vm3372_vm7 = vweird.f32 %v9971_v39 }
 0x6b7   : > { %v9981_v22 = vpop.eup %7672  ;;  %v3354_v2 = vsub.f32 1.0, %v3353_v41  ;;  %v5573_v42 = vmul.f32 1.442695, %v5551_v12  ;;  %4215 = vadd.xlane.f32.xlu0 %v4214_v10  ;;  %v5623_v61 = vsel %vm901_vm1, %v9973_v16, 0.0  ;;  %vm3388_vm10 = vweird.f32 %v9967_v52 }
 0x6b8   : > { %7266 = vmatmul.msk.f32.vlgmr.msra.gmra.mxu3 %vm901_vm1, %v9981_v22  ;;  %5624 = vadd.xlane.f32.xlu2 %v5623_v61  ;;  %v9995_v11 = vpop.eup %7674  ;;  %v3384_v47 = vsub.f32 1.0, %v3383_v37  ;;  %vm3377_vm9 = vcmp.eq.f32.partialorder %v3376_v7, 8.507059e+37  ;;  %vm3389_vm12 = vmor %vm3387_vm11, %vm3388_vm10  ;;  %vm3392_vm13 = vcmp.eq.f32.partialorder %v3391_v53, 8.507059e+37 }
 0x6b9   : > { %v3355_v49 = vmul.f32 %v7667_v60, %v3354_v2  ;;  %7678 = vpow2.f32 %v5573_v42  ;;  %7146 = vmatmul.msk.f32.gmra.mxu1 %vm901_vm1, %v3351_v62  ;;  %5896 = vmatpush.msra.mxu3 %v7485_v48  ;;  %v5626_v12 = vsel %vm901_vm1, %v9995_v11, 0.0  ;;  %v3378_v48 = vand.u32 2147483648, %v9971_v39 }
 0x6ba   : > { %7680 = vpow2.f32 %v5585_v55  ;;  %v3385_v10 = vmul.f32 %v9967_v52, %v3384_v47  ;;  %v5587_v2 = vmul.f32 1.442695, %v5558_v17 }
 0x6bb   : > { %v3356_v36 = vadd.f32 %v7667_v60, %v3355_v49  ;;  %7682 = vpow2.f32 %v5575_v29  ;;  %v3379_v62 = vor.u32 1.1754944e-38, %v3378_v48  ;;  %v4232_v48 = vsel %vm901_vm1, %v9519_v32, 0.0 }
 0x6bc   : > { %v7677_v40 = vpop.eup %7676  ;;  %v5523_v33 = vpop.xlane.xlu0 %5522  ;;  %v3386_v23 = vadd.f32 %v9967_v52, %v3385_v10  ;;  %v4235_v32 = vsel %vm901_vm1, %v9601_v27, 0.0  ;;  %v4241_v27 = vsel %vm901_vm1, %v9609_v35, 0.0 }
 0x6bd   : > { %v3368_v26 = vmul.f32 %v7677_v40, %v9971_v39  ;;  %v5553_v24 = vsub.f32 %v9850_v13, %v5523_v33  ;;  %v3360_v51 = vsel %vm3359_vm4, %v7667_v60, %v3356_v36  ;;  %vm3373_vm6 = vweird.f32 %v7677_v40 }
 0x6be   : > { %v3365_v18 = vsel %vm3362_vm5, %v3364_v54, %v3360_v51  ;;  %vm3374_vm8 = vmor %vm3372_vm7, %vm3373_vm6  ;;  %v3393_v39 = vand.u32 2147483648, %v9894_v43  ;;  %v5560_v43 = vsub.f32 %v9807_v50, %v9906_v45 }
 0x6bf   : > { %v7679_v34 = vpop.eup %7678  ;;  %v3369_v6 = vsub.f32 1.0, %v3368_v26  ;;  %v5577_v41 = vmul.f32 1.442695, %v5553_v24  ;;  %4218 = vadd.xlane.f32.xlu0 %v4217_v56  ;;  %v3366_v38 = vmul.f32 %v3365_v18, %v3091_v20  ;;  %v7480_v18 = vunpack.i.h.bf16 %v9868_v25 }
 0x6c0   : > { %5627 = vadd.xlane.f32.xlu2 %v5626_v12  ;;  %7269 = vmatmul.msk.f32.vlgmr.msrb.gmra.mxu3 %vm901_vm1, %v7679_v34  ;;  %v5611_v13 = vsel %vm901_vm1, %v7679_v34, 0.0  ;;  %v10010_v28 = vpop.eup %7680  ;;  %v3394_v54 = vor.u32 1.1754944e-38, %v3393_v39  ;;  %v7498_v34 = vpop.permute.xlu2 %7497  ;;  %v4229_v25 = vsel %vm901_vm1, %v9591_v21, 0.0 }
 0x6c1   : > { %v3370_v60 = vmul.f32 %v7677_v40, %v3369_v6  ;;  %7684 = vpow2.f32 %v5577_v41  ;;  %5612 = vadd.xlane.f32.xlu1 %v5611_v13  ;;  %7147 = vmatmul.msk.f32.gmra.mxu1 %vm901_vm1, %v3366_v38  ;;  %v10014_v61 = vpop.eup %7682  ;;  %v5629_v8 = vsel %vm901_vm1, %v10010_v28, 0.0  ;;  %v5591_v41 = vmul.f32 1.442695, %v5560_v43 }
 0x6c2   : > { %7686 = vpow2.f32 %v5579_v5  ;;  %v7500_v45 = vunpack.i.h.bf16 %v7498_v34 }
 0x6c3   : > { %v3371_v42 = vadd.f32 %v7677_v40, %v3370_v60  ;;  %7688 = vpow2.f32 %v5587_v2 }
 0x6c4   : > { %v5502_v46 = vpop.xlane.xlu0 %5501 }
 0x6c5   : > { %v5546_v55 = vsub.f32 %v9855_v19, %v5502_v46  ;;  %v3375_v49 = vsel %vm3374_vm8, %v7677_v40, %v3371_v42  ;;  %v5614_v40 = vsel %vm901_vm1, %v10014_v61, 0.0 }
 0x6c6   : > { %v3380_v37 = vsel %vm3377_vm9, %v3379_v62, %v3375_v49 }
 0x6c7   : > { %v7685_v29 = vpop.eup %7684  ;;  %v5563_v36 = vmul.f32 1.442695, %v5546_v55  ;;  %4221 = vadd.xlane.f32.xlu0 %v4220_v9  ;;  %v3381_v19 = vmul.f32 %v3380_v37, %v9477_v4  ;;  %v3390_v4 = vsel %vm3389_vm12, %v9967_v52, %v3386_v23  ;;  %v10081_v23 = vpop.f32.mrf.mxu1 }
 0x6c8   : > { %v7687_v5 = vpop.eup %7686  ;;  %7271 = vmatmul.msk.f32.vlgmr.msra.gmra.mxu2 %vm901_vm1, %v7685_v29  ;;  %5630 = vadd.xlane.f32.xlu2 %v5629_v8  ;;  %v3395_v51 = vsel %vm3392_vm13, %v3394_v54, %v3390_v4 }
 0x6c9   : > { %7690 = vpow2.f32 %v5563_v36  ;;  %7272 = vmatmul.msk.f32.vlgmr.msra.gmra.mxu3 %vm901_vm1, %v7687_v5  ;;  %5615 = vadd.xlane.f32.xlu1 %v5614_v40  ;;  %v7689_v33 = vpop.eup %7688  ;;  %v5620_v20 = vsel %vm901_vm1, %v7687_v5, 0.0  ;;  %v3396_v50 = vmul.f32 %v3395_v51, %v9341_v30  ;;  %v4226_v30 = vsel %vm901_vm1, %v9483_v1, 0.0 }
 0x6ca   : > { %7148 = vmatmul.msk.f32.gmra.mxu1 %vm901_vm1, %v3381_v19  ;;  %v5632_v52 = vsel %vm901_vm1, %v7689_v33, 0.0  ;;  %v5593_v1 = vsel %vm901_vm1, %v9956_v15, 0.0  ;;  %v4238_v15 = vsel %vm901_vm1, %v9530_v57, 0.0  ;;  %v4244_v57 = vsel %vm901_vm1, %v9626_v0, 0.0 }
 0x6cb   : > { %v5608_v0 = vsel %vm901_vm1, %v9919_v44, 0.0 }
 0x6cc   : > { %v5511_v56 = vpop.xlane.xlu0 %5510 }
 0x6cd   : > { %v5549_v26 = vsub.f32 %v9860_v58, %v5511_v56  ;;  %v7493_v24 = vpop.permute.xlu1 %7492  ;;  %v5617_v58 = vsel %vm901_vm1, %v7685_v29, 0.0 }
 0x6ce   : > { %v7494_v47 = vunpack.i.l.bf16 %v7493_v24  ;;  %v7495_v7 = vunpack.i.h.bf16 %v7493_v24 }
 0x6cf   : > { %v7691_v17 = vpop.eup %7690  ;;  %v5569_v6 = vmul.f32 1.442695, %v5549_v26  ;;  %5621 = vadd.xlane.f32.xlu0 %v5620_v20  ;;  %v10088_v40 = vpop.f32.mrf.mxu1 }
 0x6d0   : > { %7264 = vmatmul.msk.f32.vlgmr.msra.gmra.mxu0 %vm901_vm1, %v7691_v17  ;;  %5633 = vadd.xlane.f32.xlu2 %v5632_v52  ;;  %v5596_v10 = vsel %vm901_vm1, %v7691_v17, 0.0 }
 0x6d1   : > { %7692 = vpow2.f32 %v5569_v6  ;;  %5844 = vmatpush.msra.mxu0 %v7480_v18  ;;  %5974 = vmatpush.msrb.mxu3 %v7494_v47 }
 0x6d2   : > { %5618 = vadd.xlane.f32.xlu1 %v5617_v58  ;;  %7149 = vmatmul.msk.f32.gmra.mxu1 %vm901_vm1, %v3396_v50  ;;  %7694 = vpow2.f32 %v5591_v41 }
 0x6d3   : > { %7275 = vmatmul.msk.f32.vlgmr.msrb.gmra.mxu3 %vm901_vm1, %v10010_v28  ;;  %v7499_v28 = vunpack.i.l.bf16 %v7498_v34 }
 0x6d4   : > { %6052 = vmatpush.msra.mxu3 %v7500_v45 }
 0x6d7   : > { %v7693_v12 = vpop.eup %7692  ;;  %4230 = vadd.xlane.f32.xlu0 %v4229_v25  ;;  %v10097_v51 = vpop.f32.mrf.mxu1 }
 0x6d8   : > { %7267 = vmatmul.msk.f32.vlgmr.msrb.gmra.mxu0 %vm901_vm1, %v7693_v12  ;;  %v10052_v38 = vpop.eup %7694  ;;  %v5605_v62 = vsel %vm901_vm1, %v7693_v12, 0.0 }
 0x6d9   : > { %v5638_v24 = vsel %vm901_vm1, %v10052_v38, 0.0 }
 0x6da   : > { %4227 = vadd.xlane.f32.xlu1 %v4226_v30 }
 0x6db   : > { %7278 = vmatmul.msk.f32.vlgmr.msra.gmra.mxu3 %vm901_vm1, %v10052_v38 }
 0x6df   : > { %v7488_v13 = vpop.permute.xlu0 %7487  ;;  %4233 = vadd.xlane.f32.xlu0 %v4232_v48 }
 0x6e0   : > { %v7490_v60 = vunpack.i.h.bf16 %v7488_v13  ;;  %v7489_v21 = vunpack.i.l.bf16 %v7488_v13  ;;  %7270 = vmatmul.msk.f32.vlgmr.msra.gmra.mxu0 %vm901_vm1, %v10014_v61 }
 0x6e2   : > { %5594 = vadd.xlane.f32.xlu1 %v5593_v1  ;;  %5922 = vmatpush.msrb.mxu0 %v7489_v21  ;;  %v10111_v1 = vpop.f32.mrf.mxu1 }
 0x6e3   : > { %5948 = vmatpush.msrb.mxu2 %v7490_v60 }
 0x6e4   : > { %6000 = vmatpush.msra.mxu0 %v7495_v7  ;;  %7274 = vmatmul.msk.f32.vlgmr.msrb.gmra.mxu2 %vm901_vm1, %v9995_v11  ;;  %v5599_v11 = vsel %vm901_vm1, %v9903_v31, 0.0 }
 0x6e5   : > { %6026 = vmatpush.msra.mxu2 %v7499_v28 }
 0x6e7   : > { %4236 = vadd.xlane.f32.xlu0 %v4235_v32 }
 0x6e8   : > { %7273 = vmatmul.msk.f32.vlgmr.msrb.gmra.mxu0 %vm901_vm1, %v9973_v16  ;;  %v5602_v16 = vsel %vm901_vm1, %v9981_v22, 0.0 }
 0x6ea   : > { %5597 = vadd.xlane.f32.xlu1 %v5596_v10 }
 0x6ef   : > { %4239 = vadd.xlane.f32.xlu0 %v4238_v15 }
 0x6f0   : > { %7276 = vmatmul.msk.f32.vlgmr.msra.gmra.mxu0 %vm901_vm1, %v7689_v33 }
 0x6f2   : > { %5600 = vadd.xlane.f32.xlu1 %v5599_v11 }
 0x6f4   : > { %v4204_v29 = vpop.xlane.xlu2 %4203 }
 0x6f5   : > { %v4689_v25 = vand.u32 2147483648, %v4204_v29  ;;  %vm4683_vm9 = vweird.f32 %v4204_v29  ;;  %v4687_v30 = vand.u32 2147483647, %v4204_v29 }
 0x6f7   : > { %4242 = vadd.xlane.f32.xlu0 %v4241_v27  ;;  %v4690_v7 = vor.u32 1.1754944e-38, %v4689_v25  ;;  %vm4688_vm11 = vcmp.eq.f32.partialorder %v4687_v30, 8.507059e+37  ;;  %v11714_v30 = vld [vmem:[#allocation30_spill] sm:$0xff] }
 0x6f8   : > { %v2755_v2 = vpop.xlane.xlu1 %2754 }
 0x6f9   : > { %7696 = vrcp.f32 %v2755_v2  ;;  %v3408_v46 = vand.u32 2147483648, %v2755_v2  ;;  %v3406_v35 = vand.u32 2147483647, %v2755_v2  ;;  %vm3402_vm15 = vweird.f32 %v2755_v2 }
 0x6fa   : > { %5603 = vadd.xlane.f32.xlu1 %v5602_v16  ;;  %7698 = vrcp.f32 %v4204_v29  ;;  %v6297_v16 = vld [vmem:[%s11508_s6 + $0x18] sm:$0xff] }
 0x6fb   : > { %v3409_v49 = vor.u32 1.1754944e-38, %v3408_v46  ;;  %vm3407_vm3 = vcmp.eq.f32.partialorder %v3406_v35, 8.507059e+37  ;;  %7302 = vmatpush.msrb.mxu2 %v6297_v16  ;;  %6361 = vmatpush.msrb.mxu0 %v6297_v16 }
 0x6fc   : > { %v10113_v28 = vpop.xlane.xlu2 %4224 }
 0x6ff   : > { %v7697_v42 = vpop.eup %7696  ;;  %4245 = vadd.xlane.f32.xlu0 %v4244_v57 }
 0x700   : > { %v3398_v61 = vmul.f32 %v7697_v42, %v2755_v2  ;;  %vm3403_vm14 = vweird.f32 %v7697_v42  ;;  %v7699_v53 = vpop.eup %7698  ;;  %v10099_v20 = vpop.xlane.xlu1 %4212 }
 0x701   : > { %vm3404_vm2 = vmor %vm3402_vm15, %vm3403_vm14  ;;  %v4679_v44 = vmul.f32 %v7699_v53, %v4204_v29  ;;  %vm4684_vm6 = vweird.f32 %v7699_v53 }
 0x702   : > { %v3399_v31 = vsub.f32 1.0, %v3398_v61  ;;  %5606 = vadd.xlane.f32.xlu1 %v5605_v62  ;;  %vm4685_vm10 = vmor %vm4683_vm9, %vm4684_vm6 }
 0x703   : > { %v4680_v33 = vsub.f32 1.0, %v4679_v44 }
 0x704   : > { %v3400_v55 = vmul.f32 %v7697_v42, %v3399_v31 }
 0x705   : > { %v4681_v47 = vmul.f32 %v7699_v53, %v4680_v33 }
 0x706   : > { %v3401_v9 = vadd.f32 %v7697_v42, %v3400_v55 }
 0x707   : > { %v4682_v41 = vadd.f32 %v7699_v53, %v4681_v47  ;;  %v4734_v47 = vand.u32 2147483648, %v10099_v20 }
 0x708   : > { %v3405_v22 = vsel %vm3404_vm2, %v7697_v42, %v3401_v9  ;;  %v10139_v9 = vld [vmem:[%s10133_s13] sm:$0xff] }
 0x709   : > { %v3410_v37 = vsel %vm3407_vm3, %v3409_v49, %v3405_v22  ;;  %v4686_v60 = vsel %vm4685_vm10, %v7699_v53, %v4682_v41  ;;  %v10141_v49 = vpop.f32.mrf.mxu1  ;;  %v11708_v53 = vld [vmem:[#allocation20_spill] sm:$0xff] }
 0x70a   : > { %5609 = vadd.xlane.f32.xlu1 %v5608_v0  ;;  %v5541_v39 = vpop.xlane.xlu0 %5540  ;;  %v3411_v36 = vmul.f32 %v3410_v37, %v9335_v14  ;;  %v4691_v10 = vsel %vm4688_vm11, %v4690_v7, %v4686_v60  ;;  %v4735_v60 = vor.u32 1.1754944e-38, %v4734_v47  ;;  %v4792_v47 = vand.u32 2147483647, %v10113_v28 }
 0x70b   : > { %v5559_v8 = vsub.f32 %v9892_v63, %v5541_v39  ;;  %v4692_v61 = vmul.f32 %v4691_v10, %v9678_v59 }
 0x70c   : > { %7150 = vmatmul.msk.f32.gmra.mxu1 %vm901_vm1, %v3411_v36 }
 0x70d   : > { %v5589_v19 = vmul.f32 1.442695, %v5559_v8  ;;  %v559_v8 = vrot.slane %v10139_v9, 2 }
 0x70f   : > { %7700 = vpow2.f32 %v5589_v19 }
 0x711   : > { %v10191_v25 = vpop.f32.mrf.mxu1 }
 0x712   : > { %v4201_v5 = vpop.xlane.xlu0 %4200  ;;  %11713 = vst [vmem:[#allocation10_spill] sm:$0xff] %v10191_v25 }
 0x713   : > { %7702 = vrcp.f32 %v4201_v5  ;;  %v4674_v26 = vand.u32 2147483648, %v4201_v5  ;;  %v4672_v18 = vand.u32 2147483647, %v4201_v5  ;;  %vm4668_vm5 = vweird.f32 %v4201_v5 }
 0x715   : > { %v7701_v4 = vpop.eup %7700  ;;  %v4675_v52 = vor.u32 1.1754944e-38, %v4674_v26  ;;  %vm4673_vm8 = vcmp.eq.f32.partialorder %v4672_v18, 8.507059e+37  ;;  %v7833_v26 = vmov 0  }
 0x716   : > { %7277 = vmatmul.msk.f32.vlgmr.msra.gmra.mxu2 %vm901_vm1, %v7701_v4  ;;  %v5635_v54 = vsel %vm901_vm1, %v7701_v4, 0.0  ;;  %7503 = vset.pattern.permute.xlu1 %v7833_v26 }
 0x717   : > { %5636 = vadd.xlane.f32.xlu2 %v5635_v54  ;;  %7502 = vset.pattern.permute.xlu0 %v7833_v26 }
 0x718   : > { %7501 = vset.pattern.permute.xlu2 %v7833_v26  ;;  %v4794_v26 = vand.u32 2147483648, %v10113_v28 }
 0x719   : > { %v7703_v14 = vpop.eup %7702 }
 0x71a   : > { %v4664_v63 = vmul.f32 %v7703_v14, %v4201_v5  ;;  %v10092_v43 = vpop.xlane.xlu0 %4206  ;;  %vm4669_vm4 = vweird.f32 %v7703_v14 }
 0x71b   : > { %7704 = vrcp.f32 %v10092_v43  ;;  %vm4670_vm7 = vmor %vm4668_vm5, %vm4669_vm4  ;;  %v4704_v2 = vand.u32 2147483648, %v10092_v43  ;;  %vm4698_vm13 = vweird.f32 %v10092_v43  ;;  %v4702_v57 = vand.u32 2147483647, %v10092_v43 }
 0x71c   : > { %v4665_v56 = vsub.f32 1.0, %v4664_v63  ;;  %7706 = vrcp.f32 %v10099_v20 }
 0x71d   : > { %v4705_v55 = vor.u32 1.1754944e-38, %v4704_v2  ;;  %vm4703_vm15 = vcmp.eq.f32.partialorder %v4702_v57, 8.507059e+37 }
 0x71e   : > { %v4666_v17 = vmul.f32 %v7703_v14, %v4665_v56 }
 0x71f   : > { %5639 = vadd.xlane.f32.xlu2 %v5638_v24 }
 0x720   : > { %v4667_v34 = vadd.f32 %v7703_v14, %v4666_v17 }
 0x721   : > { %v7705_v6 = vpop.eup %7704 }
 0x722   : > { %v4671_v50 = vsel %vm4670_vm7, %v7703_v14, %v4667_v34  ;;  %v4694_v58 = vmul.f32 %v7705_v6, %v10092_v43  ;;  %v10103_v45 = vpop.xlane.xlu0 %4209  ;;  %v10109_v21 = vpop.eup %7706  ;;  %vm4699_vm12 = vweird.f32 %v7705_v6  ;;  %v654_v43 = vperm.slane %v559_v8, 0 }
 0x723   : > { %v4676_v12 = vsel %vm4673_vm8, %v4675_v52, %v4671_v50  ;;  %7708 = vrcp.f32 %v10103_v45  ;;  %v4724_v27 = vmul.f32 %v10109_v21, %v10099_v20  ;;  %vm4700_vm14 = vmor %vm4698_vm13, %vm4699_vm12  ;;  %v4719_v39 = vand.u32 2147483648, %v10103_v45 }
 0x724   : > { %v4677_v38 = vmul.f32 %v4676_v12, %v9680_v3  ;;  %v4695_v48 = vsub.f32 1.0, %v4694_v58  ;;  %vm4713_vm3 = vweird.f32 %v10103_v45  ;;  %v4717_v19 = vand.u32 2147483647, %v10103_v45  ;;  %677 = vperm.xlu1 %7503, %v654_v43  }
 0x725   : > { %v4725_v46 = vsub.f32 1.0, %v4724_v27  ;;  %v4720_v63 = vor.u32 1.1754944e-38, %v4719_v39  ;;  %vm4729_vm5 = vweird.f32 %v10109_v21  ;;  %vm4728_vm7 = vweird.f32 %v10099_v20 }
 0x726   : > { %v4696_v13 = vmul.f32 %v7705_v6, %v4695_v48  ;;  %7215 = vmatmul.msk.f32.vlgmr.msrb.gmra.mxu1 %vm901_vm1, %v4677_v38  ;;  %vm4718_vm6 = vcmp.eq.f32.partialorder %v4717_v19, 8.507059e+37  ;;  %v4732_v34 = vand.u32 2147483647, %v10099_v20  ;;  %vm10185_vm8 = vmor %vm4728_vm7, %vm4729_vm5 }
 0x727   : > { %v4726_v29 = vmul.f32 %v10109_v21, %v4725_v46  ;;  %v11715_v46 = vld [vmem:[#allocation32_spill] sm:$0xff] }
 0x728   : > { %v4697_v15 = vadd.f32 %v7705_v6, %v4696_v13  ;;  %vm4733_vm9 = vcmp.eq.f32.partialorder %v4732_v34, 8.507059e+37 }
 0x729   : > { %v7709_v32 = vpop.eup %7708  ;;  %v4727_v56 = vadd.f32 %v10109_v21, %v4726_v29 }
 0x72a   : > { %v4709_v3 = vmul.f32 %v7709_v32, %v10103_v45  ;;  %v10116_v11 = vpop.xlane.xlu0 %4215  ;;  %v4701_v31 = vsel %vm4700_vm14, %v7705_v6, %v4697_v15  ;;  %vm4714_vm2 = vweird.f32 %v7709_v32 }
 0x72b   : > { %7710 = vrcp.f32 %v10116_v11  ;;  %v10136_v59 = vpop.xlane.xlu2 %5624  ;;  %v4706_v35 = vsel %vm4703_vm15, %v4705_v55, %v4701_v31  ;;  %vm10158_vm4 = vmor %vm4713_vm3, %vm4714_vm2  ;;  %v4731_v48 = vsel %vm10185_vm8, %v10109_v21, %v4727_v56  ;;  %vm4743_vm14 = vweird.f32 %v10116_v11 }
 0x72c   : > { %v4710_v42 = vsub.f32 1.0, %v4709_v3  ;;  %7712 = vrcp.f32 %v10113_v28  ;;  %v4707_v4 = vmul.f32 %v4706_v35, %v11708_v53  ;;  %v4736_v3 = vsel %vm4733_vm9, %v4735_v60, %v4731_v48 }
 0x72d   : > { %v4737_v55 = vmul.f32 %v4736_v3, %v11715_v46  ;;  %v4747_v35 = vand.u32 2147483647, %v10116_v11  ;;  %vm4793_vm9 = vcmp.eq.f32.partialorder %v4792_v47, 8.507059e+37 }
 0x72e   : > { %v4711_v62 = vmul.f32 %v7709_v32, %v4710_v42  ;;  %7216 = vmatmul.msk.f32.gmra.mxu1 %vm901_vm1, %v4692_v61 }
 0x72f   : > { %vm4748_vm5 = vcmp.eq.f32.partialorder %v4747_v35, 8.507059e+37 }
 0x730   : > { %v4712_v22 = vadd.f32 %v7709_v32, %v4711_v62  ;;  %v4749_v62 = vand.u32 2147483648, %v10116_v11 }
 0x731   : > { %v10145_v37 = vpop.eup %7710 }
 0x732   : > { %v10143_v0 = vpop.xlane.xlu0 %4218  ;;  %v10163_v54 = vpop.eup %7712  ;;  %v4739_v14 = vmul.f32 %v10145_v37, %v10116_v11  ;;  %v4716_v33 = vsel %vm10158_vm4, %v7709_v32, %v4712_v22  ;;  %vm4744_vm11 = vweird.f32 %v10145_v37  ;;  %v561_v11 = vrot.slane %v10139_v9, 4 }
 0x733   : > { %v10149_v36 = vpop.f32.mrf.mxu3  ;;  %7714 = vrcp.f32 %v10143_v0  ;;  %v4784_v24 = vmul.f32 %v10163_v54, %v10113_v28  ;;  %v4721_v17 = vsel %vm4718_vm6, %v4720_v63, %v4716_v33  ;;  %v10179_v52 = vpop.xlane.xlu2 %5627  ;;  %vm10225_vm2 = vmor %vm4743_vm14, %vm4744_vm11  ;;  %vm4789_vm3 = vweird.f32 %v10163_v54 }
 0x734   : > { %v10155_v5 = vpop.xlane.xlu1 %5612  ;;  %v4740_v6 = vsub.f32 1.0, %v4739_v14  ;;  %v4722_v38 = vmul.f32 %v4721_v17, %v11714_v30  ;;  %v10236_v14 = vpop.f32.mrf.mxu1  ;;  %vm4788_vm4 = vweird.f32 %v10113_v28  ;;  %v4764_v30 = vand.u32 2147483648, %v10143_v0 }
 0x735   : > { %7716 = vrcp.f32 %v10155_v5  ;;  %v4785_v13 = vsub.f32 1.0, %v4784_v24  ;;  %v6158_v15 = vand.u32 2147483648, %v10155_v5  ;;  %v6156_v21 = vand.u32 2147483647, %v10155_v5  ;;  %vm10256_vm6 = vmor %vm4788_vm4, %vm4789_vm3 }
 0x736   : > { %7217 = vmatmul.msk.f32.gmra.mxu1 %vm901_vm1, %v4707_v4  ;;  %7718 = vrcp.f32 %v10136_v59  ;;  %v4741_v7 = vmul.f32 %v10145_v37, %v4740_v6  ;;  %vm6152_vm12 = vweird.f32 %v10155_v5  ;;  %v4750_v24 = vor.u32 1.1754944e-38, %v4749_v62 }
 0x737   : > { %v4786_v2 = vmul.f32 %v10163_v54, %v4785_v13  ;;  %v6159_v31 = vor.u32 1.1754944e-38, %v6158_v15  ;;  %vm6157_vm15 = vcmp.eq.f32.partialorder %v6156_v21, 8.507059e+37  ;;  %v656_v6 = vperm.slane %v561_v11, 0 }
 0x738   : > { %v4742_v57 = vadd.f32 %v10145_v37, %v4741_v7  ;;  %vm4758_vm8 = vweird.f32 %v10143_v0  ;;  %v4762_v13 = vand.u32 2147483647, %v10143_v0  ;;  %v11720_v7 = vld [vmem:[#allocation24_spill] sm:$0xff]  ;;  %v4765_v62 = vor.u32 1.1754944e-38, %v4764_v30 }
 0x739   : > { %v10175_v18 = vpop.eup %7714  ;;  %v4787_v56 = vadd.f32 %v10163_v54, %v4786_v2  ;;  %685 = vperm.xlu1 %7503, %v656_v6  }
 0x73a   : > { %v10181_v41 = vpop.xlane.xlu0 %4221  ;;  %v4754_v32 = vmul.f32 %v10175_v18, %v10143_v0  ;;  %v4746_v43 = vsel %vm10225_vm2, %v10145_v37, %v4742_v57  ;;  %vm4759_vm7 = vweird.f32 %v10175_v18  ;;  %v6218_v57 = vand.u32 2147483648, %v10136_v59 }
 0x73b   : > { %v7717_v50 = vpop.eup %7716  ;;  %v10189_v45 = vpop.f32.mrf.mxu3  ;;  %7720 = vrcp.f32 %v10181_v41  ;;  %v4751_v34 = vsel %vm4748_vm5, %v4750_v24, %v4746_v43  ;;  %v4777_v46 = vand.u32 2147483647, %v10181_v41  ;;  %vm4763_vm11 = vcmp.eq.f32.partialorder %v4762_v13, 8.507059e+37 }
 0x73c   : > { %v6148_v20 = vmul.f32 %v7717_v50, %v10155_v5  ;;  %v10195_v12 = vpop.xlane.xlu1 %5615  ;;  %vm6153_vm10 = vweird.f32 %v7717_v50  ;;  %v10210_v16 = vpop.eup %7718  ;;  %v4755_v42 = vsub.f32 1.0, %v4754_v32  ;;  %v4752_v32 = vmul.f32 %v4751_v34, %v11720_v7 }
 0x73d   : > { %7722 = vrcp.f32 %v10195_v12  ;;  %vm6154_vm13 = vmor %vm6152_vm12, %vm6153_vm10  ;;  %v10219_v22 = vpop.xlane.xlu2 %5630  ;;  %v6208_v19 = vmul.f32 %v10210_v16, %v10136_v59  ;;  %v10301_v35 = vpop.f32.mrf.mxu1  ;;  %vm4773_vm12 = vweird.f32 %v10181_v41 }
 0x73e   : > { %v6149_v10 = vsub.f32 1.0, %v6148_v20  ;;  %7218 = vmatmul.msk.f32.gmra.mxu1 %vm901_vm1, %v4722_v38  ;;  %v4756_v33 = vmul.f32 %v10175_v18, %v4755_v42  ;;  %7724 = vrcp.f32 %v10179_v52  ;;  %v4795_v20 = vor.u32 1.1754944e-38, %v4794_v26  ;;  %vm10274_vm10 = vmor %vm4758_vm8, %vm4759_vm7  ;;  %v10328_v34 = vpop.f32.mrf.mxu2 }
 0x73f   : > { %7726 = vrcp.f32 %v10219_v22  ;;  %v6209_v58 = vsub.f32 1.0, %v6208_v19  ;;  %v4791_v38 = vsel %vm10256_vm6, %v10163_v54, %v4787_v56  ;;  %v10317_v56 = vor.u32 1.1754944e-38, %v6218_v57  ;;  %v11732_v57 = vld [vmem:[#allocation38_spill] sm:$0xff] }
 0x740   : > { %v6150_v27 = vmul.f32 %v7717_v50, %v6149_v10  ;;  %v4757_v28 = vadd.f32 %v10175_v18, %v4756_v33  ;;  %v4796_v42 = vsel %vm4793_vm9, %v4795_v20, %v4791_v38  ;;  %v6248_v13 = vand.u32 2147483648, %v10219_v22 }
 0x741   : > { %v10234_v44 = vpop.eup %7720  ;;  %v6210_v2 = vmul.f32 %v10210_v16, %v6209_v58  ;;  %v11726_v58 = vld [vmem:[#allocation34_spill] sm:$0xff]  ;;  %vm6242_vm2 = vweird.f32 %v10219_v22 }
 0x742   : > { %v6151_v61 = vadd.f32 %v7717_v50, %v6150_v27  ;;  %v10221_v29 = vpop.xlane.xlu0 %5621  ;;  %v4769_v37 = vmul.f32 %v10234_v44, %v10181_v41  ;;  %v4761_v0 = vsel %vm10274_vm10, %v10175_v18, %v4757_v28  ;;  %v4779_v18 = vand.u32 2147483648, %v10181_v41 }
 0x743   : > { %v5820_v5 = vpop.f32.mrf.mxu3  ;;  %v10251_v17 = vpop.eup %7722  ;;  %v4766_v19 = vsel %vm4763_vm11, %v4765_v62, %v4761_v0  ;;  %v10315_v43 = vadd.f32 %v10210_v16, %v6210_v2  ;;  %vm4774_vm14 = vweird.f32 %v10234_v44  ;;  %v6173_v0 = vand.u32 2147483648, %v10195_v12 }
 0x744   : > { %v6155_v39 = vsel %vm6154_vm13, %v7717_v50, %v6151_v61  ;;  %v10267_v48 = vpop.eup %7724  ;;  %v6163_v60 = vmul.f32 %v10251_v17, %v10195_v12  ;;  %v4770_v15 = vsub.f32 1.0, %v4769_v37  ;;  %vm10320_vm13 = vcmp.eq.f32.partialorder %v4777_v46, 8.507059e+37  ;;  %vm10354_vm3 = vmor %vm4773_vm12, %vm4774_vm14 }
 0x745   : > { %v6160_v53 = vsel %vm6157_vm15, %v6159_v31, %v6155_v39  ;;  %v10231_v4 = vpop.xlane.xlu1 %5618  ;;  %v10282_v27 = vpop.eup %7726  ;;  %v10296_v31 = vmul.f32 %v10267_v48, %v10179_v52  ;;  %v4780_v6 = vor.u32 1.1754944e-38, %v4779_v18  ;;  %v4767_v28 = vmul.f32 %v4766_v19, %v11726_v58 }
 0x746   : > { %v6161_v63 = vmul.f32 %v6160_v53, %v5820_v5  ;;  %7219 = vmatmul.msk.f32.gmra.mxu1 %vm901_vm1, %v4737_v55  ;;  %7728 = vrcp.f32 %v10231_v4  ;;  %v6164_v39 = vsub.f32 1.0, %v6163_v60  ;;  %v4771_v8 = vmul.f32 %v10234_v44, %v4770_v15  ;;  %v11723_v53 = vld [vmem:[#allocation25_spill] sm:$0xff]  ;;  %v10310_v33 = vpop.xlane.xlu2 %5633  ;;  %v10348_v2 = vpop.f32.mrf.mxu1 }
 0x747   : > { %7730 = vrcp.f32 %v10221_v29  ;;  %v10307_v11 = vmul.f32 %v4796_v42, %v11723_v53  ;;  %v6238_v47 = vmul.f32 %v10282_v27, %v10219_v22  ;;  %vm6167_vm15 = vweird.f32 %v10195_v12  ;;  %11727 = vst [vmem:[#allocation35_spill] sm:$0xff] %v10348_v2 }
 0x748   : > { %7285 = vmatmul.msk.f32.vlgmr.msrb.gmra.mxu2 %vm901_vm1, %v6161_v63  ;;  %v6165_v20 = vmul.f32 %v10251_v17, %v6164_v39  ;;  %v4772_v30 = vadd.f32 %v10234_v44, %v4771_v8  ;;  %7732 = vrcp.f32 %v10310_v33  ;;  %v6203_v42 = vand.u32 2147483648, %v10221_v29 }
 0x749   : > { %v6239_v10 = vsub.f32 1.0, %v6238_v47  ;;  %vm6168_vm4 = vweird.f32 %v10251_v17  ;;  %vm6197_vm5 = vweird.f32 %v10221_v29  ;;  %v10365_v18 = vor.u32 1.1754944e-38, %v6248_v13 }
 0x74a   : > { %v10284_v21 = vpop.xlane.xlu0 %4230  ;;  %v6166_v46 = vadd.f32 %v10251_v17, %v6165_v20  ;;  %v4776_v41 = vsel %vm10354_vm3, %v10234_v44, %v4772_v30  ;;  %v563_v39 = vrot.slane %v10139_v9, 6  ;;  %vm6182_vm6 = vweird.f32 %v10231_v4  ;;  %vm10383_vm7 = vmor %vm6167_vm15, %vm6168_vm4 }
 0x74b   : > { %7734 = vrcp.f32 %v10284_v21  ;;  %v6186_v19 = vand.u32 2147483647, %v10231_v4  ;;  %v6201_v53 = vand.u32 2147483647, %v10221_v29  ;;  %v6188_v47 = vand.u32 2147483648, %v10231_v4 }
 0x74c   : > { %v10292_v61 = vpop.eup %7728  ;;  %v6240_v44 = vmul.f32 %v10282_v27, %v6239_v10  ;;  %v10389_v20 = vor.u32 1.1754944e-38, %v6203_v42  ;;  %vm6243_vm8 = vweird.f32 %v10282_v27  ;;  %v6170_v30 = vsel %vm10383_vm7, %v10251_v17, %v6166_v46 }
 0x74d   : > { %v10278_v3 = vpop.xlane.xlu1 %4227  ;;  %v10280_v54 = vpop.f32.mrf.mxu0  ;;  %v6178_v63 = vmul.f32 %v10292_v61, %v10231_v4  ;;  %v4781_v13 = vsel %vm10320_vm13, %v4780_v6, %v4776_v41  ;;  %v658_v26 = vperm.slane %v563_v39, 0  ;;  %vm6183_vm10 = vweird.f32 %v10292_v61  ;;  %vm10435_vm14 = vmor %vm6242_vm2, %vm6243_vm8 }
 0x74e   : > { %7220 = vmatmul.msk.f32.gmra.mxu1 %vm901_vm1, %v4752_v32  ;;  %v10299_v55 = vpop.eup %7730  ;;  %v6171_v32 = vand.u32 2147483647, %v10195_v12  ;;  %v4782_v42 = vmul.f32 %v4781_v13, %v11732_v57  ;;  %vm10407_vm11 = vcmp.eq.f32.partialorder %v6201_v53, 8.507059e+37  ;;  %v10413_v6 = vpop.f32.mrf.mxu2  ;;  %v10417_v46 = vadd.f32 %v10282_v27, %v6240_v44  ;;  %vm10449_vm15 = vmor %vm6182_vm6, %vm6183_vm10 }
 0x74f   : > { %v6193_v37 = vmul.f32 %v10299_v55, %v10221_v29  ;;  %v6179_v7 = vsub.f32 1.0, %v6178_v63  ;;  %v10375_v63 = vpop.eup %7732  ;;  %vm6198_vm9 = vweird.f32 %v10299_v55  ;;  %693 = vperm.xlu1 %7503, %v658_v26   ;;  %v10421_v39 = vpop.f32.mrf.mxu1  ;;  %vm10425_vm13 = vcmp.eq.f32.partialorder %v6186_v19, 8.507059e+37 }
 0x750   : > { %vm6172_vm12 = vcmp.eq.f32.partialorder %v6171_v32, 8.507059e+37  ;;  %11735 = vst [vmem:[#allocation47_spill] sm:$0xff] %v10421_v39  ;;  %v10429_v53 = vpop.f32.mrf.mxu3  ;;  %v10443_v19 = vmul.f32 %v10375_v63, %v10310_v33  ;;  %v6189_v13 = vor.u32 1.1754944e-38, %v6188_v47  ;;  %v11742_v57 = vand.u32 2147483647, %v10219_v22  ;;  %vm10470_vm4 = vmor %vm6197_vm5, %vm6198_vm9 }
 0x751   : > { %v6194_v15 = vsub.f32 1.0, %v6193_v37  ;;  %v6180_v8 = vmul.f32 %v10292_v61, %v6179_v7  ;;  %vm6213_vm3 = vweird.f32 %v10210_v16  ;;  %v4807_v29 = vand.u32 2147483647, %v10278_v3 }
 0x752   : > { %v10360_v62 = vpop.xlane.xlu0 %4233  ;;  %vm10458_vm2 = vcmp.eq.f32.partialorder %v11742_v57, 8.507059e+37  ;;  %vm6212_vm5 = vweird.f32 %v10136_v59 }
 0x753   : > { %v6195_v37 = vmul.f32 %v10299_v55, %v6194_v15  ;;  %v6174_v15 = vor.u32 1.1754944e-38, %v6173_v0  ;;  %v6181_v50 = vadd.f32 %v10292_v61, %v6180_v8 }
 0x755   : > { %v10336_v38 = vpop.xlane.xlu1 %5594  ;;  %v10339_v60 = vpop.f32.mrf.mxu0  ;;  %v6196_v0 = vadd.f32 %v10299_v55, %v6195_v37  ;;  %v6175_v41 = vsel %vm6172_vm12, %v6174_v15, %v6170_v30  ;;  %v6185_v4 = vsel %vm10449_vm15, %v10292_v61, %v6181_v50  ;;  %v6245_v50 = vsel %vm10435_vm14, %v10282_v27, %v10417_v46  ;;  %vm10559_vm14 = vmor %vm6212_vm5, %vm6213_vm3 }
 0x756   : > { %7221 = vmatmul.msk.f32.gmra.mxu1 %vm901_vm1, %v4767_v28  ;;  %7736 = vrcp.f32 %v10336_v38  ;;  %v10387_v28 = vpop.eup %7734  ;;  %vm6062_vm7 = vweird.f32 %v10336_v38  ;;  %v4809_v27 = vand.u32 2147483648, %v10278_v3  ;;  %v5872_v32 = vpop.f32.mrf.mxu2  ;;  %vm10540_vm12 = vcmp.eq.f32.partialorder %v4807_v29, 8.507059e+37 }
 0x757   : > { %7738 = vrcp.f32 %v10278_v3  ;;  %v4814_v8 = vmul.f32 %v10387_v28, %v10284_v21  ;;  %v6200_v61 = vsel %vm10470_vm4, %v10299_v55, %v6196_v0  ;;  %v6190_v0 = vsel %vm10425_vm13, %v6189_v13, %v6185_v4  ;;  %v11763_v4 = vld [vmem:[#allocation17_spill] sm:$0xff] }
 0x758   : > { %7740 = vrcp.f32 %v10360_v62  ;;  %v6205_v13 = vsel %vm10407_vm11, %v10389_v20, %v6200_v61  ;;  %v4822_v61 = vand.u32 2147483647, %v10284_v21  ;;  %vm4803_vm11 = vweird.f32 %v10278_v3 }
 0x759   : > { %v4815_v30 = vsub.f32 1.0, %v4814_v8  ;;  %vm6227_vm15 = vweird.f32 %v10179_v52  ;;  %vm4818_vm4 = vweird.f32 %v10284_v21 }
 0x75c   : > { %v10397_v7 = vpop.eup %7736 }
 0x75d   : > { %v10400_v12 = vpop.xlane.xlu1 %5597  ;;  %v5846_v10 = vpop.f32.mrf.mxu0  ;;  %v6058_v24 = vmul.f32 %v10397_v7, %v10336_v38  ;;  %vm6063_vm6 = vweird.f32 %v10397_v7 }
 0x75e   : > { %v10403_v5 = vpop.eup %7738  ;;  %7742 = vrcp.f32 %v10400_v12  ;;  %7222 = vmatmul.msk.f32.gmra.mxu1 %vm901_vm1, %v4782_v42  ;;  %v6176_v26 = vmul.f32 %v6175_v41, %v5846_v10  ;;  %v6068_v10 = vand.u32 2147483648, %v10336_v38  ;;  %v4824_v41 = vand.u32 2147483648, %v10284_v21  ;;  %vm6064_vm8 = vmor %vm6062_vm7, %vm6063_vm6 }
 0x75f   : > { %v6059_v37 = vsub.f32 1.0, %v6058_v24  ;;  %v10439_v58 = vpop.eup %7740  ;;  %v4799_v15 = vmul.f32 %v10403_v5, %v10278_v3  ;;  %v6066_v24 = vand.u32 2147483647, %v10336_v38  ;;  %vm4804_vm13 = vweird.f32 %v10403_v5 }
 0x760   : > { %7286 = vmatmul.msk.f32.gmra.mxu2 %vm901_vm1, %v6176_v26  ;;  %v4829_v26 = vmul.f32 %v10439_v58, %v10360_v62  ;;  %v6069_v46 = vor.u32 1.1754944e-38, %v6068_v10  ;;  %v10530_v2 = vor.u32 1.1754944e-38, %v4824_v41  ;;  %v4810_v41 = vor.u32 1.1754944e-38, %v4809_v27  ;;  %vm10607_vm5 = vmor %vm4803_vm11, %vm4804_vm13 }
 0x761   : > { %v6060_v22 = vmul.f32 %v10397_v7, %v6059_v37  ;;  %v10487_v37 = vpop.xlane.xlu0 %4236  ;;  %v4800_v44 = vsub.f32 1.0, %v4799_v15  ;;  %vm6067_vm9 = vcmp.eq.f32.partialorder %v6066_v24, 8.507059e+37  ;;  %v4839_v15 = vand.u32 2147483648, %v10360_v62 }
 0x762   : > { %7744 = vrcp.f32 %v10487_v37  ;;  %v4816_v24 = vmul.f32 %v10387_v28, %v4815_v30  ;;  %v4830_v39 = vsub.f32 1.0, %v4829_v26  ;;  %v6206_v30 = vmul.f32 %v6205_v13, %v10429_v53 }
 0x763   : > { %v6061_v57 = vadd.f32 %v10397_v7, %v6060_v22  ;;  %v10508_v22 = vld [vmem:[%s10133_s13 + $0x8] sm:$0xff]  ;;  %v4801_v25 = vmul.f32 %v10403_v5, %v4800_v44  ;;  %v4854_v44 = vand.u32 2147483648, %v10487_v37  ;;  %vm6077_vm3 = vweird.f32 %v10400_v12 }
 0x764   : > { %v10494_v55 = vpop.eup %7742  ;;  %v10549_v42 = vadd.f32 %v10387_v28, %v4816_v24  ;;  %v6081_v24 = vand.u32 2147483647, %v10400_v12  ;;  %v6231_v53 = vand.u32 2147483647, %v10179_v52  ;;  %vm4834_vm11 = vweird.f32 %v10439_v58 }
 0x765   : > { %v10501_v8 = vpop.xlane.xlu1 %5600  ;;  %v6065_v47 = vsel %vm6064_vm8, %v10397_v7, %v6061_v57  ;;  %v6073_v38 = vmul.f32 %v10494_v55, %v10400_v12  ;;  %v11747_v7 = vand.u32 2147483647, %v10136_v59  ;;  %v6191_v57 = vmul.f32 %v6190_v0, %v5872_v32 }
 0x766   : > { %v6070_v10 = vsel %vm6067_vm9, %v6069_v46, %v6065_v47  ;;  %7746 = vrcp.f32 %v10501_v8  ;;  %7223 = vmatmul.msk.f32.gmra.mxu1 %vm901_vm1, %v10307_v11  ;;  %v565_v47 = vrot.slane %v10508_v22, 1  ;;  %v5976_v11 = vpop.f32.mrf.mxu3  ;;  %vm6078_vm6 = vweird.f32 %v10494_v55 }
 0x767   : > { %vm10517_vm10 = vcmp.eq.f32.partialorder %v11747_v7, 8.507059e+37  ;;  %v6071_v20 = vmul.f32 %v6070_v10, %v10149_v36  ;;  %v6074_v46 = vsub.f32 1.0, %v6073_v38  ;;  %v10528_v7 = vpop.f32.mrf.mxu1  ;;  %v6250_v36 = vsel %vm10458_vm2, %v10365_v18, %v6245_v50 }
 0x768   : > { %7287 = vmatmul.msk.f32.gmra.mxu2 %vm901_vm1, %v6191_v57  ;;  %v10546_v38 = vpop.eup %7744  ;;  %v4831_v18 = vmul.f32 %v10439_v58, %v4830_v39  ;;  %v10553_v50 = vor.u32 1.1754944e-38, %v4839_v15  ;;  %v10565_v27 = vmul.f32 %v6250_v36, %v5976_v11  ;;  %v6215_v39 = vsel %vm10559_vm14, %v10210_v16, %v10315_v43 }
 0x769   : > { %7279 = vmatmul.msk.f32.vlgmr.msrb.gmra.mxu0 %vm901_vm1, %v6071_v20  ;;  %v6075_v32 = vmul.f32 %v10494_v55, %v6074_v46  ;;  %v10568_v13 = vpop.xlane.xlu0 %4239  ;;  %v661_v59 = vperm.slane %v565_v47, 0  ;;  %v4802_v10 = vadd.f32 %v10403_v5, %v4801_v25  ;;  %v6083_v57 = vand.u32 2147483648, %v10400_v12 }
 0x76a   : > { %vm4819_vm2 = vweird.f32 %v10387_v28  ;;  %v4844_v46 = vmul.f32 %v10546_v38, %v10487_v37  ;;  %v10586_v43 = vor.u32 1.1754944e-38, %v4854_v44  ;;  %v10590_v25 = vadd.f32 %v10439_v58, %v4831_v18 }
 0x76b   : > { %705 = vperm.xlu1 %7503, %v661_v59   ;;  %v6220_v47 = vsel %vm10517_vm10, %v10317_v56, %v6215_v39  ;;  %v11754_v11 = vsub.f32 1.0, %v10296_v31  ;;  %v6076_v44 = vadd.f32 %v10494_v55, %v6075_v32  ;;  %vm10611_vm7 = vcmp.eq.f32.partialorder %v6081_v24, 8.507059e+37  ;;  %vm10633_vm10 = vmor %vm6077_vm3, %vm6078_vm6 }
 0x76c   : > { %v10563_v29 = vpop.eup %7746  ;;  %v6084_v56 = vor.u32 1.1754944e-38, %v6083_v57  ;;  %vm6228_vm8 = vweird.f32 %v10267_v48  ;;  %vm10618_vm9 = vcmp.eq.f32.partialorder %v4822_v61, 8.507059e+37  ;;  %v4845_v3 = vsub.f32 1.0, %v4844_v46 }
 0x76d   : > { %v10574_v15 = vpop.xlane.xlu1 %5603  ;;  %v6088_v20 = vmul.f32 %v10563_v29, %v10501_v8  ;;  %v6225_v36 = vmul.f32 %v10267_v48, %v11754_v11  ;;  %v6096_v39 = vand.u32 2147483647, %v10501_v8  ;;  %v4806_v59 = vsel %vm10607_vm5, %v10403_v5, %v4802_v10  ;;  %v5924_v11 = vpop.f32.mrf.mxu0  ;;  %vm10675_vm6 = vmor %vm6227_vm15, %vm6228_vm8 }
 0x76e   : > { %7748 = vrcp.f32 %v10574_v15  ;;  %v558_v24 = vrot.slane %v10139_v9, 1  ;;  %v4811_v5 = vsel %vm10540_vm12, %v4810_v41, %v4806_v59  ;;  %v652_v10 = vperm.slane %v10139_v9, 0 }
 0x76f   : > { %7750 = vrcp.f32 %v10568_v13  ;;  %v6089_v18 = vsub.f32 1.0, %v6088_v20  ;;  %v10627_v57 = vpop.f32.mrf.mxu1  ;;  %v6233_v20 = vand.u32 2147483648, %v10179_v52  ;;  %v4812_v16 = vmul.f32 %v4811_v5, %v11763_v4 }
 0x770   : > { %7288 = vmatmul.msk.f32.gmra.mxu2 %vm901_vm1, %v6206_v30  ;;  %v10638_v30 = vadd.f32 %v10267_v48, %v6225_v36  ;;  %v653_v17 = vperm.slane %v558_v24, 0  ;;  %v6080_v36 = vsel %vm10633_vm10, %v10494_v55, %v6076_v44  ;;  %v6098_v41 = vand.u32 2147483648, %v10501_v8  ;;  %669 = vperm.xlu2 %7501, %v652_v10  }
 0x771   : > { %v6090_v12 = vmul.f32 %v10563_v29, %v6089_v18  ;;  %vm10656_vm12 = vcmp.eq.f32.partialorder %v6231_v53, 8.507059e+37  ;;  %vm4833_vm13 = vweird.f32 %v10360_v62  ;;  %v4846_v55 = vmul.f32 %v10546_v38, %v4845_v3  ;;  %v10679_v24 = vpop.xlane.xlu0 %4242  ;;  %7224 = vmatmul.msk.f32.gmra.mxu1 %vm901_vm1, %v4812_v16 }
 0x772   : > { %vm6092_vm14 = vweird.f32 %v10501_v8  ;;  %vm10667_vm3 = vcmp.eq.f32.partialorder %v6096_v39, 8.507059e+37  ;;  %673 = vperm.xlu0 %7502, %v653_v17   ;;  %v6085_v3 = vsel %vm10611_vm7, %v6084_v56, %v6080_v36  ;;  %v6221_v39 = vmul.f32 %v6220_v47, %v5924_v11  ;;  %vm10702_vm7 = vmor %vm4818_vm4, %vm4819_vm2 }
 0x773   : > { %v6230_v61 = vsel %vm10675_vm6, %v10267_v48, %v10638_v30  ;;  %v6086_v52 = vmul.f32 %v6085_v3, %v10280_v54  ;;  %v11770_v4 = vand.u32 2147483647, %v10360_v62  ;;  %v6091_v17 = vadd.f32 %v10563_v29, %v6090_v12 }
 0x774   : > { %v10644_v46 = vpop.eup %7748  ;;  %vm6093_vm5 = vweird.f32 %v10563_v29  ;;  %v6234_v16 = vor.u32 1.1754944e-38, %v6233_v20  ;;  %v6099_v47 = vor.u32 1.1754944e-38, %v6098_v41  ;;  %v568_v56 = vrot.slane %v10508_v22, 4 }
 0x775   : > { %v10652_v0 = vpop.xlane.xlu1 %5606  ;;  %v6103_v18 = vmul.f32 %v10644_v46, %v10574_v15  ;;  %v10662_v5 = vpop.eup %7750  ;;  %vm10691_vm15 = vcmp.eq.f32.partialorder %v11770_v4, 8.507059e+37  ;;  %7280 = vmatmul.msk.f32.gmra.mxu0 %vm901_vm1, %v6086_v52  ;;  %vm4849_vm8 = vweird.f32 %v10546_v38  ;;  %v4821_v21 = vsel %vm10702_vm7, %v10387_v28, %v10549_v42  ;;  %vm6094_vm2 = vmor %vm6092_vm14, %vm6093_vm5  ;;  %v11775_v42 = vld [vmem:[#allocation14_spill] sm:$0xff] }
 0x776   : > { %7752 = vrcp.f32 %v10652_v0  ;;  %v4859_v54 = vmul.f32 %v10662_v5, %v10568_v13  ;;  %v660_v30 = vperm.slane %v10508_v22, 0  ;;  %v560_v20 = vrot.slane %v10139_v9, 3  ;;  %v5950_v28 = vpop.f32.mrf.mxu2  ;;  %v6002_v62 = vpop.f32.mrf.mxu0 }
 0x777   : > { %v6104_v10 = vsub.f32 1.0, %v6103_v18  ;;  %7754 = vrcp.f32 %v10679_v24  ;;  %v6111_v12 = vand.u32 2147483647, %v10574_v15  ;;  %v6113_v11 = vand.u32 2147483648, %v10574_v15  ;;  %v10742_v52 = vpop.f32.mrf.mxu1 }
 0x778   : > { %7289 = vmatmul.msk.f32.gmra.mxu2 %vm901_vm1, %v6221_v39  ;;  %v664_v36 = vperm.slane %v568_v56, 0  ;;  %v4826_v41 = vsel %vm10618_vm9, %v10530_v2, %v4821_v21  ;;  %vm4848_vm4 = vweird.f32 %v10487_v37  ;;  %vm6108_vm10 = vweird.f32 %v10644_v46  ;;  %vm10755_vm9 = vmor %vm4833_vm13, %vm4834_vm11 }
 0x779   : > { %v6105_v31 = vmul.f32 %v10644_v46, %v6104_v10  ;;  %v4827_v18 = vmul.f32 %v4826_v41, %v11775_v42  ;;  %v655_v53 = vperm.slane %v560_v20, 0  ;;  %v6095_v8 = vsel %vm6094_vm2, %v10563_v29, %v6091_v17  ;;  %vm10812_vm7 = vmor %vm4848_vm4, %vm4849_vm8 }
 0x77a   : > { %717 = vperm.xlu1 %7503, %v664_v36   ;;  %v6100_v10 = vsel %vm10667_vm3, %v6099_v47, %v6095_v8  ;;  %v571_v2 = vrot.slane %v10508_v22, 7  ;;  %v4860_v4 = vsub.f32 1.0, %v4859_v54  ;;  %v6235_v29 = vsel %vm10656_vm12, %v6234_v16, %v6230_v61  ;;  %701 = vperm.xlu0 %7502, %v660_v30   ;;  %v10779_v54 = vpop.xlane.xlu0 %4245 }
 0x77b   : > { %v6106_v39 = vadd.f32 %v10644_v46, %v6105_v31  ;;  %v11776_v17 = vsub.f32 1.0, %v10443_v19  ;;  %7225 = vmatmul.msk.f32.gmra.mxu1 %vm901_vm1, %v4827_v18  ;;  %v6101_v44 = vmul.f32 %v6100_v10, %v10328_v34  ;;  %v10760_v59 = vadd.f32 %v10546_v38, %v4846_v55  ;;  %681 = vperm.xlu2 %7501, %v655_v53  }
 0x77c   : > { %v10740_v32 = vpop.eup %7752  ;;  %v6236_v61 = vmul.f32 %v6235_v29, %v5950_v28  ;;  %vm6107_vm12 = vweird.f32 %v10574_v15  ;;  %v11779_v34 = vand.u32 2147483647, %v10487_v37  ;;  %vm6112_vm13 = vcmp.eq.f32.partialorder %v6111_v12, 8.507059e+37  ;;  %v11784_v28 = vld [vmem:[#allocation23_spill] sm:$0xff] }
 0x77d   : > { %v10733_v3 = vpop.xlane.xlu1 %5609  ;;  %v6255_v48 = vmul.f32 %v10375_v63, %v11776_v17  ;;  %v6118_v19 = vmul.f32 %v10740_v32, %v10652_v0  ;;  %v10765_v16 = vpop.eup %7754  ;;  %vm10775_vm11 = vmor %vm6107_vm12, %vm6108_vm10  ;;  %v6114_v15 = vor.u32 1.1754944e-38, %v6113_v11  ;;  %v4836_v31 = vsel %vm10755_vm9, %v10439_v58, %v10590_v25  ;;  %7281 = vmatmul.msk.f32.gmra.mxu0 %vm901_vm1, %v6101_v44 }
 0x77e   : > { %7756 = vrcp.f32 %v10733_v3  ;;  %vm10769_vm14 = vcmp.eq.f32.partialorder %v11779_v34, 8.507059e+37  ;;  %v562_v56 = vrot.slane %v10139_v9, 5  ;;  %v667_v30 = vperm.slane %v571_v2, 0 }
 0x77f   : > { %v6119_v21 = vsub.f32 1.0, %v6118_v19  ;;  %v4841_v20 = vsel %vm10691_vm15, %v10553_v50, %v4836_v31  ;;  %v6110_v12 = vsel %vm10775_vm11, %v10644_v46, %v6106_v39  ;;  %v4861_v11 = vmul.f32 %v10662_v5, %v4860_v4  ;;  %v10839_v44 = vpop.f32.mrf.mxu1 }
 0x780   : > { %7290 = vmatmul.msk.f32.gmra.mxu2 %vm901_vm1, %v6236_v61  ;;  %v6256_v58 = vadd.f32 %v10375_v63, %v6255_v48  ;;  %vm6258_vm3 = vweird.f32 %v10375_v63  ;;  %v6115_v25 = vsel %vm6112_vm13, %v6114_v15, %v6110_v12  ;;  %7758 = vrcp.f32 %v10779_v54 }
 0x781   : > { %v6120_v26 = vmul.f32 %v10740_v32, %v6119_v21  ;;  %vm6123_vm6 = vweird.f32 %v10740_v32  ;;  %v657_v50 = vperm.slane %v562_v56, 0  ;;  %vm4863_vm15 = vweird.f32 %v10568_v13 }
 0x782   : > { %vm6122_vm5 = vweird.f32 %v10652_v0  ;;  %v6128_v46 = vand.u32 2147483648, %v10652_v0  ;;  %v4842_v42 = vmul.f32 %v4841_v20, %v11784_v28  ;;  %v6126_v8 = vand.u32 2147483647, %v10652_v0  ;;  %729 = vperm.xlu1 %7503, %v667_v30   ;;  %v11791_v30 = vld [vmem:[#allocation36_spill] sm:$0xff] }
 0x783   : > { %v6121_v53 = vadd.f32 %v10740_v32, %v6120_v26  ;;  %v6116_v39 = vmul.f32 %v6115_v25, %v10189_v45  ;;  %v567_v10 = vrot.slane %v10508_v22, 3  ;;  %v4874_v2 = vmul.f32 %v10765_v16, %v10679_v24  ;;  %vm10825_vm8 = vmor %vm6122_vm5, %vm6123_vm6  ;;  %689 = vperm.xlu2 %7501, %v657_v50  }
 0x784   : > { %v10797_v36 = vpop.eup %7756  ;;  %vm6257_vm2 = vweird.f32 %v10310_v33  ;;  %7226 = vmatmul.msk.f32.gmra.mxu1 %vm901_vm1, %v4842_v42  ;;  %v4851_v45 = vsel %vm10812_vm7, %v10546_v38, %v10760_v59  ;;  %v6263_v0 = vand.u32 2147483648, %v10310_v33  ;;  %v564_v29 = vrot.slane %v10139_v9, 7 }
 0x785   : > { %v6133_v41 = vmul.f32 %v10797_v36, %v10733_v3  ;;  %v6125_v17 = vsel %vm10825_vm8, %v10740_v32, %v6121_v53  ;;  %v663_v48 = vperm.slane %v567_v10, 0  ;;  %vm4864_vm4 = vweird.f32 %v10662_v5  ;;  %vm10844_vm10 = vmor %vm6257_vm2, %vm6258_vm3  ;;  %7282 = vmatmul.msk.f32.gmra.mxu0 %vm901_vm1, %v6116_v39 }
 0x786   : > { %v6261_v38 = vand.u32 2147483647, %v10310_v33  ;;  %v6129_v59 = vor.u32 1.1754944e-38, %v6128_v46  ;;  %v10850_v61 = vpop.eup %7758  ;;  %v4862_v32 = vadd.f32 %v10662_v5, %v4861_v11  ;;  %v6260_v19 = vsel %vm10844_vm10, %v10375_v63, %v6256_v58  ;;  %vm10875_vm11 = vmor %vm4863_vm15, %vm4864_vm4 }
 0x787   : > { %v6134_v4 = vsub.f32 1.0, %v6133_v41  ;;  %vm6127_vm9 = vcmp.eq.f32.partialorder %v6126_v8, 8.507059e+37  ;;  %v4856_v34 = vsel %vm10769_vm14, %v10586_v43, %v4851_v45  ;;  %v4875_v55 = vsub.f32 1.0, %v4874_v2  ;;  %713 = vperm.xlu0 %7502, %v663_v48   ;;  %v10905_v2 = vpop.f32.mrf.mxu1  ;;  %v11797_v48 = vld [vmem:[#allocation40_spill] sm:$0xff] }
 0x788   : > { %7291 = vmatmul.msk.f32.gmra.mxu2 %vm901_vm1, %v10565_v27  ;;  %v6130_v15 = vsel %vm6127_vm9, %v6129_v59, %v6125_v17  ;;  %v570_v31 = vrot.slane %v10508_v22, 6  ;;  %v6264_v63 = vor.u32 1.1754944e-38, %v6263_v0  ;;  %vm6138_vm12 = vweird.f32 %v10797_v36 }
 0x789   : > { %v6135_v9 = vmul.f32 %v10797_v36, %v6134_v4  ;;  %v659_v21 = vperm.slane %v564_v29, 0  ;;  %v4867_v43 = vand.u32 2147483647, %v10568_v13  ;;  %vm6262_vm14 = vcmp.eq.f32.partialorder %v6261_v38, 8.507059e+37 }
 0x78a   : > { %v10862_v33 = vpop.xlane.xlu2 %5636  ;;  %v6143_v27 = vand.u32 2147483648, %v10733_v3  ;;  %v4857_v20 = vmul.f32 %v4856_v34, %v11791_v30  ;;  %v6265_v11 = vsel %vm6262_vm14, %v6264_v63, %v6260_v19  ;;  %vm6137_vm13 = vweird.f32 %v10733_v3 }
 0x78b   : > { %7760 = vrcp.f32 %v10862_v33  ;;  %v6136_v56 = vadd.f32 %v10797_v36, %v6135_v9  ;;  %v6141_v58 = vand.u32 2147483647, %v10733_v3  ;;  %v6131_v25 = vmul.f32 %v6130_v15, %v10339_v60  ;;  %vm10885_vm3 = vmor %vm6137_vm13, %vm6138_vm12  ;;  %697 = vperm.xlu2 %7501, %v659_v21  }
 0x78c   : > { %v4876_v26 = vmul.f32 %v10765_v16, %v4875_v55  ;;  %v4889_v50 = vmul.f32 %v10850_v61, %v10779_v54  ;;  %7227 = vmatmul.msk.f32.gmra.mxu1 %vm901_vm1, %v4857_v20  ;;  %v4866_v41 = vsel %vm10875_vm11, %v10662_v5, %v4862_v32  ;;  %v666_v28 = vperm.slane %v570_v31, 0 }
 0x78d   : > { %v11796_v3 = vand.u32 2147483648, %v10568_v13  ;;  %v6266_v60 = vmul.f32 %v6265_v11, %v6002_v62  ;;  %v6140_v18 = vsel %vm10885_vm3, %v10797_v36, %v6136_v56  ;;  %v566_v53 = vrot.slane %v10508_v22, 2  ;;  %7283 = vmatmul.msk.f32.gmra.mxu0 %vm901_vm1, %v6131_v25  ;;  %v11800_v25 = vld [vmem:[#allocation27_spill] sm:$0xff] }
 0x78e   : > { %vm4868_vm6 = vcmp.eq.f32.partialorder %v4867_v43, 8.507059e+37  ;;  %v6144_v39 = vor.u32 1.1754944e-38, %v6143_v27  ;;  %vm4879_vm15 = vweird.f32 %v10765_v16  ;;  %vm6142_vm5 = vcmp.eq.f32.partialorder %v6141_v58, 8.507059e+37 }
 0x78f   : > { %v4870_v42 = vor.u32 1.1754944e-38, %v11796_v3  ;;  %v4877_v36 = vadd.f32 %v10765_v16, %v4876_v26  ;;  %v4890_v37 = vsub.f32 1.0, %v4889_v50  ;;  %725 = vperm.xlu0 %7502, %v666_v28   ;;  %v4884_v45 = vand.u32 2147483648, %v10679_v24  ;;  %v10933_v62 = vpop.f32.mrf.mxu1 }
 0x790   : > { %7292 = vmatmul.msk.f32.gmra.mxu2 %vm901_vm1, %v6266_v60  ;;  %v6145_v4 = vsel %vm6142_vm5, %v6144_v39, %v6140_v18  ;;  %v662_v29 = vperm.slane %v566_v53, 0  ;;  %vm4878_vm7 = vweird.f32 %v10679_v24  ;;  %v4882_v17 = vand.u32 2147483647, %v10679_v24  ;;  %v6054_v53 = vpop.f32.mrf.mxu3 }
 0x791   : > { %v7761_v8 = vpop.eup %7760  ;;  %v4871_v13 = vsel %vm4868_vm6, %v4870_v42, %v4866_v41  ;;  %v6278_v38 = vand.u32 2147483648, %v10862_v33  ;;  %vm10916_vm2 = vmor %vm4878_vm7, %vm4879_vm15  ;;  %v6146_v9 = vmul.f32 %v6145_v4, %v10413_v6  ;;  %v6276_v19 = vand.u32 2147483647, %v10862_v33 }
 0x792   : > { %v6268_v5 = vmul.f32 %v7761_v8, %v10862_v33  ;;  %v10903_v10 = vpop.xlane.xlu2 %5639  ;;  %v4872_v47 = vmul.f32 %v4871_v13, %v11797_v48  ;;  %vm6273_vm8 = vweird.f32 %v7761_v8  ;;  %v4891_v34 = vmul.f32 %v10850_v61, %v4890_v37  ;;  %v11803_v13 = vld [vmem:[#allocation9_spill] sm:$0xff] }
 0x793   : > { %7762 = vrcp.f32 %v10903_v10  ;;  %v4881_v24 = vsel %vm10916_vm2, %v10765_v16, %v4877_v36  ;;  %v4885_v55 = vor.u32 1.1754944e-38, %v4884_v45  ;;  %709 = vperm.xlu2 %7501, %v662_v29   ;;  %vm6272_vm4 = vweird.f32 %v10862_v33 }
 0x794   : > { %v6269_v0 = vsub.f32 1.0, %v6268_v5  ;;  %7228 = vmatmul.msk.f32.gmra.mxu1 %vm901_vm1, %v4872_v47  ;;  %v569_v31 = vrot.slane %v10508_v22, 5  ;;  %vm4883_vm10 = vcmp.eq.f32.partialorder %v4882_v17, 8.507059e+37  ;;  %vm6274_vm9 = vmor %vm6272_vm4, %vm6273_vm8  ;;  %v6279_v63 = vor.u32 1.1754944e-38, %v6278_v38  ;;  %v544_v17 = vld [vmem:[%s10970_s28 + $0x30] sm:$0xff] }
 0x795   : > { %7284 = vmatmul.msk.f32.gmra.mxu0 %vm901_vm1, %v6146_v9  ;;  %v4886_v21 = vsel %vm4883_vm10, %v4885_v55, %v4881_v24  ;;  %vm6277_vm12 = vcmp.eq.f32.partialorder %v6276_v19, 8.507059e+37  ;;  %v4892_v16 = vadd.f32 %v10850_v61, %v4891_v34  ;;  %vm4894_vm14 = vweird.f32 %v10850_v61  ;;  %v11804_v9 = vld [vmem:[#allocation31_spill] sm:$0xff] }
 0x796   : > { %v6270_v32 = vmul.f32 %v7761_v8, %v6269_v0  ;;  %v4899_v22 = vand.u32 2147483648, %v10779_v54  ;;  %v665_v12 = vperm.slane %v569_v31, 0  ;;  %vm4893_vm11 = vweird.f32 %v10779_v54  ;;  %v10960_v4 = vpop.permute.xlu1 %677 }
 0x797   : > { %v4897_v11 = vand.u32 2147483647, %v10779_v54  ;;  %v6293_v58 = vand.u32 2147483648, %v10903_v10  ;;  %v4887_v26 = vmul.f32 %v4886_v21, %v11800_v25  ;;  %vm10940_vm13 = vmor %vm4893_vm11, %vm4894_vm14  ;;  %v6291_v41 = vand.u32 2147483647, %v10903_v10 }
 0x798   : > { %v6271_v15 = vadd.f32 %v7761_v8, %v6270_v32  ;;  %v4896_v54 = vsel %vm10940_vm13, %v10850_v61, %v4892_v16  ;;  %v4900_v28 = vor.u32 1.1754944e-38, %v4899_v22  ;;  %vm6287_vm6 = vweird.f32 %v10903_v10  ;;  %v538_v16 = vld [vmem:[%s10970_s28] sm:$0xff] }
 0x799   : > { %v7763_v6 = vpop.eup %7762  ;;  %v6028_v33 = vpop.f32.mrf.mxu2  ;;  %vm4898_vm15 = vcmp.eq.f32.partialorder %v4897_v11, 8.507059e+37  ;;  %v6294_v42 = vor.u32 1.1754944e-38, %v6293_v58  ;;  %vm6292_vm7 = vcmp.eq.f32.partialorder %v6291_v41, 8.507059e+37  ;;  %v578_v48 = vand.u32 2147483647, %v544_v17  ;;  %v11805_v11 = vld [vmem:[#allocation18_spill] sm:$0xff] }
 0x79a   : > { %v6283_v56 = vmul.f32 %v7763_v6, %v10903_v10  ;;  %v6275_v43 = vsel %vm6274_vm9, %v7761_v8, %v6271_v15  ;;  %vm6288_vm3 = vweird.f32 %v7763_v6  ;;  %v4901_v60 = vsel %vm4898_vm15, %v4900_v28, %v4896_v54  ;;  %v10981_v15 = vld [vmem:[%s11509_s7] ss:$0 sm:$0xff] }
 0x79b   : > { %v6280_v27 = vsel %vm6277_vm12, %v6279_v63, %v6275_v43  ;;  %721 = vperm.xlu2 %7501, %v665_v12   ;;  %vm6289_vm5 = vmor %vm6287_vm6, %vm6288_vm3  ;;  %v4902_v36 = vmul.f32 %v4901_v60, %v11803_v13  ;;  %vm594_vm2 = vcmp.gt.f32.partialorder %v544_v17, 0.0  ;;  %v7834_v47 = vmov 0.0   ;;  %v545_v13 = vld [vmem:[%s10970_s28 + $0x38] sm:$0xff] }
 0x79c   : > { %v6284_v30 = vsub.f32 1.0, %v6283_v56  ;;  %v6281_v20 = vmul.f32 %v6280_v27, %v6028_v33  ;;  %7229 = vmatmul.msk.f32.gmra.mxu1 %vm901_vm1, %v4887_v26  ;;  %v3610_v32 = vadd.f32 %v11804_v9, %v10236_v14  ;;  %v572_v14 = vand.u32 2147483647, %v538_v16  ;;  %v11806_v9 = vld [vmem:[#allocation28_spill] sm:$0xff] }
 0x79d   : > { %vm604_vm8 = vcmp.lt.f32.partialorder %v538_v16, 0.0  ;;  %vm588_vm4 = vcmp.gt.f32.partialorder %v538_v16, 0.0  ;;  %v3592_v58 = vadd.f32 %v11805_v11, %v10081_v23  ;;  %vm611_vm12 = vcmp.lt.f32.partialorder %v545_v13, 0.0  ;;  %v11809_v11 = vld [vmem:[#allocation4_spill] sm:$0xff] }
 0x79e   : > { %v6285_v46 = vmul.f32 %v7763_v6, %v6284_v30  ;;  %7293 = vmatmul.msk.f32.gmra.mxu2 %vm901_vm1, %v6281_v20  ;;  %v620_v12 = vsel %vm604_vm8, -1.0, %v7834_v47  ;;  %vm595_vm11 = vcmp.gt.f32.partialorder %v545_v13, 0.0 }
 0x79f   : > { %v636_v26 = vsel %vm588_vm4, 1.0, %v620_v12 }
 0x7a0   : > { %v6286_v3 = vadd.f32 %v7763_v6, %v6285_v46 }
 0x7a2   : > { %v6290_v18 = vsel %vm6289_vm5, %v7763_v6, %v6286_v3 }
 0x7a3   : > { %v4969_v8 = vpop.f32.mrf.mxu1  ;;  %v6295_v39 = vsel %vm6292_vm7, %v6294_v42, %v6290_v18  ;;  %v539_v42 = vld [vmem:[%s10970_s28 + $0x8] sm:$0xff] }
 0x7a4   : > { %v6296_v5 = vmul.f32 %v6295_v39, %v6054_v53  ;;  %7230 = vmatmul.msk.f32.gmra.mxu1 %vm901_vm1, %v4902_v36  ;;  %v5017_v46 = vadd.f32 %v4969_v8, %v3592_v58  ;;  %v573_v53 = vand.u32 2147483647, %v539_v42  ;;  %vm605_vm10 = vcmp.lt.f32.partialorder %v539_v42, 0.0 }
 0x7a5   : > { %vm589_vm9 = vcmp.gt.f32.partialorder %v539_v42, 0.0  ;;  %v3601_v58 = vadd.f32 %v11809_v11, %v10111_v1  ;;  %v11812_v42 = vld [vmem:[#allocation29_spill] sm:$0xff]  ;;  %v11813_v1 = vld [vmem:[#allocation35_spill] sm:$0xff] }
 0x7a6   : > { %7294 = vmatmul.msk.f32.gmra.mxu2 %vm901_vm1, %v6296_v5  ;;  %vm610_vm1 = vcmp.lt.f32.partialorder %v544_v17, 0.0  ;;  %v540_v17 = vld [vmem:[%s10970_s28 + $0x10] sm:$0xff] }
 0x7a7   : > { %v626_v38 = vsel %vm610_vm1, -1.0, %v7834_v47  ;;  %vm606_vm14 = vcmp.lt.f32.partialorder %v540_v17, 0.0  ;;  %vm590_vm13 = vcmp.gt.f32.partialorder %v540_v17, 0.0 }
 0x7a8   : > { %v642_v24 = vsel %vm594_vm2, 1.0, %v626_v38  ;;  %v579_v38 = vand.u32 2147483647, %v545_v13  ;;  %v542_v13 = vld [vmem:[%s10970_s28 + $0x20] sm:$0xff] }
 0x7a9   : > { %vm608_vm15 = vcmp.lt.f32.partialorder %v542_v13, 0.0  ;;  %vm592_vm1 = vcmp.gt.f32.partialorder %v542_v13, 0.0 }
 0x7ab   : > { %v10954_v61 = vpop.f32.mrf.mxu1  ;;  %v10964_v0 = vpop.permute.xlu1 %685 }
 0x7b3   : > { %v10956_v10 = vpop.f32.mrf.mxu1 }
 0x7bb   : > { %v10958_v37 = vpop.f32.mrf.mxu1 }
 0x7c1   : > { %v694_v59 = vpop.permute.xlu1 %693 }
 0x7c2   : > { %v738_v19 = vsub.f32 %v578_v48, %v694_v59  ;;  %v621_v48 = vsel %vm605_vm10, -1.0, %v7834_v47 }
 0x7c3   : > { %v10962_v45 = vpop.f32.mrf.mxu1 }
 0x7c4   : > { %v754_v31 = vmax.f32 %v738_v19, 0.0 }
 0x7c6   : > { %v770_v21 = vmul.f32 %v754_v31, %v642_v24  ;;  %v574_v24 = vand.u32 2147483647, %v540_v17  ;;  %v11817_v17 = vld [vmem:[#allocation12_spill] sm:$0xff] }
 0x7ca   : > { %v670_v6 = vpop.permute.xlu2 %669 }
 0x7cb   : > { %v10972_v29 = vpop.f32.mrf.mxu1  ;;  %v6381_v63 = vpop.f32.mrf.mxu2  ;;  %v732_v30 = vsub.f32 %v572_v14, %v670_v6  ;;  %v11807_v6 = vld [vmem:[#allocation39_spill] sm:$0xff] }
 0x7cd   : > { %v748_v25 = vmax.f32 %v732_v30, 0.0  ;;  %v627_v30 = vsel %vm611_vm12, -1.0, %v7834_v47 }
 0x7cf   : > { %v764_v54 = vmul.f32 %v748_v25, %v636_v26  ;;  %v547_v25 = vld [vmem:[%s10970_s28 + $0x48] sm:$0xff]  ;;  %v11810_v26 = vld [vmem:[#allocation21_spill] sm:$0xff] }
 0x7d0   : > { %vm613_vm6 = vcmp.lt.f32.partialorder %v547_v25, 0.0  ;;  %vm597_vm7 = vcmp.gt.f32.partialorder %v547_v25, 0.0 }
 0x7d3   : > { %v4987_v34 = vpop.f32.mrf.mxu1 }
 0x7d4   : > { %v5023_v55 = vadd.f32 %v4987_v34, %v3610_v32  ;;  %v3595_v32 = vadd.f32 %v11806_v9, %v10088_v40 }
 0x7d5   : > { %v10989_v22 = vpop.permute.xlu2 %681 }
 0x7d6   : > { %v6417_v56 = vadd.f32 %v6381_v63, %v5023_v55  ;;  %v637_v55 = vsel %vm589_vm9, 1.0, %v621_v48  ;;  %v3613_v63 = vadd.f32 %v11807_v6, %v10301_v35  ;;  %v622_v35 = vsel %vm606_vm14, -1.0, %v7834_v47 }
 0x7d7   : > { %v11041_v48 = vadd.f32 %v11817_v17, %v10528_v7 }
 0x7d8   : > { %v6437_v43 = vadd.f32 %v10981_v15, %v6417_v56  ;;  %v5018_v56 = vadd.f32 %v10954_v61, %v3595_v32  ;;  %v734_v61 = vsub.f32 %v574_v24, %v10960_v4  ;;  %v11815_v4 = vld [vmem:[#allocation47_spill] sm:$0xff] }
 0x7da   : > { %v10985_v33 = vadd.f32 %v6437_v43, %v770_v21  ;;  %v11808_v43 = vld [vmem:[#allocation37_spill] sm:$0xff] }
 0x7db   : > { %v4990_v20 = vpop.f32.mrf.mxu1  ;;  %v3598_v16 = vadd.f32 %v11808_v43, %v10097_v51  ;;  %v541_v51 = vld [vmem:[%s10970_s28 + $0x18] sm:$0xff] }
 0x7dc   : > { %v6481_v27 = vsel %vm784_vm0, %v10985_v33, 0.0  ;;  %v5024_v14 = vadd.f32 %v4990_v20, %v3613_v63  ;;  %v575_v24 = vand.u32 2147483647, %v541_v51  ;;  %vm607_vm3 = vcmp.lt.f32.partialorder %v541_v51, 0.0 }
 0x7dd   : > { %6482 = vadd.xlane.f32.xlu1 %v6481_v27  ;;  %v10994_v3 = vpop.permute.xlu2 %689  ;;  %v5019_v32 = vadd.f32 %v10956_v10, %v3598_v16  ;;  %v706_v6 = vpop.permute.xlu1 %705  ;;  %v11819_v10 = vld [vmem:[#allocation26_spill] sm:$0xff]  ;;  %vm591_vm5 = vcmp.gt.f32.partialorder %v541_v51, 0.0 }
 0x7de   : > { %v11060_v16 = vadd.f32 %v11819_v10, %v10742_v52  ;;  %v548_v10 = vld [vmem:[%s10970_s28 + $0x50] sm:$0xff] }
 0x7df   : > { %vm614_vm14 = vcmp.lt.f32.partialorder %v548_v10, 0.0 }
 0x7e3   : > { %v6384_v50 = vpop.f32.mrf.mxu2  ;;  %v10997_v60 = vpop.f32.mrf.mxu1 }
 0x7e4   : > { %v674_v8 = vpop.permute.xlu0 %673  ;;  %v6418_v20 = vadd.f32 %v6384_v50, %v5024_v14  ;;  %v638_v50 = vsel %vm590_vm13, 1.0, %v622_v35 }
 0x7e5   : > { %v733_v36 = vsub.f32 %v573_v53, %v674_v8  ;;  %v698_v59 = vpop.permute.xlu2 %697  ;;  %v11814_v53 = vld [vmem:[#allocation22_spill] sm:$0xff]  ;;  %v11816_v8 = vld [vmem:[#allocation11_spill] sm:$0xff] }
 0x7e6   : > { %v6363_v41 = vpop.f32.mrf.mxu0  ;;  %v739_v21 = vsub.f32 %v579_v38, %v698_v59  ;;  %v581_v38 = vand.u32 2147483647, %v547_v25  ;;  %v6438_v7 = vadd.f32 %v10981_v15, %v6418_v20 }
 0x7e7   : > { %v6411_v28 = vadd.f32 %v6363_v41, %v5017_v46  ;;  %v749_v19 = vmax.f32 %v733_v36, 0.0  ;;  %v11024_v46 = vadd.f32 %v11810_v26, %v10141_v49  ;;  %v3619_v36 = vadd.f32 %v11816_v8, %v11815_v4  ;;  %v550_v26 = vld [vmem:[%s10970_s28 + $0x60] sm:$0xff] }
 0x7e8   : > { %v755_v41 = vmax.f32 %v739_v21, 0.0  ;;  %v643_v49 = vsel %vm595_vm11, 1.0, %v627_v30  ;;  %v11818_v21 = vld [vmem:[#allocation19_spill] sm:$0xff]  ;;  %v741_v30 = vsub.f32 %v581_v38, %v706_v6  ;;  %vm616_vm2 = vcmp.lt.f32.partialorder %v550_v26, 0.0 }
 0x7e9   : > { %v6431_v18 = vadd.f32 %v10981_v15, %v6411_v28  ;;  %v765_v27 = vmul.f32 %v749_v19, %v637_v55  ;;  %v11811_v28 = vld [vmem:[#allocation10_spill] sm:$0xff]  ;;  %v750_v19 = vmax.f32 %v734_v61, 0.0  ;;  %v11056_v43 = vadd.f32 %v11818_v21, %v10627_v57  ;;  %v543_v6 = vld [vmem:[%s10970_s28 + $0x28] sm:$0xff] }
 0x7ea   : > { %v771_v63 = vmul.f32 %v755_v41, %v643_v49  ;;  %v735_v61 = vsub.f32 %v575_v24, %v10989_v22  ;;  %v629_v57 = vsel %vm613_vm6, -1.0, %v7834_v47  ;;  %v5020_v22 = vadd.f32 %v10958_v37, %v3601_v58 }
 0x7eb   : > { %v11000_v39 = vadd.f32 %v6431_v18, %v764_v54  ;;  %v11002_v23 = vpop.f32.mrf.mxu2  ;;  %v11030_v18 = vadd.f32 %v11812_v42, %v11811_v28  ;;  %v766_v35 = vmul.f32 %v750_v19, %v638_v50  ;;  %v576_v28 = vand.u32 2147483647, %v542_v13  ;;  %v11820_v50 = vld [vmem:[#allocation15_spill] sm:$0xff] }
 0x7ec   : > { %v757_v25 = vmax.f32 %v741_v30, 0.0  ;;  %v11088_v38 = vadd.f32 %v11820_v50, %v10839_v44  ;;  %vm600_vm10 = vcmp.gt.f32.partialorder %v550_v26, 0.0  ;;  %vm593_vm9 = vcmp.gt.f32.partialorder %v543_v6, 0.0 }
 0x7ed   : > { %v6463_v5 = vsel %vm784_vm0, %v11000_v39, 0.0  ;;  %v736_v19 = vsub.f32 %v576_v28, %v10964_v0  ;;  %v632_v0 = vsel %vm616_vm2, -1.0, %v7834_v47  ;;  %vm609_vm12 = vcmp.lt.f32.partialorder %v543_v6, 0.0 }
 0x7ee   : > { %6464 = vadd.xlane.f32.xlu2 %v6463_v5  ;;  %v4996_v34 = vpop.f32.mrf.mxu1  ;;  %v11034_v5 = vadd.f32 %v11814_v53, %v11813_v1  ;;  %v702_v1 = vpop.permute.xlu0 %701  ;;  %v645_v53 = vsel %vm597_vm7, 1.0, %v629_v57  ;;  %vm598_vm11 = vcmp.gt.f32.partialorder %v548_v10, 0.0 }
 0x7ef   : > { %v710_v57 = vpop.permute.xlu2 %709 }
 0x7f2   : > { %v6366_v40 = vpop.f32.mrf.mxu0 }
 0x7f3   : > { %v6390_v31 = vpop.f32.mrf.mxu2  ;;  %v6412_v12 = vadd.f32 %v6366_v40, %v5018_v56  ;;  %v546_v40 = vld [vmem:[%s10970_s28 + $0x40] sm:$0xff] }
 0x7f4   : > { %v580_v52 = vand.u32 2147483647, %v546_v40  ;;  %vm612_vm8 = vcmp.lt.f32.partialorder %v546_v40, 0.0  ;;  %vm596_vm4 = vcmp.gt.f32.partialorder %v546_v40, 0.0 }
 0x7f5   : > { %v6432_v54 = vadd.f32 %v10981_v15, %v6412_v12  ;;  %v5026_v12 = vadd.f32 %v4996_v34, %v3619_v36  ;;  %v624_v34 = vsel %vm608_vm15, -1.0, %v7834_v47  ;;  %v584_v36 = vand.u32 2147483647, %v550_v26 }
 0x7f6   : > { %v740_v17 = vsub.f32 %v580_v52, %v702_v1  ;;  %v628_v21 = vsel %vm612_vm8, -1.0, %v7834_v47  ;;  %v5021_v52 = vadd.f32 %v10962_v45, %v11024_v46 }
 0x7f7   : > { %v11045_v9 = vadd.f32 %v6432_v54, %v765_v27  ;;  %v623_v27 = vsel %vm607_vm3, -1.0, %v7834_v47  ;;  %v6420_v41 = vadd.f32 %v6390_v31, %v5026_v12  ;;  %v11069_v54 = vadd.f32 %v6438_v7, %v771_v63 }
 0x7f8   : > { %v11043_v59 = vpop.f32.mrf.mxu1  ;;  %v639_v42 = vsel %vm591_vm5, 1.0, %v623_v27  ;;  %v751_v31 = vmax.f32 %v735_v61, 0.0  ;;  %v773_v63 = vmul.f32 %v757_v25, %v645_v53  ;;  %v5025_v7 = vadd.f32 %v10997_v60, %v11034_v5 }
 0x7f9   : > { %v6466_v56 = vsel %vm784_vm0, %v11045_v9, 0.0  ;;  %v6440_v51 = vadd.f32 %v10981_v15, %v6420_v41  ;;  %v6484_v58 = vsel %vm784_vm0, %v11069_v54, 0.0  ;;  %v756_v27 = vmax.f32 %v740_v17, 0.0 }
 0x7fa   : > { %6467 = vadd.xlane.f32.xlu0 %v6466_v56  ;;  %v6369_v14 = vpop.f32.mrf.mxu0  ;;  %v718_v56 = vpop.permute.xlu1 %717  ;;  %v6419_v30 = vadd.f32 %v11002_v23, %v5025_v7  ;;  %v752_v60 = vmax.f32 %v736_v19, 0.0  ;;  %v577_v5 = vand.u32 2147483647, %v543_v6  ;;  %v582_v61 = vand.u32 2147483647, %v548_v10 }
 0x7fb   : > { %v11048_v55 = vpop.f32.mrf.mxu2  ;;  %v6413_v11 = vadd.f32 %v6369_v14, %v5019_v32  ;;  %v640_v32 = vsel %vm592_vm1, 1.0, %v624_v34  ;;  %v767_v14 = vmul.f32 %v751_v31, %v639_v42  ;;  %v744_v13 = vsub.f32 %v584_v36, %v718_v56 }
 0x7fc   : > { %v648_v23 = vsel %vm600_vm10, 1.0, %v632_v0  ;;  %v6439_v1 = vadd.f32 %v10981_v15, %v6419_v30  ;;  %v625_v53 = vsel %vm609_vm12, -1.0, %v7834_v47  ;;  %v742_v26 = vsub.f32 %v582_v61, %v710_v57 }
 0x7fd   : > { %v6433_v20 = vadd.f32 %v10981_v15, %v6413_v11  ;;  %v11102_v11 = vadd.f32 %v6440_v51, %v773_v63  ;;  %v760_v28 = vmax.f32 %v744_v13, 0.0  ;;  %v5027_v25 = vadd.f32 %v11043_v59, %v11041_v48  ;;  %v722_v13 = vpop.permute.xlu2 %721 }
 0x7fe   : > { %v737_v36 = vsub.f32 %v577_v5, %v10994_v3  ;;  %v630_v17 = vsel %vm614_vm14, -1.0, %v7834_v47  ;;  %v768_v48 = vmul.f32 %v752_v60, %v640_v32  ;;  %v641_v59 = vsel %vm593_vm9, 1.0, %v625_v53 }
 0x7ff   : > { %v11077_v8 = vadd.f32 %v6433_v20, %v766_v35  ;;  %v644_v35 = vsel %vm596_vm4, 1.0, %v628_v21  ;;  %v6490_v46 = vsel %vm784_vm0, %v11102_v11, 0.0  ;;  %v6421_v50 = vadd.f32 %v11048_v55, %v5027_v25 }
 0x800   : > { %v772_v40 = vmul.f32 %v756_v27, %v644_v35  ;;  %v5022_v3 = vadd.f32 %v10972_v29, %v11030_v18  ;;  %v758_v21 = vmax.f32 %v742_v26, 0.0  ;;  %v646_v55 = vsel %vm598_vm11, 1.0, %v630_v17  ;;  %v552_v35 = vld [vmem:[%s10970_s28 + $0x70] sm:$0xff] }
 0x801   : > { %v11075_v4 = vpop.f32.mrf.mxu1  ;;  %v6469_v37 = vsel %vm784_vm0, %v11077_v8, 0.0  ;;  %v753_v6 = vmax.f32 %v737_v36, 0.0  ;;  %v6441_v27 = vadd.f32 %v10981_v15, %v6421_v50  ;;  %vm618_vm5 = vcmp.lt.f32.partialorder %v552_v35, 0.0 }
 0x802   : > { %v6372_v24 = vpop.f32.mrf.mxu0  ;;  %6470 = vadd.xlane.f32.xlu1 %v6469_v37  ;;  %6485 = vadd.xlane.f32.xlu0 %v6484_v58  ;;  %v776_v37 = vmul.f32 %v760_v28, %v648_v23  ;;  %v551_v58 = vld [vmem:[%s10970_s28 + $0x68] sm:$0xff]  ;;  %v11128_v56 = vadd.f32 %v6439_v1, %v772_v40  ;;  %v774_v60 = vmul.f32 %v758_v21, %v646_v55  ;;  %vm602_vm7 = vcmp.gt.f32.partialorder %v552_v35, 0.0 }
 0x803   : > { %v11079_v49 = vpop.f32.mrf.mxu2  ;;  %v6414_v44 = vadd.f32 %v6372_v24, %v5020_v22  ;;  %v549_v22 = vld [vmem:[%s10970_s28 + $0x58] sm:$0xff]  ;;  %v714_v24 = vpop.permute.xlu0 %713  ;;  %vm617_vm3 = vcmp.lt.f32.partialorder %v551_v58, 0.0  ;;  %vm601_vm15 = vcmp.gt.f32.partialorder %v551_v58, 0.0 }
 0x804   : > { %v583_v19 = vand.u32 2147483647, %v549_v22  ;;  %vm615_vm13 = vcmp.lt.f32.partialorder %v549_v22, 0.0  ;;  %vm599_vm6 = vcmp.gt.f32.partialorder %v549_v22, 0.0  ;;  %v633_v5 = vsel %vm617_vm3, -1.0, %v7834_v47 }
 0x805   : > { %v6434_v12 = vadd.f32 %v10981_v15, %v6414_v44  ;;  %v631_v18 = vsel %vm615_vm13, -1.0, %v7834_v47  ;;  %v11151_v1 = vadd.f32 %v6441_v27, %v774_v60  ;;  %v649_v22 = vsel %vm601_vm15, 1.0, %v633_v5 }
 0x806   : > { %v743_v30 = vsub.f32 %v583_v19, %v714_v24 }
 0x807   : > { %v11107_v20 = vadd.f32 %v6434_v12, %v767_v14  ;;  %v585_v14 = vand.u32 2147483647, %v551_v58  ;;  %v6487_v12 = vsel %vm784_vm0, %v11128_v56, 0.0  ;;  %v634_v58 = vsel %vm618_vm5, -1.0, %v7834_v47 }
 0x808   : > { %v759_v40 = vmax.f32 %v743_v30, 0.0 }
 0x809   : > { %v5005_v41 = vpop.f32.mrf.mxu1  ;;  %v6472_v45 = vsel %vm784_vm0, %v11107_v20, 0.0 }
 0x80a   : > { %v5029_v34 = vadd.f32 %v5005_v41, %v11060_v16  ;;  %6473 = vadd.xlane.f32.xlu2 %v6472_v45  ;;  %v6375_v16 = vpop.f32.mrf.mxu0  ;;  %6491 = vadd.xlane.f32.xlu1 %v6490_v46  ;;  %v5028_v41 = vadd.f32 %v11075_v4, %v11056_v43  ;;  %v586_v46 = vand.u32 2147483647, %v552_v35  ;;  %v553_v4 = vld [vmem:[%s10970_s28 + $0x78] sm:$0xff] }
 0x80b   : > { %v6399_v42 = vpop.f32.mrf.mxu2  ;;  %v6415_v51 = vadd.f32 %v6375_v16, %v5021_v52  ;;  %v745_v52 = vsub.f32 %v585_v14, %v722_v13  ;;  %v726_v25 = vpop.permute.xlu0 %725  ;;  %v11821_v16 = vld [vmem:[#allocation16_spill] sm:$0xff]  ;;  %v587_v19 = vand.u32 2147483647, %v553_v4  ;;  %vm619_vm1 = vcmp.lt.f32.partialorder %v553_v4, 0.0  ;;  %v11822_v13 = vld [vmem:[#allocation13_spill] sm:$0xff] }
 0x80c   : > { %v6423_v31 = vadd.f32 %v6399_v42, %v5029_v34  ;;  %v769_v34 = vmul.f32 %v753_v6, %v641_v59  ;;  %v647_v42 = vsel %vm599_vm6, 1.0, %v631_v18  ;;  %v6422_v45 = vadd.f32 %v11079_v49, %v5028_v41 }
 0x80d   : > { %v6435_v7 = vadd.f32 %v10981_v15, %v6415_v51  ;;  %v3634_v43 = vadd.f32 %v11821_v16, %v10905_v2  ;;  %v775_v17 = vmul.f32 %v759_v40, %v647_v42  ;;  %v6493_v49 = vsel %vm784_vm0, %v11151_v1, 0.0 }
 0x80e   : > { %v6443_v63 = vadd.f32 %v10981_v15, %v6423_v31  ;;  %v6442_v51 = vadd.f32 %v10981_v15, %v6422_v45  ;;  %v650_v14 = vsel %vm602_vm7, 1.0, %v634_v58  ;;  %v3637_v27 = vadd.f32 %v11822_v13, %v10933_v62 }
 0x80f   : > { %v11135_v32 = vadd.f32 %v6435_v7, %v768_v48  ;;  %v730_v48 = vpop.permute.xlu1 %729  ;;  %vm603_vm2 = vcmp.gt.f32.partialorder %v553_v4, 0.0 }
 0x810   : > { %v11132_v44 = vadd.f32 %v6443_v63, %v776_v37  ;;  %v746_v37 = vsub.f32 %v586_v46, %v726_v25 }
 0x811   : > { %v5008_v0 = vpop.f32.mrf.mxu1  ;;  %v6475_v10 = vsel %vm784_vm0, %v11135_v32, 0.0 }
 0x812   : > { %v6499_v29 = vsel %vm784_vm0, %v11132_v44, 0.0  ;;  %v6378_v61 = vpop.f32.mrf.mxu0  ;;  %6476 = vadd.xlane.f32.xlu0 %v6475_v10  ;;  %6488 = vadd.xlane.f32.xlu2 %v6487_v12  ;;  %v5030_v23 = vadd.f32 %v5008_v0, %v11088_v38  ;;  %v761_v38 = vmax.f32 %v745_v52, 0.0  ;;  %v762_v7 = vmax.f32 %v746_v37, 0.0 }
 0x813   : > { %v6402_v57 = vpop.f32.mrf.mxu2  ;;  %v6416_v28 = vadd.f32 %v6378_v61, %v5022_v3  ;;  %6500 = vadd.xlane.f32.xlu1 %v6499_v29  ;;  %v11168_v3 = vadd.f32 %v6442_v51, %v775_v17  ;;  %v747_v0 = vsub.f32 %v587_v19, %v730_v48  ;;  %v635_v29 = vsel %vm619_vm1, -1.0, %v7834_v47 }
 0x814   : > { %v6424_v26 = vadd.f32 %v6402_v57, %v5030_v23  ;;  %v777_v24 = vmul.f32 %v761_v38, %v649_v22  ;;  %v778_v18 = vmul.f32 %v762_v7, %v650_v14  ;;  %v651_v61 = vsel %vm603_vm2, 1.0, %v635_v29 }
 0x815   : > { %v6436_v53 = vadd.f32 %v10981_v15, %v6416_v28  ;;  %v6496_v10 = vsel %vm784_vm0, %v11168_v3, 0.0  ;;  %v763_v60 = vmax.f32 %v747_v0, 0.0 }
 0x816   : > { %v6444_v50 = vadd.f32 %v10981_v15, %v6424_v26 }
 0x817   : > { %v11158_v36 = vadd.f32 %v6436_v53, %v769_v34  ;;  %v779_v52 = vmul.f32 %v763_v60, %v651_v61  ;;  %v7835_v34 = vmov 32.0  }
 0x818   : > { %v11170_v21 = vadd.f32 %v6444_v50, %v777_v24  ;;  %7764 = vrcp.f32 %v7835_v34 }
 0x819   : > { %v5011_v31 = vpop.f32.mrf.mxu1  ;;  %v6478_v2 = vsel %vm784_vm0, %v11158_v36, 0.0 }
 0x81a   : > { %6479 = vadd.xlane.f32.xlu2 %v6478_v2  ;;  %6494 = vadd.xlane.f32.xlu0 %v6493_v49  ;;  %v5031_v63 = vadd.f32 %v5011_v31, %v3634_v43  ;;  %v6502_v12 = vsel %vm784_vm0, %v11170_v21, 0.0 }
 0x81e   : > { %v7765_v42 = vpop.eup %7764 }
 0x81f   : > { %v6512_v40 = vmul.f32 32.0, %v7765_v42  ;;  %vm6516_vm8 = vweird.f32 %v7765_v42 }
 0x821   : > { %v6405_v59 = vpop.f32.mrf.mxu2  ;;  %v5014_v30 = vpop.f32.mrf.mxu1  ;;  %v6513_v45 = vsub.f32 1.0, %v6512_v40 }
 0x822   : > { %v6425_v55 = vadd.f32 %v6405_v59, %v5031_v63  ;;  %6497 = vadd.xlane.f32.xlu2 %v6496_v10  ;;  %6503 = vadd.xlane.f32.xlu0 %v6502_v12  ;;  %v5032_v5 = vadd.f32 %v5014_v30, %v3637_v27 }
 0x823   : > { %v6514_v46 = vmul.f32 %v7765_v42, %v6513_v45 }
 0x824   : > { %v6445_v6 = vadd.f32 %v10981_v15, %v6425_v55 }
 0x825   : > { %v6515_v53 = vadd.f32 %v7765_v42, %v6514_v46 }
 0x826   : > { %v11180_v35 = vadd.f32 %v6445_v6, %v778_v18 }
 0x827   : > { %v11189_v26 = vsel %vm6516_vm8, %v7765_v42, %v6515_v53 }
 0x828   : > { %v6505_v47 = vsel %vm784_vm0, %v11180_v35, 0.0 }
 0x829   : > { %v6408_v57 = vpop.f32.mrf.mxu2 }
 0x82a   : > { %v6426_v62 = vadd.f32 %v6408_v57, %v5032_v5  ;;  %6506 = vadd.xlane.f32.xlu2 %v6505_v47 }
 0x82c   : > { %v6446_v41 = vadd.f32 %v10981_v15, %v6426_v62 }
 0x82e   : > { %v11185_v23 = vadd.f32 %v6446_v41, %v779_v52 }
 0x830   : > { %v6508_v28 = vsel %vm784_vm0, %v11185_v23, 0.0 }
 0x831   : > { %6509 = vadd.xlane.f32.xlu1 %v6508_v28 }
 0x850   : > { %v6483_v25 = vpop.xlane.xlu1 %6482 }
 0x851   : > { %v6524_v43 = vmul.f32 %v11189_v26, %v6483_v25 }
 0x853   : > { %v11199_v31 = vsub.f32 %v10985_v33, %v6524_v43 }
 0x855   : > { %v6556_v17 = vmul.f32 %v11199_v31, %v11199_v31 }
 0x857   : > { %v6584_v49 = vsel %vm784_vm0, %v6556_v17, 0.0 }
 0x861   : > { %v6465_v16 = vpop.xlane.xlu2 %6464 }
 0x862   : > { %v6518_v15 = vmul.f32 %v11189_v26, %v6465_v16 }
 0x864   : > { %v11194_v4 = vsub.f32 %v11000_v39, %v6518_v15 }
 0x866   : > { %v6550_v38 = vmul.f32 %v11194_v4, %v11194_v4 }
 0x868   : > { %v6566_v22 = vsel %vm784_vm0, %v6550_v38, 0.0 }
 0x869   : > { %6567 = vadd.xlane.f32.xlu0 %v6566_v22 }
 0x86d   : > { %v6468_v51 = vpop.xlane.xlu0 %6467 }
 0x86e   : > { %v6519_v37 = vmul.f32 %v11189_v26, %v6468_v51 }
 0x870   : > { %v11207_v39 = vsub.f32 %v11045_v9, %v6519_v37 }
 0x871   : > { %6585 = vadd.xlane.f32.xlu0 %v6584_v49 }
 0x872   : > { %v6551_v50 = vmul.f32 %v11207_v39, %v11207_v39 }
 0x874   : > { %v6569_v33 = vsel %vm784_vm0, %v6551_v50, 0.0 }
 0x875   : > { %v6471_v2 = vpop.xlane.xlu1 %6470  ;;  %v6486_v19 = vpop.xlane.xlu0 %6485  ;;  %6570 = vadd.xlane.f32.xlu2 %v6569_v33 }
 0x876   : > { %v6520_v24 = vmul.f32 %v11189_v26, %v6471_v2  ;;  %v6525_v58 = vmul.f32 %v11189_v26, %v6486_v19 }
 0x878   : > { %v11215_v63 = vsub.f32 %v11077_v8, %v6520_v24  ;;  %v11218_v48 = vsub.f32 %v11069_v54, %v6525_v58 }
 0x87a   : > { %v6557_v9 = vmul.f32 %v11218_v48, %v11218_v48  ;;  %v6552_v59 = vmul.f32 %v11215_v63, %v11215_v63 }
 0x87c   : > { %v6587_v7 = vsel %vm784_vm0, %v6557_v9, 0.0  ;;  %v6572_v55 = vsel %vm784_vm0, %v6552_v59, 0.0 }
 0x87d   : > { %v6474_v14 = vpop.xlane.xlu2 %6473  ;;  %v6492_v0 = vpop.xlane.xlu1 %6491  ;;  %6588 = vadd.xlane.f32.xlu2 %v6587_v7  ;;  %6573 = vadd.xlane.f32.xlu1 %v6572_v55 }
 0x87e   : > { %v6521_v8 = vmul.f32 %v11189_v26, %v6474_v14  ;;  %v6527_v54 = vmul.f32 %v11189_v26, %v6492_v0 }
 0x880   : > { %v11228_v6 = vsub.f32 %v11107_v20, %v6521_v8  ;;  %v11234_v27 = vsub.f32 %v11102_v11, %v6527_v54 }
 0x882   : > { %v6553_v13 = vmul.f32 %v11228_v6, %v11228_v6  ;;  %v6559_v11 = vmul.f32 %v11234_v27, %v11234_v27 }
 0x884   : > { %v6575_v30 = vsel %vm784_vm0, %v6553_v13, 0.0 }
 0x885   : > { %v6477_v29 = vpop.xlane.xlu0 %6476  ;;  %v6489_v18 = vpop.xlane.xlu2 %6488  ;;  %6576 = vadd.xlane.f32.xlu0 %v6575_v30 }
 0x886   : > { %v6522_v10 = vmul.f32 %v11189_v26, %v6477_v29  ;;  %v6526_v12 = vmul.f32 %v11189_v26, %v6489_v18  ;;  %v6501_v60 = vpop.xlane.xlu1 %6500 }
 0x887   : > { %v6530_v61 = vmul.f32 %v11189_v26, %v6501_v60 }
 0x888   : > { %v11240_v20 = vsub.f32 %v11135_v32, %v6522_v10  ;;  %v11243_v5 = vsub.f32 %v11128_v56, %v6526_v12  ;;  %v6593_v32 = vsel %vm784_vm0, %v6559_v11, 0.0 }
 0x889   : > { %v11253_v52 = vsub.f32 %v11132_v44, %v6530_v61 }
 0x88a   : > { %v6554_v57 = vmul.f32 %v11240_v20, %v11240_v20  ;;  %v6558_v62 = vmul.f32 %v11243_v5, %v11243_v5 }
 0x88b   : > { %v6562_v45 = vmul.f32 %v11253_v52, %v11253_v52 }
 0x88c   : > { %v6578_v47 = vsel %vm784_vm0, %v6554_v57, 0.0  ;;  %v6590_v56 = vsel %vm784_vm0, %v6558_v62, 0.0  ;;  %v11309_v62 = vld [vmem:[%s11510_s8] ss:$0 sm:$0xff] }
 0x88d   : > { %v6480_v41 = vpop.xlane.xlu2 %6479  ;;  %v6495_v28 = vpop.xlane.xlu0 %6494  ;;  %6594 = vadd.xlane.f32.xlu0 %v6593_v32  ;;  %6579 = vadd.xlane.f32.xlu2 %v6578_v47  ;;  %v6602_v25 = vsel %vm784_vm0, %v6562_v45, 0.0 }
 0x88e   : > { %v6523_v34 = vmul.f32 %v11189_v26, %v6480_v41  ;;  %v6528_v42 = vmul.f32 %v11189_v26, %v6495_v28  ;;  %6591 = vadd.xlane.f32.xlu1 %v6590_v56  ;;  %v11314_v56 = vld [vmem:[%s11511_s9] ss:$0 sm:$0xff] }
 0x890   : > { %v11261_v40 = vsub.f32 %v11158_v36, %v6523_v34  ;;  %v11264_v44 = vsub.f32 %v11151_v1, %v6528_v42 }
 0x892   : > { %v6560_v46 = vmul.f32 %v11264_v44, %v11264_v44  ;;  %v6555_v53 = vmul.f32 %v11261_v40, %v11261_v40 }
 0x894   : > { %v6596_v16 = vsel %vm784_vm0, %v6560_v46, 0.0  ;;  %v6581_v15 = vsel %vm784_vm0, %v6555_v53, 0.0 }
 0x895   : > { %v6498_v36 = vpop.xlane.xlu2 %6497  ;;  %6603 = vadd.xlane.f32.xlu0 %v6602_v25  ;;  %v6504_v43 = vpop.xlane.xlu0 %6503  ;;  %6597 = vadd.xlane.f32.xlu2 %v6596_v16 }
 0x896   : > { %v6529_v1 = vmul.f32 %v11189_v26, %v6498_v36  ;;  %v6531_v38 = vmul.f32 %v11189_v26, %v6504_v43  ;;  %6582 = vadd.xlane.f32.xlu1 %v6581_v15 }
 0x898   : > { %v11278_v22 = vsub.f32 %v11168_v3, %v6529_v1  ;;  %v11281_v17 = vsub.f32 %v11170_v21, %v6531_v38 }
 0x89a   : > { %v6563_v49 = vmul.f32 %v11281_v17, %v11281_v17  ;;  %v6561_v51 = vmul.f32 %v11278_v22, %v11278_v22 }
 0x89c   : > { %v6605_v37 = vsel %vm784_vm0, %v6563_v49, 0.0  ;;  %v6599_v50 = vsel %vm784_vm0, %v6561_v51, 0.0 }
 0x89d   : > { %6606 = vadd.xlane.f32.xlu2 %v6605_v37  ;;  %v6507_v33 = vpop.xlane.xlu2 %6506 }
 0x89e   : > { %6600 = vadd.xlane.f32.xlu1 %v6599_v50  ;;  %v6532_v2 = vmul.f32 %v11189_v26, %v6507_v33 }
 0x8a0   : > { %v11291_v19 = vsub.f32 %v11180_v35, %v6532_v2 }
 0x8a2   : > { %v6564_v24 = vmul.f32 %v11291_v19, %v11291_v19 }
 0x8a4   : > { %v6510_v3 = vpop.xlane.xlu1 %6509  ;;  %v6608_v9 = vsel %vm784_vm0, %v6564_v24, 0.0 }
 0x8a5   : > { %v6533_v21 = vmul.f32 %v11189_v26, %v6510_v3 }
 0x8a6   : > { %6609 = vadd.xlane.f32.xlu1 %v6608_v9 }
 0x8a7   : > { %v11297_v58 = vsub.f32 %v11185_v23, %v6533_v21 }
 0x8a9   : > { %v6565_v59 = vmul.f32 %v11297_v58, %v11297_v58 }
 0x8ab   : > { %v6611_v7 = vsel %vm784_vm0, %v6565_v59, 0.0 }
 0x8ac   : > { %6612 = vadd.xlane.f32.xlu0 %v6611_v7 }
 0x8dc   : > { %v6568_v55 = vpop.xlane.xlu0 %6567 }
 0x8dd   : > { %v6614_v35 = vmul.f32 %v6568_v55, %v11189_v26 }
 0x8df   : > { %v6630_v14 = vadd.f32 1e-05, %v6614_v35 }
 0x8e1   : > { %7766 = vrsqrt.f32 %v6630_v14  ;;  %vm6652_vm10 = vweird.f32 %v6630_v14 }
 0x8e4   : > { %v6586_v0 = vpop.xlane.xlu0 %6585 }
 0x8e5   : > { %v6620_v8 = vmul.f32 %v6586_v0, %v11189_v26 }
 0x8e7   : > { %v7767_v54 = vpop.eup %7766  ;;  %v6636_v23 = vadd.f32 1e-05, %v6620_v8 }
 0x8e8   : > { %v6647_v13 = vmul.f32 %v7767_v54, %v6630_v14  ;;  %v6571_v18 = vpop.xlane.xlu2 %6570  ;;  %vm6653_vm4 = vweird.f32 %v7767_v54 }
 0x8e9   : > { %7768 = vrsqrt.f32 %v6636_v23  ;;  %v6615_v10 = vmul.f32 %v6571_v18, %v11189_v26  ;;  %vm6654_vm9 = vmor %vm6652_vm10, %vm6653_vm4  ;;  %vm6712_vm14 = vweird.f32 %v6636_v23 }
 0x8ea   : > { %v6648_v30 = vmul.f32 %v7767_v54, %v6647_v13 }
 0x8eb   : > { %v6631_v61 = vadd.f32 1e-05, %v6615_v10 }
 0x8ec   : > { %v6649_v29 = vmul.f32 0.5, %v6648_v30 }
 0x8ed   : > { %7770 = vrsqrt.f32 %v6631_v61  ;;  %vm6662_vm3 = vweird.f32 %v6631_v61 }
 0x8ee   : > { %v6650_v12 = vsub.f32 1.5, %v6649_v29 }
 0x8ef   : > { %v7769_v60 = vpop.eup %7768 }
 0x8f0   : > { %v6651_v11 = vmul.f32 %v7767_v54, %v6650_v12  ;;  %v6707_v57 = vmul.f32 %v7769_v60, %v6636_v23  ;;  %v6589_v34 = vpop.xlane.xlu2 %6588  ;;  %v6574_v42 = vpop.xlane.xlu1 %6573  ;;  %vm6713_vm12 = vweird.f32 %v7769_v60 }
 0x8f1   : > { %v6621_v46 = vmul.f32 %v6589_v34, %v11189_v26  ;;  %v6616_v53 = vmul.f32 %v6574_v42, %v11189_v26  ;;  %vm6714_vm11 = vmor %vm6712_vm14, %vm6713_vm12 }
 0x8f2   : > { %v6655_v32 = vsel %vm6654_vm9, %v7767_v54, %v6651_v11  ;;  %v6708_v47 = vmul.f32 %v7769_v60, %v6707_v57 }
 0x8f3   : > { %v6806_v41 = vmul.f32 %v6655_v32, %v11194_v4  ;;  %v7771_v16 = vpop.eup %7770  ;;  %v6637_v15 = vadd.f32 1e-05, %v6621_v46  ;;  %v6632_v36 = vadd.f32 1e-05, %v6616_v53 }
 0x8f4   : > { %v6709_v28 = vmul.f32 0.5, %v6708_v47  ;;  %v6657_v1 = vmul.f32 %v7771_v16, %v6631_v61  ;;  %vm6663_vm13 = vweird.f32 %v7771_v16 }
 0x8f5   : > { %v6826_v45 = vmul.f32 %v11309_v62, %v6806_v41  ;;  %7772 = vrsqrt.f32 %v6637_v15  ;;  %vm6664_vm6 = vmor %vm6662_vm3, %vm6663_vm13  ;;  %vm6722_vm7 = vweird.f32 %v6637_v15  ;;  %vm6672_vm2 = vweird.f32 %v6632_v36 }
 0x8f6   : > { %v6710_v25 = vsub.f32 1.5, %v6709_v28  ;;  %v6658_v49 = vmul.f32 %v7771_v16, %v6657_v1  ;;  %7774 = vrsqrt.f32 %v6632_v36 }
 0x8f7   : > { %v6846_v4 = vadd.f32 %v11314_v56, %v6826_v45 }
 0x8f8   : > { %v6711_v43 = vmul.f32 %v7769_v60, %v6710_v25  ;;  %v6659_v37 = vmul.f32 0.5, %v6658_v49  ;;  %v6577_v50 = vpop.xlane.xlu0 %6576 }
 0x8f9   : > { %6862 = vst.msk [vmem:[%s11324_s21] sm:$0xff] %vm784_vm0, %v6846_v4  ;;  %v6617_v2 = vmul.f32 %v6577_v50, %v11189_v26 }
 0x8fa   : > { %v6715_v38 = vsel %vm6714_vm11, %v7769_v60, %v6711_v43  ;;  %v6660_v3 = vsub.f32 1.5, %v6659_v37 }
 0x8fb   : > { %v6812_v51 = vmul.f32 %v6715_v38, %v11199_v31  ;;  %v7773_v21 = vpop.eup %7772  ;;  %v11333_v9 = vadd.f32 1e-05, %v6617_v2 }
 0x8fc   : > { %v7775_v59 = vpop.eup %7774  ;;  %v6661_v7 = vmul.f32 %v7771_v16, %v6660_v3  ;;  %v6717_v55 = vmul.f32 %v7773_v21, %v6637_v15  ;;  %vm6723_vm15 = vweird.f32 %v7773_v21 }
 0x8fd   : > { %v6832_v33 = vmul.f32 %v11309_v62, %v6812_v51  ;;  %v6667_v31 = vmul.f32 %v7775_v59, %v6632_v36  ;;  %7776 = vrsqrt.f32 %v11333_v9  ;;  %vm6673_vm5 = vweird.f32 %v7775_v59  ;;  %vm6724_vm1 = vmor %vm6722_vm7, %vm6723_vm15 }
 0x8fe   : > { %v6665_v35 = vsel %vm6664_vm6, %v7771_v16, %v6661_v7  ;;  %v6718_v14 = vmul.f32 %v7773_v21, %v6717_v55  ;;  %vm6674_vm8 = vmor %vm6672_vm2, %vm6673_vm5  ;;  %vm6682_vm10 = vweird.f32 %v11333_v9 }
 0x8ff   : > { %v6852_v24 = vadd.f32 %v11314_v56, %v6832_v33  ;;  %v6807_v0 = vmul.f32 %v6665_v35, %v11207_v39  ;;  %v6668_v8 = vmul.f32 %v7775_v59, %v6667_v31 }
 0x900   : > { %v6719_v54 = vmul.f32 0.5, %v6718_v14  ;;  %v6595_v23 = vpop.xlane.xlu0 %6594  ;;  %v6580_v13 = vpop.xlane.xlu2 %6579 }
 0x901   : > { %6868 = vst.msk [vmem:[%s11324_s21 + $0x30] sm:$0xff] %vm784_vm0, %v6852_v24  ;;  %v6827_v30 = vmul.f32 %v11309_v62, %v6807_v0  ;;  %v6669_v29 = vmul.f32 0.5, %v6668_v8  ;;  %v6623_v18 = vmul.f32 %v6595_v23, %v11189_v26  ;;  %v6618_v10 = vmul.f32 %v6580_v13, %v11189_v26  ;;  %v6592_v12 = vpop.xlane.xlu1 %6591 }
 0x902   : > { %v6720_v60 = vsub.f32 1.5, %v6719_v54  ;;  %v6622_v61 = vmul.f32 %v6592_v12, %v11189_v26 }
 0x903   : > { %v7777_v11 = vpop.eup %7776  ;;  %v6847_v39 = vadd.f32 %v11314_v56, %v6827_v30  ;;  %v6670_v57 = vsub.f32 1.5, %v6669_v29  ;;  %v11344_v32 = vadd.f32 1e-05, %v6623_v18  ;;  %v11346_v47 = vadd.f32 1e-05, %v6618_v10 }
 0x904   : > { %v6721_v41 = vmul.f32 %v7773_v21, %v6720_v60  ;;  %v6677_v28 = vmul.f32 %v7777_v11, %v11333_v9  ;;  %v11349_v34 = vadd.f32 1e-05, %v6622_v61  ;;  %vm6683_vm4 = vweird.f32 %v7777_v11 }
 0x905   : > { %6863 = vst.msk [vmem:[%s11324_s21 + $0x8] sm:$0xff] %vm784_vm0, %v6847_v39  ;;  %v6671_v42 = vmul.f32 %v7775_v59, %v6670_v57  ;;  %7778 = vrsqrt.f32 %v11344_v32  ;;  %vm6684_vm9 = vmor %vm6682_vm10, %vm6683_vm4  ;;  %vm6742_vm12 = vweird.f32 %v11344_v32  ;;  %vm6692_vm14 = vweird.f32 %v11346_v47 }
 0x906   : > { %v6725_v45 = vsel %vm6724_vm1, %v7773_v21, %v6721_v41  ;;  %v6678_v46 = vmul.f32 %v7777_v11, %v6677_v28  ;;  %7780 = vrsqrt.f32 %v11346_v47  ;;  %vm6732_vm15 = vweird.f32 %v11349_v34 }
 0x907   : > { %v6813_v53 = vmul.f32 %v6725_v45, %v11218_v48  ;;  %v6675_v25 = vsel %vm6674_vm8, %v7775_v59, %v6671_v42  ;;  %7782 = vrsqrt.f32 %v11349_v34 }
 0x908   : > { %v6808_v16 = vmul.f32 %v6675_v25, %v11215_v63  ;;  %v6679_v4 = vmul.f32 0.5, %v6678_v46  ;;  %v6604_v15 = vpop.xlane.xlu0 %6603  ;;  %v6598_v43 = vpop.xlane.xlu2 %6597 }
 0x909   : > { %v6833_v36 = vmul.f32 %v11309_v62, %v6813_v53  ;;  %v6626_v1 = vmul.f32 %v6604_v15, %v11189_v26  ;;  %v6624_v38 = vmul.f32 %v6598_v43, %v11189_v26  ;;  %v6583_v49 = vpop.xlane.xlu1 %6582 }
 0x90a   : > { %v6828_v51 = vmul.f32 %v11309_v62, %v6808_v16  ;;  %v6680_v37 = vsub.f32 1.5, %v6679_v4  ;;  %v6619_v59 = vmul.f32 %v6583_v49, %v11189_v26 }
 0x90b   : > { %v7779_v48 = vpop.eup %7778  ;;  %v6853_v50 = vadd.f32 %v11314_v56, %v6833_v36  ;;  %v11365_v63 = vadd.f32 1e-05, %v6626_v1  ;;  %v11367_v33 = vadd.f32 1e-05, %v6624_v38 }
 0x90c   : > { %v7781_v2 = vpop.eup %7780  ;;  %v6848_v3 = vadd.f32 %v11314_v56, %v6828_v51  ;;  %v6681_v21 = vmul.f32 %v7777_v11, %v6680_v37  ;;  %v6737_v24 = vmul.f32 %v7779_v48, %v11344_v32  ;;  %v11383_v23 = vadd.f32 1e-05, %v6619_v59 }
 0x90d   : > { %v7783_v7 = vpop.eup %7782  ;;  %6869 = vst.msk [vmem:[%s11324_s21 + $0x38] sm:$0xff] %vm784_vm0, %v6853_v50  ;;  %v6687_v55 = vmul.f32 %v7781_v2, %v11346_v47  ;;  %7784 = vrsqrt.f32 %v11365_v63  ;;  %vm6743_vm11 = vweird.f32 %v7779_v48  ;;  %vm6693_vm13 = vweird.f32 %v7781_v2 }
 0x90e   : > { %6864 = vst.msk [vmem:[%s11324_s21 + $0x10] sm:$0xff] %vm784_vm0, %v6848_v3  ;;  %v6685_v9 = vsel %vm6684_vm9, %v7777_v11, %v6681_v21  ;;  %v6738_v31 = vmul.f32 %v7779_v48, %v6737_v24  ;;  %v6727_v35 = vmul.f32 %v7783_v7, %v11349_v34  ;;  %7786 = vrsqrt.f32 %v11367_v33  ;;  %vm6744_vm6 = vmor %vm6742_vm12, %vm6743_vm11 }
 0x90f   : > { %v6809_v14 = vmul.f32 %v6685_v9, %v11228_v6  ;;  %v6688_v0 = vmul.f32 %v7781_v2, %v6687_v55  ;;  %7788 = vrsqrt.f32 %v11383_v23  ;;  %vm6733_vm3 = vweird.f32 %v7783_v7  ;;  %vm6694_vm5 = vmor %vm6692_vm14, %vm6693_vm13 }
 0x910   : > { %v6739_v8 = vmul.f32 0.5, %v6738_v31  ;;  %v6728_v54 = vmul.f32 %v7783_v7, %v6727_v35  ;;  %v6607_v13 = vpop.xlane.xlu2 %6606  ;;  %vm6734_vm7 = vmor %vm6732_vm15, %vm6733_vm3  ;;  %vm6772_vm1 = vweird.f32 %v11365_v63  ;;  %vm6752_vm10 = vweird.f32 %v11367_v33 }
 0x911   : > { %v6829_v30 = vmul.f32 %v11309_v62, %v6809_v14  ;;  %v6689_v29 = vmul.f32 0.5, %v6688_v0  ;;  %v6627_v18 = vmul.f32 %v6607_v13, %v11189_v26  ;;  %v6601_v6 = vpop.xlane.xlu1 %6600  ;;  %vm6702_vm14 = vweird.f32 %v11383_v23 }
 0x912   : > { %v6740_v10 = vsub.f32 1.5, %v6739_v8  ;;  %v6729_v12 = vmul.f32 0.5, %v6728_v54  ;;  %v6625_v57 = vmul.f32 %v6601_v6, %v11189_v26 }
 0x913   : > { %v11388_v60 = vpop.eup %7784  ;;  %v6849_v61 = vadd.f32 %v11314_v56, %v6829_v30  ;;  %v6690_v11 = vsub.f32 1.5, %v6689_v29  ;;  %v11391_v39 = vadd.f32 1e-05, %v6627_v18 }
 0x914   : > { %v6741_v41 = vmul.f32 %v7779_v48, %v6740_v10  ;;  %v6730_v28 = vsub.f32 1.5, %v6729_v12  ;;  %v6767_v42 = vmul.f32 %v11388_v60, %v11365_v63  ;;  %v11396_v45 = vpop.eup %7786  ;;  %v11405_v53 = vadd.f32 1e-05, %v6625_v57 }
 0x915   : > { %6865 = vst.msk [vmem:[%s11324_s21 + $0x18] sm:$0xff] %vm784_vm0, %v6849_v61  ;;  %v6691_v46 = vmul.f32 %v7781_v2, %v6690_v11  ;;  %7790 = vrsqrt.f32 %v11391_v39  ;;  %v6747_v15 = vmul.f32 %v11396_v45, %v11367_v33  ;;  %v7789_v34 = vpop.eup %7788  ;;  %vm6773_vm2 = vweird.f32 %v11388_v60 }
 0x916   : > { %v6745_v25 = vsel %vm6744_vm6, %v7779_v48, %v6741_v41  ;;  %v6731_v16 = vmul.f32 %v7783_v7, %v6730_v28  ;;  %v6768_v4 = vmul.f32 %v11388_v60, %v6767_v42  ;;  %7792 = vrsqrt.f32 %v11405_v53  ;;  %vm6774_vm4 = vmor %vm6772_vm1, %vm6773_vm2 }
 0x917   : > { %v6815_v32 = vmul.f32 %v6745_v25, %v11234_v27  ;;  %v6695_v43 = vsel %vm6694_vm5, %v7781_v2, %v6691_v46  ;;  %v6748_v38 = vmul.f32 %v11396_v45, %v6747_v15  ;;  %v6697_v27 = vmul.f32 %v7789_v34, %v11383_v23 }
 0x918   : > { %v6810_v36 = vmul.f32 %v6695_v43, %v11240_v20  ;;  %v6735_v47 = vsel %vm6734_vm7, %v7783_v7, %v6731_v16  ;;  %v6769_v1 = vmul.f32 0.5, %v6768_v4  ;;  %vm6753_vm8 = vweird.f32 %v11396_v45 }
 0x919   : > { %v6835_v49 = vmul.f32 %v11309_v62, %v6815_v32  ;;  %v6814_v51 = vmul.f32 %v6735_v47, %v11243_v5  ;;  %v6610_v37 = vpop.xlane.xlu1 %6609  ;;  %v6749_v2 = vmul.f32 0.5, %v6748_v38  ;;  %v6698_v24 = vmul.f32 %v7789_v34, %v6697_v27  ;;  %vm6754_vm9 = vmor %vm6752_vm10, %vm6753_vm8 }
 0x91a   : > { %v6830_v48 = vmul.f32 %v11309_v62, %v6810_v36  ;;  %v6770_v50 = vsub.f32 1.5, %v6769_v1  ;;  %v6628_v5 = vmul.f32 %v6610_v37, %v11189_v26  ;;  %vm6703_vm12 = vweird.f32 %v7789_v34 }
 0x91b   : > { %v7791_v20 = vpop.eup %7790  ;;  %v6855_v3 = vadd.f32 %v11314_v56, %v6835_v49  ;;  %v6834_v21 = vmul.f32 %v11309_v62, %v6814_v51  ;;  %v6750_v55 = vsub.f32 1.5, %v6749_v2  ;;  %v6699_v14 = vmul.f32 0.5, %v6698_v24  ;;  %vm6704_vm11 = vmor %vm6702_vm14, %vm6703_vm12 }
 0x91c   : > { %v6850_v59 = vadd.f32 %v11314_v56, %v6830_v48  ;;  %v6771_v7 = vmul.f32 %v11388_v60, %v6770_v50  ;;  %v6777_v9 = vmul.f32 %v7791_v20, %v11391_v39  ;;  %v7793_v31 = vpop.eup %7792  ;;  %v11439_v0 = vadd.f32 1e-05, %v6628_v5 }
 0x91d   : > { %6871 = vst.msk [vmem:[%s11324_s21 + $0x48] sm:$0xff] %vm784_vm0, %v6855_v3  ;;  %v6854_v35 = vadd.f32 %v11314_v56, %v6834_v21  ;;  %v6751_v54 = vmul.f32 %v11396_v45, %v6750_v55  ;;  %v6757_v30 = vmul.f32 %v7793_v31, %v11405_v53  ;;  %v6700_v33 = vsub.f32 1.5, %v6699_v14 }
 0x91e   : > { %6866 = vst.msk [vmem:[%s11324_s21 + $0x20] sm:$0xff] %vm784_vm0, %v6850_v59  ;;  %v6775_v8 = vsel %vm6774_vm4, %v11388_v60, %v6771_v7  ;;  %v6778_v13 = vmul.f32 %v7791_v20, %v6777_v9  ;;  %7794 = vrsqrt.f32 %v11439_v0  ;;  %vm6782_vm13 = vweird.f32 %v11391_v39 }
 0x91f   : > { %v6613_v29 = vpop.xlane.xlu0 %6612  ;;  %6870 = vst.msk [vmem:[%s11324_s21 + $0x40] sm:$0xff] %vm784_vm0, %v6854_v35  ;;  %v6818_v63 = vmul.f32 %v6775_v8, %v11253_v52  ;;  %v6755_v18 = vsel %vm6754_vm9, %v11396_v45, %v6751_v54  ;;  %v6758_v10 = vmul.f32 %v7793_v31, %v6757_v30  ;;  %v6701_v61 = vmul.f32 %v7789_v34, %v6700_v33 }
 0x920   : > { %v6779_v6 = vmul.f32 0.5, %v6778_v13  ;;  %v6816_v60 = vmul.f32 %v6755_v18, %v11264_v44  ;;  %v6629_v52 = vmul.f32 %v6613_v29, %v11189_v26  ;;  %vm6783_vm3 = vweird.f32 %v7791_v20 }
 0x921   : > { %v6838_v12 = vmul.f32 %v11309_v62, %v6818_v63  ;;  %v6759_v57 = vmul.f32 0.5, %v6758_v10  ;;  %v6705_v28 = vsel %vm6704_vm11, %v7789_v34, %v6701_v61  ;;  %vm6763_vm6 = vweird.f32 %v7793_v31  ;;  %vm6784_vm15 = vmor %vm6782_vm13, %vm6783_vm3 }
 0x922   : > { %v6780_v11 = vsub.f32 1.5, %v6779_v6  ;;  %v6836_v23 = vmul.f32 %v11309_v62, %v6816_v60  ;;  %v6645_v42 = vadd.f32 1e-05, %v6629_v52  ;;  %v6811_v45 = vmul.f32 %v6705_v28, %v11261_v40 }
 0x923   : > { %v6858_v41 = vadd.f32 %v11314_v56, %v6838_v12  ;;  %v6760_v46 = vsub.f32 1.5, %v6759_v57  ;;  %vm6762_vm5 = vweird.f32 %v11405_v53  ;;  %vm6792_vm2 = vweird.f32 %v11439_v0 }
 0x924   : > { %v6781_v44 = vmul.f32 %v7791_v20, %v6780_v11  ;;  %v7795_v25 = vpop.eup %7794  ;;  %v6856_v26 = vadd.f32 %v11314_v56, %v6836_v23  ;;  %7796 = vrsqrt.f32 %v6645_v42  ;;  %v6831_v39 = vmul.f32 %v11309_v62, %v6811_v45  ;;  %vm6764_vm7 = vmor %vm6762_vm5, %vm6763_vm6 }
 0x925   : > { %6874 = vst.msk [vmem:[%s11324_s21 + $0x60] sm:$0xff] %vm784_vm0, %v6858_v41  ;;  %v6761_v4 = vmul.f32 %v7793_v31, %v6760_v46  ;;  %v6787_v15 = vmul.f32 %v7795_v25, %v11439_v0  ;;  %vm6793_vm1 = vweird.f32 %v7795_v25  ;;  %vm6802_vm10 = vweird.f32 %v6645_v42 }
 0x926   : > { %v6785_v16 = vsel %vm6784_vm15, %v7791_v20, %v6781_v44  ;;  %6872 = vst.msk [vmem:[%s11324_s21 + $0x50] sm:$0xff] %vm784_vm0, %v6856_v26  ;;  %v6851_v32 = vadd.f32 %v11314_v56, %v6831_v39  ;;  %vm6794_vm8 = vmor %vm6792_vm2, %vm6793_vm1 }
 0x927   : > { %v6819_v40 = vmul.f32 %v6785_v16, %v11281_v17  ;;  %v6765_v43 = vsel %vm6764_vm7, %v7793_v31, %v6761_v4  ;;  %v6788_v34 = vmul.f32 %v7795_v25, %v6787_v15 }
 0x928   : > { %v6817_v36 = vmul.f32 %v6765_v43, %v11278_v22  ;;  %6867 = vst.msk [vmem:[%s11324_s21 + $0x28] sm:$0xff] %vm784_vm0, %v6851_v32 }
 0x929   : > { %v6839_v53 = vmul.f32 %v11309_v62, %v6819_v40  ;;  %v6789_v47 = vmul.f32 0.5, %v6788_v34 }
 0x92a   : > { %v7797_v1 = vpop.eup %7796  ;;  %v6837_v49 = vmul.f32 %v11309_v62, %v6817_v36 }
 0x92b   : > { %v6859_v38 = vadd.f32 %v11314_v56, %v6839_v53  ;;  %v6790_v51 = vsub.f32 1.5, %v6789_v47  ;;  %v6797_v17 = vmul.f32 %v7797_v1, %v6645_v42  ;;  %vm6803_vm4 = vweird.f32 %v7797_v1 }
 0x92c   : > { %v6857_v27 = vadd.f32 %v11314_v56, %v6837_v49  ;;  %vm6804_vm9 = vmor %vm6802_vm10, %vm6803_vm4 }
 0x92d   : > { %6875 = vst.msk [vmem:[%s11324_s21 + $0x68] sm:$0xff] %vm784_vm0, %v6859_v38  ;;  %v6791_v37 = vmul.f32 %v7795_v25, %v6790_v51  ;;  %v6798_v22 = vmul.f32 %v7797_v1, %v6797_v17 }
 0x92e   : > { %6873 = vst.msk [vmem:[%s11324_s21 + $0x58] sm:$0xff] %vm784_vm0, %v6857_v27 }
 0x92f   : > { %v6795_v48 = vsel %vm6794_vm8, %v7795_v25, %v6791_v37  ;;  %v6799_v50 = vmul.f32 0.5, %v6798_v22 }
 0x930   : > { %v6820_v2 = vmul.f32 %v6795_v48, %v11291_v19 }
 0x931   : > { %v6800_v20 = vsub.f32 1.5, %v6799_v50 }
 0x932   : > { %v6840_v3 = vmul.f32 %v11309_v62, %v6820_v2 }
 0x933   : > { %v6801_v21 = vmul.f32 %v7797_v1, %v6800_v20 }
 0x934   : > { %v6860_v24 = vadd.f32 %v11314_v56, %v6840_v3 }
 0x935   : > { %v6805_v5 = vsel %vm6804_vm9, %v7797_v1, %v6801_v21 }
 0x936   : > { %6876 = vst.msk [vmem:[%s11324_s21 + $0x70] sm:$0xff] %vm784_vm0, %v6860_v24  ;;  %v6821_v59 = vmul.f32 %v6805_v5, %v11297_v58 }
 0x938   : > { %v6841_v7 = vmul.f32 %v11309_v62, %v6821_v59 }
 0x93a   : > { %v6861_v55 = vadd.f32 %v11314_v56, %v6841_v7 }
 0x93c   : > { %6877 = vst.msk [vmem:[%s11324_s21 + $0x78] sm:$0xff] %vm784_vm0, %v6861_v55 }
 0x93d PF: > { %s20_s15 = sadd.s32 1, %s7820_s15   ;;  %s11823_s13 = smov %s7816_s14 }
 0x93e   : > { %p17_p5 = scmp.ge.s32.totalorder %s20_s15, 4   ;;  %s11824_s14 = smov %s11826_s16 }
 0x940   :  { %19 = sbr.rel (!%p17_p5) target bundleno = 2 (0x2), region = 99 }

</bundles_post_ra>
